<compile_context>
chip_gen: v6e
topology: v6e:2x2x1
jax: 0.10.0
libtpu: 0.0.40
codegen_flags: <defaults>
</compile_context>

<pallas_src>
import jax
import jax.numpy as jnp
import numpy as np
from jax.experimental import pallas as pl
from jax.experimental.pallas import tpu as pltpu


# ----------------------------- static helpers ------------------------------

def _pair(v):
    return (v, v) if isinstance(v, int) else tuple(v)


def _out_size(S, k, s, p, d, ceil_mode):
    """PyTorch MaxPool2d output-size formula (incl. ceil_mode correction)."""
    eff = d * (k - 1) + 1
    num = S + 2 * p - eff
    if ceil_mode:
        o = -(-num // s) + 1
        if (o - 1) * s >= S + p:   # last window must start inside input+left pad
            o -= 1
    else:
        o = num // s + 1
    return o


def _stage_cfg(H, W, kernel_size, stride=None, padding=0, dilation=1,
               ceil_mode=False, return_indices=False):
    k = _pair(kernel_size)
    s = _pair(stride) if stride is not None else k
    p = _pair(padding)
    d = _pair(dilation)
    Ho = _out_size(H, k[0], s[0], p[0], d[0], ceil_mode)
    Wo = _out_size(W, k[1], s[1], p[1], d[1], ceil_mode)
    # extents of the (possibly padded / ceil-overhanging) plane actually read
    Hneed = (Ho - 1) * s[0] + (k[0] - 1) * d[0] + 1
    Wneed = (Wo - 1) * s[1] + (k[1] - 1) * d[1] + 1
    Hp = max(H + 2 * p[0], Hneed)
    Wp = max(W + 2 * p[1], Wneed)
    return dict(H=H, W=W, k=k, s=s, p=p, d=d, Ho=Ho, Wo=Wo,
                Hneed=Hneed, Wneed=Wneed, Hp=Hp, Wp=Wp)


def _needs_pad(cfg):
    return (cfg["p"][0] > 0 or cfg["p"][1] > 0
            or cfg["Hneed"] > cfg["H"] or cfg["Wneed"] > cfg["W"])


def _scratch_need(cfg, has_input_ref):
    """(rows, cols) of the per-path VMEM scratch this stage requires."""
    sh, sw = cfg["s"]
    h = w = 0
    if _needs_pad(cfg) or (sh > 1 and not has_input_ref):
        h, w = cfg["Hp"], cfg["Wp"]
    if sw > 1:                       # column-compaction staging area
        h, w = max(h, cfg["Ho"]), max(w, cfg["Wo"])
    return h, w


def _chain_cfgs(H, W, pool_params):
    cfgs = []
    for pp in pool_params:
        cfg = _stage_cfg(H, W, **pp)
        cfgs.append(cfg)
        H, W = cfg["Ho"], cfg["Wo"]
    return cfgs


# nn.MaxPool2d parameters of the original Model, in forward order.
_POOL_PARAMS = (
    dict(kernel_size=3),
    dict(kernel_size=4, stride=2, padding=2, dilation=1),
    dict(kernel_size=(1, 3), stride=1, padding=(0, 1), dilation=1),
    dict(kernel_size=(4, 5), stride=(1, 2), padding=(1, 2), dilation=1,
         ceil_mode=True),
    dict(kernel_size=(2, 3), stride=1, padding=1, dilation=(1, 2)),
    dict(kernel_size=2, stride=1, padding=0, dilation=1, ceil_mode=True,
         return_indices=True),
    dict(kernel_size=(5, 4), stride=1, padding=2, dilation=1,
         return_indices=True),
)


# ----------------------------- kernel internals ----------------------------

def _stage_padded(src_val, pad_ref, cfg):
    """Write src_val into pad_ref with -inf written only on the border strips."""
    NC, H, W = src_val.shape
    ph, pw = cfg["p"]
    Hp, Wp = cfg["Hp"], cfg["Wp"]
    pad_ref[:, ph:ph + H, pw:pw + W] = src_val
    if ph > 0:
        pad_ref[:, 0:ph, 0:Wp] = jnp.full((NC, ph, Wp), -jnp.inf, jnp.float32)
    if Hp > ph + H:
        pad_ref[:, ph + H:Hp, 0:Wp] = jnp.full((NC, Hp - ph - H, Wp),
                                               -jnp.inf, jnp.float32)
    if pw > 0:
        pad_ref[:, ph:ph + H, 0:pw] = jnp.full((NC, H, pw),
                                               -jnp.inf, jnp.float32)
    if Wp > pw + W:
        pad_ref[:, ph:ph + H, pw + W:Wp] = jnp.full((NC, H, Wp - pw - W),
                                                    -jnp.inf, jnp.float32)


def _pool_stage_value(src_val, src_ref, pad_ref, cfg):
    """One value-only MaxPool2d stage, separable (vertical then horizontal)."""
    KH, KW = cfg["k"]
    sh, sw = cfg["s"]
    dh, dw = cfg["d"]
    Ho, Wo = cfg["Ho"], cfg["Wo"]
    Wneed = cfg["Wneed"]
    needs_pad = _needs_pad(cfg)

    if not needs_pad and src_ref is not None:
        src = src_ref                  # tap the input ref directly (pool_0)
    elif not needs_pad and sh == 1:
        src = src_val                  # pure value slicing (pool_5)
    else:
        if src_val is None:
            src_val = src_ref[...]
        _stage_padded(src_val, pad_ref, cfg)
        src = pad_ref

    # ---- vertical pass: tmp[i, c] = max_kh src[i*sh + kh*dh, c] ----------
    tmp = None
    for kh in range(KH):
        r0 = kh * dh
        if sh == 1:
            win = src[:, r0:r0 + Ho, 0:Wneed]
        else:
            # pooling row-stride folded into a strided ref read
            win = src[:, pl.ds(r0, Ho, stride=sh), 0:Wneed]
        tmp = win if tmp is None else jnp.maximum(tmp, win)

    # ---- horizontal pass: out[i, j] = max_kw tmp[i, j*sw + kw*dw] --------
    if sw == 1:
        out = None
        for kw in range(KW):
            c0 = kw * dw
            win = tmp[:, :, c0:c0 + Wo]
            out = win if out is None else jnp.maximum(out, win)
        return out

    # column stride: dense horizontal pass, then in-place left compaction of
    # the Wo wanted columns via tiny stores (dst col j <= src col j*sw).
    Wf = (Wo - 1) * sw + 1
    dense = None
    for kw in range(KW):
        c0 = kw * dw
        win = tmp[:, :, c0:c0 + Wf]
        dense = win if dense is None else jnp.maximum(dense, win)
    for j in range(Wo):
        pad_ref[:, 0:Ho, j:j + 1] = dense[:, :, j * sw:j * sw + 1]
    return pad_ref[:, 0:Ho, 0:Wo]


def _pool_stage_indices(src_val, pad_ref, cfg):
    """MaxPool2d stage returning (values, flat indices). Requires s=1, d=1.

    Horizontal argmax pass first (tracks column), then vertical pass (adds
    row); with strict '>' this reproduces PyTorch's row-major first-maximum
    tie-break."""
    KH, KW = cfg["k"]
    sh, sw = cfg["s"]
    dh, dw = cfg["d"]
    assert sh == 1 and sw == 1 and dh == 1 and dw == 1
    ph, pw = cfg["p"]
    W = cfg["W"]
    Ho, Wo = cfg["Ho"], cfg["Wo"]
    Hneed = cfg["Hneed"]
    NC = src_val.shape[0]

    _stage_padded(src_val, pad_ref, cfg)

    # horizontal pass: per padded row, max over kw + column index (hoisted base)
    jcol0 = jax.lax.broadcasted_iota(jnp.int32, (NC, Hneed, Wo), 2) - pw
    hval = None
    hcol = None
    for kw in range(KW):
        win = pad_ref[:, 0:Hneed, kw:kw + Wo]
        cand = jcol0 + kw
        if hval is None:
            hval, hcol = win, cand
        else:
            sel = win > hval
            hcol = jnp.where(sel, cand, hcol)
            hval = jnp.where(sel, win, hval)

    # vertical pass: combine row index (hoisted base) with tracked column
    ibase = (jax.lax.broadcasted_iota(jnp.int32, (NC, Ho, Wo), 1) - ph) * W
    val = None
    idx = None
    for kh in range(KH):
        winv = hval[:, kh:kh + Ho, :]
        winc = hcol[:, kh:kh + Ho, :]
        cand = ibase + kh * W + winc
        if val is None:
            val, idx = winv, cand
        else:
            sel = winv > val
            idx = jnp.where(sel, cand, idx)
            val = jnp.where(sel, winv, val)
    return val, idx


def _make_fused_kernel(x_cfgs, y_cfgs):
    def kernel(x_ref, y_ref, xo_ref, xidx_ref, yo_ref, pax, pay):
        # ------------------------- x path (7 pools) -------------------------
        a = None
        src_ref = x_ref
        for cfg in x_cfgs[:-1]:
            a = _pool_stage_value(a, src_ref, pax, cfg)
            src_ref = None
        v, idx = _pool_stage_indices(a, pax, x_cfgs[-1])
        xo_ref[...] = v.astype(xo_ref.dtype)
        xidx_ref[...] = idx.astype(xidx_ref.dtype)

        # ------------------------- y path (6 pools) -------------------------
        b = None
        src_ref = y_ref
        for cfg in y_cfgs:
            b = _pool_stage_value(b, src_ref, pay, cfg)
            src_ref = None
        yo_ref[...] = b.astype(yo_ref.dtype)

    return kernel


# --------------------------------- wrapper ---------------------------------

def model_forward(x, y):
    N, C, H, W = x.shape
    Ny, Cy, Hy, Wy = y.shape
    NCx, NCy = N * C, Ny * Cy

    x_cfgs = _chain_cfgs(H, W, _POOL_PARAMS)          # pool_0 .. pool_6
    y_cfgs = _chain_cfgs(Hy, Wy, _POOL_PARAMS[:6])    # pool_0 .. pool_5

    def scratch_hw(cfgs, index_stage_last):
        hs = ws = 1
        for i, cfg in enumerate(cfgs):
            h, w = _scratch_need(cfg, has_input_ref=(i == 0))
            hs, ws = max(hs, h), max(ws, w)
        if index_stage_last:   # index stage always stages through the pad ref
            hs = max(hs, cfgs[-1]["Hp"])
            ws = max(ws, cfgs[-1]["Wp"])
        return hs, ws

    Hsx, Wsx = scratch_hw(x_cfgs, True)
    Hsy, Wsy = scratch_hw(y_cfgs, False)

    Hox, Wox = x_cfgs[-1]["Ho"], x_cfgs[-1]["Wo"]
    Hoy, Woy = y_cfgs[-1]["Ho"], y_cfgs[-1]["Wo"]

    kernel = _make_fused_kernel(x_cfgs, y_cfgs)

    out_shape = (
        jax.ShapeDtypeStruct((NCx, Hox, Wox), jnp.float32),
        jax.ShapeDtypeStruct((NCx, Hox, Wox), jnp.int32),
        jax.ShapeDtypeStruct((NCy, Hoy, Woy), jnp.float32),
    )

    xo, xidx, yo = pl.pallas_call(
        kernel,
        out_shape=out_shape,
        # whole arrays as single VMEM blocks; no grid, no per-step pipeline
        scratch_shapes=[
            pltpu.VMEM((NCx, Hsx, Wsx), jnp.float32),   # x padded/staging plane
            pltpu.VMEM((NCy, Hsy, Wsy), jnp.float32),   # y padded/staging plane
        ],
        compiler_params=pltpu.CompilerParams(
            vmem_limit_bytes=8 * 1024 * 1024),
    )(x.reshape(NCx, H, W).astype(jnp.float32),
      y.reshape(NCy, Hy, Wy).astype(jnp.float32))

    return (xo.reshape(N, C, Hox, Wox),
            xidx.reshape(N, C, Hox, Wox),
            yo.reshape(Ny, Cy, Hoy, Woy))


# --------------------------- pure-numpy reference ---------------------------

def _np_maxpool2d(a, kernel_size, stride=None, padding=0, dilation=1,
                  ceil_mode=False, return_indices=False):
    k = _pair(kernel_size)
    s = _pair(stride) if stride is not None else k
    p = _pair(padding)
    d = _pair(dilation)
    N, C, H, W = a.shape
    Ho = _out_size(H, k[0], s[0], p[0], d[0], ceil_mode)
    Wo = _out_size(W, k[1], s[1], p[1], d[1], ceil_mode)
    out = np.full((N, C, Ho, Wo), -np.inf, np.float32)
    idx = np.zeros((N, C, Ho, Wo), np.int64)
    for i in range(Ho):
        for j in range(Wo):
            for kh in range(k[0]):
                for kw in range(k[1]):
                    r = i * s[0] - p[0] + kh * d[0]
                    c = j * s[1] - p[1] + kw * d[1]
                    if 0 <= r < H and 0 <= c < W:
                        v = a[:, :, r, c]
                        m = v > out[:, :, i, j]
                        out[:, :, i, j] = np.where(m, v, out[:, :, i, j])
                        idx[:, :, i, j] = np.where(m, r * W + c,
                                                   idx[:, :, i, j])
    if return_indices:
        return out, idx
    return out


def _np_reference(x, y):
    a = np.asarray(x)
    idx_last = None
    for pp in _POOL_PARAMS:
        res = _np_maxpool2d(a, **pp)
        if pp.get("return_indices", False):
            a, idx_last = res
        else:
            a = res
    b = np.asarray(y)
    for pp in _POOL_PARAMS[:6]:
        res = _np_maxpool2d(b, **pp)
        b = res[0] if pp.get("return_indices", False) else res
    return a, idx_last, b


# ----------------------------------- main -----------------------------------

if __name__ == "__main__":
    key = jax.random.PRNGKey(0)
    kx, ky = jax.random.split(key)
    # small NCHW shapes chosen so every pooling stage keeps spatial dims >= 1
    x = jax.random.uniform(kx, (2, 4, 31, 31), dtype=jnp.float32)
    y = jax.random.uniform(ky, (2, 4, 28, 31), dtype=jnp.float32)

    out_x, out_idx, out_y = model_forward(x, y)
    jax.block_until_ready((out_x, out_idx, out_y))

    assert out_x.shape == (2, 4, 5, 2)
    assert out_idx.shape == (2, 4, 5, 2)
    assert out_y.shape == (2, 4, 4, 1)

    # verify against a pure-numpy MaxPool2d reference
    ref_x, ref_idx, ref_y = _np_reference(x, y)
    assert np.allclose(np.asarray(out_x), ref_x)
    assert np.array_equal(np.asarray(out_idx), ref_idx.astype(np.int32))
    assert np.allclose(np.asarray(out_y), ref_y)

    print("KERNEL_OK")
</pallas_src>

<mosaic_0001>
module attributes {stable_mosaic.version = 11 : i64} {
  func.func @kernel(%arg0: memref<8x31x31xf32, #tpu.memory_space<vmem>>, %arg1: memref<8x28x31xf32, #tpu.memory_space<vmem>>, %arg2: memref<8x5x2xf32, #tpu.memory_space<vmem>>, %arg3: memref<8x5x2xi32, #tpu.memory_space<vmem>>, %arg4: memref<8x4x1xf32, #tpu.memory_space<vmem>>, %arg5: memref<8x14x14xf32, #tpu.memory_space<vmem>>, %arg6: memref<8x13x14xf32, #tpu.memory_space<vmem>>) attributes {dimension_semantics = [], scalar_prefetch = 0 : i64, scratch_operands = 2 : i64, tpu.core_type = #tpu.core_type<tc>} {
    %c0 = arith.constant 0 : index
    %c0_0 = arith.constant 0 : index
    %c0_1 = arith.constant 0 : index
    %0 = tpu.strided_load %arg0[%c0, %c0_0, %c0_1] {strides = array<i32: 1, 3, 1>} : memref<8x31x31xf32, #tpu.memory_space<vmem>>, vector<8x10x30xf32>
    %c0_2 = arith.constant 0 : index
    %c1 = arith.constant 1 : index
    %c0_3 = arith.constant 0 : index
    %1 = tpu.strided_load %arg0[%c0_2, %c1, %c0_3] {strides = array<i32: 1, 3, 1>} : memref<8x31x31xf32, #tpu.memory_space<vmem>>, vector<8x10x30xf32>
    %2 = arith.maximumf %0, %1 : vector<8x10x30xf32>
    %c0_4 = arith.constant 0 : index
    %c2 = arith.constant 2 : index
    %c0_5 = arith.constant 0 : index
    %3 = tpu.strided_load %arg0[%c0_4, %c2, %c0_5] {strides = array<i32: 1, 3, 1>} : memref<8x31x31xf32, #tpu.memory_space<vmem>>, vector<8x10x30xf32>
    %4 = arith.maximumf %2, %3 : vector<8x10x30xf32>
    %5 = vector.extract_strided_slice %4 {offsets = [0, 0, 0], sizes = [8, 10, 28], strides = [1, 1, 1]} : vector<8x10x30xf32> to vector<8x10x28xf32>
    %6 = vector.extract_strided_slice %4 {offsets = [0, 0, 1], sizes = [8, 10, 28], strides = [1, 1, 1]} : vector<8x10x30xf32> to vector<8x10x28xf32>
    %7 = arith.maximumf %5, %6 : vector<8x10x28xf32>
    %8 = vector.extract_strided_slice %4 {offsets = [0, 0, 2], sizes = [8, 10, 28], strides = [1, 1, 1]} : vector<8x10x30xf32> to vector<8x10x28xf32>
    %9 = arith.maximumf %7, %8 : vector<8x10x28xf32>
    %10 = vector.extract_strided_slice %9 {offsets = [0, 0, 0], sizes = [8, 10, 1], strides = [1, 1, 1]} : vector<8x10x28xf32> to vector<8x10x1xf32>
    %c0_6 = arith.constant 0 : index
    %c0_7 = arith.constant 0 : index
    %c0_8 = arith.constant 0 : index
    %11 = vector.load %arg5[%c0_6, %c0_7, %c0_8] : memref<8x14x14xf32, #tpu.memory_space<vmem>>, vector<8x10x1xf32>
    tpu.vector_store %arg5[%c0_6, %c0_7, %c0_8], %10 {strides = array<i32>} : memref<8x14x14xf32, #tpu.memory_space<vmem>>, vector<8x10x1xf32>,
    %12 = vector.extract_strided_slice %9 {offsets = [0, 0, 3], sizes = [8, 10, 1], strides = [1, 1, 1]} : vector<8x10x28xf32> to vector<8x10x1xf32>
    %c0_9 = arith.constant 0 : index
    %c0_10 = arith.constant 0 : index
    %c1_11 = arith.constant 1 : index
    %13 = vector.load %arg5[%c0_9, %c0_10, %c1_11] : memref<8x14x14xf32, #tpu.memory_space<vmem>>, vector<8x10x1xf32>
    tpu.vector_store %arg5[%c0_9, %c0_10, %c1_11], %12 {strides = array<i32>} : memref<8x14x14xf32, #tpu.memory_space<vmem>>, vector<8x10x1xf32>,
    %14 = vector.extract_strided_slice %9 {offsets = [0, 0, 6], sizes = [8, 10, 1], strides = [1, 1, 1]} : vector<8x10x28xf32> to vector<8x10x1xf32>
    %c0_12 = arith.constant 0 : index
    %c0_13 = arith.constant 0 : index
    %c2_14 = arith.constant 2 : index
    %15 = vector.load %arg5[%c0_12, %c0_13, %c2_14] : memref<8x14x14xf32, #tpu.memory_space<vmem>>, vector<8x10x1xf32>
    tpu.vector_store %arg5[%c0_12, %c0_13, %c2_14], %14 {strides = array<i32>} : memref<8x14x14xf32, #tpu.memory_space<vmem>>, vector<8x10x1xf32>,
    %16 = vector.extract_strided_slice %9 {offsets = [0, 0, 9], sizes = [8, 10, 1], strides = [1, 1, 1]} : vector<8x10x28xf32> to vector<8x10x1xf32>
    %c0_15 = arith.constant 0 : index
    %c0_16 = arith.constant 0 : index
    %c3 = arith.constant 3 : index
    %17 = vector.load %arg5[%c0_15, %c0_16, %c3] : memref<8x14x14xf32, #tpu.memory_space<vmem>>, vector<8x10x1xf32>
    tpu.vector_store %arg5[%c0_15, %c0_16, %c3], %16 {strides = array<i32>} : memref<8x14x14xf32, #tpu.memory_space<vmem>>, vector<8x10x1xf32>,
    %18 = vector.extract_strided_slice %9 {offsets = [0, 0, 12], sizes = [8, 10, 1], strides = [1, 1, 1]} : vector<8x10x28xf32> to vector<8x10x1xf32>
    %c0_17 = arith.constant 0 : index
    %c0_18 = arith.constant 0 : index
    %c4 = arith.constant 4 : index
    %19 = vector.load %arg5[%c0_17, %c0_18, %c4] : memref<8x14x14xf32, #tpu.memory_space<vmem>>, vector<8x10x1xf32>
    tpu.vector_store %arg5[%c0_17, %c0_18, %c4], %18 {strides = array<i32>} : memref<8x14x14xf32, #tpu.memory_space<vmem>>, vector<8x10x1xf32>,
    %20 = vector.extract_strided_slice %9 {offsets = [0, 0, 15], sizes = [8, 10, 1], strides = [1, 1, 1]} : vector<8x10x28xf32> to vector<8x10x1xf32>
    %c0_19 = arith.constant 0 : index
    %c0_20 = arith.constant 0 : index
    %c5 = arith.constant 5 : index
    %21 = vector.load %arg5[%c0_19, %c0_20, %c5] : memref<8x14x14xf32, #tpu.memory_space<vmem>>, vector<8x10x1xf32>
    tpu.vector_store %arg5[%c0_19, %c0_20, %c5], %20 {strides = array<i32>} : memref<8x14x14xf32, #tpu.memory_space<vmem>>, vector<8x10x1xf32>,
    %22 = vector.extract_strided_slice %9 {offsets = [0, 0, 18], sizes = [8, 10, 1], strides = [1, 1, 1]} : vector<8x10x28xf32> to vector<8x10x1xf32>
    %c0_21 = arith.constant 0 : index
    %c0_22 = arith.constant 0 : index
    %c6 = arith.constant 6 : index
    %23 = vector.load %arg5[%c0_21, %c0_22, %c6] : memref<8x14x14xf32, #tpu.memory_space<vmem>>, vector<8x10x1xf32>
    tpu.vector_store %arg5[%c0_21, %c0_22, %c6], %22 {strides = array<i32>} : memref<8x14x14xf32, #tpu.memory_space<vmem>>, vector<8x10x1xf32>,
    %24 = vector.extract_strided_slice %9 {offsets = [0, 0, 21], sizes = [8, 10, 1], strides = [1, 1, 1]} : vector<8x10x28xf32> to vector<8x10x1xf32>
    %c0_23 = arith.constant 0 : index
    %c0_24 = arith.constant 0 : index
    %c7 = arith.constant 7 : index
    %25 = vector.load %arg5[%c0_23, %c0_24, %c7] : memref<8x14x14xf32, #tpu.memory_space<vmem>>, vector<8x10x1xf32>
    tpu.vector_store %arg5[%c0_23, %c0_24, %c7], %24 {strides = array<i32>} : memref<8x14x14xf32, #tpu.memory_space<vmem>>, vector<8x10x1xf32>,
    %26 = vector.extract_strided_slice %9 {offsets = [0, 0, 24], sizes = [8, 10, 1], strides = [1, 1, 1]} : vector<8x10x28xf32> to vector<8x10x1xf32>
    %c0_25 = arith.constant 0 : index
    %c0_26 = arith.constant 0 : index
    %c8 = arith.constant 8 : index
    %27 = vector.load %arg5[%c0_25, %c0_26, %c8] : memref<8x14x14xf32, #tpu.memory_space<vmem>>, vector<8x10x1xf32>
    tpu.vector_store %arg5[%c0_25, %c0_26, %c8], %26 {strides = array<i32>} : memref<8x14x14xf32, #tpu.memory_space<vmem>>, vector<8x10x1xf32>,
    %28 = vector.extract_strided_slice %9 {offsets = [0, 0, 27], sizes = [8, 10, 1], strides = [1, 1, 1]} : vector<8x10x28xf32> to vector<8x10x1xf32>
    %c0_27 = arith.constant 0 : index
    %c0_28 = arith.constant 0 : index
    %c9 = arith.constant 9 : index
    %29 = vector.load %arg5[%c0_27, %c0_28, %c9] : memref<8x14x14xf32, #tpu.memory_space<vmem>>, vector<8x10x1xf32>
    tpu.vector_store %arg5[%c0_27, %c0_28, %c9], %28 {strides = array<i32>} : memref<8x14x14xf32, #tpu.memory_space<vmem>>, vector<8x10x1xf32>,
    %c0_29 = arith.constant 0 : index
    %c0_30 = arith.constant 0 : index
    %c0_31 = arith.constant 0 : index
    %30 = vector.load %arg5[%c0_29, %c0_30, %c0_31] : memref<8x14x14xf32, #tpu.memory_space<vmem>>, vector<8x10x10xf32>
    %c0_32 = arith.constant 0 : index
    %c2_33 = arith.constant 2 : index
    %c2_34 = arith.constant 2 : index
    %31 = vector.load %arg5[%c0_32, %c2_33, %c2_34] : memref<8x14x14xf32, #tpu.memory_space<vmem>>, vector<8x10x10xf32>
    tpu.vector_store %arg5[%c0_32, %c2_33, %c2_34], %30 {strides = array<i32>} : memref<8x14x14xf32, #tpu.memory_space<vmem>>, vector<8x10x10xf32>,
    %cst = arith.constant 0xFF800000 : f32
    %32 = vector.broadcast %cst : f32 to vector<8x2x14xf32>
    %c0_35 = arith.constant 0 : index
    %c0_36 = arith.constant 0 : index
    %c0_37 = arith.constant 0 : index
    %33 = vector.load %arg5[%c0_35, %c0_36, %c0_37] : memref<8x14x14xf32, #tpu.memory_space<vmem>>, vector<8x2x14xf32>
    tpu.vector_store %arg5[%c0_35, %c0_36, %c0_37], %32 {strides = array<i32>} : memref<8x14x14xf32, #tpu.memory_space<vmem>>, vector<8x2x14xf32>,
    %cst_38 = arith.constant 0xFF800000 : f32
    %34 = vector.broadcast %cst_38 : f32 to vector<8x2x14xf32>
    %c0_39 = arith.constant 0 : index
    %c12 = arith.constant 12 : index
    %c0_40 = arith.constant 0 : index
    %35 = vector.load %arg5[%c0_39, %c12, %c0_40] : memref<8x14x14xf32, #tpu.memory_space<vmem>>, vector<8x2x14xf32>
    tpu.vector_store %arg5[%c0_39, %c12, %c0_40], %34 {strides = array<i32>} : memref<8x14x14xf32, #tpu.memory_space<vmem>>, vector<8x2x14xf32>,
    %cst_41 = arith.constant 0xFF800000 : f32
    %36 = vector.broadcast %cst_41 : f32 to vector<8x10x2xf32>
    %c0_42 = arith.constant 0 : index
    %c2_43 = arith.constant 2 : index
    %c0_44 = arith.constant 0 : index
    %37 = vector.load %arg5[%c0_42, %c2_43, %c0_44] : memref<8x14x14xf32, #tpu.memory_space<vmem>>, vector<8x10x2xf32>
    tpu.vector_store %arg5[%c0_42, %c2_43, %c0_44], %36 {strides = array<i32>} : memref<8x14x14xf32, #tpu.memory_space<vmem>>, vector<8x10x2xf32>,
    %cst_45 = arith.constant 0xFF800000 : f32
    %38 = vector.broadcast %cst_45 : f32 to vector<8x10x2xf32>
    %c0_46 = arith.constant 0 : index
    %c2_47 = arith.constant 2 : index
    %c12_48 = arith.constant 12 : index
    %39 = vector.load %arg5[%c0_46, %c2_47, %c12_48] : memref<8x14x14xf32, #tpu.memory_space<vmem>>, vector<8x10x2xf32>
    tpu.vector_store %arg5[%c0_46, %c2_47, %c12_48], %38 {strides = array<i32>} : memref<8x14x14xf32, #tpu.memory_space<vmem>>, vector<8x10x2xf32>,
    %c0_49 = arith.constant 0 : index
    %c0_50 = arith.constant 0 : index
    %c0_51 = arith.constant 0 : index
    %40 = tpu.strided_load %arg5[%c0_49, %c0_50, %c0_51] {strides = array<i32: 1, 2, 1>} : memref<8x14x14xf32, #tpu.memory_space<vmem>>, vector<8x6x14xf32>
    %c0_52 = arith.constant 0 : index
    %c1_53 = arith.constant 1 : index
    %c0_54 = arith.constant 0 : index
    %41 = tpu.strided_load %arg5[%c0_52, %c1_53, %c0_54] {strides = array<i32: 1, 2, 1>} : memref<8x14x14xf32, #tpu.memory_space<vmem>>, vector<8x6x14xf32>
    %42 = arith.maximumf %40, %41 : vector<8x6x14xf32>
    %c0_55 = arith.constant 0 : index
    %c2_56 = arith.constant 2 : index
    %c0_57 = arith.constant 0 : index
    %43 = tpu.strided_load %arg5[%c0_55, %c2_56, %c0_57] {strides = array<i32: 1, 2, 1>} : memref<8x14x14xf32, #tpu.memory_space<vmem>>, vector<8x6x14xf32>
    %44 = arith.maximumf %42, %43 : vector<8x6x14xf32>
    %c0_58 = arith.constant 0 : index
    %c3_59 = arith.constant 3 : index
    %c0_60 = arith.constant 0 : index
    %45 = tpu.strided_load %arg5[%c0_58, %c3_59, %c0_60] {strides = array<i32: 1, 2, 1>} : memref<8x14x14xf32, #tpu.memory_space<vmem>>, vector<8x6x14xf32>
    %46 = arith.maximumf %44, %45 : vector<8x6x14xf32>
    %47 = vector.extract_strided_slice %46 {offsets = [0, 0, 0], sizes = [8, 6, 11], strides = [1, 1, 1]} : vector<8x6x14xf32> to vector<8x6x11xf32>
    %48 = vector.extract_strided_slice %46 {offsets = [0, 0, 1], sizes = [8, 6, 11], strides = [1, 1, 1]} : vector<8x6x14xf32> to vector<8x6x11xf32>
    %49 = arith.maximumf %47, %48 : vector<8x6x11xf32>
    %50 = vector.extract_strided_slice %46 {offsets = [0, 0, 2], sizes = [8, 6, 11], strides = [1, 1, 1]} : vector<8x6x14xf32> to vector<8x6x11xf32>
    %51 = arith.maximumf %49, %50 : vector<8x6x11xf32>
    %52 = vector.extract_strided_slice %46 {offsets = [0, 0, 3], sizes = [8, 6, 11], strides = [1, 1, 1]} : vector<8x6x14xf32> to vector<8x6x11xf32>
    %53 = arith.maximumf %51, %52 : vector<8x6x11xf32>
    %54 = vector.extract_strided_slice %53 {offsets = [0, 0, 0], sizes = [8, 6, 1], strides = [1, 1, 1]} : vector<8x6x11xf32> to vector<8x6x1xf32>
    %c0_61 = arith.constant 0 : index
    %c0_62 = arith.constant 0 : index
    %c0_63 = arith.constant 0 : index
    %55 = vector.load %arg5[%c0_61, %c0_62, %c0_63] : memref<8x14x14xf32, #tpu.memory_space<vmem>>, vector<8x6x1xf32>
    tpu.vector_store %arg5[%c0_61, %c0_62, %c0_63], %54 {strides = array<i32>} : memref<8x14x14xf32, #tpu.memory_space<vmem>>, vector<8x6x1xf32>,
    %56 = vector.extract_strided_slice %53 {offsets = [0, 0, 2], sizes = [8, 6, 1], strides = [1, 1, 1]} : vector<8x6x11xf32> to vector<8x6x1xf32>
    %c0_64 = arith.constant 0 : index
    %c0_65 = arith.constant 0 : index
    %c1_66 = arith.constant 1 : index
    %57 = vector.load %arg5[%c0_64, %c0_65, %c1_66] : memref<8x14x14xf32, #tpu.memory_space<vmem>>, vector<8x6x1xf32>
    tpu.vector_store %arg5[%c0_64, %c0_65, %c1_66], %56 {strides = array<i32>} : memref<8x14x14xf32, #tpu.memory_space<vmem>>, vector<8x6x1xf32>,
    %58 = vector.extract_strided_slice %53 {offsets = [0, 0, 4], sizes = [8, 6, 1], strides = [1, 1, 1]} : vector<8x6x11xf32> to vector<8x6x1xf32>
    %c0_67 = arith.constant 0 : index
    %c0_68 = arith.constant 0 : index
    %c2_69 = arith.constant 2 : index
    %59 = vector.load %arg5[%c0_67, %c0_68, %c2_69] : memref<8x14x14xf32, #tpu.memory_space<vmem>>, vector<8x6x1xf32>
    tpu.vector_store %arg5[%c0_67, %c0_68, %c2_69], %58 {strides = array<i32>} : memref<8x14x14xf32, #tpu.memory_space<vmem>>, vector<8x6x1xf32>,
    %60 = vector.extract_strided_slice %53 {offsets = [0, 0, 6], sizes = [8, 6, 1], strides = [1, 1, 1]} : vector<8x6x11xf32> to vector<8x6x1xf32>
    %c0_70 = arith.constant 0 : index
    %c0_71 = arith.constant 0 : index
    %c3_72 = arith.constant 3 : index
    %61 = vector.load %arg5[%c0_70, %c0_71, %c3_72] : memref<8x14x14xf32, #tpu.memory_space<vmem>>, vector<8x6x1xf32>
    tpu.vector_store %arg5[%c0_70, %c0_71, %c3_72], %60 {strides = array<i32>} : memref<8x14x14xf32, #tpu.memory_space<vmem>>, vector<8x6x1xf32>,
    %62 = vector.extract_strided_slice %53 {offsets = [0, 0, 8], sizes = [8, 6, 1], strides = [1, 1, 1]} : vector<8x6x11xf32> to vector<8x6x1xf32>
    %c0_73 = arith.constant 0 : index
    %c0_74 = arith.constant 0 : index
    %c4_75 = arith.constant 4 : index
    %63 = vector.load %arg5[%c0_73, %c0_74, %c4_75] : memref<8x14x14xf32, #tpu.memory_space<vmem>>, vector<8x6x1xf32>
    tpu.vector_store %arg5[%c0_73, %c0_74, %c4_75], %62 {strides = array<i32>} : memref<8x14x14xf32, #tpu.memory_space<vmem>>, vector<8x6x1xf32>,
    %64 = vector.extract_strided_slice %53 {offsets = [0, 0, 10], sizes = [8, 6, 1], strides = [1, 1, 1]} : vector<8x6x11xf32> to vector<8x6x1xf32>
    %c0_76 = arith.constant 0 : index
    %c0_77 = arith.constant 0 : index
    %c5_78 = arith.constant 5 : index
    %65 = vector.load %arg5[%c0_76, %c0_77, %c5_78] : memref<8x14x14xf32, #tpu.memory_space<vmem>>, vector<8x6x1xf32>
    tpu.vector_store %arg5[%c0_76, %c0_77, %c5_78], %64 {strides = array<i32>} : memref<8x14x14xf32, #tpu.memory_space<vmem>>, vector<8x6x1xf32>,
    %c0_79 = arith.constant 0 : index
    %c0_80 = arith.constant 0 : index
    %c0_81 = arith.constant 0 : index
    %66 = vector.load %arg5[%c0_79, %c0_80, %c0_81] : memref<8x14x14xf32, #tpu.memory_space<vmem>>, vector<8x6x6xf32>
    %c0_82 = arith.constant 0 : index
    %c0_83 = arith.constant 0 : index
    %c1_84 = arith.constant 1 : index
    %67 = vector.load %arg5[%c0_82, %c0_83, %c1_84] : memref<8x14x14xf32, #tpu.memory_space<vmem>>, vector<8x6x6xf32>
    tpu.vector_store %arg5[%c0_82, %c0_83, %c1_84], %66 {strides = array<i32>} : memref<8x14x14xf32, #tpu.memory_space<vmem>>, vector<8x6x6xf32>,
    %cst_85 = arith.constant 0xFF800000 : f32
    %68 = vector.broadcast %cst_85 : f32 to vector<8x6x1xf32>
    %c0_86 = arith.constant 0 : index
    %c0_87 = arith.constant 0 : index
    %c0_88 = arith.constant 0 : index
    %69 = vector.load %arg5[%c0_86, %c0_87, %c0_88] : memref<8x14x14xf32, #tpu.memory_space<vmem>>, vector<8x6x1xf32>
    tpu.vector_store %arg5[%c0_86, %c0_87, %c0_88], %68 {strides = array<i32>} : memref<8x14x14xf32, #tpu.memory_space<vmem>>, vector<8x6x1xf32>,
    %cst_89 = arith.constant 0xFF800000 : f32
    %70 = vector.broadcast %cst_89 : f32 to vector<8x6x1xf32>
    %c0_90 = arith.constant 0 : index
    %c0_91 = arith.constant 0 : index
    %c7_92 = arith.constant 7 : index
    %71 = vector.load %arg5[%c0_90, %c0_91, %c7_92] : memref<8x14x14xf32, #tpu.memory_space<vmem>>, vector<8x6x1xf32>
    tpu.vector_store %arg5[%c0_90, %c0_91, %c7_92], %70 {strides = array<i32>} : memref<8x14x14xf32, #tpu.memory_space<vmem>>, vector<8x6x1xf32>,
    %c0_93 = arith.constant 0 : index
    %c0_94 = arith.constant 0 : index
    %c0_95 = arith.constant 0 : index
    %72 = vector.load %arg5[%c0_93, %c0_94, %c0_95] : memref<8x14x14xf32, #tpu.memory_space<vmem>>, vector<8x6x8xf32>
    %73 = vector.extract_strided_slice %72 {offsets = [0, 0, 0], sizes = [8, 6, 6], strides = [1, 1, 1]} : vector<8x6x8xf32> to vector<8x6x6xf32>
    %74 = vector.extract_strided_slice %72 {offsets = [0, 0, 1], sizes = [8, 6, 6], strides = [1, 1, 1]} : vector<8x6x8xf32> to vector<8x6x6xf32>
    %75 = arith.maximumf %73, %74 : vector<8x6x6xf32>
    %76 = vector.extract_strided_slice %72 {offsets = [0, 0, 2], sizes = [8, 6, 6], strides = [1, 1, 1]} : vector<8x6x8xf32> to vector<8x6x6xf32>
    %77 = arith.maximumf %75, %76 : vector<8x6x6xf32>
    %c0_96 = arith.constant 0 : index
    %c1_97 = arith.constant 1 : index
    %c2_98 = arith.constant 2 : index
    %78 = vector.load %arg5[%c0_96, %c1_97, %c2_98] : memref<8x14x14xf32, #tpu.memory_space<vmem>>, vector<8x6x6xf32>
    tpu.vector_store %arg5[%c0_96, %c1_97, %c2_98], %77 {strides = array<i32>} : memref<8x14x14xf32, #tpu.memory_space<vmem>>, vector<8x6x6xf32>,
    %cst_99 = arith.constant 0xFF800000 : f32
    %79 = vector.broadcast %cst_99 : f32 to vector<8x1x11xf32>
    %c0_100 = arith.constant 0 : index
    %c0_101 = arith.constant 0 : index
    %c0_102 = arith.constant 0 : index
    %80 = vector.load %arg5[%c0_100, %c0_101, %c0_102] : memref<8x14x14xf32, #tpu.memory_space<vmem>>, vector<8x1x11xf32>
    tpu.vector_store %arg5[%c0_100, %c0_101, %c0_102], %79 {strides = array<i32>} : memref<8x14x14xf32, #tpu.memory_space<vmem>>, vector<8x1x11xf32>,
    %cst_103 = arith.constant 0xFF800000 : f32
    %81 = vector.broadcast %cst_103 : f32 to vector<8x1x11xf32>
    %c0_104 = arith.constant 0 : index
    %c7_105 = arith.constant 7 : index
    %c0_106 = arith.constant 0 : index
    %82 = vector.load %arg5[%c0_104, %c7_105, %c0_106] : memref<8x14x14xf32, #tpu.memory_space<vmem>>, vector<8x1x11xf32>
    tpu.vector_store %arg5[%c0_104, %c7_105, %c0_106], %81 {strides = array<i32>} : memref<8x14x14xf32, #tpu.memory_space<vmem>>, vector<8x1x11xf32>,
    %cst_107 = arith.constant 0xFF800000 : f32
    %83 = vector.broadcast %cst_107 : f32 to vector<8x6x2xf32>
    %c0_108 = arith.constant 0 : index
    %c1_109 = arith.constant 1 : index
    %c0_110 = arith.constant 0 : index
    %84 = vector.load %arg5[%c0_108, %c1_109, %c0_110] : memref<8x14x14xf32, #tpu.memory_space<vmem>>, vector<8x6x2xf32>
    tpu.vector_store %arg5[%c0_108, %c1_109, %c0_110], %83 {strides = array<i32>} : memref<8x14x14xf32, #tpu.memory_space<vmem>>, vector<8x6x2xf32>,
    %cst_111 = arith.constant 0xFF800000 : f32
    %85 = vector.broadcast %cst_111 : f32 to vector<8x6x3xf32>
    %c0_112 = arith.constant 0 : index
    %c1_113 = arith.constant 1 : index
    %c8_114 = arith.constant 8 : index
    %86 = vector.load %arg5[%c0_112, %c1_113, %c8_114] : memref<8x14x14xf32, #tpu.memory_space<vmem>>, vector<8x6x3xf32>
    tpu.vector_store %arg5[%c0_112, %c1_113, %c8_114], %85 {strides = array<i32>} : memref<8x14x14xf32, #tpu.memory_space<vmem>>, vector<8x6x3xf32>,
    %c0_115 = arith.constant 0 : index
    %c0_116 = arith.constant 0 : index
    %c0_117 = arith.constant 0 : index
    %87 = vector.load %arg5[%c0_115, %c0_116, %c0_117] : memref<8x14x14xf32, #tpu.memory_space<vmem>>, vector<8x5x11xf32>
    %c0_118 = arith.constant 0 : index
    %c1_119 = arith.constant 1 : index
    %c0_120 = arith.constant 0 : index
    %88 = vector.load %arg5[%c0_118, %c1_119, %c0_120] : memref<8x14x14xf32, #tpu.memory_space<vmem>>, vector<8x5x11xf32>
    %89 = arith.maximumf %87, %88 : vector<8x5x11xf32>
    %c0_121 = arith.constant 0 : index
    %c2_122 = arith.constant 2 : index
    %c0_123 = arith.constant 0 : index
    %90 = vector.load %arg5[%c0_121, %c2_122, %c0_123] : memref<8x14x14xf32, #tpu.memory_space<vmem>>, vector<8x5x11xf32>
    %91 = arith.maximumf %89, %90 : vector<8x5x11xf32>
    %c0_124 = arith.constant 0 : index
    %c3_125 = arith.constant 3 : index
    %c0_126 = arith.constant 0 : index
    %92 = vector.load %arg5[%c0_124, %c3_125, %c0_126] : memref<8x14x14xf32, #tpu.memory_space<vmem>>, vector<8x5x11xf32>
    %93 = arith.maximumf %91, %92 : vector<8x5x11xf32>
    %94 = vector.extract_strided_slice %93 {offsets = [0, 0, 0], sizes = [8, 5, 7], strides = [1, 1, 1]} : vector<8x5x11xf32> to vector<8x5x7xf32>
    %95 = vector.extract_strided_slice %93 {offsets = [0, 0, 1], sizes = [8, 5, 7], strides = [1, 1, 1]} : vector<8x5x11xf32> to vector<8x5x7xf32>
    %96 = arith.maximumf %94, %95 : vector<8x5x7xf32>
    %97 = vector.extract_strided_slice %93 {offsets = [0, 0, 2], sizes = [8, 5, 7], strides = [1, 1, 1]} : vector<8x5x11xf32> to vector<8x5x7xf32>
    %98 = arith.maximumf %96, %97 : vector<8x5x7xf32>
    %99 = vector.extract_strided_slice %93 {offsets = [0, 0, 3], sizes = [8, 5, 7], strides = [1, 1, 1]} : vector<8x5x11xf32> to vector<8x5x7xf32>
    %100 = arith.maximumf %98, %99 : vector<8x5x7xf32>
    %101 = vector.extract_strided_slice %93 {offsets = [0, 0, 4], sizes = [8, 5, 7], strides = [1, 1, 1]} : vector<8x5x11xf32> to vector<8x5x7xf32>
    %102 = arith.maximumf %100, %101 : vector<8x5x7xf32>
    %103 = vector.extract_strided_slice %102 {offsets = [0, 0, 0], sizes = [8, 5, 1], strides = [1, 1, 1]} : vector<8x5x7xf32> to vector<8x5x1xf32>
    %c0_127 = arith.constant 0 : index
    %c0_128 = arith.constant 0 : index
    %c0_129 = arith.constant 0 : index
    %104 = vector.load %arg5[%c0_127, %c0_128, %c0_129] : memref<8x14x14xf32, #tpu.memory_space<vmem>>, vector<8x5x1xf32>
    tpu.vector_store %arg5[%c0_127, %c0_128, %c0_129], %103 {strides = array<i32>} : memref<8x14x14xf32, #tpu.memory_space<vmem>>, vector<8x5x1xf32>,
    %105 = vector.extract_strided_slice %102 {offsets = [0, 0, 2], sizes = [8, 5, 1], strides = [1, 1, 1]} : vector<8x5x7xf32> to vector<8x5x1xf32>
    %c0_130 = arith.constant 0 : index
    %c0_131 = arith.constant 0 : index
    %c1_132 = arith.constant 1 : index
    %106 = vector.load %arg5[%c0_130, %c0_131, %c1_132] : memref<8x14x14xf32, #tpu.memory_space<vmem>>, vector<8x5x1xf32>
    tpu.vector_store %arg5[%c0_130, %c0_131, %c1_132], %105 {strides = array<i32>} : memref<8x14x14xf32, #tpu.memory_space<vmem>>, vector<8x5x1xf32>,
    %107 = vector.extract_strided_slice %102 {offsets = [0, 0, 4], sizes = [8, 5, 1], strides = [1, 1, 1]} : vector<8x5x7xf32> to vector<8x5x1xf32>
    %c0_133 = arith.constant 0 : index
    %c0_134 = arith.constant 0 : index
    %c2_135 = arith.constant 2 : index
    %108 = vector.load %arg5[%c0_133, %c0_134, %c2_135] : memref<8x14x14xf32, #tpu.memory_space<vmem>>, vector<8x5x1xf32>
    tpu.vector_store %arg5[%c0_133, %c0_134, %c2_135], %107 {strides = array<i32>} : memref<8x14x14xf32, #tpu.memory_space<vmem>>, vector<8x5x1xf32>,
    %109 = vector.extract_strided_slice %102 {offsets = [0, 0, 6], sizes = [8, 5, 1], strides = [1, 1, 1]} : vector<8x5x7xf32> to vector<8x5x1xf32>
    %c0_136 = arith.constant 0 : index
    %c0_137 = arith.constant 0 : index
    %c3_138 = arith.constant 3 : index
    %110 = vector.load %arg5[%c0_136, %c0_137, %c3_138] : memref<8x14x14xf32, #tpu.memory_space<vmem>>, vector<8x5x1xf32>
    tpu.vector_store %arg5[%c0_136, %c0_137, %c3_138], %109 {strides = array<i32>} : memref<8x14x14xf32, #tpu.memory_space<vmem>>, vector<8x5x1xf32>,
    %c0_139 = arith.constant 0 : index
    %c0_140 = arith.constant 0 : index
    %c0_141 = arith.constant 0 : index
    %111 = vector.load %arg5[%c0_139, %c0_140, %c0_141] : memref<8x14x14xf32, #tpu.memory_space<vmem>>, vector<8x5x4xf32>
    %c0_142 = arith.constant 0 : index
    %c1_143 = arith.constant 1 : index
    %c1_144 = arith.constant 1 : index
    %112 = vector.load %arg5[%c0_142, %c1_143, %c1_144] : memref<8x14x14xf32, #tpu.memory_space<vmem>>, vector<8x5x4xf32>
    tpu.vector_store %arg5[%c0_142, %c1_143, %c1_144], %111 {strides = array<i32>} : memref<8x14x14xf32, #tpu.memory_space<vmem>>, vector<8x5x4xf32>,
    %cst_145 = arith.constant 0xFF800000 : f32
    %113 = vector.broadcast %cst_145 : f32 to vector<8x1x6xf32>
    %c0_146 = arith.constant 0 : index
    %c0_147 = arith.constant 0 : index
    %c0_148 = arith.constant 0 : index
    %114 = vector.load %arg5[%c0_146, %c0_147, %c0_148] : memref<8x14x14xf32, #tpu.memory_space<vmem>>, vector<8x1x6xf32>
    tpu.vector_store %arg5[%c0_146, %c0_147, %c0_148], %113 {strides = array<i32>} : memref<8x14x14xf32, #tpu.memory_space<vmem>>, vector<8x1x6xf32>,
    %cst_149 = arith.constant 0xFF800000 : f32
    %115 = vector.broadcast %cst_149 : f32 to vector<8x1x6xf32>
    %c0_150 = arith.constant 0 : index
    %c6_151 = arith.constant 6 : index
    %c0_152 = arith.constant 0 : index
    %116 = vector.load %arg5[%c0_150, %c6_151, %c0_152] : memref<8x14x14xf32, #tpu.memory_space<vmem>>, vector<8x1x6xf32>
    tpu.vector_store %arg5[%c0_150, %c6_151, %c0_152], %115 {strides = array<i32>} : memref<8x14x14xf32, #tpu.memory_space<vmem>>, vector<8x1x6xf32>,
    %cst_153 = arith.constant 0xFF800000 : f32
    %117 = vector.broadcast %cst_153 : f32 to vector<8x5x1xf32>
    %c0_154 = arith.constant 0 : index
    %c1_155 = arith.constant 1 : index
    %c0_156 = arith.constant 0 : index
    %118 = vector.load %arg5[%c0_154, %c1_155, %c0_156] : memref<8x14x14xf32, #tpu.memory_space<vmem>>, vector<8x5x1xf32>
    tpu.vector_store %arg5[%c0_154, %c1_155, %c0_156], %117 {strides = array<i32>} : memref<8x14x14xf32, #tpu.memory_space<vmem>>, vector<8x5x1xf32>,
    %cst_157 = arith.constant 0xFF800000 : f32
    %119 = vector.broadcast %cst_157 : f32 to vector<8x5x1xf32>
    %c0_158 = arith.constant 0 : index
    %c1_159 = arith.constant 1 : index
    %c5_160 = arith.constant 5 : index
    %120 = vector.load %arg5[%c0_158, %c1_159, %c5_160] : memref<8x14x14xf32, #tpu.memory_space<vmem>>, vector<8x5x1xf32>
    tpu.vector_store %arg5[%c0_158, %c1_159, %c5_160], %119 {strides = array<i32>} : memref<8x14x14xf32, #tpu.memory_space<vmem>>, vector<8x5x1xf32>,
    %c0_161 = arith.constant 0 : index
    %c0_162 = arith.constant 0 : index
    %c0_163 = arith.constant 0 : index
    %121 = vector.load %arg5[%c0_161, %c0_162, %c0_163] : memref<8x14x14xf32, #tpu.memory_space<vmem>>, vector<8x6x6xf32>
    %c0_164 = arith.constant 0 : index
    %c1_165 = arith.constant 1 : index
    %c0_166 = arith.constant 0 : index
    %122 = vector.load %arg5[%c0_164, %c1_165, %c0_166] : memref<8x14x14xf32, #tpu.memory_space<vmem>>, vector<8x6x6xf32>
    %123 = arith.maximumf %121, %122 : vector<8x6x6xf32>
    %124 = vector.extract_strided_slice %123 {offsets = [0, 0, 0], sizes = [8, 6, 2], strides = [1, 1, 1]} : vector<8x6x6xf32> to vector<8x6x2xf32>
    %125 = vector.extract_strided_slice %123 {offsets = [0, 0, 2], sizes = [8, 6, 2], strides = [1, 1, 1]} : vector<8x6x6xf32> to vector<8x6x2xf32>
    %126 = arith.maximumf %124, %125 : vector<8x6x2xf32>
    %127 = vector.extract_strided_slice %123 {offsets = [0, 0, 4], sizes = [8, 6, 2], strides = [1, 1, 1]} : vector<8x6x6xf32> to vector<8x6x2xf32>
    %128 = arith.maximumf %126, %127 : vector<8x6x2xf32>
    %129 = vector.extract_strided_slice %128 {offsets = [0, 0, 0], sizes = [8, 5, 2], strides = [1, 1, 1]} : vector<8x6x2xf32> to vector<8x5x2xf32>
    %130 = vector.extract_strided_slice %128 {offsets = [0, 1, 0], sizes = [8, 5, 2], strides = [1, 1, 1]} : vector<8x6x2xf32> to vector<8x5x2xf32>
    %131 = arith.maximumf %129, %130 : vector<8x5x2xf32>
    %132 = vector.extract_strided_slice %131 {offsets = [0, 0, 0], sizes = [8, 5, 1], strides = [1, 1, 1]} : vector<8x5x2xf32> to vector<8x5x1xf32>
    %133 = vector.extract_strided_slice %131 {offsets = [0, 0, 1], sizes = [8, 5, 1], strides = [1, 1, 1]} : vector<8x5x2xf32> to vector<8x5x1xf32>
    %134 = arith.maximumf %132, %133 : vector<8x5x1xf32>
    %c0_167 = arith.constant 0 : index
    %c2_168 = arith.constant 2 : index
    %c2_169 = arith.constant 2 : index
    %135 = vector.load %arg5[%c0_167, %c2_168, %c2_169] : memref<8x14x14xf32, #tpu.memory_space<vmem>>, vector<8x5x1xf32>
    tpu.vector_store %arg5[%c0_167, %c2_168, %c2_169], %134 {strides = array<i32>} : memref<8x14x14xf32, #tpu.memory_space<vmem>>, vector<8x5x1xf32>,
    %cst_170 = arith.constant 0xFF800000 : f32
    %136 = vector.broadcast %cst_170 : f32 to vector<8x2x5xf32>
    %c0_171 = arith.constant 0 : index
    %c0_172 = arith.constant 0 : index
    %c0_173 = arith.constant 0 : index
    %137 = vector.load %arg5[%c0_171, %c0_172, %c0_173] : memref<8x14x14xf32, #tpu.memory_space<vmem>>, vector<8x2x5xf32>
    tpu.vector_store %arg5[%c0_171, %c0_172, %c0_173], %136 {strides = array<i32>} : memref<8x14x14xf32, #tpu.memory_space<vmem>>, vector<8x2x5xf32>,
    %cst_174 = arith.constant 0xFF800000 : f32
    %138 = vector.broadcast %cst_174 : f32 to vector<8x2x5xf32>
    %c0_175 = arith.constant 0 : index
    %c7_176 = arith.constant 7 : index
    %c0_177 = arith.constant 0 : index
    %139 = vector.load %arg5[%c0_175, %c7_176, %c0_177] : memref<8x14x14xf32, #tpu.memory_space<vmem>>, vector<8x2x5xf32>
    tpu.vector_store %arg5[%c0_175, %c7_176, %c0_177], %138 {strides = array<i32>} : memref<8x14x14xf32, #tpu.memory_space<vmem>>, vector<8x2x5xf32>,
    %cst_178 = arith.constant 0xFF800000 : f32
    %140 = vector.broadcast %cst_178 : f32 to vector<8x5x2xf32>
    %c0_179 = arith.constant 0 : index
    %c2_180 = arith.constant 2 : index
    %c0_181 = arith.constant 0 : index
    %141 = vector.load %arg5[%c0_179, %c2_180, %c0_181] : memref<8x14x14xf32, #tpu.memory_space<vmem>>, vector<8x5x2xf32>
    tpu.vector_store %arg5[%c0_179, %c2_180, %c0_181], %140 {strides = array<i32>} : memref<8x14x14xf32, #tpu.memory_space<vmem>>, vector<8x5x2xf32>,
    %cst_182 = arith.constant 0xFF800000 : f32
    %142 = vector.broadcast %cst_182 : f32 to vector<8x5x2xf32>
    %c0_183 = arith.constant 0 : index
    %c2_184 = arith.constant 2 : index
    %c3_185 = arith.constant 3 : index
    %143 = vector.load %arg5[%c0_183, %c2_184, %c3_185] : memref<8x14x14xf32, #tpu.memory_space<vmem>>, vector<8x5x2xf32>
    tpu.vector_store %arg5[%c0_183, %c2_184, %c3_185], %142 {strides = array<i32>} : memref<8x14x14xf32, #tpu.memory_space<vmem>>, vector<8x5x2xf32>,
    %144 = tpu.iota {dimensions = array<i32: 2>} : vector<8x9x2xi32>
    %c2_i32 = arith.constant 2 : i32
    %145 = vector.broadcast %c2_i32 : i32 to vector<8x9x2xi32>
    %146 = arith.subi %144, %145 : vector<8x9x2xi32>
    %c0_186 = arith.constant 0 : index
    %c0_187 = arith.constant 0 : index
    %c0_188 = arith.constant 0 : index
    %147 = vector.load %arg5[%c0_186, %c0_187, %c0_188] : memref<8x14x14xf32, #tpu.memory_space<vmem>>, vector<8x9x2xf32>
    %c0_i32 = arith.constant 0 : i32
    %148 = vector.broadcast %c0_i32 : i32 to vector<8x9x2xi32>
    %149 = arith.addi %146, %148 : vector<8x9x2xi32>
    %c0_189 = arith.constant 0 : index
    %c0_190 = arith.constant 0 : index
    %c1_191 = arith.constant 1 : index
    %150 = vector.load %arg5[%c0_189, %c0_190, %c1_191] : memref<8x14x14xf32, #tpu.memory_space<vmem>>, vector<8x9x2xf32>
    %c1_i32 = arith.constant 1 : i32
    %151 = vector.broadcast %c1_i32 : i32 to vector<8x9x2xi32>
    %152 = arith.addi %146, %151 : vector<8x9x2xi32>
    %153 = arith.cmpf ogt, %150, %147 : vector<8x9x2xf32>
    %154 = arith.select %153, %152, %149 : vector<8x9x2xi1>, vector<8x9x2xi32>
    %155 = arith.select %153, %150, %147 : vector<8x9x2xi1>, vector<8x9x2xf32>
    %c0_192 = arith.constant 0 : index
    %c0_193 = arith.constant 0 : index
    %c2_194 = arith.constant 2 : index
    %156 = vector.load %arg5[%c0_192, %c0_193, %c2_194] : memref<8x14x14xf32, #tpu.memory_space<vmem>>, vector<8x9x2xf32>
    %c2_i32_195 = arith.constant 2 : i32
    %157 = vector.broadcast %c2_i32_195 : i32 to vector<8x9x2xi32>
    %158 = arith.addi %146, %157 : vector<8x9x2xi32>
    %159 = arith.cmpf ogt, %156, %155 : vector<8x9x2xf32>
    %160 = arith.select %159, %158, %154 : vector<8x9x2xi1>, vector<8x9x2xi32>
    %161 = arith.select %159, %156, %155 : vector<8x9x2xi1>, vector<8x9x2xf32>
    %c0_196 = arith.constant 0 : index
    %c0_197 = arith.constant 0 : index
    %c3_198 = arith.constant 3 : index
    %162 = vector.load %arg5[%c0_196, %c0_197, %c3_198] : memref<8x14x14xf32, #tpu.memory_space<vmem>>, vector<8x9x2xf32>
    %c3_i32 = arith.constant 3 : i32
    %163 = vector.broadcast %c3_i32 : i32 to vector<8x9x2xi32>
    %164 = arith.addi %146, %163 : vector<8x9x2xi32>
    %165 = arith.cmpf ogt, %162, %161 : vector<8x9x2xf32>
    %166 = arith.select %165, %164, %160 : vector<8x9x2xi1>, vector<8x9x2xi32>
    %167 = arith.select %165, %162, %161 : vector<8x9x2xi1>, vector<8x9x2xf32>
    %168 = tpu.iota {dimensions = array<i32: 1>} : vector<8x5x2xi32>
    %c2_i32_199 = arith.constant 2 : i32
    %169 = vector.broadcast %c2_i32_199 : i32 to vector<8x5x2xi32>
    %170 = arith.subi %168, %169 : vector<8x5x2xi32>
    %c1_i32_200 = arith.constant 1 : i32
    %171 = vector.broadcast %c1_i32_200 : i32 to vector<8x5x2xi32>
    %172 = arith.muli %170, %171 : vector<8x5x2xi32>
    %173 = vector.extract_strided_slice %167 {offsets = [0, 0, 0], sizes = [8, 5, 2], strides = [1, 1, 1]} : vector<8x9x2xf32> to vector<8x5x2xf32>
    %174 = vector.extract_strided_slice %166 {offsets = [0, 0, 0], sizes = [8, 5, 2], strides = [1, 1, 1]} : vector<8x9x2xi32> to vector<8x5x2xi32>
    %c0_i32_201 = arith.constant 0 : i32
    %175 = vector.broadcast %c0_i32_201 : i32 to vector<8x5x2xi32>
    %176 = arith.addi %172, %175 : vector<8x5x2xi32>
    %177 = arith.addi %176, %174 : vector<8x5x2xi32>
    %178 = vector.extract_strided_slice %167 {offsets = [0, 1, 0], sizes = [8, 5, 2], strides = [1, 1, 1]} : vector<8x9x2xf32> to vector<8x5x2xf32>
    %179 = vector.extract_strided_slice %166 {offsets = [0, 1, 0], sizes = [8, 5, 2], strides = [1, 1, 1]} : vector<8x9x2xi32> to vector<8x5x2xi32>
    %c1_i32_202 = arith.constant 1 : i32
    %180 = vector.broadcast %c1_i32_202 : i32 to vector<8x5x2xi32>
    %181 = arith.addi %172, %180 : vector<8x5x2xi32>
    %182 = arith.addi %181, %179 : vector<8x5x2xi32>
    %183 = arith.cmpf ogt, %178, %173 : vector<8x5x2xf32>
    %184 = arith.select %183, %182, %177 : vector<8x5x2xi1>, vector<8x5x2xi32>
    %185 = arith.select %183, %178, %173 : vector<8x5x2xi1>, vector<8x5x2xf32>
    %186 = vector.extract_strided_slice %167 {offsets = [0, 2, 0], sizes = [8, 5, 2], strides = [1, 1, 1]} : vector<8x9x2xf32> to vector<8x5x2xf32>
    %187 = vector.extract_strided_slice %166 {offsets = [0, 2, 0], sizes = [8, 5, 2], strides = [1, 1, 1]} : vector<8x9x2xi32> to vector<8x5x2xi32>
    %c2_i32_203 = arith.constant 2 : i32
    %188 = vector.broadcast %c2_i32_203 : i32 to vector<8x5x2xi32>
    %189 = arith.addi %172, %188 : vector<8x5x2xi32>
    %190 = arith.addi %189, %187 : vector<8x5x2xi32>
    %191 = arith.cmpf ogt, %186, %185 : vector<8x5x2xf32>
    %192 = arith.select %191, %190, %184 : vector<8x5x2xi1>, vector<8x5x2xi32>
    %193 = arith.select %191, %186, %185 : vector<8x5x2xi1>, vector<8x5x2xf32>
    %194 = vector.extract_strided_slice %167 {offsets = [0, 3, 0], sizes = [8, 5, 2], strides = [1, 1, 1]} : vector<8x9x2xf32> to vector<8x5x2xf32>
    %195 = vector.extract_strided_slice %166 {offsets = [0, 3, 0], sizes = [8, 5, 2], strides = [1, 1, 1]} : vector<8x9x2xi32> to vector<8x5x2xi32>
    %c3_i32_204 = arith.constant 3 : i32
    %196 = vector.broadcast %c3_i32_204 : i32 to vector<8x5x2xi32>
    %197 = arith.addi %172, %196 : vector<8x5x2xi32>
    %198 = arith.addi %197, %195 : vector<8x5x2xi32>
    %199 = arith.cmpf ogt, %194, %193 : vector<8x5x2xf32>
    %200 = arith.select %199, %198, %192 : vector<8x5x2xi1>, vector<8x5x2xi32>
    %201 = arith.select %199, %194, %193 : vector<8x5x2xi1>, vector<8x5x2xf32>
    %202 = vector.extract_strided_slice %167 {offsets = [0, 4, 0], sizes = [8, 5, 2], strides = [1, 1, 1]} : vector<8x9x2xf32> to vector<8x5x2xf32>
    %203 = vector.extract_strided_slice %166 {offsets = [0, 4, 0], sizes = [8, 5, 2], strides = [1, 1, 1]} : vector<8x9x2xi32> to vector<8x5x2xi32>
    %c4_i32 = arith.constant 4 : i32
    %204 = vector.broadcast %c4_i32 : i32 to vector<8x5x2xi32>
    %205 = arith.addi %172, %204 : vector<8x5x2xi32>
    %206 = arith.addi %205, %203 : vector<8x5x2xi32>
    %207 = arith.cmpf ogt, %202, %201 : vector<8x5x2xf32>
    %208 = arith.select %207, %206, %200 : vector<8x5x2xi1>, vector<8x5x2xi32>
    %209 = arith.select %207, %202, %201 : vector<8x5x2xi1>, vector<8x5x2xf32>
    %c0_205 = arith.constant 0 : index
    %c0_206 = arith.constant 0 : index
    %c0_207 = arith.constant 0 : index
    %210 = vector.load %arg2[%c0_205, %c0_206, %c0_207] : memref<8x5x2xf32, #tpu.memory_space<vmem>>, vector<8x5x2xf32>
    tpu.vector_store %arg2[%c0_205, %c0_206, %c0_207], %209 {strides = array<i32>} : memref<8x5x2xf32, #tpu.memory_space<vmem>>, vector<8x5x2xf32>,
    %c0_208 = arith.constant 0 : index
    %c0_209 = arith.constant 0 : index
    %c0_210 = arith.constant 0 : index
    %211 = vector.load %arg3[%c0_208, %c0_209, %c0_210] : memref<8x5x2xi32, #tpu.memory_space<vmem>>, vector<8x5x2xi32>
    tpu.vector_store %arg3[%c0_208, %c0_209, %c0_210], %208 {strides = array<i32>} : memref<8x5x2xi32, #tpu.memory_space<vmem>>, vector<8x5x2xi32>,
    %c0_211 = arith.constant 0 : index
    %c0_212 = arith.constant 0 : index
    %c0_213 = arith.constant 0 : index
    %212 = tpu.strided_load %arg1[%c0_211, %c0_212, %c0_213] {strides = array<i32: 1, 3, 1>} : memref<8x28x31xf32, #tpu.memory_space<vmem>>, vector<8x9x30xf32>
    %c0_214 = arith.constant 0 : index
    %c1_215 = arith.constant 1 : index
    %c0_216 = arith.constant 0 : index
    %213 = tpu.strided_load %arg1[%c0_214, %c1_215, %c0_216] {strides = array<i32: 1, 3, 1>} : memref<8x28x31xf32, #tpu.memory_space<vmem>>, vector<8x9x30xf32>
    %214 = arith.maximumf %212, %213 : vector<8x9x30xf32>
    %c0_217 = arith.constant 0 : index
    %c2_218 = arith.constant 2 : index
    %c0_219 = arith.constant 0 : index
    %215 = tpu.strided_load %arg1[%c0_217, %c2_218, %c0_219] {strides = array<i32: 1, 3, 1>} : memref<8x28x31xf32, #tpu.memory_space<vmem>>, vector<8x9x30xf32>
    %216 = arith.maximumf %214, %215 : vector<8x9x30xf32>
    %217 = vector.extract_strided_slice %216 {offsets = [0, 0, 0], sizes = [8, 9, 28], strides = [1, 1, 1]} : vector<8x9x30xf32> to vector<8x9x28xf32>
    %218 = vector.extract_strided_slice %216 {offsets = [0, 0, 1], sizes = [8, 9, 28], strides = [1, 1, 1]} : vector<8x9x30xf32> to vector<8x9x28xf32>
    %219 = arith.maximumf %217, %218 : vector<8x9x28xf32>
    %220 = vector.extract_strided_slice %216 {offsets = [0, 0, 2], sizes = [8, 9, 28], strides = [1, 1, 1]} : vector<8x9x30xf32> to vector<8x9x28xf32>
    %221 = arith.maximumf %219, %220 : vector<8x9x28xf32>
    %222 = vector.extract_strided_slice %221 {offsets = [0, 0, 0], sizes = [8, 9, 1], strides = [1, 1, 1]} : vector<8x9x28xf32> to vector<8x9x1xf32>
    %c0_220 = arith.constant 0 : index
    %c0_221 = arith.constant 0 : index
    %c0_222 = arith.constant 0 : index
    %223 = vector.load %arg6[%c0_220, %c0_221, %c0_222] : memref<8x13x14xf32, #tpu.memory_space<vmem>>, vector<8x9x1xf32>
    tpu.vector_store %arg6[%c0_220, %c0_221, %c0_222], %222 {strides = array<i32>} : memref<8x13x14xf32, #tpu.memory_space<vmem>>, vector<8x9x1xf32>,
    %224 = vector.extract_strided_slice %221 {offsets = [0, 0, 3], sizes = [8, 9, 1], strides = [1, 1, 1]} : vector<8x9x28xf32> to vector<8x9x1xf32>
    %c0_223 = arith.constant 0 : index
    %c0_224 = arith.constant 0 : index
    %c1_225 = arith.constant 1 : index
    %225 = vector.load %arg6[%c0_223, %c0_224, %c1_225] : memref<8x13x14xf32, #tpu.memory_space<vmem>>, vector<8x9x1xf32>
    tpu.vector_store %arg6[%c0_223, %c0_224, %c1_225], %224 {strides = array<i32>} : memref<8x13x14xf32, #tpu.memory_space<vmem>>, vector<8x9x1xf32>,
    %226 = vector.extract_strided_slice %221 {offsets = [0, 0, 6], sizes = [8, 9, 1], strides = [1, 1, 1]} : vector<8x9x28xf32> to vector<8x9x1xf32>
    %c0_226 = arith.constant 0 : index
    %c0_227 = arith.constant 0 : index
    %c2_228 = arith.constant 2 : index
    %227 = vector.load %arg6[%c0_226, %c0_227, %c2_228] : memref<8x13x14xf32, #tpu.memory_space<vmem>>, vector<8x9x1xf32>
    tpu.vector_store %arg6[%c0_226, %c0_227, %c2_228], %226 {strides = array<i32>} : memref<8x13x14xf32, #tpu.memory_space<vmem>>, vector<8x9x1xf32>,
    %228 = vector.extract_strided_slice %221 {offsets = [0, 0, 9], sizes = [8, 9, 1], strides = [1, 1, 1]} : vector<8x9x28xf32> to vector<8x9x1xf32>
    %c0_229 = arith.constant 0 : index
    %c0_230 = arith.constant 0 : index
    %c3_231 = arith.constant 3 : index
    %229 = vector.load %arg6[%c0_229, %c0_230, %c3_231] : memref<8x13x14xf32, #tpu.memory_space<vmem>>, vector<8x9x1xf32>
    tpu.vector_store %arg6[%c0_229, %c0_230, %c3_231], %228 {strides = array<i32>} : memref<8x13x14xf32, #tpu.memory_space<vmem>>, vector<8x9x1xf32>,
    %230 = vector.extract_strided_slice %221 {offsets = [0, 0, 12], sizes = [8, 9, 1], strides = [1, 1, 1]} : vector<8x9x28xf32> to vector<8x9x1xf32>
    %c0_232 = arith.constant 0 : index
    %c0_233 = arith.constant 0 : index
    %c4_234 = arith.constant 4 : index
    %231 = vector.load %arg6[%c0_232, %c0_233, %c4_234] : memref<8x13x14xf32, #tpu.memory_space<vmem>>, vector<8x9x1xf32>
    tpu.vector_store %arg6[%c0_232, %c0_233, %c4_234], %230 {strides = array<i32>} : memref<8x13x14xf32, #tpu.memory_space<vmem>>, vector<8x9x1xf32>,
    %232 = vector.extract_strided_slice %221 {offsets = [0, 0, 15], sizes = [8, 9, 1], strides = [1, 1, 1]} : vector<8x9x28xf32> to vector<8x9x1xf32>
    %c0_235 = arith.constant 0 : index
    %c0_236 = arith.constant 0 : index
    %c5_237 = arith.constant 5 : index
    %233 = vector.load %arg6[%c0_235, %c0_236, %c5_237] : memref<8x13x14xf32, #tpu.memory_space<vmem>>, vector<8x9x1xf32>
    tpu.vector_store %arg6[%c0_235, %c0_236, %c5_237], %232 {strides = array<i32>} : memref<8x13x14xf32, #tpu.memory_space<vmem>>, vector<8x9x1xf32>,
    %234 = vector.extract_strided_slice %221 {offsets = [0, 0, 18], sizes = [8, 9, 1], strides = [1, 1, 1]} : vector<8x9x28xf32> to vector<8x9x1xf32>
    %c0_238 = arith.constant 0 : index
    %c0_239 = arith.constant 0 : index
    %c6_240 = arith.constant 6 : index
    %235 = vector.load %arg6[%c0_238, %c0_239, %c6_240] : memref<8x13x14xf32, #tpu.memory_space<vmem>>, vector<8x9x1xf32>
    tpu.vector_store %arg6[%c0_238, %c0_239, %c6_240], %234 {strides = array<i32>} : memref<8x13x14xf32, #tpu.memory_space<vmem>>, vector<8x9x1xf32>,
    %236 = vector.extract_strided_slice %221 {offsets = [0, 0, 21], sizes = [8, 9, 1], strides = [1, 1, 1]} : vector<8x9x28xf32> to vector<8x9x1xf32>
    %c0_241 = arith.constant 0 : index
    %c0_242 = arith.constant 0 : index
    %c7_243 = arith.constant 7 : index
    %237 = vector.load %arg6[%c0_241, %c0_242, %c7_243] : memref<8x13x14xf32, #tpu.memory_space<vmem>>, vector<8x9x1xf32>
    tpu.vector_store %arg6[%c0_241, %c0_242, %c7_243], %236 {strides = array<i32>} : memref<8x13x14xf32, #tpu.memory_space<vmem>>, vector<8x9x1xf32>,
    %238 = vector.extract_strided_slice %221 {offsets = [0, 0, 24], sizes = [8, 9, 1], strides = [1, 1, 1]} : vector<8x9x28xf32> to vector<8x9x1xf32>
    %c0_244 = arith.constant 0 : index
    %c0_245 = arith.constant 0 : index
    %c8_246 = arith.constant 8 : index
    %239 = vector.load %arg6[%c0_244, %c0_245, %c8_246] : memref<8x13x14xf32, #tpu.memory_space<vmem>>, vector<8x9x1xf32>
    tpu.vector_store %arg6[%c0_244, %c0_245, %c8_246], %238 {strides = array<i32>} : memref<8x13x14xf32, #tpu.memory_space<vmem>>, vector<8x9x1xf32>,
    %240 = vector.extract_strided_slice %221 {offsets = [0, 0, 27], sizes = [8, 9, 1], strides = [1, 1, 1]} : vector<8x9x28xf32> to vector<8x9x1xf32>
    %c0_247 = arith.constant 0 : index
    %c0_248 = arith.constant 0 : index
    %c9_249 = arith.constant 9 : index
    %241 = vector.load %arg6[%c0_247, %c0_248, %c9_249] : memref<8x13x14xf32, #tpu.memory_space<vmem>>, vector<8x9x1xf32>
    tpu.vector_store %arg6[%c0_247, %c0_248, %c9_249], %240 {strides = array<i32>} : memref<8x13x14xf32, #tpu.memory_space<vmem>>, vector<8x9x1xf32>,
    %c0_250 = arith.constant 0 : index
    %c0_251 = arith.constant 0 : index
    %c0_252 = arith.constant 0 : index
    %242 = vector.load %arg6[%c0_250, %c0_251, %c0_252] : memref<8x13x14xf32, #tpu.memory_space<vmem>>, vector<8x9x10xf32>
    %c0_253 = arith.constant 0 : index
    %c2_254 = arith.constant 2 : index
    %c2_255 = arith.constant 2 : index
    %243 = vector.load %arg6[%c0_253, %c2_254, %c2_255] : memref<8x13x14xf32, #tpu.memory_space<vmem>>, vector<8x9x10xf32>
    tpu.vector_store %arg6[%c0_253, %c2_254, %c2_255], %242 {strides = array<i32>} : memref<8x13x14xf32, #tpu.memory_space<vmem>>, vector<8x9x10xf32>,
    %cst_256 = arith.constant 0xFF800000 : f32
    %244 = vector.broadcast %cst_256 : f32 to vector<8x2x14xf32>
    %c0_257 = arith.constant 0 : index
    %c0_258 = arith.constant 0 : index
    %c0_259 = arith.constant 0 : index
    %245 = vector.load %arg6[%c0_257, %c0_258, %c0_259] : memref<8x13x14xf32, #tpu.memory_space<vmem>>, vector<8x2x14xf32>
    tpu.vector_store %arg6[%c0_257, %c0_258, %c0_259], %244 {strides = array<i32>} : memref<8x13x14xf32, #tpu.memory_space<vmem>>, vector<8x2x14xf32>,
    %cst_260 = arith.constant 0xFF800000 : f32
    %246 = vector.broadcast %cst_260 : f32 to vector<8x2x14xf32>
    %c0_261 = arith.constant 0 : index
    %c11 = arith.constant 11 : index
    %c0_262 = arith.constant 0 : index
    %247 = vector.load %arg6[%c0_261, %c11, %c0_262] : memref<8x13x14xf32, #tpu.memory_space<vmem>>, vector<8x2x14xf32>
    tpu.vector_store %arg6[%c0_261, %c11, %c0_262], %246 {strides = array<i32>} : memref<8x13x14xf32, #tpu.memory_space<vmem>>, vector<8x2x14xf32>,
    %cst_263 = arith.constant 0xFF800000 : f32
    %248 = vector.broadcast %cst_263 : f32 to vector<8x9x2xf32>
    %c0_264 = arith.constant 0 : index
    %c2_265 = arith.constant 2 : index
    %c0_266 = arith.constant 0 : index
    %249 = vector.load %arg6[%c0_264, %c2_265, %c0_266] : memref<8x13x14xf32, #tpu.memory_space<vmem>>, vector<8x9x2xf32>
    tpu.vector_store %arg6[%c0_264, %c2_265, %c0_266], %248 {strides = array<i32>} : memref<8x13x14xf32, #tpu.memory_space<vmem>>, vector<8x9x2xf32>,
    %cst_267 = arith.constant 0xFF800000 : f32
    %250 = vector.broadcast %cst_267 : f32 to vector<8x9x2xf32>
    %c0_268 = arith.constant 0 : index
    %c2_269 = arith.constant 2 : index
    %c12_270 = arith.constant 12 : index
    %251 = vector.load %arg6[%c0_268, %c2_269, %c12_270] : memref<8x13x14xf32, #tpu.memory_space<vmem>>, vector<8x9x2xf32>
    tpu.vector_store %arg6[%c0_268, %c2_269, %c12_270], %250 {strides = array<i32>} : memref<8x13x14xf32, #tpu.memory_space<vmem>>, vector<8x9x2xf32>,
    %c0_271 = arith.constant 0 : index
    %c0_272 = arith.constant 0 : index
    %c0_273 = arith.constant 0 : index
    %252 = tpu.strided_load %arg6[%c0_271, %c0_272, %c0_273] {strides = array<i32: 1, 2, 1>} : memref<8x13x14xf32, #tpu.memory_space<vmem>>, vector<8x5x14xf32>
    %c0_274 = arith.constant 0 : index
    %c1_275 = arith.constant 1 : index
    %c0_276 = arith.constant 0 : index
    %253 = tpu.strided_load %arg6[%c0_274, %c1_275, %c0_276] {strides = array<i32: 1, 2, 1>} : memref<8x13x14xf32, #tpu.memory_space<vmem>>, vector<8x5x14xf32>
    %254 = arith.maximumf %252, %253 : vector<8x5x14xf32>
    %c0_277 = arith.constant 0 : index
    %c2_278 = arith.constant 2 : index
    %c0_279 = arith.constant 0 : index
    %255 = tpu.strided_load %arg6[%c0_277, %c2_278, %c0_279] {strides = array<i32: 1, 2, 1>} : memref<8x13x14xf32, #tpu.memory_space<vmem>>, vector<8x5x14xf32>
    %256 = arith.maximumf %254, %255 : vector<8x5x14xf32>
    %c0_280 = arith.constant 0 : index
    %c3_281 = arith.constant 3 : index
    %c0_282 = arith.constant 0 : index
    %257 = tpu.strided_load %arg6[%c0_280, %c3_281, %c0_282] {strides = array<i32: 1, 2, 1>} : memref<8x13x14xf32, #tpu.memory_space<vmem>>, vector<8x5x14xf32>
    %258 = arith.maximumf %256, %257 : vector<8x5x14xf32>
    %259 = vector.extract_strided_slice %258 {offsets = [0, 0, 0], sizes = [8, 5, 11], strides = [1, 1, 1]} : vector<8x5x14xf32> to vector<8x5x11xf32>
    %260 = vector.extract_strided_slice %258 {offsets = [0, 0, 1], sizes = [8, 5, 11], strides = [1, 1, 1]} : vector<8x5x14xf32> to vector<8x5x11xf32>
    %261 = arith.maximumf %259, %260 : vector<8x5x11xf32>
    %262 = vector.extract_strided_slice %258 {offsets = [0, 0, 2], sizes = [8, 5, 11], strides = [1, 1, 1]} : vector<8x5x14xf32> to vector<8x5x11xf32>
    %263 = arith.maximumf %261, %262 : vector<8x5x11xf32>
    %264 = vector.extract_strided_slice %258 {offsets = [0, 0, 3], sizes = [8, 5, 11], strides = [1, 1, 1]} : vector<8x5x14xf32> to vector<8x5x11xf32>
    %265 = arith.maximumf %263, %264 : vector<8x5x11xf32>
    %266 = vector.extract_strided_slice %265 {offsets = [0, 0, 0], sizes = [8, 5, 1], strides = [1, 1, 1]} : vector<8x5x11xf32> to vector<8x5x1xf32>
    %c0_283 = arith.constant 0 : index
    %c0_284 = arith.constant 0 : index
    %c0_285 = arith.constant 0 : index
    %267 = vector.load %arg6[%c0_283, %c0_284, %c0_285] : memref<8x13x14xf32, #tpu.memory_space<vmem>>, vector<8x5x1xf32>
    tpu.vector_store %arg6[%c0_283, %c0_284, %c0_285], %266 {strides = array<i32>} : memref<8x13x14xf32, #tpu.memory_space<vmem>>, vector<8x5x1xf32>,
    %268 = vector.extract_strided_slice %265 {offsets = [0, 0, 2], sizes = [8, 5, 1], strides = [1, 1, 1]} : vector<8x5x11xf32> to vector<8x5x1xf32>
    %c0_286 = arith.constant 0 : index
    %c0_287 = arith.constant 0 : index
    %c1_288 = arith.constant 1 : index
    %269 = vector.load %arg6[%c0_286, %c0_287, %c1_288] : memref<8x13x14xf32, #tpu.memory_space<vmem>>, vector<8x5x1xf32>
    tpu.vector_store %arg6[%c0_286, %c0_287, %c1_288], %268 {strides = array<i32>} : memref<8x13x14xf32, #tpu.memory_space<vmem>>, vector<8x5x1xf32>,
    %270 = vector.extract_strided_slice %265 {offsets = [0, 0, 4], sizes = [8, 5, 1], strides = [1, 1, 1]} : vector<8x5x11xf32> to vector<8x5x1xf32>
    %c0_289 = arith.constant 0 : index
    %c0_290 = arith.constant 0 : index
    %c2_291 = arith.constant 2 : index
    %271 = vector.load %arg6[%c0_289, %c0_290, %c2_291] : memref<8x13x14xf32, #tpu.memory_space<vmem>>, vector<8x5x1xf32>
    tpu.vector_store %arg6[%c0_289, %c0_290, %c2_291], %270 {strides = array<i32>} : memref<8x13x14xf32, #tpu.memory_space<vmem>>, vector<8x5x1xf32>,
    %272 = vector.extract_strided_slice %265 {offsets = [0, 0, 6], sizes = [8, 5, 1], strides = [1, 1, 1]} : vector<8x5x11xf32> to vector<8x5x1xf32>
    %c0_292 = arith.constant 0 : index
    %c0_293 = arith.constant 0 : index
    %c3_294 = arith.constant 3 : index
    %273 = vector.load %arg6[%c0_292, %c0_293, %c3_294] : memref<8x13x14xf32, #tpu.memory_space<vmem>>, vector<8x5x1xf32>
    tpu.vector_store %arg6[%c0_292, %c0_293, %c3_294], %272 {strides = array<i32>} : memref<8x13x14xf32, #tpu.memory_space<vmem>>, vector<8x5x1xf32>,
    %274 = vector.extract_strided_slice %265 {offsets = [0, 0, 8], sizes = [8, 5, 1], strides = [1, 1, 1]} : vector<8x5x11xf32> to vector<8x5x1xf32>
    %c0_295 = arith.constant 0 : index
    %c0_296 = arith.constant 0 : index
    %c4_297 = arith.constant 4 : index
    %275 = vector.load %arg6[%c0_295, %c0_296, %c4_297] : memref<8x13x14xf32, #tpu.memory_space<vmem>>, vector<8x5x1xf32>
    tpu.vector_store %arg6[%c0_295, %c0_296, %c4_297], %274 {strides = array<i32>} : memref<8x13x14xf32, #tpu.memory_space<vmem>>, vector<8x5x1xf32>,
    %276 = vector.extract_strided_slice %265 {offsets = [0, 0, 10], sizes = [8, 5, 1], strides = [1, 1, 1]} : vector<8x5x11xf32> to vector<8x5x1xf32>
    %c0_298 = arith.constant 0 : index
    %c0_299 = arith.constant 0 : index
    %c5_300 = arith.constant 5 : index
    %277 = vector.load %arg6[%c0_298, %c0_299, %c5_300] : memref<8x13x14xf32, #tpu.memory_space<vmem>>, vector<8x5x1xf32>
    tpu.vector_store %arg6[%c0_298, %c0_299, %c5_300], %276 {strides = array<i32>} : memref<8x13x14xf32, #tpu.memory_space<vmem>>, vector<8x5x1xf32>,
    %c0_301 = arith.constant 0 : index
    %c0_302 = arith.constant 0 : index
    %c0_303 = arith.constant 0 : index
    %278 = vector.load %arg6[%c0_301, %c0_302, %c0_303] : memref<8x13x14xf32, #tpu.memory_space<vmem>>, vector<8x5x6xf32>
    %c0_304 = arith.constant 0 : index
    %c0_305 = arith.constant 0 : index
    %c1_306 = arith.constant 1 : index
    %279 = vector.load %arg6[%c0_304, %c0_305, %c1_306] : memref<8x13x14xf32, #tpu.memory_space<vmem>>, vector<8x5x6xf32>
    tpu.vector_store %arg6[%c0_304, %c0_305, %c1_306], %278 {strides = array<i32>} : memref<8x13x14xf32, #tpu.memory_space<vmem>>, vector<8x5x6xf32>,
    %cst_307 = arith.constant 0xFF800000 : f32
    %280 = vector.broadcast %cst_307 : f32 to vector<8x5x1xf32>
    %c0_308 = arith.constant 0 : index
    %c0_309 = arith.constant 0 : index
    %c0_310 = arith.constant 0 : index
    %281 = vector.load %arg6[%c0_308, %c0_309, %c0_310] : memref<8x13x14xf32, #tpu.memory_space<vmem>>, vector<8x5x1xf32>
    tpu.vector_store %arg6[%c0_308, %c0_309, %c0_310], %280 {strides = array<i32>} : memref<8x13x14xf32, #tpu.memory_space<vmem>>, vector<8x5x1xf32>,
    %cst_311 = arith.constant 0xFF800000 : f32
    %282 = vector.broadcast %cst_311 : f32 to vector<8x5x1xf32>
    %c0_312 = arith.constant 0 : index
    %c0_313 = arith.constant 0 : index
    %c7_314 = arith.constant 7 : index
    %283 = vector.load %arg6[%c0_312, %c0_313, %c7_314] : memref<8x13x14xf32, #tpu.memory_space<vmem>>, vector<8x5x1xf32>
    tpu.vector_store %arg6[%c0_312, %c0_313, %c7_314], %282 {strides = array<i32>} : memref<8x13x14xf32, #tpu.memory_space<vmem>>, vector<8x5x1xf32>,
    %c0_315 = arith.constant 0 : index
    %c0_316 = arith.constant 0 : index
    %c0_317 = arith.constant 0 : index
    %284 = vector.load %arg6[%c0_315, %c0_316, %c0_317] : memref<8x13x14xf32, #tpu.memory_space<vmem>>, vector<8x5x8xf32>
    %285 = vector.extract_strided_slice %284 {offsets = [0, 0, 0], sizes = [8, 5, 6], strides = [1, 1, 1]} : vector<8x5x8xf32> to vector<8x5x6xf32>
    %286 = vector.extract_strided_slice %284 {offsets = [0, 0, 1], sizes = [8, 5, 6], strides = [1, 1, 1]} : vector<8x5x8xf32> to vector<8x5x6xf32>
    %287 = arith.maximumf %285, %286 : vector<8x5x6xf32>
    %288 = vector.extract_strided_slice %284 {offsets = [0, 0, 2], sizes = [8, 5, 6], strides = [1, 1, 1]} : vector<8x5x8xf32> to vector<8x5x6xf32>
    %289 = arith.maximumf %287, %288 : vector<8x5x6xf32>
    %c0_318 = arith.constant 0 : index
    %c1_319 = arith.constant 1 : index
    %c2_320 = arith.constant 2 : index
    %290 = vector.load %arg6[%c0_318, %c1_319, %c2_320] : memref<8x13x14xf32, #tpu.memory_space<vmem>>, vector<8x5x6xf32>
    tpu.vector_store %arg6[%c0_318, %c1_319, %c2_320], %289 {strides = array<i32>} : memref<8x13x14xf32, #tpu.memory_space<vmem>>, vector<8x5x6xf32>,
    %cst_321 = arith.constant 0xFF800000 : f32
    %291 = vector.broadcast %cst_321 : f32 to vector<8x1x11xf32>
    %c0_322 = arith.constant 0 : index
    %c0_323 = arith.constant 0 : index
    %c0_324 = arith.constant 0 : index
    %292 = vector.load %arg6[%c0_322, %c0_323, %c0_324] : memref<8x13x14xf32, #tpu.memory_space<vmem>>, vector<8x1x11xf32>
    tpu.vector_store %arg6[%c0_322, %c0_323, %c0_324], %291 {strides = array<i32>} : memref<8x13x14xf32, #tpu.memory_space<vmem>>, vector<8x1x11xf32>,
    %cst_325 = arith.constant 0xFF800000 : f32
    %293 = vector.broadcast %cst_325 : f32 to vector<8x1x11xf32>
    %c0_326 = arith.constant 0 : index
    %c6_327 = arith.constant 6 : index
    %c0_328 = arith.constant 0 : index
    %294 = vector.load %arg6[%c0_326, %c6_327, %c0_328] : memref<8x13x14xf32, #tpu.memory_space<vmem>>, vector<8x1x11xf32>
    tpu.vector_store %arg6[%c0_326, %c6_327, %c0_328], %293 {strides = array<i32>} : memref<8x13x14xf32, #tpu.memory_space<vmem>>, vector<8x1x11xf32>,
    %cst_329 = arith.constant 0xFF800000 : f32
    %295 = vector.broadcast %cst_329 : f32 to vector<8x5x2xf32>
    %c0_330 = arith.constant 0 : index
    %c1_331 = arith.constant 1 : index
    %c0_332 = arith.constant 0 : index
    %296 = vector.load %arg6[%c0_330, %c1_331, %c0_332] : memref<8x13x14xf32, #tpu.memory_space<vmem>>, vector<8x5x2xf32>
    tpu.vector_store %arg6[%c0_330, %c1_331, %c0_332], %295 {strides = array<i32>} : memref<8x13x14xf32, #tpu.memory_space<vmem>>, vector<8x5x2xf32>,
    %cst_333 = arith.constant 0xFF800000 : f32
    %297 = vector.broadcast %cst_333 : f32 to vector<8x5x3xf32>
    %c0_334 = arith.constant 0 : index
    %c1_335 = arith.constant 1 : index
    %c8_336 = arith.constant 8 : index
    %298 = vector.load %arg6[%c0_334, %c1_335, %c8_336] : memref<8x13x14xf32, #tpu.memory_space<vmem>>, vector<8x5x3xf32>
    tpu.vector_store %arg6[%c0_334, %c1_335, %c8_336], %297 {strides = array<i32>} : memref<8x13x14xf32, #tpu.memory_space<vmem>>, vector<8x5x3xf32>,
    %c0_337 = arith.constant 0 : index
    %c0_338 = arith.constant 0 : index
    %c0_339 = arith.constant 0 : index
    %299 = vector.load %arg6[%c0_337, %c0_338, %c0_339] : memref<8x13x14xf32, #tpu.memory_space<vmem>>, vector<8x4x11xf32>
    %c0_340 = arith.constant 0 : index
    %c1_341 = arith.constant 1 : index
    %c0_342 = arith.constant 0 : index
    %300 = vector.load %arg6[%c0_340, %c1_341, %c0_342] : memref<8x13x14xf32, #tpu.memory_space<vmem>>, vector<8x4x11xf32>
    %301 = arith.maximumf %299, %300 : vector<8x4x11xf32>
    %c0_343 = arith.constant 0 : index
    %c2_344 = arith.constant 2 : index
    %c0_345 = arith.constant 0 : index
    %302 = vector.load %arg6[%c0_343, %c2_344, %c0_345] : memref<8x13x14xf32, #tpu.memory_space<vmem>>, vector<8x4x11xf32>
    %303 = arith.maximumf %301, %302 : vector<8x4x11xf32>
    %c0_346 = arith.constant 0 : index
    %c3_347 = arith.constant 3 : index
    %c0_348 = arith.constant 0 : index
    %304 = vector.load %arg6[%c0_346, %c3_347, %c0_348] : memref<8x13x14xf32, #tpu.memory_space<vmem>>, vector<8x4x11xf32>
    %305 = arith.maximumf %303, %304 : vector<8x4x11xf32>
    %306 = vector.extract_strided_slice %305 {offsets = [0, 0, 0], sizes = [8, 4, 7], strides = [1, 1, 1]} : vector<8x4x11xf32> to vector<8x4x7xf32>
    %307 = vector.extract_strided_slice %305 {offsets = [0, 0, 1], sizes = [8, 4, 7], strides = [1, 1, 1]} : vector<8x4x11xf32> to vector<8x4x7xf32>
    %308 = arith.maximumf %306, %307 : vector<8x4x7xf32>
    %309 = vector.extract_strided_slice %305 {offsets = [0, 0, 2], sizes = [8, 4, 7], strides = [1, 1, 1]} : vector<8x4x11xf32> to vector<8x4x7xf32>
    %310 = arith.maximumf %308, %309 : vector<8x4x7xf32>
    %311 = vector.extract_strided_slice %305 {offsets = [0, 0, 3], sizes = [8, 4, 7], strides = [1, 1, 1]} : vector<8x4x11xf32> to vector<8x4x7xf32>
    %312 = arith.maximumf %310, %311 : vector<8x4x7xf32>
    %313 = vector.extract_strided_slice %305 {offsets = [0, 0, 4], sizes = [8, 4, 7], strides = [1, 1, 1]} : vector<8x4x11xf32> to vector<8x4x7xf32>
    %314 = arith.maximumf %312, %313 : vector<8x4x7xf32>
    %315 = vector.extract_strided_slice %314 {offsets = [0, 0, 0], sizes = [8, 4, 1], strides = [1, 1, 1]} : vector<8x4x7xf32> to vector<8x4x1xf32>
    %c0_349 = arith.constant 0 : index
    %c0_350 = arith.constant 0 : index
    %c0_351 = arith.constant 0 : index
    %316 = vector.load %arg6[%c0_349, %c0_350, %c0_351] : memref<8x13x14xf32, #tpu.memory_space<vmem>>, vector<8x4x1xf32>
    tpu.vector_store %arg6[%c0_349, %c0_350, %c0_351], %315 {strides = array<i32>} : memref<8x13x14xf32, #tpu.memory_space<vmem>>, vector<8x4x1xf32>,
    %317 = vector.extract_strided_slice %314 {offsets = [0, 0, 2], sizes = [8, 4, 1], strides = [1, 1, 1]} : vector<8x4x7xf32> to vector<8x4x1xf32>
    %c0_352 = arith.constant 0 : index
    %c0_353 = arith.constant 0 : index
    %c1_354 = arith.constant 1 : index
    %318 = vector.load %arg6[%c0_352, %c0_353, %c1_354] : memref<8x13x14xf32, #tpu.memory_space<vmem>>, vector<8x4x1xf32>
    tpu.vector_store %arg6[%c0_352, %c0_353, %c1_354], %317 {strides = array<i32>} : memref<8x13x14xf32, #tpu.memory_space<vmem>>, vector<8x4x1xf32>,
    %319 = vector.extract_strided_slice %314 {offsets = [0, 0, 4], sizes = [8, 4, 1], strides = [1, 1, 1]} : vector<8x4x7xf32> to vector<8x4x1xf32>
    %c0_355 = arith.constant 0 : index
    %c0_356 = arith.constant 0 : index
    %c2_357 = arith.constant 2 : index
    %320 = vector.load %arg6[%c0_355, %c0_356, %c2_357] : memref<8x13x14xf32, #tpu.memory_space<vmem>>, vector<8x4x1xf32>
    tpu.vector_store %arg6[%c0_355, %c0_356, %c2_357], %319 {strides = array<i32>} : memref<8x13x14xf32, #tpu.memory_space<vmem>>, vector<8x4x1xf32>,
    %321 = vector.extract_strided_slice %314 {offsets = [0, 0, 6], sizes = [8, 4, 1], strides = [1, 1, 1]} : vector<8x4x7xf32> to vector<8x4x1xf32>
    %c0_358 = arith.constant 0 : index
    %c0_359 = arith.constant 0 : index
    %c3_360 = arith.constant 3 : index
    %322 = vector.load %arg6[%c0_358, %c0_359, %c3_360] : memref<8x13x14xf32, #tpu.memory_space<vmem>>, vector<8x4x1xf32>
    tpu.vector_store %arg6[%c0_358, %c0_359, %c3_360], %321 {strides = array<i32>} : memref<8x13x14xf32, #tpu.memory_space<vmem>>, vector<8x4x1xf32>,
    %c0_361 = arith.constant 0 : index
    %c0_362 = arith.constant 0 : index
    %c0_363 = arith.constant 0 : index
    %323 = vector.load %arg6[%c0_361, %c0_362, %c0_363] : memref<8x13x14xf32, #tpu.memory_space<vmem>>, vector<8x4x4xf32>
    %c0_364 = arith.constant 0 : index
    %c1_365 = arith.constant 1 : index
    %c1_366 = arith.constant 1 : index
    %324 = vector.load %arg6[%c0_364, %c1_365, %c1_366] : memref<8x13x14xf32, #tpu.memory_space<vmem>>, vector<8x4x4xf32>
    tpu.vector_store %arg6[%c0_364, %c1_365, %c1_366], %323 {strides = array<i32>} : memref<8x13x14xf32, #tpu.memory_space<vmem>>, vector<8x4x4xf32>,
    %cst_367 = arith.constant 0xFF800000 : f32
    %325 = vector.broadcast %cst_367 : f32 to vector<8x1x6xf32>
    %c0_368 = arith.constant 0 : index
    %c0_369 = arith.constant 0 : index
    %c0_370 = arith.constant 0 : index
    %326 = vector.load %arg6[%c0_368, %c0_369, %c0_370] : memref<8x13x14xf32, #tpu.memory_space<vmem>>, vector<8x1x6xf32>
    tpu.vector_store %arg6[%c0_368, %c0_369, %c0_370], %325 {strides = array<i32>} : memref<8x13x14xf32, #tpu.memory_space<vmem>>, vector<8x1x6xf32>,
    %cst_371 = arith.constant 0xFF800000 : f32
    %327 = vector.broadcast %cst_371 : f32 to vector<8x1x6xf32>
    %c0_372 = arith.constant 0 : index
    %c5_373 = arith.constant 5 : index
    %c0_374 = arith.constant 0 : index
    %328 = vector.load %arg6[%c0_372, %c5_373, %c0_374] : memref<8x13x14xf32, #tpu.memory_space<vmem>>, vector<8x1x6xf32>
    tpu.vector_store %arg6[%c0_372, %c5_373, %c0_374], %327 {strides = array<i32>} : memref<8x13x14xf32, #tpu.memory_space<vmem>>, vector<8x1x6xf32>,
    %cst_375 = arith.constant 0xFF800000 : f32
    %329 = vector.broadcast %cst_375 : f32 to vector<8x4x1xf32>
    %c0_376 = arith.constant 0 : index
    %c1_377 = arith.constant 1 : index
    %c0_378 = arith.constant 0 : index
    %330 = vector.load %arg6[%c0_376, %c1_377, %c0_378] : memref<8x13x14xf32, #tpu.memory_space<vmem>>, vector<8x4x1xf32>
    tpu.vector_store %arg6[%c0_376, %c1_377, %c0_378], %329 {strides = array<i32>} : memref<8x13x14xf32, #tpu.memory_space<vmem>>, vector<8x4x1xf32>,
    %cst_379 = arith.constant 0xFF800000 : f32
    %331 = vector.broadcast %cst_379 : f32 to vector<8x4x1xf32>
    %c0_380 = arith.constant 0 : index
    %c1_381 = arith.constant 1 : index
    %c5_382 = arith.constant 5 : index
    %332 = vector.load %arg6[%c0_380, %c1_381, %c5_382] : memref<8x13x14xf32, #tpu.memory_space<vmem>>, vector<8x4x1xf32>
    tpu.vector_store %arg6[%c0_380, %c1_381, %c5_382], %331 {strides = array<i32>} : memref<8x13x14xf32, #tpu.memory_space<vmem>>, vector<8x4x1xf32>,
    %c0_383 = arith.constant 0 : index
    %c0_384 = arith.constant 0 : index
    %c0_385 = arith.constant 0 : index
    %333 = vector.load %arg6[%c0_383, %c0_384, %c0_385] : memref<8x13x14xf32, #tpu.memory_space<vmem>>, vector<8x5x6xf32>
    %c0_386 = arith.constant 0 : index
    %c1_387 = arith.constant 1 : index
    %c0_388 = arith.constant 0 : index
    %334 = vector.load %arg6[%c0_386, %c1_387, %c0_388] : memref<8x13x14xf32, #tpu.memory_space<vmem>>, vector<8x5x6xf32>
    %335 = arith.maximumf %333, %334 : vector<8x5x6xf32>
    %336 = vector.extract_strided_slice %335 {offsets = [0, 0, 0], sizes = [8, 5, 2], strides = [1, 1, 1]} : vector<8x5x6xf32> to vector<8x5x2xf32>
    %337 = vector.extract_strided_slice %335 {offsets = [0, 0, 2], sizes = [8, 5, 2], strides = [1, 1, 1]} : vector<8x5x6xf32> to vector<8x5x2xf32>
    %338 = arith.maximumf %336, %337 : vector<8x5x2xf32>
    %339 = vector.extract_strided_slice %335 {offsets = [0, 0, 4], sizes = [8, 5, 2], strides = [1, 1, 1]} : vector<8x5x6xf32> to vector<8x5x2xf32>
    %340 = arith.maximumf %338, %339 : vector<8x5x2xf32>
    %341 = vector.extract_strided_slice %340 {offsets = [0, 0, 0], sizes = [8, 4, 2], strides = [1, 1, 1]} : vector<8x5x2xf32> to vector<8x4x2xf32>
    %342 = vector.extract_strided_slice %340 {offsets = [0, 1, 0], sizes = [8, 4, 2], strides = [1, 1, 1]} : vector<8x5x2xf32> to vector<8x4x2xf32>
    %343 = arith.maximumf %341, %342 : vector<8x4x2xf32>
    %344 = vector.extract_strided_slice %343 {offsets = [0, 0, 0], sizes = [8, 4, 1], strides = [1, 1, 1]} : vector<8x4x2xf32> to vector<8x4x1xf32>
    %345 = vector.extract_strided_slice %343 {offsets = [0, 0, 1], sizes = [8, 4, 1], strides = [1, 1, 1]} : vector<8x4x2xf32> to vector<8x4x1xf32>
    %346 = arith.maximumf %344, %345 : vector<8x4x1xf32>
    %c0_389 = arith.constant 0 : index
    %c0_390 = arith.constant 0 : index
    %c0_391 = arith.constant 0 : index
    %347 = vector.load %arg4[%c0_389, %c0_390, %c0_391] : memref<8x4x1xf32, #tpu.memory_space<vmem>>, vector<8x4x1xf32>
    tpu.vector_store %arg4[%c0_389, %c0_390, %c0_391], %346 {strides = array<i32>} : memref<8x4x1xf32, #tpu.memory_space<vmem>>, vector<8x4x1xf32>,
    return
  }
}

</mosaic_0001>

<bundles_post_ra>
// kernel: tpu_custom_call.1
= control target key start
LH: loop header
LB: loop body
LE: loop exit
PB: predicated region body
PF: predicated region fallthrough
CT: control target
= control target key end

     0   :  { %s5679_s13 = smov 127   ;;  %s5680_s10 = smov 126   ;;  %vm287_vm0 = vcmask 1024   ;;  %vm285_vm1 = vcmask 7168   ;;  %vm369_vm2 = vcmask 9224   ;;  %vm367_vm3 = vcmask 15368   ;;  %s10794_s0 = inlined_call_operand.vmem [shape: f32[8,31,31], index: 0, kind: input, shape index: {}]   ;;  %s10795_s1 = inlined_call_operand.vmem [shape: f32[8,28,31], index: 1, kind: input, shape index: {}]   ;;  %s10796_s2 = inlined_call_operand.vmem [shape: f32[8,5,2], index: 2, kind: output, shape index: {0}]   ;;  %s10797_s4 = inlined_call_operand.vmem [shape: f32[8,4,1], index: 4, kind: output, shape index: {2}]   ;;  %s10798_s3 = inlined_call_operand.vmem [shape: s32[8,5,2], index: 3, kind: output, shape index: {1}]  }
   0x1   :  { %v5557_v0 = vld [vmem:[%s10794_s0 + $0x20] ss:$3 sm:$0xff]  ;;  %v5573_v1 = vld [vmem:[%s10794_s0 + $0x21] ss:$3 sm:$0xff]  ;;  %v5589_v2 = vld [vmem:[%s10794_s0 + $0x22] ss:$3 sm:$0xff] }
   0x2   :  { %v79_v3 = vmax.f32 %v5557_v0, %v5573_v1  ;;  %v14_v4 = vld [vmem:[%s10794_s0] ss:$3 sm:$0xff]  ;;  %v5571_v5 = vld [vmem:[%s10794_s0 + $0x1] ss:$3 sm:$0xff]  ;;  %v5587_v6 = vld [vmem:[%s10794_s0 + $0x2] ss:$3 sm:$0xff] }
   0x3   :  { %v77_v7 = vmax.f32 %v14_v4, %v5571_v5  ;;  %v5558_v8 = vld [vmem:[%s10794_s0 + $0x38] ss:$3 sm:$0x3]  ;;  %v5574_v9 = vld [vmem:[%s10794_s0 + $0x39] ss:$3 sm:$0x3] }
   0x4   :  { %v5744_v10 = vmax.f32 %v79_v3, %v5589_v2  ;;  %v80_v11 = vmax.f32 %v5558_v8, %v5574_v9  ;;  %v5590_v12 = vld [vmem:[%s10794_s0 + $0x3a] ss:$3 sm:$0x3]  ;;  %v5556_v13 = vld [vmem:[%s10794_s0 + $0x18] ss:$3 sm:$0x3] }
   0x5   :  { %v5752_v14 = vmax.f32 %v77_v7, %v5587_v6  ;;  %v5572_v15 = vld [vmem:[%s10794_s0 + $0x19] ss:$3 sm:$0x3]  ;;  %v5588_v16 = vld [vmem:[%s10794_s0 + $0x1a] ss:$3 sm:$0x3] }
   0x6   :  { %161 = vrot.lane.b32.xlu1 %v5744_v10, %s5679_s13  ;;  %v5762_v17 = vmax.f32 %v80_v11, %v5590_v12  ;;  %v78_v18 = vmax.f32 %v5556_v13, %v5572_v15  ;;  %v5560_v19 = vld [vmem:[%s10794_s0 + $0x58] ss:$3 sm:$0x3]  ;;  %v5576_v20 = vld [vmem:[%s10794_s0 + $0x59] ss:$3 sm:$0x3] }
   0x7   :  { %157 = vrot.lane.b32.xlu0 %v5752_v14, %s5679_s13  ;;  %v82_v21 = vmax.f32 %v5560_v19, %v5576_v20  ;;  %v5592_v22 = vld [vmem:[%s10794_s0 + $0x5a] ss:$3 sm:$0x3]  ;;  %v5559_v23 = vld [vmem:[%s10794_s0 + $0x40] ss:$3 sm:$0xff]  ;;  %s5682_s11 = smov 122  }
   0x8   :  { %v5778_v24 = vmax.f32 %v78_v18, %v5588_v16  ;;  %v5575_v25 = vld [vmem:[%s10794_s0 + $0x41] ss:$3 sm:$0xff]  ;;  %v5591_v26 = vld [vmem:[%s10794_s0 + $0x42] ss:$3 sm:$0xff]  ;;  %v5561_v27 = vld [vmem:[%s10794_s0 + $0x60] ss:$3 sm:$0xff] }
   0x9   :  { %v81_v28 = vmax.f32 %v5559_v23, %v5575_v25  ;;  %v5562_v29 = vld [vmem:[%s10794_s0 + $0x78] ss:$3 sm:$0x3]  ;;  %v5578_v30 = vld [vmem:[%s10794_s0 + $0x79] ss:$3 sm:$0x3]  ;;  %v5797_v31 = vmax.f32 %v82_v21, %v5592_v22 }
   0xa   :  { %163 = vrot.lane.b32.xlu1 %v5762_v17, %s5679_s13  ;;  %v84_v32 = vmax.f32 %v5562_v29, %v5578_v30  ;;  %v5577_v33 = vld [vmem:[%s10794_s0 + $0x61] ss:$3 sm:$0xff]  ;;  %v5594_v35 = vld [vmem:[%s10794_s0 + $0x7a] ss:$3 sm:$0x3]  ;;  %s5683_s12 = smov 120  }
   0xb   :  { %159 = vrot.lane.b32.xlu0 %v5778_v24, %s5679_s13  ;;  %v5804_v34 = vmax.f32 %v81_v28, %v5591_v26  ;;  %v83_v36 = vmax.f32 %v5561_v27, %v5577_v33  ;;  %v5564_v37 = vld [vmem:[%s10794_s0 + $0x98] ss:$3 sm:$0x3]  ;;  %v5593_v38 = vld [vmem:[%s10794_s0 + $0x62] ss:$3 sm:$0xff]  ;;  %s5684_s14 = smov 118  }
   0xc   :  { %v5580_v39 = vld [vmem:[%s10794_s0 + $0x99] ss:$3 sm:$0x3]  ;;  %v5563_v40 = vld [vmem:[%s10794_s0 + $0x80] ss:$3 sm:$0xff]  ;;  %v5826_v42 = vmax.f32 %v84_v32, %v5594_v35  ;;  %vm435_vm4 = vcmask 17424  }
   0xd   :  { %v5579_v41 = vld [vmem:[%s10794_s0 + $0x81] ss:$3 sm:$0xff]  ;;  %v86_v43 = vmax.f32 %v5564_v37, %v5580_v39  ;;  %v5596_v44 = vld [vmem:[%s10794_s0 + $0x9a] ss:$3 sm:$0x3]  ;;  %v5833_v45 = vmax.f32 %v83_v36, %v5593_v38  ;;  %vm433_vm5 = vcmask 23568  }
   0xe   :  { %167 = vrot.lane.b32.xlu1 %v5797_v31, %s5679_s13  ;;  %v85_v46 = vmax.f32 %v5563_v40, %v5579_v41  ;;  %v5566_v47 = vld [vmem:[%s10794_s0 + $0xb8] ss:$3 sm:$0x3]  ;;  %v5582_v48 = vld [vmem:[%s10794_s0 + $0xb9] ss:$3 sm:$0x3] }
   0xf   :  { %165 = vrot.lane.b32.xlu0 %v5804_v34, %s5679_s13  ;;  %v5595_v49 = vld [vmem:[%s10794_s0 + $0x82] ss:$3 sm:$0xff]  ;;  %v5565_v50 = vld [vmem:[%s10794_s0 + $0xa0] ss:$3 sm:$0xff]  ;;  %v5581_v51 = vld [vmem:[%s10794_s0 + $0xa1] ss:$3 sm:$0xff]  ;;  %v5852_v52 = vmax.f32 %v86_v43, %v5596_v44  ;;  %v88_v53 = vmax.f32 %v5566_v47, %v5582_v48 }
  0x10   :  { %v5598_v54 = vld [vmem:[%s10794_s0 + $0xba] ss:$3 sm:$0x3]  ;;  %v5859_v55 = vmax.f32 %v85_v46, %v5595_v49  ;;  %v87_v56 = vmax.f32 %v5565_v50, %v5581_v51  ;;  %v5568_v57 = vld [vmem:[%s10794_s0 + $0xd8] ss:$3 sm:$0x3] }
  0x11   :  { %v5584_v58 = vld [vmem:[%s10794_s0 + $0xd9] ss:$3 sm:$0x3]  ;;  %v5597_v59 = vld [vmem:[%s10794_s0 + $0xa2] ss:$3 sm:$0xff]  ;;  %v5878_v62 = vmax.f32 %v88_v53, %v5598_v54  ;;  %s5685_s15 = smov 116  }
  0x12   :  { %171 = vrot.lane.b32.xlu1 %v5826_v42, %s5679_s13  ;;  %v5567_v60 = vld [vmem:[%s10794_s0 + $0xc0] ss:$3 sm:$0xff]  ;;  %v5583_v61 = vld [vmem:[%s10794_s0 + $0xc1] ss:$3 sm:$0xff]  ;;  %v90_v63 = vmax.f32 %v5568_v57, %v5584_v58  ;;  %v5885_v1 = vmax.f32 %v87_v56, %v5597_v59  ;;  %v5599_v5 = vld [vmem:[%s10794_s0 + $0xc2] ss:$3 sm:$0xff] }
  0x13   :  { %169 = vrot.lane.b32.xlu0 %v5833_v45, %s5679_s13  ;;  %v5600_v0 = vld [vmem:[%s10794_s0 + $0xda] ss:$3 sm:$0x3]  ;;  %v89_v2 = vmax.f32 %v5567_v60, %v5583_v61  ;;  %v5570_v3 = vld [vmem:[%s10794_s0 + $0xf8] ss:$3 sm:$0x3] }
  0x14   :  { %v5586_v4 = vld [vmem:[%s10794_s0 + $0xf9] ss:$3 sm:$0x3]  ;;  %v5569_v6 = vld [vmem:[%s10794_s0 + $0xe0] ss:$3 sm:$0xff]  ;;  %v5904_v8 = vmax.f32 %v90_v63, %v5600_v0  ;;  %vm501_vm6 = vcmask 25624  }
  0x15   :  { %v5585_v7 = vld [vmem:[%s10794_s0 + $0xe1] ss:$3 sm:$0xff]  ;;  %v92_v9 = vmax.f32 %v5570_v3, %v5586_v4  ;;  %v5908_v11 = vmax.f32 %v89_v2, %v5599_v5  ;;  %v5602_v12 = vld [vmem:[%s10794_s0 + $0xfa] ss:$3 sm:$0x3]  ;;  %vm499_vm7 = vcmask 31768  }
  0x16   :  { %175 = vrot.lane.b32.xlu1 %v5852_v52, %s5679_s13  ;;  %v91_v13 = vmax.f32 %v5569_v6, %v5585_v7  ;;  %v5601_v15 = vld [vmem:[%s10794_s0 + $0xe2] ss:$3 sm:$0xff]  ;;  %s5681_s0 = smov 124   ;;  %s5686_s16 = smov 114   ;;  %vm567_vm8 = vcmask 33824   ;;  %vm565_vm9 = vcmask 39968  }
  0x17   :  { %173 = vrot.lane.b32.xlu0 %v5859_v55, %s5679_s13  ;;  %v5918_v16 = vmax.f32 %v92_v9, %v5602_v12  ;;  %s5687_s17 = smov 112   ;;  %vm633_vm10 = vcmask 42024   ;;  %vm631_vm11 = vcmask 48168   ;;  %vm10800_vm12 = vcmask 107520   ;;  %s5689_s18 = smov 110  }
  0x18   :  { %v5922_v18 = vmax.f32 %v91_v13, %v5601_v15  ;;  %vm699_vm13 = vcmask 50224   ;;  %vm697_vm14 = vcmask 56368   ;;  %vm765_vm15 = vcmask 58424   ;;  %s5690_s19 = smov 2   ;;  %s5691_s20 = smov 125  }
  0x19   :  { %s5692_s21 = smov 123   ;;  %s5693_s26 = smov 1  }
  0x1a   :  { %179 = vrot.lane.b32.xlu1 %v5878_v62, %s5679_s13  ;;  %s5694_s24 = smov 3  }
  0x1b   :  { %177 = vrot.lane.b32.xlu0 %v5885_v1, %s5679_s13 }
  0x1e   :  { %183 = vrot.lane.b32.xlu1 %v5904_v8, %s5679_s13 }
  0x1f   :  { %181 = vrot.lane.b32.xlu0 %v5908_v11, %s5679_s13 }
  0x22   :  { %187 = vrot.lane.b32.xlu1 %v5918_v16, %s5679_s13 }
  0x23   :  { %185 = vrot.lane.b32.xlu0 %v5922_v18, %s5679_s13 }
  0x26   :  { %223 = vrot.lane.b32.xlu1 %v5778_v24, %s5680_s10 }
  0x27   :  { %221 = vrot.lane.b32.xlu0 %v5752_v14, %s5680_s10 }
  0x2a   :  { %227 = vrot.lane.b32.xlu1 %v5762_v17, %s5680_s10 }
  0x2b   :  { %225 = vrot.lane.b32.xlu0 %v5744_v10, %s5680_s10 }
  0x2e   :  { %231 = vrot.lane.b32.xlu1 %v5797_v31, %s5680_s10 }
  0x2f   :  { %229 = vrot.lane.b32.xlu0 %v5804_v34, %s5680_s10 }
  0x32   :  { %235 = vrot.lane.b32.xlu1 %v5826_v42, %s5680_s10 }
  0x33   :  { %233 = vrot.lane.b32.xlu0 %v5833_v45, %s5680_s10 }
  0x36   :  { %239 = vrot.lane.b32.xlu1 %v5852_v52, %s5680_s10 }
  0x37   :  { %237 = vrot.lane.b32.xlu0 %v5859_v55, %s5680_s10 }
  0x3a   :  { %243 = vrot.lane.b32.xlu1 %v5878_v62, %s5680_s10 }
  0x3b   :  { %241 = vrot.lane.b32.xlu0 %v5885_v1, %s5680_s10 }
  0x3e   :  { %247 = vrot.lane.b32.xlu1 %v5904_v8, %s5680_s10 }
  0x3f   :  { %245 = vrot.lane.b32.xlu0 %v5908_v11, %s5680_s10 }
  0x42   :  { %251 = vrot.lane.b32.xlu1 %v5918_v16, %s5680_s10 }
  0x43   :  { %249 = vrot.lane.b32.xlu0 %v5922_v18, %s5680_s10 }
  0x78   :  { %v162_v19 = vpop.permute.xlu1 %161 }
  0x79   :  { %v158_v20 = vpop.permute.xlu0 %157 }
  0x7a   :  { %v205_v39 = vmax.f32 %v5752_v14, %v158_v20 }
  0x7c   :  { %v164_v21 = vpop.permute.xlu1 %163 }
  0x7d   :  { %v160_v22 = vpop.permute.xlu0 %159  ;;  %v208_v46 = vmax.f32 %v5762_v17, %v164_v21 }
  0x7e   :  { %v206_v38 = vmax.f32 %v5778_v24, %v160_v22  ;;  %v207_v24 = vmax.f32 %v5744_v10, %v162_v19 }
  0x80   :  { %v168_v23 = vpop.permute.xlu1 %167 }
  0x81   :  { %v166_v25 = vpop.permute.xlu0 %165  ;;  %v210_v17 = vmax.f32 %v5797_v31, %v168_v23 }
  0x82   :  { %v209_v10 = vmax.f32 %v5804_v34, %v166_v25 }
  0x84   :  { %v172_v26 = vpop.permute.xlu1 %171 }
  0x85   :  { %v170_v27 = vpop.permute.xlu0 %169  ;;  %v212_v31 = vmax.f32 %v5826_v42, %v172_v26 }
  0x86   :  { %v211_v34 = vmax.f32 %v5833_v45, %v170_v27 }
  0x88   :  { %v176_v28 = vpop.permute.xlu1 %175 }
  0x89   :  { %v174_v29 = vpop.permute.xlu0 %173  ;;  %v214_v42 = vmax.f32 %v5852_v52, %v176_v28 }
  0x8a   :  { %v213_v45 = vmax.f32 %v5859_v55, %v174_v29 }
  0x8c   :  { %v180_v30 = vpop.permute.xlu1 %179 }
  0x8d   :  { %v5960_v32 = vpop.permute.xlu0 %177  ;;  %v216_v52 = vmax.f32 %v5878_v62, %v180_v30 }
  0x8e   :  { %v215_v55 = vmax.f32 %v5885_v1, %v5960_v32 }
  0x90   :  { %v5962_v33 = vpop.permute.xlu1 %183 }
  0x91   :  { %v5964_v35 = vpop.permute.xlu0 %181  ;;  %v218_v5 = vmax.f32 %v5904_v8, %v5962_v33 }
  0x92   :  { %v217_v1 = vmax.f32 %v5908_v11, %v5964_v35 }
  0x94   :  { %v5966_v36 = vpop.permute.xlu1 %187 }
  0x95   :  { %v5968_v37 = vpop.permute.xlu0 %185  ;;  %v220_v12 = vmax.f32 %v5918_v16, %v5966_v36 }
  0x96   :  { %v219_v11 = vmax.f32 %v5922_v18, %v5968_v37 }
  0x98   :  { %v224_v40 = vpop.permute.xlu1 %223 }
  0x99   :  { %v5972_v41 = vmax.f32 %v206_v38, %v224_v40  ;;  %v222_v43 = vpop.permute.xlu0 %221 }
  0x9a   :  { %v5974_v44 = vmax.f32 %v205_v39, %v222_v43 }
  0x9b   :  { %321 = vrot.lane.b32.xlu1 %v5972_v41, %s5680_s10  ;;  %288 = vst.msk [vmem:[#allocation2 + $0x8] sm:$0x3] %vm287_vm0, %v5972_v41 }
  0x9c   :  { %319 = vrot.lane.b32.xlu0 %v5974_v44, %s5680_s10  ;;  %v228_v14 = vpop.permute.xlu1 %227  ;;  %286 = vst.msk [vmem:[#allocation2] sm:$0xff] %vm285_vm1, %v5974_v44 }
  0x9d   :  { %v5986_v47 = vmax.f32 %v208_v46, %v228_v14  ;;  %v226_v48 = vpop.permute.xlu0 %225 }
  0x9e   :  { %v5988_v49 = vmax.f32 %v207_v24, %v226_v48 }
  0x9f   :  { %325 = vrot.lane.b32.xlu1 %v5986_v47, %s5680_s10  ;;  %290 = vst.msk [vmem:[#allocation2 + $0x18] sm:$0x3] %vm287_vm0, %v5986_v47 }
  0xa0   :  { %323 = vrot.lane.b32.xlu0 %v5988_v49, %s5680_s10  ;;  %v232_v50 = vpop.permute.xlu1 %231  ;;  %289 = vst.msk [vmem:[#allocation2 + $0x10] sm:$0xff] %vm285_vm1, %v5988_v49 }
  0xa1   :  { %v6000_v51 = vmax.f32 %v210_v17, %v232_v50  ;;  %v230_v53 = vpop.permute.xlu0 %229 }
  0xa2   :  { %v6002_v54 = vmax.f32 %v209_v10, %v230_v53 }
  0xa3   :  { %329 = vrot.lane.b32.xlu1 %v6000_v51, %s5680_s10  ;;  %292 = vst.msk [vmem:[#allocation2 + $0x28] sm:$0x3] %vm287_vm0, %v6000_v51 }
  0xa4   :  { %327 = vrot.lane.b32.xlu0 %v6002_v54, %s5680_s10  ;;  %v236_v56 = vpop.permute.xlu1 %235  ;;  %291 = vst.msk [vmem:[#allocation2 + $0x20] sm:$0xff] %vm285_vm1, %v6002_v54 }
  0xa5   :  { %v6014_v57 = vmax.f32 %v212_v31, %v236_v56  ;;  %v234_v58 = vpop.permute.xlu0 %233 }
  0xa6   :  { %v6016_v59 = vmax.f32 %v211_v34, %v234_v58 }
  0xa7   :  { %333 = vrot.lane.b32.xlu1 %v6014_v57, %s5680_s10  ;;  %294 = vst.msk [vmem:[#allocation2 + $0x38] sm:$0x3] %vm287_vm0, %v6014_v57 }
  0xa8   :  { %331 = vrot.lane.b32.xlu0 %v6016_v59, %s5680_s10  ;;  %v240_v60 = vpop.permute.xlu1 %239  ;;  %293 = vst.msk [vmem:[#allocation2 + $0x30] sm:$0xff] %vm285_vm1, %v6016_v59 }
  0xa9   :  { %v6028_v61 = vmax.f32 %v214_v42, %v240_v60  ;;  %v238_v63 = vpop.permute.xlu0 %237 }
  0xaa   :  { %v6030_v0 = vmax.f32 %v213_v45, %v238_v63 }
  0xab   :  { %337 = vrot.lane.b32.xlu1 %v6028_v61, %s5680_s10  ;;  %296 = vst.msk [vmem:[#allocation2 + $0x48] sm:$0x3] %vm287_vm0, %v6028_v61 }
  0xac   :  { %335 = vrot.lane.b32.xlu0 %v6030_v0, %s5680_s10  ;;  %v244_v2 = vpop.permute.xlu1 %243  ;;  %295 = vst.msk [vmem:[#allocation2 + $0x40] sm:$0xff] %vm285_vm1, %v6030_v0 }
  0xad   :  { %v6043_v3 = vmax.f32 %v216_v52, %v244_v2  ;;  %v242_v4 = vpop.permute.xlu0 %241 }
  0xae   :  { %v6045_v62 = vmax.f32 %v215_v55, %v242_v4 }
  0xaf   :  { %341 = vrot.lane.b32.xlu1 %v6043_v3, %s5680_s10  ;;  %298 = vst.msk [vmem:[#allocation2 + $0x58] sm:$0x3] %vm287_vm0, %v6043_v3 }
  0xb0   :  { %339 = vrot.lane.b32.xlu0 %v6045_v62, %s5680_s10  ;;  %v248_v6 = vpop.permute.xlu1 %247  ;;  %297 = vst.msk [vmem:[#allocation2 + $0x50] sm:$0xff] %vm285_vm1, %v6045_v62 }
  0xb1   :  { %v6059_v7 = vmax.f32 %v218_v5, %v248_v6  ;;  %v246_v9 = vpop.permute.xlu0 %245 }
  0xb2   :  { %v6061_v8 = vmax.f32 %v217_v1, %v246_v9 }
  0xb3   :  { %345 = vrot.lane.b32.xlu1 %v6059_v7, %s5680_s10  ;;  %300 = vst.msk [vmem:[#allocation2 + $0x68] sm:$0x3] %vm287_vm0, %v6059_v7 }
  0xb4   :  { %343 = vrot.lane.b32.xlu0 %v6061_v8, %s5680_s10  ;;  %v252_v13 = vpop.permute.xlu1 %251  ;;  %299 = vst.msk [vmem:[#allocation2 + $0x60] sm:$0xff] %vm285_vm1, %v6061_v8 }
  0xb5   :  { %v6075_v15 = vmax.f32 %v220_v12, %v252_v13  ;;  %v250_v19 = vpop.permute.xlu0 %249 }
  0xb6   :  { %v6077_v16 = vmax.f32 %v219_v11, %v250_v19 }
  0xb7   :  { %349 = vrot.lane.b32.xlu1 %v6075_v15, %s5680_s10  ;;  %302 = vst.msk [vmem:[#allocation2 + $0x78] sm:$0x3] %vm287_vm0, %v6075_v15  ;;  %vm763_vm0 = vcmask 64568  }
  0xb8   :  { %347 = vrot.lane.b32.xlu0 %v6077_v16, %s5680_s10  ;;  %301 = vst.msk [vmem:[#allocation2 + $0x70] sm:$0xff] %vm285_vm1, %v6077_v16 }
  0xbb   :  { %387 = vrot.lane.b32.xlu1 %v5972_v41, %s5681_s0 }
  0xbc   :  { %385 = vrot.lane.b32.xlu0 %v5974_v44, %s5681_s0 }
  0xbf   :  { %391 = vrot.lane.b32.xlu1 %v5986_v47, %s5681_s0 }
  0xc0   :  { %389 = vrot.lane.b32.xlu0 %v5988_v49, %s5681_s0 }
  0xc3   :  { %395 = vrot.lane.b32.xlu1 %v6000_v51, %s5681_s0 }
  0xc4   :  { %393 = vrot.lane.b32.xlu0 %v6002_v54, %s5681_s0 }
  0xc7   :  { %399 = vrot.lane.b32.xlu1 %v6014_v57, %s5681_s0 }
  0xc8   :  { %397 = vrot.lane.b32.xlu0 %v6016_v59, %s5681_s0 }
  0xcb   :  { %403 = vrot.lane.b32.xlu1 %v6028_v61, %s5681_s0 }
  0xcc   :  { %401 = vrot.lane.b32.xlu0 %v6030_v0, %s5681_s0 }
  0xcf   :  { %407 = vrot.lane.b32.xlu1 %v6043_v3, %s5681_s0 }
  0xd0   :  { %405 = vrot.lane.b32.xlu0 %v6045_v62, %s5681_s0 }
  0xd3   :  { %411 = vrot.lane.b32.xlu1 %v6059_v7, %s5681_s0 }
  0xd4   :  { %409 = vrot.lane.b32.xlu0 %v6061_v8, %s5681_s0 }
  0xd7   :  { %415 = vrot.lane.b32.xlu1 %v6075_v15, %s5681_s0 }
  0xd8   :  { %413 = vrot.lane.b32.xlu0 %v6077_v16, %s5681_s0 }
  0xdb   :  { %453 = vrot.lane.b32.xlu1 %v5972_v41, %s5682_s11 }
  0xdc   :  { %451 = vrot.lane.b32.xlu0 %v5974_v44, %s5682_s11 }
  0xdf   :  { %457 = vrot.lane.b32.xlu1 %v5986_v47, %s5682_s11 }
  0xe0   :  { %455 = vrot.lane.b32.xlu0 %v5988_v49, %s5682_s11 }
  0xe3   :  { %461 = vrot.lane.b32.xlu1 %v6000_v51, %s5682_s11 }
  0xe4   :  { %459 = vrot.lane.b32.xlu0 %v6002_v54, %s5682_s11 }
  0xe7   :  { %465 = vrot.lane.b32.xlu1 %v6014_v57, %s5682_s11 }
  0xe8   :  { %463 = vrot.lane.b32.xlu0 %v6016_v59, %s5682_s11 }
  0xeb   :  { %469 = vrot.lane.b32.xlu1 %v6028_v61, %s5682_s11 }
  0xec   :  { %467 = vrot.lane.b32.xlu0 %v6030_v0, %s5682_s11 }
  0xef   :  { %473 = vrot.lane.b32.xlu1 %v6043_v3, %s5682_s11 }
  0xf0   :  { %471 = vrot.lane.b32.xlu0 %v6045_v62, %s5682_s11 }
  0xf3   :  { %477 = vrot.lane.b32.xlu1 %v6059_v7, %s5682_s11 }
  0xf4   :  { %475 = vrot.lane.b32.xlu0 %v6061_v8, %s5682_s11 }
  0xf7   :  { %481 = vrot.lane.b32.xlu1 %v6075_v15, %s5682_s11 }
  0xf8   :  { %479 = vrot.lane.b32.xlu0 %v6077_v16, %s5682_s11 }
  0xfb   :  { %519 = vrot.lane.b32.xlu1 %v5972_v41, %s5683_s12 }
  0xfc   :  { %517 = vrot.lane.b32.xlu0 %v5974_v44, %s5683_s12 }
  0xff   :  { %523 = vrot.lane.b32.xlu1 %v5986_v47, %s5683_s12 }
 0x100   :  { %521 = vrot.lane.b32.xlu0 %v5988_v49, %s5683_s12 }
 0x103   :  { %527 = vrot.lane.b32.xlu1 %v6000_v51, %s5683_s12 }
 0x104   :  { %525 = vrot.lane.b32.xlu0 %v6002_v54, %s5683_s12 }
 0x107   :  { %531 = vrot.lane.b32.xlu1 %v6014_v57, %s5683_s12 }
 0x108   :  { %529 = vrot.lane.b32.xlu0 %v6016_v59, %s5683_s12 }
 0x10b   :  { %535 = vrot.lane.b32.xlu1 %v6028_v61, %s5683_s12 }
 0x10c   :  { %533 = vrot.lane.b32.xlu0 %v6030_v0, %s5683_s12 }
 0x10d   :  { %v322_v18 = vpop.permute.xlu1 %321 }
 0x10e   :  { %370 = vst.msk [vmem:[#allocation2 + $0x8] sm:$0x3] %vm369_vm2, %v322_v18  ;;  %v320_v20 = vpop.permute.xlu0 %319 }
 0x10f   :  { %368 = vst.msk [vmem:[#allocation2] sm:$0xff] %vm367_vm3, %v320_v20  ;;  %539 = vrot.lane.b32.xlu1 %v6043_v3, %s5683_s12 }
 0x110   :  { %537 = vrot.lane.b32.xlu0 %v6045_v62, %s5683_s12 }
 0x111   :  { %v326_v21 = vpop.permute.xlu1 %325 }
 0x112   :  { %372 = vst.msk [vmem:[#allocation2 + $0x18] sm:$0x3] %vm369_vm2, %v326_v21  ;;  %v324_v22 = vpop.permute.xlu0 %323 }
 0x113   :  { %371 = vst.msk [vmem:[#allocation2 + $0x10] sm:$0xff] %vm367_vm3, %v324_v22  ;;  %543 = vrot.lane.b32.xlu1 %v6059_v7, %s5683_s12 }
 0x114   :  { %541 = vrot.lane.b32.xlu0 %v6061_v8, %s5683_s12 }
 0x115   :  { %v330_v23 = vpop.permute.xlu1 %329 }
 0x116   :  { %374 = vst.msk [vmem:[#allocation2 + $0x28] sm:$0x3] %vm369_vm2, %v330_v23  ;;  %v328_v25 = vpop.permute.xlu0 %327 }
 0x117   :  { %373 = vst.msk [vmem:[#allocation2 + $0x20] sm:$0xff] %vm367_vm3, %v328_v25  ;;  %547 = vrot.lane.b32.xlu1 %v6075_v15, %s5683_s12 }
 0x118   :  { %545 = vrot.lane.b32.xlu0 %v6077_v16, %s5683_s12 }
 0x119   :  { %v334_v26 = vpop.permute.xlu1 %333 }
 0x11a   :  { %376 = vst.msk [vmem:[#allocation2 + $0x38] sm:$0x3] %vm369_vm2, %v334_v26  ;;  %v332_v27 = vpop.permute.xlu0 %331 }
 0x11b   :  { %375 = vst.msk [vmem:[#allocation2 + $0x30] sm:$0xff] %vm367_vm3, %v332_v27  ;;  %585 = vrot.lane.b32.xlu1 %v5972_v41, %s5684_s14 }
 0x11c   :  { %583 = vrot.lane.b32.xlu0 %v5974_v44, %s5684_s14 }
 0x11d   :  { %v338_v28 = vpop.permute.xlu1 %337 }
 0x11e   :  { %378 = vst.msk [vmem:[#allocation2 + $0x48] sm:$0x3] %vm369_vm2, %v338_v28  ;;  %v336_v29 = vpop.permute.xlu0 %335 }
 0x11f   :  { %377 = vst.msk [vmem:[#allocation2 + $0x40] sm:$0xff] %vm367_vm3, %v336_v29  ;;  %589 = vrot.lane.b32.xlu1 %v5986_v47, %s5684_s14 }
 0x120   :  { %587 = vrot.lane.b32.xlu0 %v5988_v49, %s5684_s14 }
 0x121   :  { %v342_v30 = vpop.permute.xlu1 %341 }
 0x122   :  { %380 = vst.msk [vmem:[#allocation2 + $0x58] sm:$0x3] %vm369_vm2, %v342_v30  ;;  %v340_v32 = vpop.permute.xlu0 %339 }
 0x123   :  { %379 = vst.msk [vmem:[#allocation2 + $0x50] sm:$0xff] %vm367_vm3, %v340_v32  ;;  %593 = vrot.lane.b32.xlu1 %v6000_v51, %s5684_s14 }
 0x124   :  { %591 = vrot.lane.b32.xlu0 %v6002_v54, %s5684_s14 }
 0x125   :  { %v346_v33 = vpop.permute.xlu1 %345 }
 0x126   :  { %382 = vst.msk [vmem:[#allocation2 + $0x68] sm:$0x3] %vm369_vm2, %v346_v33  ;;  %v344_v35 = vpop.permute.xlu0 %343 }
 0x127   :  { %381 = vst.msk [vmem:[#allocation2 + $0x60] sm:$0xff] %vm367_vm3, %v344_v35  ;;  %597 = vrot.lane.b32.xlu1 %v6014_v57, %s5684_s14 }
 0x128   :  { %595 = vrot.lane.b32.xlu0 %v6016_v59, %s5684_s14 }
 0x129   :  { %v350_v36 = vpop.permute.xlu1 %349 }
 0x12a   :  { %384 = vst.msk [vmem:[#allocation2 + $0x78] sm:$0x3] %vm369_vm2, %v350_v36  ;;  %v348_v37 = vpop.permute.xlu0 %347  ;;  %vm831_vm2 = vcmask 66624  }
 0x12b   :  { %383 = vst.msk [vmem:[#allocation2 + $0x70] sm:$0xff] %vm367_vm3, %v348_v37  ;;  %601 = vrot.lane.b32.xlu1 %v6028_v61, %s5684_s14 }
 0x12c   :  { %599 = vrot.lane.b32.xlu0 %v6030_v0, %s5684_s14 }
 0x12d   :  { %v388_v38 = vpop.permute.xlu1 %387 }
 0x12e   :  { %436 = vst.msk [vmem:[#allocation2 + $0x8] sm:$0x3] %vm435_vm4, %v388_v38  ;;  %v386_v39 = vpop.permute.xlu0 %385 }
 0x12f   :  { %434 = vst.msk [vmem:[#allocation2] sm:$0xff] %vm433_vm5, %v386_v39  ;;  %605 = vrot.lane.b32.xlu1 %v6043_v3, %s5684_s14 }
 0x130   :  { %603 = vrot.lane.b32.xlu0 %v6045_v62, %s5684_s14 }
 0x131   :  { %v392_v40 = vpop.permute.xlu1 %391 }
 0x132   :  { %438 = vst.msk [vmem:[#allocation2 + $0x18] sm:$0x3] %vm435_vm4, %v392_v40  ;;  %v390_v43 = vpop.permute.xlu0 %389  ;;  %v5688_v40 = vmov -inf  }
 0x133   :  { %437 = vst.msk [vmem:[#allocation2 + $0x10] sm:$0xff] %vm433_vm5, %v390_v43  ;;  %609 = vrot.lane.b32.xlu1 %v6059_v7, %s5684_s14 }
 0x134   :  { %607 = vrot.lane.b32.xlu0 %v6061_v8, %s5684_s14  ;;  %1020 = vst.msk [vmem:[#allocation2 + $0xc] sm:$0x3] %vm10800_vm12, %v5688_v40  ;;  %1021 = vst.msk [vmem:[#allocation2 + $0x1c] sm:$0x3] %vm10800_vm12, %v5688_v40 }
 0x135   :  { %v396_v46 = vpop.permute.xlu1 %395  ;;  %1022 = vst.msk [vmem:[#allocation2 + $0x2c] sm:$0x3] %vm10800_vm12, %v5688_v40  ;;  %1023 = vst.msk [vmem:[#allocation2 + $0x3c] sm:$0x3] %vm10800_vm12, %v5688_v40 }
 0x136   :  { %440 = vst.msk [vmem:[#allocation2 + $0x28] sm:$0x3] %vm435_vm4, %v396_v46  ;;  %v394_v24 = vpop.permute.xlu0 %393 }
 0x137   :  { %439 = vst.msk [vmem:[#allocation2 + $0x20] sm:$0xff] %vm433_vm5, %v394_v24  ;;  %613 = vrot.lane.b32.xlu1 %v6075_v15, %s5684_s14 }
 0x138   :  { %611 = vrot.lane.b32.xlu0 %v6077_v16, %s5684_s14  ;;  %1024 = vst.msk [vmem:[#allocation2 + $0x4c] sm:$0x3] %vm10800_vm12, %v5688_v40  ;;  %1025 = vst.msk [vmem:[#allocation2 + $0x5c] sm:$0x3] %vm10800_vm12, %v5688_v40 }
 0x139   :  { %v400_v14 = vpop.permute.xlu1 %399  ;;  %1026 = vst.msk [vmem:[#allocation2 + $0x6c] sm:$0x3] %vm10800_vm12, %v5688_v40  ;;  %1027 = vst.msk [vmem:[#allocation2 + $0x7c] sm:$0x3] %vm10800_vm12, %v5688_v40 }
 0x13a   :  { %442 = vst.msk [vmem:[#allocation2 + $0x38] sm:$0x3] %vm435_vm4, %v400_v14  ;;  %v398_v48 = vpop.permute.xlu0 %397 }
 0x13b   :  { %441 = vst.msk [vmem:[#allocation2 + $0x30] sm:$0xff] %vm433_vm5, %v398_v48  ;;  %651 = vrot.lane.b32.xlu1 %v5972_v41, %s5685_s15 }
 0x13c   :  { %649 = vrot.lane.b32.xlu0 %v5974_v44, %s5685_s15  ;;  %4349 = vst.msk [vmem:[#allocation3 + $0xb] sm:$0x3] %vm10800_vm12, %v5688_v40  ;;  %4350 = vst.msk [vmem:[#allocation3 + $0x1b] sm:$0x3] %vm10800_vm12, %v5688_v40 }
 0x13d   :  { %v404_v17 = vpop.permute.xlu1 %403  ;;  %4351 = vst.msk [vmem:[#allocation3 + $0x2b] sm:$0x3] %vm10800_vm12, %v5688_v40  ;;  %4352 = vst.msk [vmem:[#allocation3 + $0x3b] sm:$0x3] %vm10800_vm12, %v5688_v40 }
 0x13e   :  { %444 = vst.msk [vmem:[#allocation2 + $0x48] sm:$0x3] %vm435_vm4, %v404_v17  ;;  %v402_v10 = vpop.permute.xlu0 %401 }
 0x13f   :  { %443 = vst.msk [vmem:[#allocation2 + $0x40] sm:$0xff] %vm433_vm5, %v402_v10  ;;  %655 = vrot.lane.b32.xlu1 %v5986_v47, %s5685_s15 }
 0x140   :  { %653 = vrot.lane.b32.xlu0 %v5988_v49, %s5685_s15  ;;  %4353 = vst.msk [vmem:[#allocation3 + $0x4b] sm:$0x3] %vm10800_vm12, %v5688_v40  ;;  %4354 = vst.msk [vmem:[#allocation3 + $0x5b] sm:$0x3] %vm10800_vm12, %v5688_v40 }
 0x141   :  { %v408_v50 = vpop.permute.xlu1 %407  ;;  %4355 = vst.msk [vmem:[#allocation3 + $0x6b] sm:$0x3] %vm10800_vm12, %v5688_v40  ;;  %4356 = vst.msk [vmem:[#allocation3 + $0x7b] sm:$0x3] %vm10800_vm12, %v5688_v40 }
 0x142   :  { %446 = vst.msk [vmem:[#allocation2 + $0x58] sm:$0x3] %vm435_vm4, %v408_v50  ;;  %v406_v53 = vpop.permute.xlu0 %405 }
 0x143   :  { %445 = vst.msk [vmem:[#allocation2 + $0x50] sm:$0xff] %vm433_vm5, %v406_v53  ;;  %659 = vrot.lane.b32.xlu1 %v6000_v51, %s5685_s15 }
 0x144   :  { %657 = vrot.lane.b32.xlu0 %v6002_v54, %s5685_s15 }
 0x145   :  { %v412_v31 = vpop.permute.xlu1 %411 }
 0x146   :  { %448 = vst.msk [vmem:[#allocation2 + $0x68] sm:$0x3] %vm435_vm4, %v412_v31  ;;  %v410_v34 = vpop.permute.xlu0 %409 }
 0x147   :  { %447 = vst.msk [vmem:[#allocation2 + $0x60] sm:$0xff] %vm433_vm5, %v410_v34  ;;  %663 = vrot.lane.b32.xlu1 %v6014_v57, %s5685_s15 }
 0x148   :  { %661 = vrot.lane.b32.xlu0 %v6016_v59, %s5685_s15 }
 0x149   :  { %v416_v56 = vpop.permute.xlu1 %415 }
 0x14a   :  { %450 = vst.msk [vmem:[#allocation2 + $0x78] sm:$0x3] %vm435_vm4, %v416_v56  ;;  %v414_v58 = vpop.permute.xlu0 %413  ;;  %vm829_vm4 = vcmask 72768  }
 0x14b   :  { %449 = vst.msk [vmem:[#allocation2 + $0x70] sm:$0xff] %vm433_vm5, %v414_v58  ;;  %667 = vrot.lane.b32.xlu1 %v6028_v61, %s5685_s15 }
 0x14c   :  { %665 = vrot.lane.b32.xlu0 %v6030_v0, %s5685_s15 }
 0x14d   :  { %v454_v42 = vpop.permute.xlu1 %453 }
 0x14e   :  { %502 = vst.msk [vmem:[#allocation2 + $0x8] sm:$0x3] %vm501_vm6, %v454_v42  ;;  %v452_v45 = vpop.permute.xlu0 %451 }
 0x14f   :  { %500 = vst.msk [vmem:[#allocation2] sm:$0xff] %vm499_vm7, %v452_v45  ;;  %671 = vrot.lane.b32.xlu1 %v6043_v3, %s5685_s15 }
 0x150   :  { %669 = vrot.lane.b32.xlu0 %v6045_v62, %s5685_s15 }
 0x151   :  { %v458_v60 = vpop.permute.xlu1 %457 }
 0x152   :  { %504 = vst.msk [vmem:[#allocation2 + $0x18] sm:$0x3] %vm501_vm6, %v458_v60  ;;  %v456_v63 = vpop.permute.xlu0 %455 }
 0x153   :  { %503 = vst.msk [vmem:[#allocation2 + $0x10] sm:$0xff] %vm499_vm7, %v456_v63  ;;  %675 = vrot.lane.b32.xlu1 %v6059_v7, %s5685_s15 }
 0x154   :  { %673 = vrot.lane.b32.xlu0 %v6061_v8, %s5685_s15 }
 0x155   :  { %v462_v52 = vpop.permute.xlu1 %461 }
 0x156   :  { %506 = vst.msk [vmem:[#allocation2 + $0x28] sm:$0x3] %vm501_vm6, %v462_v52  ;;  %v460_v55 = vpop.permute.xlu0 %459 }
 0x157   :  { %505 = vst.msk [vmem:[#allocation2 + $0x20] sm:$0xff] %vm499_vm7, %v460_v55  ;;  %679 = vrot.lane.b32.xlu1 %v6075_v15, %s5685_s15 }
 0x158   :  { %677 = vrot.lane.b32.xlu0 %v6077_v16, %s5685_s15 }
 0x159   :  { %v466_v2 = vpop.permute.xlu1 %465 }
 0x15a   :  { %508 = vst.msk [vmem:[#allocation2 + $0x38] sm:$0x3] %vm501_vm6, %v466_v2  ;;  %v464_v4 = vpop.permute.xlu0 %463 }
 0x15b   :  { %507 = vst.msk [vmem:[#allocation2 + $0x30] sm:$0xff] %vm499_vm7, %v464_v4  ;;  %717 = vrot.lane.b32.xlu1 %v5972_v41, %s5686_s16 }
 0x15c   :  { %715 = vrot.lane.b32.xlu0 %v5974_v44, %s5686_s16 }
 0x15d   :  { %v470_v5 = vpop.permute.xlu1 %469 }
 0x15e   :  { %510 = vst.msk [vmem:[#allocation2 + $0x48] sm:$0x3] %vm501_vm6, %v470_v5  ;;  %v468_v1 = vpop.permute.xlu0 %467 }
 0x15f   :  { %509 = vst.msk [vmem:[#allocation2 + $0x40] sm:$0xff] %vm499_vm7, %v468_v1  ;;  %721 = vrot.lane.b32.xlu1 %v5986_v47, %s5686_s16 }
 0x160   :  { %719 = vrot.lane.b32.xlu0 %v5988_v49, %s5686_s16 }
 0x161   :  { %v474_v6 = vpop.permute.xlu1 %473 }
 0x162   :  { %512 = vst.msk [vmem:[#allocation2 + $0x58] sm:$0x3] %vm501_vm6, %v474_v6  ;;  %v472_v9 = vpop.permute.xlu0 %471 }
 0x163   :  { %511 = vst.msk [vmem:[#allocation2 + $0x50] sm:$0xff] %vm499_vm7, %v472_v9  ;;  %725 = vrot.lane.b32.xlu1 %v6000_v51, %s5686_s16 }
 0x164   :  { %723 = vrot.lane.b32.xlu0 %v6002_v54, %s5686_s16 }
 0x165   :  { %v478_v12 = vpop.permute.xlu1 %477 }
 0x166   :  { %514 = vst.msk [vmem:[#allocation2 + $0x68] sm:$0x3] %vm501_vm6, %v478_v12  ;;  %v476_v11 = vpop.permute.xlu0 %475 }
 0x167   :  { %513 = vst.msk [vmem:[#allocation2 + $0x60] sm:$0xff] %vm499_vm7, %v476_v11  ;;  %729 = vrot.lane.b32.xlu1 %v6014_v57, %s5686_s16 }
 0x168   :  { %727 = vrot.lane.b32.xlu0 %v6016_v59, %s5686_s16 }
 0x169   :  { %v482_v13 = vpop.permute.xlu1 %481 }
 0x16a   :  { %516 = vst.msk [vmem:[#allocation2 + $0x78] sm:$0x3] %vm501_vm6, %v482_v13  ;;  %v480_v19 = vpop.permute.xlu0 %479  ;;  %vm897_vm6 = vcmask 74824  }
 0x16b   :  { %515 = vst.msk [vmem:[#allocation2 + $0x70] sm:$0xff] %vm499_vm7, %v480_v19  ;;  %733 = vrot.lane.b32.xlu1 %v6028_v61, %s5686_s16 }
 0x16c   :  { %731 = vrot.lane.b32.xlu0 %v6030_v0, %s5686_s16 }
 0x16d   :  { %v520_v18 = vpop.permute.xlu1 %519 }
 0x16e   :  { %568 = vst.msk [vmem:[#allocation2 + $0x8] sm:$0x3] %vm567_vm8, %v520_v18  ;;  %v518_v20 = vpop.permute.xlu0 %517 }
 0x16f   :  { %566 = vst.msk [vmem:[#allocation2] sm:$0xff] %vm565_vm9, %v518_v20  ;;  %737 = vrot.lane.b32.xlu1 %v6043_v3, %s5686_s16 }
 0x170   :  { %735 = vrot.lane.b32.xlu0 %v6045_v62, %s5686_s16 }
 0x171   :  { %v524_v21 = vpop.permute.xlu1 %523 }
 0x172   :  { %570 = vst.msk [vmem:[#allocation2 + $0x18] sm:$0x3] %vm567_vm8, %v524_v21  ;;  %v522_v22 = vpop.permute.xlu0 %521 }
 0x173   :  { %569 = vst.msk [vmem:[#allocation2 + $0x10] sm:$0xff] %vm565_vm9, %v522_v22  ;;  %741 = vrot.lane.b32.xlu1 %v6059_v7, %s5686_s16 }
 0x174   :  { %739 = vrot.lane.b32.xlu0 %v6061_v8, %s5686_s16 }
 0x175   :  { %v528_v23 = vpop.permute.xlu1 %527 }
 0x176   :  { %572 = vst.msk [vmem:[#allocation2 + $0x28] sm:$0x3] %vm567_vm8, %v528_v23  ;;  %v526_v25 = vpop.permute.xlu0 %525 }
 0x177   :  { %571 = vst.msk [vmem:[#allocation2 + $0x20] sm:$0xff] %vm565_vm9, %v526_v25  ;;  %745 = vrot.lane.b32.xlu1 %v6075_v15, %s5686_s16 }
 0x178   :  { %743 = vrot.lane.b32.xlu0 %v6077_v16, %s5686_s16 }
 0x179   :  { %v532_v26 = vpop.permute.xlu1 %531 }
 0x17a   :  { %574 = vst.msk [vmem:[#allocation2 + $0x38] sm:$0x3] %vm567_vm8, %v532_v26  ;;  %v530_v27 = vpop.permute.xlu0 %529 }
 0x17b   :  { %573 = vst.msk [vmem:[#allocation2 + $0x30] sm:$0xff] %vm565_vm9, %v530_v27  ;;  %783 = vrot.lane.b32.xlu1 %v5972_v41, %s5687_s17 }
 0x17c   :  { %781 = vrot.lane.b32.xlu0 %v5974_v44, %s5687_s17 }
 0x17d   :  { %v536_v28 = vpop.permute.xlu1 %535 }
 0x17e   :  { %576 = vst.msk [vmem:[#allocation2 + $0x48] sm:$0x3] %vm567_vm8, %v536_v28  ;;  %v534_v29 = vpop.permute.xlu0 %533 }
 0x17f   :  { %575 = vst.msk [vmem:[#allocation2 + $0x40] sm:$0xff] %vm565_vm9, %v534_v29  ;;  %787 = vrot.lane.b32.xlu1 %v5986_v47, %s5687_s17 }
 0x180   :  { %785 = vrot.lane.b32.xlu0 %v5988_v49, %s5687_s17 }
 0x181   :  { %v540_v30 = vpop.permute.xlu1 %539 }
 0x182   :  { %578 = vst.msk [vmem:[#allocation2 + $0x58] sm:$0x3] %vm567_vm8, %v540_v30  ;;  %v538_v32 = vpop.permute.xlu0 %537 }
 0x183   :  { %577 = vst.msk [vmem:[#allocation2 + $0x50] sm:$0xff] %vm565_vm9, %v538_v32  ;;  %791 = vrot.lane.b32.xlu1 %v6000_v51, %s5687_s17 }
 0x184   :  { %789 = vrot.lane.b32.xlu0 %v6002_v54, %s5687_s17 }
 0x185   :  { %v544_v33 = vpop.permute.xlu1 %543 }
 0x186   :  { %580 = vst.msk [vmem:[#allocation2 + $0x68] sm:$0x3] %vm567_vm8, %v544_v33  ;;  %v542_v35 = vpop.permute.xlu0 %541 }
 0x187   :  { %579 = vst.msk [vmem:[#allocation2 + $0x60] sm:$0xff] %vm565_vm9, %v542_v35  ;;  %795 = vrot.lane.b32.xlu1 %v6014_v57, %s5687_s17 }
 0x188   :  { %793 = vrot.lane.b32.xlu0 %v6016_v59, %s5687_s17 }
 0x189   :  { %v548_v36 = vpop.permute.xlu1 %547 }
 0x18a   :  { %582 = vst.msk [vmem:[#allocation2 + $0x78] sm:$0x3] %vm567_vm8, %v548_v36  ;;  %v546_v37 = vpop.permute.xlu0 %545  ;;  %vm10799_vm8 = vcmask 80968  }
 0x18b   :  { %581 = vst.msk [vmem:[#allocation2 + $0x70] sm:$0xff] %vm565_vm9, %v546_v37  ;;  %799 = vrot.lane.b32.xlu1 %v6028_v61, %s5687_s17 }
 0x18c   :  { %797 = vrot.lane.b32.xlu0 %v6030_v0, %s5687_s17 }
 0x18d   :  { %v586_v38 = vpop.permute.xlu1 %585 }
 0x18e   :  { %634 = vst.msk [vmem:[#allocation2 + $0x8] sm:$0x3] %vm633_vm10, %v586_v38  ;;  %v584_v39 = vpop.permute.xlu0 %583 }
 0x18f   :  { %632 = vst.msk [vmem:[#allocation2] sm:$0xff] %vm631_vm11, %v584_v39  ;;  %803 = vrot.lane.b32.xlu1 %v6043_v3, %s5687_s17 }
 0x190   :  { %801 = vrot.lane.b32.xlu0 %v6045_v62, %s5687_s17 }
 0x191   :  { %v590_v43 = vpop.permute.xlu1 %589 }
 0x192   :  { %636 = vst.msk [vmem:[#allocation2 + $0x18] sm:$0x3] %vm633_vm10, %v590_v43  ;;  %v588_v46 = vpop.permute.xlu0 %587 }
 0x193   :  { %635 = vst.msk [vmem:[#allocation2 + $0x10] sm:$0xff] %vm631_vm11, %v588_v46  ;;  %807 = vrot.lane.b32.xlu1 %v6059_v7, %s5687_s17 }
 0x194   :  { %805 = vrot.lane.b32.xlu0 %v6061_v8, %s5687_s17 }
 0x195   :  { %v594_v24 = vpop.permute.xlu1 %593 }
 0x196   :  { %638 = vst.msk [vmem:[#allocation2 + $0x28] sm:$0x3] %vm633_vm10, %v594_v24  ;;  %v592_v14 = vpop.permute.xlu0 %591 }
 0x197   :  { %637 = vst.msk [vmem:[#allocation2 + $0x20] sm:$0xff] %vm631_vm11, %v592_v14  ;;  %811 = vrot.lane.b32.xlu1 %v6075_v15, %s5687_s17 }
 0x198   :  { %809 = vrot.lane.b32.xlu0 %v6077_v16, %s5687_s17 }
 0x199   :  { %v598_v48 = vpop.permute.xlu1 %597 }
 0x19a   :  { %640 = vst.msk [vmem:[#allocation2 + $0x38] sm:$0x3] %vm633_vm10, %v598_v48  ;;  %v596_v17 = vpop.permute.xlu0 %595 }
 0x19b   :  { %639 = vst.msk [vmem:[#allocation2 + $0x30] sm:$0xff] %vm631_vm11, %v596_v17  ;;  %849 = vrot.lane.b32.xlu1 %v5972_v41, %s5689_s18 }
 0x19c   :  { %847 = vrot.lane.b32.xlu0 %v5974_v44, %s5689_s18 }
 0x19d   :  { %v602_v10 = vpop.permute.xlu1 %601 }
 0x19e   :  { %642 = vst.msk [vmem:[#allocation2 + $0x48] sm:$0x3] %vm633_vm10, %v602_v10  ;;  %v600_v50 = vpop.permute.xlu0 %599 }
 0x19f   :  { %641 = vst.msk [vmem:[#allocation2 + $0x40] sm:$0xff] %vm631_vm11, %v600_v50  ;;  %853 = vrot.lane.b32.xlu1 %v5986_v47, %s5689_s18 }
 0x1a0   :  { %851 = vrot.lane.b32.xlu0 %v5988_v49, %s5689_s18 }
 0x1a1   :  { %v606_v53 = vpop.permute.xlu1 %605 }
 0x1a2   :  { %644 = vst.msk [vmem:[#allocation2 + $0x58] sm:$0x3] %vm633_vm10, %v606_v53  ;;  %v604_v31 = vpop.permute.xlu0 %603 }
 0x1a3   :  { %643 = vst.msk [vmem:[#allocation2 + $0x50] sm:$0xff] %vm631_vm11, %v604_v31  ;;  %857 = vrot.lane.b32.xlu1 %v6000_v51, %s5689_s18 }
 0x1a4   :  { %855 = vrot.lane.b32.xlu0 %v6002_v54, %s5689_s18 }
 0x1a5   :  { %v610_v41 = vpop.permute.xlu1 %609 }
 0x1a6   :  { %646 = vst.msk [vmem:[#allocation2 + $0x68] sm:$0x3] %vm633_vm10, %v610_v41  ;;  %v608_v44 = vpop.permute.xlu0 %607 }
 0x1a7   :  { %645 = vst.msk [vmem:[#allocation2 + $0x60] sm:$0xff] %vm631_vm11, %v608_v44  ;;  %861 = vrot.lane.b32.xlu1 %v6014_v57, %s5689_s18 }
 0x1a8   :  { %859 = vrot.lane.b32.xlu0 %v6016_v59, %s5689_s18 }
 0x1a9   :  { %v614_v47 = vpop.permute.xlu1 %613 }
 0x1aa   :  { %648 = vst.msk [vmem:[#allocation2 + $0x78] sm:$0x3] %vm633_vm10, %v614_v47  ;;  %v612_v49 = vpop.permute.xlu0 %611  ;;  %vm995_vm10 = vcmask 91152  }
 0x1ab   :  { %647 = vst.msk [vmem:[#allocation2 + $0x70] sm:$0xff] %vm631_vm11, %v612_v49  ;;  %865 = vrot.lane.b32.xlu1 %v6028_v61, %s5689_s18 }
 0x1ac   :  { %863 = vrot.lane.b32.xlu0 %v6030_v0, %s5689_s18 }
 0x1ad   :  { %v652_v51 = vpop.permute.xlu1 %651 }
 0x1ae   :  { %700 = vst.msk [vmem:[#allocation2 + $0x8] sm:$0x3] %vm699_vm13, %v652_v51  ;;  %v650_v54 = vpop.permute.xlu0 %649 }
 0x1af   :  { %698 = vst.msk [vmem:[#allocation2] sm:$0xff] %vm697_vm14, %v650_v54  ;;  %869 = vrot.lane.b32.xlu1 %v6043_v3, %s5689_s18 }
 0x1b0   :  { %867 = vrot.lane.b32.xlu0 %v6045_v62, %s5689_s18 }
 0x1b1   :  { %v656_v57 = vpop.permute.xlu1 %655 }
 0x1b2   :  { %702 = vst.msk [vmem:[#allocation2 + $0x18] sm:$0x3] %vm699_vm13, %v656_v57  ;;  %v654_v59 = vpop.permute.xlu0 %653 }
 0x1b3   :  { %701 = vst.msk [vmem:[#allocation2 + $0x10] sm:$0xff] %vm697_vm14, %v654_v59  ;;  %873 = vrot.lane.b32.xlu1 %v6059_v7, %s5689_s18 }
 0x1b4   :  { %871 = vrot.lane.b32.xlu0 %v6061_v8, %s5689_s18 }
 0x1b5   :  { %v660_v61 = vpop.permute.xlu1 %659 }
 0x1b6   :  { %704 = vst.msk [vmem:[#allocation2 + $0x28] sm:$0x3] %vm699_vm13, %v660_v61  ;;  %v658_v0 = vpop.permute.xlu0 %657 }
 0x1b7   :  { %703 = vst.msk [vmem:[#allocation2 + $0x20] sm:$0xff] %vm697_vm14, %v658_v0  ;;  %877 = vrot.lane.b32.xlu1 %v6075_v15, %s5689_s18 }
 0x1b8   :  { %875 = vrot.lane.b32.xlu0 %v6077_v16, %s5689_s18 }
 0x1b9   :  { %v664_v3 = vpop.permute.xlu1 %663 }
 0x1ba   :  { %706 = vst.msk [vmem:[#allocation2 + $0x38] sm:$0x3] %vm699_vm13, %v664_v3  ;;  %v662_v62 = vpop.permute.xlu0 %661 }
 0x1bb   :  { %705 = vst.msk [vmem:[#allocation2 + $0x30] sm:$0xff] %vm697_vm14, %v662_v62 }
 0x1bd   :  { %v668_v7 = vpop.permute.xlu1 %667 }
 0x1be   :  { %708 = vst.msk [vmem:[#allocation2 + $0x48] sm:$0x3] %vm699_vm13, %v668_v7  ;;  %v666_v8 = vpop.permute.xlu0 %665 }
 0x1bf   :  { %707 = vst.msk [vmem:[#allocation2 + $0x40] sm:$0xff] %vm697_vm14, %v666_v8 }
 0x1c1   :  { %v672_v34 = vpop.permute.xlu1 %671 }
 0x1c2   :  { %710 = vst.msk [vmem:[#allocation2 + $0x58] sm:$0x3] %vm699_vm13, %v672_v34  ;;  %v670_v56 = vpop.permute.xlu0 %669 }
 0x1c3   :  { %709 = vst.msk [vmem:[#allocation2 + $0x50] sm:$0xff] %vm697_vm14, %v670_v56 }
 0x1c5   :  { %v676_v15 = vpop.permute.xlu1 %675 }
 0x1c6   :  { %712 = vst.msk [vmem:[#allocation2 + $0x68] sm:$0x3] %vm699_vm13, %v676_v15  ;;  %v674_v16 = vpop.permute.xlu0 %673 }
 0x1c7   :  { %711 = vst.msk [vmem:[#allocation2 + $0x60] sm:$0xff] %vm697_vm14, %v674_v16 }
 0x1c9   :  { %v680_v58 = vpop.permute.xlu1 %679 }
 0x1ca   :  { %714 = vst.msk [vmem:[#allocation2 + $0x78] sm:$0x3] %vm699_vm13, %v680_v58  ;;  %v678_v42 = vpop.permute.xlu0 %677  ;;  %vm1030_vm13 = vcmask 9216  }
 0x1cb   :  { %713 = vst.msk [vmem:[#allocation2 + $0x70] sm:$0xff] %vm697_vm14, %v678_v42 }
 0x1cd   :  { %v718_v45 = vpop.permute.xlu1 %717 }
 0x1ce   :  { %766 = vst.msk [vmem:[#allocation2 + $0x8] sm:$0x3] %vm765_vm15, %v718_v45  ;;  %v716_v60 = vpop.permute.xlu0 %715 }
 0x1cf   :  { %764 = vst.msk [vmem:[#allocation2] sm:$0xff] %vm763_vm0, %v716_v60 }
 0x1d1   :  { %v722_v63 = vpop.permute.xlu1 %721 }
 0x1d2   :  { %768 = vst.msk [vmem:[#allocation2 + $0x18] sm:$0x3] %vm765_vm15, %v722_v63  ;;  %v720_v52 = vpop.permute.xlu0 %719 }
 0x1d3   :  { %767 = vst.msk [vmem:[#allocation2 + $0x10] sm:$0xff] %vm763_vm0, %v720_v52 }
 0x1d5   :  { %v726_v55 = vpop.permute.xlu1 %725 }
 0x1d6   :  { %770 = vst.msk [vmem:[#allocation2 + $0x28] sm:$0x3] %vm765_vm15, %v726_v55  ;;  %v724_v2 = vpop.permute.xlu0 %723 }
 0x1d7   :  { %769 = vst.msk [vmem:[#allocation2 + $0x20] sm:$0xff] %vm763_vm0, %v724_v2 }
 0x1d9   :  { %v730_v4 = vpop.permute.xlu1 %729 }
 0x1da   :  { %772 = vst.msk [vmem:[#allocation2 + $0x38] sm:$0x3] %vm765_vm15, %v730_v4  ;;  %v728_v5 = vpop.permute.xlu0 %727 }
 0x1db   :  { %771 = vst.msk [vmem:[#allocation2 + $0x30] sm:$0xff] %vm763_vm0, %v728_v5 }
 0x1dd   :  { %v734_v1 = vpop.permute.xlu1 %733 }
 0x1de   :  { %774 = vst.msk [vmem:[#allocation2 + $0x48] sm:$0x3] %vm765_vm15, %v734_v1  ;;  %v732_v6 = vpop.permute.xlu0 %731 }
 0x1df   :  { %773 = vst.msk [vmem:[#allocation2 + $0x40] sm:$0xff] %vm763_vm0, %v732_v6 }
 0x1e1   :  { %v738_v9 = vpop.permute.xlu1 %737 }
 0x1e2   :  { %776 = vst.msk [vmem:[#allocation2 + $0x58] sm:$0x3] %vm765_vm15, %v738_v9  ;;  %v736_v12 = vpop.permute.xlu0 %735 }
 0x1e3   :  { %775 = vst.msk [vmem:[#allocation2 + $0x50] sm:$0xff] %vm763_vm0, %v736_v12 }
 0x1e5   :  { %v742_v11 = vpop.permute.xlu1 %741 }
 0x1e6   :  { %778 = vst.msk [vmem:[#allocation2 + $0x68] sm:$0x3] %vm765_vm15, %v742_v11  ;;  %v740_v13 = vpop.permute.xlu0 %739 }
 0x1e7   :  { %777 = vst.msk [vmem:[#allocation2 + $0x60] sm:$0xff] %vm763_vm0, %v740_v13 }
 0x1e9   :  { %v746_v19 = vpop.permute.xlu1 %745 }
 0x1ea   :  { %780 = vst.msk [vmem:[#allocation2 + $0x78] sm:$0x3] %vm765_vm15, %v746_v19  ;;  %v744_v18 = vpop.permute.xlu0 %743  ;;  %vm993_vm15 = vcmask 97296  }
 0x1eb   :  { %779 = vst.msk [vmem:[#allocation2 + $0x70] sm:$0xff] %vm763_vm0, %v744_v18 }
 0x1ed   :  { %v784_v20 = vpop.permute.xlu1 %783 }
 0x1ee   :  { %832 = vst.msk [vmem:[#allocation2 + $0x8] sm:$0x3] %vm831_vm2, %v784_v20  ;;  %v782_v21 = vpop.permute.xlu0 %781 }
 0x1ef   :  { %830 = vst.msk [vmem:[#allocation2] sm:$0xff] %vm829_vm4, %v782_v21 }
 0x1f1   :  { %v788_v22 = vpop.permute.xlu1 %787 }
 0x1f2   :  { %834 = vst.msk [vmem:[#allocation2 + $0x18] sm:$0x3] %vm831_vm2, %v788_v22  ;;  %v786_v23 = vpop.permute.xlu0 %785 }
 0x1f3   :  { %833 = vst.msk [vmem:[#allocation2 + $0x10] sm:$0xff] %vm829_vm4, %v786_v23 }
 0x1f5   :  { %v792_v25 = vpop.permute.xlu1 %791 }
 0x1f6   :  { %836 = vst.msk [vmem:[#allocation2 + $0x28] sm:$0x3] %vm831_vm2, %v792_v25  ;;  %v790_v26 = vpop.permute.xlu0 %789 }
 0x1f7   :  { %835 = vst.msk [vmem:[#allocation2 + $0x20] sm:$0xff] %vm829_vm4, %v790_v26 }
 0x1f9   :  { %v796_v27 = vpop.permute.xlu1 %795 }
 0x1fa   :  { %838 = vst.msk [vmem:[#allocation2 + $0x38] sm:$0x3] %vm831_vm2, %v796_v27  ;;  %v794_v28 = vpop.permute.xlu0 %793 }
 0x1fb   :  { %837 = vst.msk [vmem:[#allocation2 + $0x30] sm:$0xff] %vm829_vm4, %v794_v28 }
 0x1fd   :  { %v800_v29 = vpop.permute.xlu1 %799 }
 0x1fe   :  { %840 = vst.msk [vmem:[#allocation2 + $0x48] sm:$0x3] %vm831_vm2, %v800_v29  ;;  %v798_v30 = vpop.permute.xlu0 %797 }
 0x1ff   :  { %839 = vst.msk [vmem:[#allocation2 + $0x40] sm:$0xff] %vm829_vm4, %v798_v30 }
 0x201   :  { %v804_v32 = vpop.permute.xlu1 %803 }
 0x202   :  { %842 = vst.msk [vmem:[#allocation2 + $0x58] sm:$0x3] %vm831_vm2, %v804_v32  ;;  %v802_v33 = vpop.permute.xlu0 %801 }
 0x203   :  { %841 = vst.msk [vmem:[#allocation2 + $0x50] sm:$0xff] %vm829_vm4, %v802_v33 }
 0x205   :  { %v808_v35 = vpop.permute.xlu1 %807 }
 0x206   :  { %844 = vst.msk [vmem:[#allocation2 + $0x68] sm:$0x3] %vm831_vm2, %v808_v35  ;;  %v806_v36 = vpop.permute.xlu0 %805 }
 0x207   :  { %843 = vst.msk [vmem:[#allocation2 + $0x60] sm:$0xff] %vm829_vm4, %v806_v36 }
 0x209   :  { %v812_v37 = vpop.permute.xlu1 %811 }
 0x20a   :  { %846 = vst.msk [vmem:[#allocation2 + $0x78] sm:$0x3] %vm831_vm2, %v812_v37  ;;  %v810_v38 = vpop.permute.xlu0 %809  ;;  %vm1048_vm2 = vcmask 107616  }
 0x20b   :  { %845 = vst.msk [vmem:[#allocation2 + $0x70] sm:$0xff] %vm829_vm4, %v810_v38 }
 0x20d   :  { %v850_v39 = vpop.permute.xlu1 %849 }
 0x20e   :  { %898 = vst.msk [vmem:[#allocation2 + $0x8] sm:$0x3] %vm897_vm6, %v850_v39  ;;  %v848_v43 = vpop.permute.xlu0 %847 }
 0x20f   :  { %896 = vst.msk [vmem:[#allocation2] sm:$0xff] %vm10799_vm8, %v848_v43 }
 0x211   :  { %v854_v46 = vpop.permute.xlu1 %853 }
 0x212   :  { %900 = vst.msk [vmem:[#allocation2 + $0x18] sm:$0x3] %vm897_vm6, %v854_v46  ;;  %v852_v24 = vpop.permute.xlu0 %851 }
 0x213   :  { %899 = vst.msk [vmem:[#allocation2 + $0x10] sm:$0xff] %vm10799_vm8, %v852_v24 }
 0x215   :  { %v858_v14 = vpop.permute.xlu1 %857  ;;  %v914_v48 = vld [vmem:[#allocation2 + $0x8] sm:$0x3] }
 0x216   :  { %v913_v17 = vld [vmem:[#allocation2] sm:$0xff]  ;;  %902 = vst.msk [vmem:[#allocation2 + $0x28] sm:$0x3] %vm897_vm6, %v858_v14  ;;  %v856_v10 = vpop.permute.xlu0 %855  ;;  %947 = vrot.lane.b32.xlu1 %v914_v48, %s5690_s19 }
 0x217   :  { %1012 = vst.msk [vmem:[#allocation2] sm:$0x3] %vm10800_vm12, %v5688_v40  ;;  %945 = vrot.lane.b32.xlu0 %v913_v17, %s5690_s19 }
 0x218   :  { %901 = vst.msk [vmem:[#allocation2 + $0x20] sm:$0xff] %vm10799_vm8, %v856_v10 }
 0x219   :  { %v862_v50 = vpop.permute.xlu1 %861  ;;  %v916_v53 = vld [vmem:[#allocation2 + $0x18] sm:$0x3] }
 0x21a   :  { %v915_v31 = vld [vmem:[#allocation2 + $0x10] sm:$0xff]  ;;  %904 = vst.msk [vmem:[#allocation2 + $0x38] sm:$0x3] %vm897_vm6, %v862_v50  ;;  %v860_v41 = vpop.permute.xlu0 %859  ;;  %951 = vrot.lane.b32.xlu1 %v916_v53, %s5690_s19 }
 0x21b   :  { %1013 = vst.msk [vmem:[#allocation2 + $0x10] sm:$0x3] %vm10800_vm12, %v5688_v40  ;;  %949 = vrot.lane.b32.xlu0 %v915_v31, %s5690_s19 }
 0x21c   :  { %903 = vst.msk [vmem:[#allocation2 + $0x30] sm:$0xff] %vm10799_vm8, %v860_v41 }
 0x21d   :  { %v866_v44 = vpop.permute.xlu1 %865  ;;  %v918_v47 = vld [vmem:[#allocation2 + $0x28] sm:$0x3] }
 0x21e   :  { %906 = vst.msk [vmem:[#allocation2 + $0x48] sm:$0x3] %vm897_vm6, %v866_v44  ;;  %v864_v51 = vpop.permute.xlu0 %863  ;;  %955 = vrot.lane.b32.xlu1 %v918_v47, %s5690_s19 }
 0x21f   :  { %v917_v49 = vld [vmem:[#allocation2 + $0x20] sm:$0xff]  ;;  %905 = vst.msk [vmem:[#allocation2 + $0x40] sm:$0xff] %vm10799_vm8, %v864_v51 }
 0x220   :  { %1014 = vst.msk [vmem:[#allocation2 + $0x20] sm:$0x3] %vm10800_vm12, %v5688_v40  ;;  %953 = vrot.lane.b32.xlu0 %v917_v49, %s5690_s19 }
 0x221   :  { %v870_v54 = vpop.permute.xlu1 %869  ;;  %v920_v57 = vld [vmem:[#allocation2 + $0x38] sm:$0x3] }
 0x222   :  { %908 = vst.msk [vmem:[#allocation2 + $0x58] sm:$0x3] %vm897_vm6, %v870_v54  ;;  %v868_v61 = vpop.permute.xlu0 %867  ;;  %959 = vrot.lane.b32.xlu1 %v920_v57, %s5690_s19 }
 0x223   :  { %v919_v59 = vld [vmem:[#allocation2 + $0x30] sm:$0xff]  ;;  %907 = vst.msk [vmem:[#allocation2 + $0x50] sm:$0xff] %vm10799_vm8, %v868_v61 }
 0x224   :  { %1015 = vst.msk [vmem:[#allocation2 + $0x30] sm:$0x3] %vm10800_vm12, %v5688_v40  ;;  %957 = vrot.lane.b32.xlu0 %v919_v59, %s5690_s19 }
 0x225   :  { %v874_v0 = vpop.permute.xlu1 %873  ;;  %v922_v3 = vld [vmem:[#allocation2 + $0x48] sm:$0x3] }
 0x226   :  { %v921_v62 = vld [vmem:[#allocation2 + $0x40] sm:$0xff]  ;;  %910 = vst.msk [vmem:[#allocation2 + $0x68] sm:$0x3] %vm897_vm6, %v874_v0  ;;  %v872_v7 = vpop.permute.xlu0 %871  ;;  %963 = vrot.lane.b32.xlu1 %v922_v3, %s5690_s19 }
 0x227   :  { %1016 = vst.msk [vmem:[#allocation2 + $0x40] sm:$0x3] %vm10800_vm12, %v5688_v40 }
 0x228   :  { %909 = vst.msk [vmem:[#allocation2 + $0x60] sm:$0xff] %vm10799_vm8, %v872_v7  ;;  %961 = vrot.lane.b32.xlu0 %v921_v62, %s5690_s19 }
 0x229   :  { %v878_v8 = vpop.permute.xlu1 %877  ;;  %v924_v34 = vld [vmem:[#allocation2 + $0x58] sm:$0x3] }
 0x22a   :  { %v923_v56 = vld [vmem:[#allocation2 + $0x50] sm:$0xff]  ;;  %912 = vst.msk [vmem:[#allocation2 + $0x78] sm:$0x3] %vm897_vm6, %v878_v8  ;;  %v876_v15 = vpop.permute.xlu0 %875  ;;  %967 = vrot.lane.b32.xlu1 %v924_v34, %s5690_s19  ;;  %vm1028_vm6 = vcmask 15360  }
 0x22b   :  { %1017 = vst.msk [vmem:[#allocation2 + $0x50] sm:$0x3] %vm10800_vm12, %v5688_v40 }
 0x22c   :  { %911 = vst.msk [vmem:[#allocation2 + $0x70] sm:$0xff] %vm10799_vm8, %v876_v15  ;;  %965 = vrot.lane.b32.xlu0 %v923_v56, %s5690_s19  ;;  %vm1046_vm8 = vcmask 113760  }
 0x22d   :  { %v926_v16 = vld [vmem:[#allocation2 + $0x68] sm:$0x3] }
 0x22e   :  { %971 = vrot.lane.b32.xlu1 %v926_v16, %s5690_s19 }
 0x22f   :  { %v925_v58 = vld [vmem:[#allocation2 + $0x60] sm:$0xff] }
 0x230   :  { %1018 = vst.msk [vmem:[#allocation2 + $0x60] sm:$0x3] %vm10800_vm12, %v5688_v40  ;;  %969 = vrot.lane.b32.xlu0 %v925_v58, %s5690_s19 }
 0x231   :  { %v928_v42 = vld [vmem:[#allocation2 + $0x78] sm:$0x3] }
 0x232   :  { %975 = vrot.lane.b32.xlu1 %v928_v42, %s5690_s19 }
 0x233   :  { %v927_v45 = vld [vmem:[#allocation2 + $0x70] sm:$0xff] }
 0x234   :  { %1019 = vst.msk [vmem:[#allocation2 + $0x70] sm:$0x3] %vm10800_vm12, %v5688_v40  ;;  %973 = vrot.lane.b32.xlu0 %v927_v45, %s5690_s19  ;;  %vm1624_vm12 = vcmask 81920  }
 0x288   :  { %v948_v60 = vpop.permute.xlu1 %947 }
 0x289   :  { %996 = vst.msk [vmem:[#allocation2 + $0xa] sm:$0x3] %vm995_vm10, %v948_v60  ;;  %v946_v63 = vpop.permute.xlu0 %945 }
 0x28a   :  { %1031 = vst.msk [vmem:[#allocation2 + $0xa] sm:$0x3] %vm1030_vm13, %v5688_v40 }
 0x28b   :  { %994 = vst.msk [vmem:[#allocation2 + $0x2] sm:$0xff] %vm993_vm15, %v946_v63 }
 0x28c   :  { %1049 = vst.msk [vmem:[#allocation2 + $0xa] sm:$0x3] %vm1048_vm2, %v5688_v40  ;;  %v952_v52 = vpop.permute.xlu1 %951 }
 0x28d   :  { %1029 = vst.msk [vmem:[#allocation2 + $0x2] sm:$0xff] %vm1028_vm6, %v5688_v40  ;;  %v950_v55 = vpop.permute.xlu0 %949 }
 0x28e   :  { %1047 = vst.msk [vmem:[#allocation2 + $0x2] sm:$0xff] %vm1046_vm8, %v5688_v40 }
 0x28f   :  { %998 = vst.msk [vmem:[#allocation2 + $0x1a] sm:$0x3] %vm995_vm10, %v952_v52 }
 0x290   :  { %1033 = vst.msk [vmem:[#allocation2 + $0x1a] sm:$0x3] %vm1030_vm13, %v5688_v40  ;;  %v956_v2 = vpop.permute.xlu1 %955 }
 0x291   :  { %997 = vst.msk [vmem:[#allocation2 + $0x12] sm:$0xff] %vm993_vm15, %v950_v55 }
 0x292   :  { %1051 = vst.msk [vmem:[#allocation2 + $0x1a] sm:$0x3] %vm1048_vm2, %v5688_v40  ;;  %v954_v4 = vpop.permute.xlu0 %953 }
 0x293   :  { %1032 = vst.msk [vmem:[#allocation2 + $0x12] sm:$0xff] %vm1028_vm6, %v5688_v40 }
 0x294   :  { %1050 = vst.msk [vmem:[#allocation2 + $0x12] sm:$0xff] %vm1046_vm8, %v5688_v40  ;;  %v960_v12 = vpop.permute.xlu1 %959 }
 0x295   :  { %1000 = vst.msk [vmem:[#allocation2 + $0x2a] sm:$0x3] %vm995_vm10, %v956_v2  ;;  %v1064_v5 = vld [vmem:[#allocation2] ss:$2 sm:$0x3f] }
 0x296   :  { %1035 = vst.msk [vmem:[#allocation2 + $0x2a] sm:$0x3] %vm1030_vm13, %v5688_v40  ;;  %v1080_v1 = vld [vmem:[#allocation2 + $0x1] ss:$2 sm:$0x3f]  ;;  %v958_v13 = vpop.permute.xlu0 %957 }
 0x297   :  { %999 = vst.msk [vmem:[#allocation2 + $0x22] sm:$0xff] %vm993_vm15, %v954_v4  ;;  %v1104_v6 = vld [vmem:[#allocation2 + $0x2] ss:$2 sm:$0x3f]  ;;  %v1095_v11 = vmax.f32 %v1064_v5, %v1080_v1  ;;  %1001 = vst.msk [vmem:[#allocation2 + $0x32] sm:$0xff] %vm993_vm15, %v958_v13 }
 0x298   :  { %1053 = vst.msk [vmem:[#allocation2 + $0x2a] sm:$0x3] %vm1048_vm2, %v5688_v40  ;;  %v1128_v9 = vld [vmem:[#allocation2 + $0x3] ss:$2 sm:$0x3f]  ;;  %v964_v23 = vpop.permute.xlu1 %963 }
 0x299   :  { %1034 = vst.msk [vmem:[#allocation2 + $0x22] sm:$0xff] %vm1028_vm6, %v5688_v40  ;;  %v1119_v19 = vmax.f32 %v1095_v11, %v1104_v6  ;;  %1036 = vst.msk [vmem:[#allocation2 + $0x32] sm:$0xff] %vm1028_vm6, %v5688_v40 }
 0x29a   :  { %1052 = vst.msk [vmem:[#allocation2 + $0x22] sm:$0xff] %vm1046_vm8, %v5688_v40  ;;  %1054 = vst.msk [vmem:[#allocation2 + $0x32] sm:$0xff] %vm1046_vm8, %v5688_v40  ;;  %v962_v27 = vpop.permute.xlu0 %961 }
 0x29b   :  { %1633 = vst.msk [vmem:[#allocation2 + $0x7] sm:$0x1] %vm1624_vm12, %v5688_v40  ;;  %v1066_v18 = vld [vmem:[#allocation2 + $0x10] ss:$2 sm:$0x3f]  ;;  %v6593_v25 = vmax.f32 %v1119_v19, %v1128_v9 }
 0x29c   :  { %1002 = vst.msk [vmem:[#allocation2 + $0x3a] sm:$0x3] %vm995_vm10, %v960_v12  ;;  %v1082_v20 = vld [vmem:[#allocation2 + $0x11] ss:$2 sm:$0x3f]  ;;  %v968_v35 = vpop.permute.xlu1 %967 }
 0x29d   :  { %1037 = vst.msk [vmem:[#allocation2 + $0x3a] sm:$0x3] %vm1030_vm13, %v5688_v40  ;;  %v1106_v21 = vld [vmem:[#allocation2 + $0x12] ss:$2 sm:$0x3f]  ;;  %v1096_v26 = vmax.f32 %v1066_v18, %v1082_v20  ;;  %1159 = vrot.lane.b32.xlu0 %v6593_v25, %s5679_s13 }
 0x29e   :  { %1055 = vst.msk [vmem:[#allocation2 + $0x3a] sm:$0x3] %vm1048_vm2, %v5688_v40  ;;  %v1130_v22 = vld [vmem:[#allocation2 + $0x13] ss:$2 sm:$0x3f]  ;;  %v966_v38 = vpop.permute.xlu0 %965 }
 0x29f   :  { %1634 = vst.msk [vmem:[#allocation2 + $0x17] sm:$0x1] %vm1624_vm12, %v5688_v40  ;;  %v1120_v28 = vmax.f32 %v1096_v26, %v1106_v21 }
 0x2a0   :  { %1004 = vst.msk [vmem:[#allocation2 + $0x4a] sm:$0x3] %vm995_vm10, %v964_v23  ;;  %1006 = vst.msk [vmem:[#allocation2 + $0x5a] sm:$0x3] %vm995_vm10, %v968_v35  ;;  %v972_v48 = vpop.permute.xlu1 %971 }
 0x2a1   :  { %1039 = vst.msk [vmem:[#allocation2 + $0x4a] sm:$0x3] %vm1030_vm13, %v5688_v40  ;;  %v1068_v29 = vld [vmem:[#allocation2 + $0x20] ss:$2 sm:$0x3f]  ;;  %v6609_v36 = vmax.f32 %v1120_v28, %v1130_v22 }
 0x2a2   :  { %1003 = vst.msk [vmem:[#allocation2 + $0x42] sm:$0xff] %vm993_vm15, %v962_v27  ;;  %v1084_v30 = vld [vmem:[#allocation2 + $0x21] ss:$2 sm:$0x3f]  ;;  %1005 = vst.msk [vmem:[#allocation2 + $0x52] sm:$0xff] %vm993_vm15, %v966_v38  ;;  %v970_v50 = vpop.permute.xlu0 %969 }
 0x2a3   :  { %1057 = vst.msk [vmem:[#allocation2 + $0x4a] sm:$0x3] %vm1048_vm2, %v5688_v40  ;;  %v1108_v32 = vld [vmem:[#allocation2 + $0x22] ss:$2 sm:$0x3f]  ;;  %v1097_v37 = vmax.f32 %v1068_v29, %v1084_v30  ;;  %1161 = vrot.lane.b32.xlu1 %v6609_v36, %s5679_s13 }
 0x2a4   :  { %1038 = vst.msk [vmem:[#allocation2 + $0x42] sm:$0xff] %vm1028_vm6, %v5688_v40  ;;  %v1132_v33 = vld [vmem:[#allocation2 + $0x23] ss:$2 sm:$0x3f]  ;;  %1040 = vst.msk [vmem:[#allocation2 + $0x52] sm:$0xff] %vm1028_vm6, %v5688_v40  ;;  %v976_v49 = vpop.permute.xlu1 %975 }
 0x2a5   :  { %1056 = vst.msk [vmem:[#allocation2 + $0x42] sm:$0xff] %vm1046_vm8, %v5688_v40  ;;  %v1121_v39 = vmax.f32 %v1097_v37, %v1108_v32  ;;  %v1070_v43 = vld [vmem:[#allocation2 + $0x30] ss:$2 sm:$0x3f]  ;;  %1058 = vst.msk [vmem:[#allocation2 + $0x52] sm:$0xff] %vm1046_vm8, %v5688_v40 }
 0x2a6   :  { %1635 = vst.msk [vmem:[#allocation2 + $0x27] sm:$0x1] %vm1624_vm12, %v5688_v40  ;;  %v1086_v46 = vld [vmem:[#allocation2 + $0x31] ss:$2 sm:$0x3f]  ;;  %v974_v57 = vpop.permute.xlu0 %973 }
 0x2a7   :  { %1041 = vst.msk [vmem:[#allocation2 + $0x5a] sm:$0x3] %vm1030_vm13, %v5688_v40  ;;  %v1110_v24 = vld [vmem:[#allocation2 + $0x32] ss:$2 sm:$0x3f]  ;;  %v6625_v17 = vmax.f32 %v1121_v39, %v1132_v33  ;;  %v1098_v10 = vmax.f32 %v1070_v43, %v1086_v46 }
 0x2a8   :  { %1059 = vst.msk [vmem:[#allocation2 + $0x5a] sm:$0x3] %vm1048_vm2, %v5688_v40  ;;  %v1134_v14 = vld [vmem:[#allocation2 + $0x33] ss:$2 sm:$0x3f] }
 0x2a9   :  { %1636 = vst.msk [vmem:[#allocation2 + $0x37] sm:$0x1] %vm1624_vm12, %v5688_v40  ;;  %1163 = vrot.lane.b32.xlu0 %v6625_v17, %s5679_s13  ;;  %v1122_v53 = vmax.f32 %v1098_v10, %v1110_v24 }
 0x2aa   :  { %1008 = vst.msk [vmem:[#allocation2 + $0x6a] sm:$0x3] %vm995_vm10, %v972_v48  ;;  %1010 = vst.msk [vmem:[#allocation2 + $0x7a] sm:$0x3] %vm995_vm10, %v976_v49  ;;  %vm1255_vm10 = vcmask 5120  }
 0x2ab   :  { %1043 = vst.msk [vmem:[#allocation2 + $0x6a] sm:$0x3] %vm1030_vm13, %v5688_v40  ;;  %v6641_v51 = vmax.f32 %v1122_v53, %v1134_v14  ;;  %1045 = vst.msk [vmem:[#allocation2 + $0x7a] sm:$0x3] %vm1030_vm13, %v5688_v40  ;;  %vm1296_vm13 = vcmask 13320  }
 0x2ac   :  { %1007 = vst.msk [vmem:[#allocation2 + $0x62] sm:$0xff] %vm993_vm15, %v970_v50  ;;  %v1072_v31 = vld [vmem:[#allocation2 + $0x40] ss:$2 sm:$0x3f]  ;;  %1009 = vst.msk [vmem:[#allocation2 + $0x72] sm:$0xff] %vm993_vm15, %v974_v57 }
 0x2ad   :  { %v1088_v41 = vld [vmem:[#allocation2 + $0x41] ss:$2 sm:$0x3f]  ;;  %1061 = vst.msk [vmem:[#allocation2 + $0x6a] sm:$0x3] %vm1048_vm2, %v5688_v40  ;;  %1165 = vrot.lane.b32.xlu1 %v6641_v51, %s5679_s13 }
 0x2ae   :  { %1042 = vst.msk [vmem:[#allocation2 + $0x62] sm:$0xff] %vm1028_vm6, %v5688_v40  ;;  %v1112_v44 = vld [vmem:[#allocation2 + $0x42] ss:$2 sm:$0x3f]  ;;  %v1099_v54 = vmax.f32 %v1072_v31, %v1088_v41  ;;  %1044 = vst.msk [vmem:[#allocation2 + $0x72] sm:$0xff] %vm1028_vm6, %v5688_v40 }
 0x2af   :  { %v1136_v47 = vld [vmem:[#allocation2 + $0x43] ss:$2 sm:$0x3f]  ;;  %1060 = vst.msk [vmem:[#allocation2 + $0x62] sm:$0xff] %vm1046_vm8, %v5688_v40  ;;  %1062 = vst.msk [vmem:[#allocation2 + $0x72] sm:$0xff] %vm1046_vm8, %v5688_v40 }
 0x2b0   :  { %1637 = vst.msk [vmem:[#allocation2 + $0x47] sm:$0x1] %vm1624_vm12, %v5688_v40  ;;  %v1123_v59 = vmax.f32 %v1099_v54, %v1112_v44  ;;  %v1074_v61 = vld [vmem:[#allocation2 + $0x50] ss:$2 sm:$0x3f] }
 0x2b1   :  { %v1090_v0 = vld [vmem:[#allocation2 + $0x51] ss:$2 sm:$0x3f]  ;;  %1063 = vst.msk [vmem:[#allocation2 + $0x7a] sm:$0x3] %vm1048_vm2, %v5688_v40  ;;  %vm1329_vm2 = vcmask 21520  }
 0x2b2   :  { %v1114_v3 = vld [vmem:[#allocation2 + $0x52] ss:$2 sm:$0x3f]  ;;  %v1138_v62 = vld [vmem:[#allocation2 + $0x53] ss:$2 sm:$0x3f]  ;;  %v6657_v7 = vmax.f32 %v1123_v59, %v1136_v47  ;;  %v1100_v8 = vmax.f32 %v1074_v61, %v1090_v0 }
 0x2b3   :  { %1638 = vst.msk [vmem:[#allocation2 + $0x57] sm:$0x1] %vm1624_vm12, %v5688_v40 }
 0x2b4   :  { %1167 = vrot.lane.b32.xlu0 %v6657_v7, %s5679_s13  ;;  %v1124_v34 = vmax.f32 %v1100_v8, %v1114_v3 }
 0x2b6   :  { %v1076_v56 = vld [vmem:[#allocation2 + $0x60] ss:$2 sm:$0x3f]  ;;  %v1092_v15 = vld [vmem:[#allocation2 + $0x61] ss:$2 sm:$0x3f]  ;;  %v6663_v42 = vmax.f32 %v1124_v34, %v1138_v62 }
 0x2b7   :  { %v1116_v16 = vld [vmem:[#allocation2 + $0x62] ss:$2 sm:$0x3f]  ;;  %v1140_v58 = vld [vmem:[#allocation2 + $0x63] ss:$2 sm:$0x3f]  ;;  %v1101_v45 = vmax.f32 %v1076_v56, %v1092_v15  ;;  %v10801_v56 = vlaneseq }
 0x2b8   :  { %1639 = vst.msk [vmem:[#allocation2 + $0x67] sm:$0x1] %vm1624_vm12, %v5688_v40  ;;  %1169 = vrot.lane.b32.xlu1 %v6663_v42, %s5679_s13  ;;  %v1078_v63 = vld [vmem:[#allocation2 + $0x70] ss:$2 sm:$0x3f] }
 0x2b9   :  { %v1125_v60 = vmax.f32 %v1101_v45, %v1116_v16  ;;  %v1094_v52 = vld [vmem:[#allocation2 + $0x71] ss:$2 sm:$0x3f]  ;;  %v1118_v55 = vld [vmem:[#allocation2 + $0x72] ss:$2 sm:$0x3f] }
 0x2ba   :  { %v1142_v2 = vld [vmem:[#allocation2 + $0x73] ss:$2 sm:$0x3f]  ;;  %v1102_v5 = vmax.f32 %v1078_v63, %v1094_v52  ;;  %v2294_v15 = vand.u32 127, %v10801_v56 }
 0x2bb   :  { %v6669_v4 = vmax.f32 %v1125_v60, %v1140_v58  ;;  %1640 = vst.msk [vmem:[#allocation2 + $0x77] sm:$0x1] %vm1624_vm12, %v5688_v40  ;;  %v5622_v45 = vld [vmem:[%s10795_s1 + $0x21] ss:$3 sm:$0xff]  ;;  %v5638_v63 = vld [vmem:[%s10795_s1 + $0x22] ss:$3 sm:$0xff] }
 0x2bc   :  { %v1126_v1 = vmax.f32 %v1102_v5, %v1118_v55  ;;  %v5603_v16 = vadd.s32 4294967294, %v2294_v15  ;;  %v3355_v52 = vld [vmem:[%s10795_s1] ss:$3 sm:$0xff]  ;;  %v5620_v55 = vld [vmem:[%s10795_s1 + $0x1] ss:$3 sm:$0xff] }
 0x2bd   :  { %1171 = vrot.lane.b32.xlu0 %v6669_v4, %s5679_s13  ;;  %v5636_v5 = vld [vmem:[%s10795_s1 + $0x2] ss:$3 sm:$0xff] }
 0x2be   :  { %v6675_v6 = vmax.f32 %v1126_v1, %v1142_v2  ;;  %v2312_v58 = vadd.s32 1, %v5603_v16  ;;  %v5610_v2 = vld [vmem:[%s10795_s1 + $0x60] ss:$3 sm:$0xff]  ;;  %v2575_v1 = vadd.s32 3, %v5603_v16 }
 0x2c0   :  { %1173 = vrot.lane.b32.xlu1 %v6675_v6, %s5679_s13 }
 0x2c1   :  { %1191 = vrot.lane.b32.xlu0 %v6593_v25, %s5680_s10 }
 0x2c4   :  { %1193 = vrot.lane.b32.xlu1 %v6609_v36, %s5680_s10 }
 0x2c5   :  { %1195 = vrot.lane.b32.xlu0 %v6625_v17, %s5680_s10 }
 0x2c8   :  { %1197 = vrot.lane.b32.xlu1 %v6641_v51, %s5680_s10 }
 0x2c9   :  { %1199 = vrot.lane.b32.xlu0 %v6657_v7, %s5680_s10 }
 0x2cc   :  { %1201 = vrot.lane.b32.xlu1 %v6663_v42, %s5680_s10 }
 0x2cd   :  { %1203 = vrot.lane.b32.xlu0 %v6669_v4, %s5680_s10 }
 0x2d0   :  { %1205 = vrot.lane.b32.xlu1 %v6675_v6, %s5680_s10 }
 0x2d1   :  { %1223 = vrot.lane.b32.xlu0 %v6593_v25, %s5691_s20 }
 0x2d4   :  { %1225 = vrot.lane.b32.xlu1 %v6609_v36, %s5691_s20 }
 0x2d5   :  { %1227 = vrot.lane.b32.xlu0 %v6625_v17, %s5691_s20 }
 0x2d8   :  { %1229 = vrot.lane.b32.xlu1 %v6641_v51, %s5691_s20 }
 0x2d9   :  { %1231 = vrot.lane.b32.xlu0 %v6657_v7, %s5691_s20 }
 0x2dc   :  { %1233 = vrot.lane.b32.xlu1 %v6663_v42, %s5691_s20 }
 0x2dd   :  { %1235 = vrot.lane.b32.xlu0 %v6669_v4, %s5691_s20 }
 0x2e0   :  { %1237 = vrot.lane.b32.xlu1 %v6675_v6, %s5691_s20 }
 0x30f   :  { %v1160_v9 = vpop.permute.xlu0 %1159 }
 0x310   :  { %v1183_v32 = vmax.f32 %v6593_v25, %v1160_v9  ;;  %v3418_v9 = vmax.f32 %v3355_v52, %v5620_v55  ;;  %v5619_v52 = vld [vmem:[%s10795_s1 + $0xf8] ss:$3 sm:$0x1]  ;;  %v5635_v55 = vld [vmem:[%s10795_s1 + $0xf9] ss:$3 sm:$0x1] }
 0x315   :  { %v1162_v12 = vpop.permute.xlu1 %1161 }
 0x316   :  { %v1184_v38 = vmax.f32 %v6609_v36, %v1162_v12 }
 0x31b   :  { %v1164_v11 = vpop.permute.xlu0 %1163 }
 0x31c   :  { %v1185_v39 = vmax.f32 %v6625_v17, %v1164_v11  ;;  %v5608_v11 = vld [vmem:[%s10795_s1 + $0x40] ss:$3 sm:$0xff] }
 0x31f   :  { %v1166_v13 = vpop.permute.xlu1 %1165 }
 0x320   :  { %v1186_v48 = vmax.f32 %v6641_v51, %v1166_v13  ;;  %v5624_v13 = vld [vmem:[%s10795_s1 + $0x41] ss:$3 sm:$0xff] }
 0x326   :  { %v1168_v19 = vpop.permute.xlu0 %1167 }
 0x327   :  { %v1187_v10 = vmax.f32 %v6657_v7, %v1168_v19  ;;  %v5642_v19 = vld [vmem:[%s10795_s1 + $0x62] ss:$3 sm:$0xff] }
 0x32a   :  { %v1170_v18 = vpop.permute.xlu1 %1169 }
 0x32b   :  { %v1188_v44 = vmax.f32 %v6663_v42, %v1170_v18  ;;  %v5606_v42 = vld [vmem:[%s10795_s1 + $0x20] ss:$3 sm:$0xff] }
 0x32c   :  { %v3420_v60 = vmax.f32 %v5606_v42, %v5622_v45  ;;  %v5614_v18 = vld [vmem:[%s10795_s1 + $0xa0] ss:$3 sm:$0xff] }
 0x32f   :  { %v1172_v20 = vpop.permute.xlu0 %1171 }
 0x330   :  { %v1189_v47 = vmax.f32 %v6669_v4, %v1172_v20  ;;  %v5626_v4 = vld [vmem:[%s10795_s1 + $0x61] ss:$3 sm:$0xff] }
 0x331   :  { %v3424_v12 = vmax.f32 %v5610_v2, %v5626_v4  ;;  %v5630_v20 = vld [vmem:[%s10795_s1 + $0xa1] ss:$3 sm:$0xff] }
 0x332   :  { %v1174_v21 = vpop.permute.xlu1 %1173 }
 0x333   :  { %v1192_v22 = vpop.permute.xlu0 %1191  ;;  %v1190_v0 = vmax.f32 %v6675_v6, %v1174_v21  ;;  %v6803_v6 = vmax.f32 %v3420_v60, %v5638_v63  ;;  %v3422_v21 = vmax.f32 %v5608_v11, %v5624_v13  ;;  %v5613_v60 = vld [vmem:[%s10795_s1 + $0x98] ss:$3 sm:$0x1]  ;;  %v5629_v63 = vld [vmem:[%s10795_s1 + $0x99] ss:$3 sm:$0x1] }
 0x334   :  { %v1215_v33 = vmax.f32 %v1183_v32, %v1192_v22  ;;  %v5640_v22 = vld [vmem:[%s10795_s1 + $0x42] ss:$3 sm:$0xff]  ;;  %v5618_v32 = vld [vmem:[%s10795_s1 + $0xe0] ss:$3 sm:$0xff] }
 0x335   :  { %v5617_v11 = vld [vmem:[%s10795_s1 + $0xd8] ss:$3 sm:$0x1]  ;;  %v5633_v13 = vld [vmem:[%s10795_s1 + $0xd9] ss:$3 sm:$0x1] }
 0x336   :  { %v1194_v23 = vpop.permute.xlu1 %1193 }
 0x337   :  { %v1196_v26 = vpop.permute.xlu0 %1195  ;;  %v1216_v46 = vmax.f32 %v1184_v38, %v1194_v23  ;;  %v6826_v23 = vmax.f32 %v3418_v9, %v5636_v5  ;;  %v5650_v38 = vld [vmem:[%s10795_s1 + $0xe2] ss:$3 sm:$0xff]  ;;  %v3427_v5 = vmax.f32 %v5613_v60, %v5629_v63  ;;  %v3433_v9 = vmax.f32 %v5619_v52, %v5635_v55 }
 0x338   :  { %v1217_v24 = vmax.f32 %v1185_v39, %v1196_v26  ;;  %v6828_v26 = vmax.f32 %v3424_v12, %v5642_v19  ;;  %v5651_v12 = vld [vmem:[%s10795_s1 + $0xfa] ss:$3 sm:$0x1] }
 0x33a   :  { %v1198_v27 = vpop.permute.xlu1 %1197 }
 0x33b   :  { %v1200_v28 = vpop.permute.xlu0 %1199  ;;  %v1218_v53 = vmax.f32 %v1186_v48, %v1198_v27  ;;  %v3428_v27 = vmax.f32 %v5614_v18, %v5630_v20  ;;  %v5623_v48 = vld [vmem:[%s10795_s1 + $0x39] ss:$3 sm:$0x1]  ;;  %v6975_v18 = vmax.f32 %v3433_v9, %v5651_v12  ;;  %v3431_v20 = vmax.f32 %v5617_v11, %v5633_v13 }
 0x33c   :  { %v1219_v17 = vmax.f32 %v1187_v10, %v1200_v28  ;;  %v5646_v28 = vld [vmem:[%s10795_s1 + $0xa2] ss:$3 sm:$0xff] }
 0x33d   :  { %v6857_v39 = vmax.f32 %v3428_v27, %v5646_v28 }
 0x33e   :  { %v1202_v29 = vpop.permute.xlu1 %1201 }
 0x33f   :  { %v1204_v30 = vpop.permute.xlu0 %1203  ;;  %v1220_v54 = vmax.f32 %v1188_v44, %v1202_v29  ;;  %v5612_v29 = vld [vmem:[%s10795_s1 + $0x80] ss:$3 sm:$0xff]  ;;  %v5621_v44 = vld [vmem:[%s10795_s1 + $0x19] ss:$3 sm:$0x1] }
 0x340   :  { %v1221_v57 = vmax.f32 %v1189_v47, %v1204_v30  ;;  %v5628_v30 = vld [vmem:[%s10795_s1 + $0x81] ss:$3 sm:$0xff]  ;;  %v5611_v47 = vld [vmem:[%s10795_s1 + $0x78] ss:$3 sm:$0x1] }
 0x342   :  { %v1206_v35 = vpop.permute.xlu1 %1205 }
 0x343   :  { %v1224_v37 = vpop.permute.xlu0 %1223  ;;  %v1222_v7 = vmax.f32 %v1190_v0, %v1206_v35  ;;  %v6845_v35 = vmax.f32 %v3422_v21, %v5640_v22  ;;  %v5649_v21 = vld [vmem:[%s10795_s1 + $0xda] ss:$3 sm:$0x1] }
 0x344   :  { %v6714_v43 = vmax.f32 %v1215_v33, %v1224_v37  ;;  %v5634_v33 = vld [vmem:[%s10795_s1 + $0xe1] ss:$3 sm:$0xff]  ;;  %v5644_v37 = vld [vmem:[%s10795_s1 + $0x82] ss:$3 sm:$0xff]  ;;  %v6985_v27 = vmax.f32 %v3431_v20, %v5649_v21 }
 0x346   :  { %1272 = vrot.lane.b32.xlu0 %v6714_v43, %s5679_s13  ;;  %1256 = vst.msk [vmem:[#allocation2] sm:$0x3f] %vm1255_vm10, %v6714_v43  ;;  %v1226_v14 = vpop.permute.xlu1 %1225 }
 0x347   :  { %v1228_v25 = vpop.permute.xlu0 %1227  ;;  %v1248_v50 = vmax.f32 %v1216_v46, %v1226_v14  ;;  %v3432_v46 = vmax.f32 %v5618_v32, %v5634_v33  ;;  %v5632_v14 = vld [vmem:[%s10795_s1 + $0xc1] ss:$3 sm:$0xff] }
 0x348   :  { %v1249_v36 = vmax.f32 %v1217_v24, %v1228_v25  ;;  %v5616_v24 = vld [vmem:[%s10795_s1 + $0xc0] ss:$3 sm:$0xff]  ;;  %v5607_v25 = vld [vmem:[%s10795_s1 + $0x38] ss:$3 sm:$0x1] }
 0x349   :  { %1274 = vrot.lane.b32.xlu1 %v1248_v50, %s5679_s13  ;;  %1257 = vst.msk [vmem:[#allocation2 + $0x10] sm:$0x3f] %vm1255_vm10, %v1248_v50  ;;  %v3430_v10 = vmax.f32 %v5616_v24, %v5632_v14 }
 0x34a   :  { %1276 = vrot.lane.b32.xlu0 %v1249_v36, %s5679_s13  ;;  %1258 = vst.msk [vmem:[#allocation2 + $0x20] sm:$0x3f] %vm1255_vm10, %v1249_v36  ;;  %v1230_v31 = vpop.permute.xlu1 %1229 }
 0x34b   :  { %v1232_v41 = vpop.permute.xlu0 %1231  ;;  %v1250_v49 = vmax.f32 %v1218_v53, %v1230_v31  ;;  %v3421_v31 = vmax.f32 %v5607_v25, %v5623_v48 }
 0x34c   :  { %v1251_v51 = vmax.f32 %v1219_v17, %v1232_v41  ;;  %v6883_v17 = vmax.f32 %v3432_v46, %v5650_v38  ;;  %v5605_v41 = vld [vmem:[%s10795_s1 + $0x18] ss:$3 sm:$0x1] }
 0x34d   :  { %1278 = vrot.lane.b32.xlu1 %v1250_v49, %s5679_s13  ;;  %1259 = vst.msk [vmem:[#allocation2 + $0x30] sm:$0x3f] %vm1255_vm10, %v1250_v49 }
 0x34e   :  { %1280 = vrot.lane.b32.xlu0 %v1251_v51, %s5679_s13  ;;  %1260 = vst.msk [vmem:[#allocation2 + $0x40] sm:$0x3f] %vm1255_vm10, %v1251_v51  ;;  %v1234_v59 = vpop.permute.xlu1 %1233 }
 0x34f   :  { %v1236_v61 = vpop.permute.xlu0 %1235  ;;  %v1252_v3 = vmax.f32 %v1220_v54, %v1234_v59  ;;  %v5637_v54 = vld [vmem:[%s10795_s1 + $0x1a] ss:$3 sm:$0x1] }
 0x350   :  { %v1253_v62 = vmax.f32 %v1221_v57, %v1236_v61  ;;  %v5643_v57 = vld [vmem:[%s10795_s1 + $0x7a] ss:$3 sm:$0x1]  ;;  %v3419_v61 = vmax.f32 %v5605_v41, %v5621_v44 }
 0x351   :  { %1282 = vrot.lane.b32.xlu1 %v1252_v3, %s5679_s13  ;;  %1261 = vst.msk [vmem:[#allocation2 + $0x50] sm:$0x3f] %vm1255_vm10, %v1252_v3 }
 0x352   :  { %1284 = vrot.lane.b32.xlu0 %v1253_v62, %s5679_s13  ;;  %1262 = vst.msk [vmem:[#allocation2 + $0x60] sm:$0x3f] %vm1255_vm10, %v1253_v62  ;;  %v1238_v8 = vpop.permute.xlu1 %1237 }
 0x353   :  { %v1254_v34 = vmax.f32 %v1222_v7, %v1238_v8  ;;  %v5615_v7 = vld [vmem:[%s10795_s1 + $0xb8] ss:$3 sm:$0x1]  ;;  %v5631_v8 = vld [vmem:[%s10795_s1 + $0xb9] ss:$3 sm:$0x1] }
 0x354   :  { %v3429_v45 = vmax.f32 %v5615_v7, %v5631_v8 }
 0x355   :  { %1286 = vrot.lane.b32.xlu1 %v1254_v34, %s5679_s13  ;;  %1263 = vst.msk [vmem:[#allocation2 + $0x70] sm:$0x3f] %vm1255_vm10, %v1254_v34 }
 0x356   :  { %1305 = vrot.lane.b32.xlu0 %v6714_v43, %s5680_s10 }
 0x359   :  { %1307 = vrot.lane.b32.xlu1 %v1248_v50, %s5680_s10 }
 0x35a   :  { %1309 = vrot.lane.b32.xlu0 %v1249_v36, %s5680_s10 }
 0x35d   :  { %1311 = vrot.lane.b32.xlu1 %v1250_v49, %s5680_s10 }
 0x35e   :  { %1313 = vrot.lane.b32.xlu0 %v1251_v51, %s5680_s10 }
 0x361   :  { %1315 = vrot.lane.b32.xlu1 %v1252_v3, %s5680_s10 }
 0x362   :  { %1317 = vrot.lane.b32.xlu0 %v1253_v62, %s5680_s10 }
 0x365   :  { %1319 = vrot.lane.b32.xlu1 %v1254_v34, %s5680_s10 }
 0x366   :  { %1338 = vrot.lane.b32.xlu0 %v6714_v43, %s5691_s20 }
 0x369   :  { %1340 = vrot.lane.b32.xlu1 %v1248_v50, %s5691_s20 }
 0x36a   :  { %1342 = vrot.lane.b32.xlu0 %v1249_v36, %s5691_s20 }
 0x36d   :  { %1344 = vrot.lane.b32.xlu1 %v1250_v49, %s5691_s20 }
 0x36e   :  { %1346 = vrot.lane.b32.xlu0 %v1251_v51, %s5691_s20 }
 0x371   :  { %1348 = vrot.lane.b32.xlu1 %v1252_v3, %s5691_s20 }
 0x372   :  { %1350 = vrot.lane.b32.xlu0 %v1253_v62, %s5691_s20 }
 0x375   :  { %1352 = vrot.lane.b32.xlu1 %v1254_v34, %s5691_s20 }
 0x376   :  { %1371 = vrot.lane.b32.xlu0 %v6714_v43, %s5681_s0 }
 0x379   :  { %1373 = vrot.lane.b32.xlu1 %v1248_v50, %s5681_s0 }
 0x37a   :  { %1375 = vrot.lane.b32.xlu0 %v1249_v36, %s5681_s0 }
 0x37d   :  { %1377 = vrot.lane.b32.xlu1 %v1250_v49, %s5681_s0 }
 0x37e   :  { %1379 = vrot.lane.b32.xlu0 %v1251_v51, %s5681_s0 }
 0x381   :  { %1381 = vrot.lane.b32.xlu1 %v1252_v3, %s5681_s0 }
 0x382   :  { %1383 = vrot.lane.b32.xlu0 %v1253_v62, %s5681_s0 }
 0x385   :  { %1385 = vrot.lane.b32.xlu1 %v1254_v34, %s5681_s0 }
 0x386   :  { %1404 = vrot.lane.b32.xlu0 %v6714_v43, %s5692_s21  ;;  %v3426_v43 = vmax.f32 %v5612_v29, %v5628_v30 }
 0x388   :  { %v6881_v53 = vmax.f32 %v3426_v43, %v5644_v37 }
 0x389   :  { %1406 = vrot.lane.b32.xlu1 %v1248_v50, %s5692_s21  ;;  %v5648_v50 = vld [vmem:[%s10795_s1 + $0xc2] ss:$3 sm:$0xff] }
 0x38a   :  { %1408 = vrot.lane.b32.xlu0 %v1249_v36, %s5692_s21  ;;  %v5639_v36 = vld [vmem:[%s10795_s1 + $0x3a] ss:$3 sm:$0x1] }
 0x38b   :  { %v6909_v59 = vmax.f32 %v3421_v31, %v5639_v36 }
 0x38d   :  { %1410 = vrot.lane.b32.xlu1 %v1250_v49, %s5692_s21  ;;  %v5627_v49 = vld [vmem:[%s10795_s1 + $0x79] ss:$3 sm:$0x1] }
 0x38e   :  { %1412 = vrot.lane.b32.xlu0 %v1251_v51, %s5692_s21  ;;  %v6897_v51 = vmax.f32 %v3430_v10, %v5648_v50  ;;  %v3425_v0 = vmax.f32 %v5611_v47, %v5627_v49 }
 0x390   :  { %v6935_v42 = vmax.f32 %v3425_v0, %v5643_v57 }
 0x391   :  { %1414 = vrot.lane.b32.xlu1 %v1252_v3, %s5692_s21  ;;  %v5609_v3 = vld [vmem:[%s10795_s1 + $0x58] ss:$3 sm:$0x1] }
 0x392   :  { %1416 = vrot.lane.b32.xlu0 %v1253_v62, %s5692_s21  ;;  %v5625_v62 = vld [vmem:[%s10795_s1 + $0x59] ss:$3 sm:$0x1] }
 0x395   :  { %1418 = vrot.lane.b32.xlu1 %v1254_v34, %s5692_s21  ;;  %v3423_v34 = vmax.f32 %v5609_v3, %v5625_v62 }
 0x396   :  { %2393 = vrot.lane.b32.xlu0 %v2312_v58, %s5693_s26  ;;  %v6933_v58 = vmax.f32 %v3419_v61, %v5637_v54 }
 0x399   :  { %2395 = vrot.lane.b32.xlu1 %v5603_v16, %s5693_s26  ;;  %v5647_v16 = vld [vmem:[%s10795_s1 + $0xba] ss:$3 sm:$0x1] }
 0x39a   :  { %2509 = vrot.lane.b32.xlu0 %v2294_v15, %s5690_s19  ;;  %v5641_v15 = vld [vmem:[%s10795_s1 + $0x5a] ss:$3 sm:$0x1]  ;;  %v6955_v4 = vmax.f32 %v3429_v45, %v5647_v16 }
 0x39b   :  { %v6949_v2 = vmax.f32 %v3423_v34, %v5641_v15 }
 0x39d   :  { %2656 = vrot.lane.b32.xlu1 %v2575_v1, %s5694_s24  ;;  %v5645_v1 = vld [vmem:[%s10795_s1 + $0x9a] ss:$3 sm:$0x1] }
 0x39e   :  { %3502 = vrot.lane.b32.xlu0 %v6803_v6, %s5679_s13  ;;  %v6973_v19 = vmax.f32 %v3427_v5, %v5645_v1 }
 0x3a1   :  { %3498 = vrot.lane.b32.xlu1 %v6826_v23, %s5679_s13 }
 0x3a2   :  { %3510 = vrot.lane.b32.xlu0 %v6828_v26, %s5679_s13 }
 0x3a5   :  { %3506 = vrot.lane.b32.xlu1 %v6845_v35, %s5679_s13 }
 0x3a6   :  { %3518 = vrot.lane.b32.xlu0 %v6857_v39, %s5679_s13 }
 0x3a9   :  { %3514 = vrot.lane.b32.xlu1 %v6881_v53, %s5679_s13 }
 0x3aa   :  { %3526 = vrot.lane.b32.xlu0 %v6883_v17, %s5679_s13 }
 0x3ad   :  { %3522 = vrot.lane.b32.xlu1 %v6897_v51, %s5679_s13 }
 0x3ae   :  { %3504 = vrot.lane.b32.xlu0 %v6909_v59, %s5679_s13 }
 0x3b1   :  { %3500 = vrot.lane.b32.xlu1 %v6933_v58, %s5679_s13 }
 0x3b2   :  { %3512 = vrot.lane.b32.xlu0 %v6935_v42, %s5679_s13 }
 0x3b5   :  { %3508 = vrot.lane.b32.xlu1 %v6949_v2, %s5679_s13 }
 0x3b6   :  { %3520 = vrot.lane.b32.xlu0 %v6955_v4, %s5679_s13 }
 0x3b8   :  { %v1273_v22 = vpop.permute.xlu0 %1272 }
 0x3b9   :  { %1297 = vst.msk [vmem:[#allocation2] sm:$0x3f] %vm1296_vm13, %v1273_v22  ;;  %3516 = vrot.lane.b32.xlu1 %v6973_v19, %s5679_s13 }
 0x3ba   :  { %3528 = vrot.lane.b32.xlu0 %v6975_v18, %s5679_s13 }
 0x3bb   :  { %v1275_v28 = vpop.permute.xlu1 %1274 }
 0x3bc   :  { %v1277_v29 = vpop.permute.xlu0 %1276  ;;  %1298 = vst.msk [vmem:[#allocation2 + $0x10] sm:$0x3f] %vm1296_vm13, %v1275_v28 }
 0x3bd   :  { %1299 = vst.msk [vmem:[#allocation2 + $0x20] sm:$0x3f] %vm1296_vm13, %v1277_v29  ;;  %3524 = vrot.lane.b32.xlu1 %v6985_v27, %s5679_s13 }
 0x3be   :  { %3566 = vrot.lane.b32.xlu0 %v6803_v6, %s5680_s10 }
 0x3bf   :  { %v1279_v30 = vpop.permute.xlu1 %1278 }
 0x3c0   :  { %v1281_v32 = vpop.permute.xlu0 %1280  ;;  %1300 = vst.msk [vmem:[#allocation2 + $0x30] sm:$0x3f] %vm1296_vm13, %v1279_v30 }
 0x3c1   :  { %1301 = vst.msk [vmem:[#allocation2 + $0x40] sm:$0x3f] %vm1296_vm13, %v1281_v32  ;;  %3562 = vrot.lane.b32.xlu1 %v6826_v23, %s5680_s10 }
 0x3c2   :  { %3574 = vrot.lane.b32.xlu0 %v6828_v26, %s5680_s10 }
 0x3c3   :  { %v1283_v33 = vpop.permute.xlu1 %1282 }
 0x3c4   :  { %v1285_v37 = vpop.permute.xlu0 %1284  ;;  %1302 = vst.msk [vmem:[#allocation2 + $0x50] sm:$0x3f] %vm1296_vm13, %v1283_v33 }
 0x3c5   :  { %1303 = vst.msk [vmem:[#allocation2 + $0x60] sm:$0x3f] %vm1296_vm13, %v1285_v37  ;;  %3570 = vrot.lane.b32.xlu1 %v6845_v35, %s5680_s10 }
 0x3c6   :  { %3582 = vrot.lane.b32.xlu0 %v6857_v39, %s5680_s10 }
 0x3c7   :  { %v1287_v38 = vpop.permute.xlu1 %1286 }
 0x3c8   :  { %v1306_v43 = vpop.permute.xlu0 %1305  ;;  %1304 = vst.msk [vmem:[#allocation2 + $0x70] sm:$0x3f] %vm1296_vm13, %v1287_v38  ;;  %vm1362_vm13 = vcmask 29720  }
 0x3c9   :  { %1330 = vst.msk [vmem:[#allocation2] sm:$0x3f] %vm1329_vm2, %v1306_v43  ;;  %3578 = vrot.lane.b32.xlu1 %v6881_v53, %s5680_s10 }
 0x3ca   :  { %3590 = vrot.lane.b32.xlu0 %v6883_v17, %s5680_s10 }
 0x3cb   :  { %v1308_v46 = vpop.permute.xlu1 %1307 }
 0x3cc   :  { %v1310_v24 = vpop.permute.xlu0 %1309  ;;  %1331 = vst.msk [vmem:[#allocation2 + $0x10] sm:$0x3f] %vm1329_vm2, %v1308_v46 }
 0x3cd   :  { %1332 = vst.msk [vmem:[#allocation2 + $0x20] sm:$0x3f] %vm1329_vm2, %v1310_v24  ;;  %3586 = vrot.lane.b32.xlu1 %v6897_v51, %s5680_s10 }
 0x3ce   :  { %3568 = vrot.lane.b32.xlu0 %v6909_v59, %s5680_s10 }
 0x3cf   :  { %v1312_v14 = vpop.permute.xlu1 %1311 }
 0x3d0   :  { %v1314_v25 = vpop.permute.xlu0 %1313  ;;  %1333 = vst.msk [vmem:[#allocation2 + $0x30] sm:$0x3f] %vm1329_vm2, %v1312_v14 }
 0x3d1   :  { %1334 = vst.msk [vmem:[#allocation2 + $0x40] sm:$0x3f] %vm1329_vm2, %v1314_v25  ;;  %3564 = vrot.lane.b32.xlu1 %v6933_v58, %s5680_s10 }
 0x3d2   :  { %3576 = vrot.lane.b32.xlu0 %v6935_v42, %s5680_s10 }
 0x3d3   :  { %v1316_v48 = vpop.permute.xlu1 %1315 }
 0x3d4   :  { %v1318_v10 = vpop.permute.xlu0 %1317  ;;  %1335 = vst.msk [vmem:[#allocation2 + $0x50] sm:$0x3f] %vm1329_vm2, %v1316_v48 }
 0x3d5   :  { %1336 = vst.msk [vmem:[#allocation2 + $0x60] sm:$0x3f] %vm1329_vm2, %v1318_v10  ;;  %3572 = vrot.lane.b32.xlu1 %v6949_v2, %s5680_s10 }
 0x3d6   :  { %3584 = vrot.lane.b32.xlu0 %v6955_v4, %s5680_s10 }
 0x3d7   :  { %v1320_v50 = vpop.permute.xlu1 %1319 }
 0x3d8   :  { %v1339_v36 = vpop.permute.xlu0 %1338  ;;  %1337 = vst.msk [vmem:[#allocation2 + $0x70] sm:$0x3f] %vm1329_vm2, %v1320_v50  ;;  %vm1395_vm2 = vcmask 37920  }
 0x3d9   :  { %1363 = vst.msk [vmem:[#allocation2] sm:$0x3f] %vm1362_vm13, %v1339_v36  ;;  %3580 = vrot.lane.b32.xlu1 %v6973_v19, %s5680_s10 }
 0x3da   :  { %3592 = vrot.lane.b32.xlu0 %v6975_v18, %s5680_s10 }
 0x3db   :  { %v1341_v31 = vpop.permute.xlu1 %1340 }
 0x3dc   :  { %v1343_v41 = vpop.permute.xlu0 %1342  ;;  %1364 = vst.msk [vmem:[#allocation2 + $0x10] sm:$0x3f] %vm1362_vm13, %v1341_v31 }
 0x3dd   :  { %1365 = vst.msk [vmem:[#allocation2 + $0x20] sm:$0x3f] %vm1362_vm13, %v1343_v41  ;;  %3588 = vrot.lane.b32.xlu1 %v6985_v27, %s5680_s10 }
 0x3df   :  { %v1345_v44 = vpop.permute.xlu1 %1344 }
 0x3e0   :  { %v1347_v47 = vpop.permute.xlu0 %1346  ;;  %1366 = vst.msk [vmem:[#allocation2 + $0x30] sm:$0x3f] %vm1362_vm13, %v1345_v44 }
 0x3e1   :  { %1367 = vst.msk [vmem:[#allocation2 + $0x40] sm:$0x3f] %vm1362_vm13, %v1347_v47 }
 0x3e3   :  { %v1349_v49 = vpop.permute.xlu1 %1348 }
 0x3e4   :  { %v1351_v54 = vpop.permute.xlu0 %1350  ;;  %1368 = vst.msk [vmem:[#allocation2 + $0x50] sm:$0x3f] %vm1362_vm13, %v1349_v49 }
 0x3e5   :  { %1369 = vst.msk [vmem:[#allocation2 + $0x60] sm:$0x3f] %vm1362_vm13, %v1351_v54 }
 0x3e7   :  { %v1353_v57 = vpop.permute.xlu1 %1352 }
 0x3e8   :  { %v1372_v61 = vpop.permute.xlu0 %1371  ;;  %1370 = vst.msk [vmem:[#allocation2 + $0x70] sm:$0x3f] %vm1362_vm13, %v1353_v57  ;;  %vm1428_vm13 = vcmask 46120  }
 0x3e9   :  { %1396 = vst.msk [vmem:[#allocation2] sm:$0x3f] %vm1395_vm2, %v1372_v61 }
 0x3eb   :  { %v1374_v0 = vpop.permute.xlu1 %1373 }
 0x3ec   :  { %v1376_v3 = vpop.permute.xlu0 %1375  ;;  %1397 = vst.msk [vmem:[#allocation2 + $0x10] sm:$0x3f] %vm1395_vm2, %v1374_v0 }
 0x3ed   :  { %1398 = vst.msk [vmem:[#allocation2 + $0x20] sm:$0x3f] %vm1395_vm2, %v1376_v3 }
 0x3ef   :  { %v1378_v62 = vpop.permute.xlu1 %1377 }
 0x3f0   :  { %v1380_v7 = vpop.permute.xlu0 %1379  ;;  %1399 = vst.msk [vmem:[#allocation2 + $0x30] sm:$0x3f] %vm1395_vm2, %v1378_v62 }
 0x3f1   :  { %1400 = vst.msk [vmem:[#allocation2 + $0x40] sm:$0x3f] %vm1395_vm2, %v1380_v7 }
 0x3f3   :  { %v1382_v8 = vpop.permute.xlu1 %1381 }
 0x3f4   :  { %v1384_v34 = vpop.permute.xlu0 %1383  ;;  %1401 = vst.msk [vmem:[#allocation2 + $0x50] sm:$0x3f] %vm1395_vm2, %v1382_v8 }
 0x3f5   :  { %1402 = vst.msk [vmem:[#allocation2 + $0x60] sm:$0x3f] %vm1395_vm2, %v1384_v34 }
 0x3f7   :  { %v1386_v15 = vpop.permute.xlu1 %1385 }
 0x3f8   :  { %v1405_v16 = vpop.permute.xlu0 %1404  ;;  %1403 = vst.msk [vmem:[#allocation2 + $0x70] sm:$0x3f] %vm1395_vm2, %v1386_v15  ;;  %vm3627_vm2 = vcmask 0  }
 0x3f9   :  { %1429 = vst.msk [vmem:[#allocation2] sm:$0x3f] %vm1428_vm13, %v1405_v16 }
 0x3fb   :  { %v1407_v45 = vpop.permute.xlu1 %1406 }
 0x3fc   :  { %v1409_v60 = vpop.permute.xlu0 %1408  ;;  %1430 = vst.msk [vmem:[#allocation2 + $0x10] sm:$0x3f] %vm1428_vm13, %v1407_v45 }
 0x3fd   :  { %1431 = vst.msk [vmem:[#allocation2 + $0x20] sm:$0x3f] %vm1428_vm13, %v1409_v60 }
 0x3ff   :  { %v1411_v63 = vpop.permute.xlu1 %1410 }
 0x400   :  { %v1413_v52 = vpop.permute.xlu0 %1412  ;;  %1432 = vst.msk [vmem:[#allocation2 + $0x30] sm:$0x3f] %vm1428_vm13, %v1411_v63 }
 0x401   :  { %1433 = vst.msk [vmem:[#allocation2 + $0x40] sm:$0x3f] %vm1428_vm13, %v1413_v52 }
 0x403   :  { %v1415_v55 = vpop.permute.xlu1 %1414 }
 0x404   :  { %v1417_v5 = vpop.permute.xlu0 %1416  ;;  %1434 = vst.msk [vmem:[#allocation2 + $0x50] sm:$0x3f] %vm1428_vm13, %v1415_v55 }
 0x405   :  { %1435 = vst.msk [vmem:[#allocation2 + $0x60] sm:$0x3f] %vm1428_vm13, %v1417_v5 }
 0x407   :  { %v1419_v1 = vpop.permute.xlu1 %1418 }
 0x408   :  { %v7059_v9 = vpop.permute.xlu0 %2393  ;;  %1436 = vst.msk [vmem:[#allocation2 + $0x70] sm:$0x3f] %vm1428_vm13, %v1419_v1  ;;  %vm1494_vm13 = vcmask 62520  }
 0x40b   :  { %v7062_v12 = vpop.permute.xlu1 %2395 }
 0x40c   :  { %v7064_v11 = vpop.permute.xlu0 %2509 }
 0x40f   :  { %v7066_v13 = vpop.permute.xlu1 %2656 }
 0x410   :  { %v3503_v20 = vpop.permute.xlu0 %3502 }
 0x411   :  { %v3548_v48 = vmax.f32 %v6803_v6, %v3503_v20 }
 0x413   :  { %v3499_v21 = vpop.permute.xlu1 %3498 }
 0x414   :  { %v3511_v22 = vpop.permute.xlu0 %3510  ;;  %v3546_v31 = vmax.f32 %v6826_v23, %v3499_v21 }
 0x415   :  { %v3552_v41 = vmax.f32 %v6828_v26, %v3511_v22 }
 0x417   :  { %v3507_v28 = vpop.permute.xlu1 %3506 }
 0x418   :  { %v3519_v29 = vpop.permute.xlu0 %3518  ;;  %v3550_v54 = vmax.f32 %v6845_v35, %v3507_v28 }
 0x419   :  { %v3556_v57 = vmax.f32 %v6857_v39, %v3519_v29 }
 0x41b   :  { %v3515_v30 = vpop.permute.xlu1 %3514 }
 0x41c   :  { %v3527_v32 = vpop.permute.xlu0 %3526  ;;  %v3554_v35 = vmax.f32 %v6881_v53, %v3515_v30 }
 0x41d   :  { %v3560_v39 = vmax.f32 %v6883_v17, %v3527_v32 }
 0x41f   :  { %v3523_v33 = vpop.permute.xlu1 %3522 }
 0x420   :  { %v3505_v37 = vpop.permute.xlu0 %3504  ;;  %v3558_v53 = vmax.f32 %v6897_v51, %v3523_v33  ;;  %v1438_v33 = vld [vmem:[#allocation2 + $0x10] sm:$0x3f] }
 0x421   :  { %v3549_v17 = vmax.f32 %v6909_v59, %v3505_v37  ;;  %v1439_v37 = vld [vmem:[#allocation2 + $0x20] sm:$0x3f] }
 0x423   :  { %v3501_v38 = vpop.permute.xlu1 %3500 }
 0x424   :  { %v3513_v43 = vpop.permute.xlu0 %3512  ;;  %v3547_v59 = vmax.f32 %v6933_v58, %v3501_v38  ;;  %v1440_v38 = vld [vmem:[#allocation2 + $0x30] sm:$0x3f] }
 0x425   :  { %v3553_v45 = vmax.f32 %v6935_v42, %v3513_v43  ;;  %v1441_v43 = vld [vmem:[#allocation2 + $0x40] sm:$0x3f] }
 0x427   :  { %v7068_v46 = vpop.permute.xlu1 %3508 }
 0x428   :  { %v7070_v24 = vpop.permute.xlu0 %3520  ;;  %v3551_v58 = vmax.f32 %v6949_v2, %v7068_v46  ;;  %v1442_v46 = vld [vmem:[#allocation2 + $0x50] sm:$0x3f] }
 0x429   :  { %v3557_v42 = vmax.f32 %v6955_v4, %v7070_v24  ;;  %v1443_v24 = vld [vmem:[#allocation2 + $0x60] sm:$0x3f] }
 0x42b   :  { %v7072_v14 = vpop.permute.xlu1 %3516 }
 0x42c   :  { %v7074_v25 = vpop.permute.xlu0 %3528  ;;  %v3555_v4 = vmax.f32 %v6973_v19, %v7072_v14  ;;  %v1444_v14 = vld [vmem:[#allocation2 + $0x70] sm:$0x3f] }
 0x42d   :  { %v3561_v21 = vmax.f32 %v6975_v18, %v7074_v25 }
 0x42f   :  { %v7077_v10 = vpop.permute.xlu1 %3524 }
 0x430   :  { %v3567_v50 = vpop.permute.xlu0 %3566  ;;  %v3559_v18 = vmax.f32 %v6985_v27, %v7077_v10  ;;  %v1437_v27 = vld [vmem:[#allocation2] sm:$0x3f] }
 0x431   :  { %v7079_v36 = vmax.f32 %v3548_v48, %v3567_v50 }
 0x433   :  { %3629 = vst.msk [vmem:[#allocation3 + $0x10] sm:$0xff] %vm285_vm1, %v7079_v36  ;;  %3663 = vrot.lane.b32.xlu0 %v7079_v36, %s5680_s10  ;;  %v3563_v44 = vpop.permute.xlu1 %3562 }
 0x434   :  { %v3575_v47 = vpop.permute.xlu0 %3574  ;;  %v7087_v49 = vmax.f32 %v3546_v31, %v3563_v44 }
 0x435   :  { %v7089_v6 = vmax.f32 %v3552_v41, %v3575_v47 }
 0x436   :  { %3626 = vst.msk [vmem:[#allocation3] sm:$0xff] %vm285_vm1, %v7087_v49  ;;  %3659 = vrot.lane.b32.xlu1 %v7087_v49, %s5680_s10 }
 0x437   :  { %3633 = vst.msk [vmem:[#allocation3 + $0x30] sm:$0xff] %vm285_vm1, %v7089_v6  ;;  %3671 = vrot.lane.b32.xlu0 %v7089_v6, %s5680_s10  ;;  %v3571_v23 = vpop.permute.xlu1 %3570 }
 0x438   :  { %v3583_v26 = vpop.permute.xlu0 %3582  ;;  %v7101_v61 = vmax.f32 %v3550_v54, %v3571_v23 }
 0x439   :  { %v7103_v0 = vmax.f32 %v3556_v57, %v3583_v26 }
 0x43a   :  { %3631 = vst.msk [vmem:[#allocation3 + $0x20] sm:$0xff] %vm285_vm1, %v7101_v61  ;;  %3667 = vrot.lane.b32.xlu1 %v7101_v61, %s5680_s10 }
 0x43b   :  { %3637 = vst.msk [vmem:[#allocation3 + $0x50] sm:$0xff] %vm285_vm1, %v7103_v0  ;;  %3679 = vrot.lane.b32.xlu0 %v7103_v0, %s5680_s10  ;;  %v3579_v3 = vpop.permute.xlu1 %3578 }
 0x43c   :  { %v3591_v62 = vpop.permute.xlu0 %3590  ;;  %v7115_v7 = vmax.f32 %v3554_v35, %v3579_v3 }
 0x43d   :  { %v7117_v8 = vmax.f32 %v3560_v39, %v3591_v62 }
 0x43e   :  { %3635 = vst.msk [vmem:[#allocation3 + $0x40] sm:$0xff] %vm285_vm1, %v7115_v7  ;;  %3675 = vrot.lane.b32.xlu1 %v7115_v7, %s5680_s10 }
 0x43f   :  { %3641 = vst.msk [vmem:[#allocation3 + $0x70] sm:$0xff] %vm285_vm1, %v7117_v8  ;;  %3687 = vrot.lane.b32.xlu0 %v7117_v8, %s5680_s10  ;;  %v3587_v34 = vpop.permute.xlu1 %3586 }
 0x440   :  { %v3569_v15 = vpop.permute.xlu0 %3568  ;;  %v7129_v16 = vmax.f32 %v3558_v53, %v3587_v34 }
 0x441   :  { %v7131_v51 = vmax.f32 %v3549_v17, %v3569_v15 }
 0x442   :  { %3639 = vst.msk [vmem:[#allocation3 + $0x60] sm:$0xff] %vm285_vm1, %v7129_v16  ;;  %3683 = vrot.lane.b32.xlu1 %v7129_v16, %s5680_s10  ;;  %vm3708_vm1 = vcmask 8200  }
 0x443   :  { %3728 = vrot.lane.b32.xlu0 %v7079_v36, %s5681_s0  ;;  %3630 = vst.msk [vmem:[#allocation3 + $0x18] sm:$0x1] %vm3627_vm2, %v7131_v51  ;;  %v3565_v60 = vpop.permute.xlu1 %3564 }
 0x444   :  { %v3577_v63 = vpop.permute.xlu0 %3576  ;;  %v7143_v52 = vmax.f32 %v3547_v59, %v3565_v60 }
 0x445   :  { %v7145_v55 = vmax.f32 %v3553_v45, %v3577_v63 }
 0x446   :  { %3724 = vrot.lane.b32.xlu1 %v7087_v49, %s5681_s0  ;;  %3628 = vst.msk [vmem:[#allocation3 + $0x8] sm:$0x1] %vm3627_vm2, %v7143_v52 }
 0x447   :  { %3736 = vrot.lane.b32.xlu0 %v7089_v6, %s5681_s0  ;;  %3634 = vst.msk [vmem:[#allocation3 + $0x38] sm:$0x1] %vm3627_vm2, %v7145_v55  ;;  %v3573_v5 = vpop.permute.xlu1 %3572 }
 0x448   :  { %v3585_v1 = vpop.permute.xlu0 %3584  ;;  %v7159_v20 = vmax.f32 %v3551_v58, %v3573_v5 }
 0x449   :  { %v7161_v2 = vmax.f32 %v3557_v42, %v3585_v1 }
 0x44a   :  { %3732 = vrot.lane.b32.xlu1 %v7101_v61, %s5681_s0  ;;  %3632 = vst.msk [vmem:[#allocation3 + $0x28] sm:$0x1] %vm3627_vm2, %v7159_v20 }
 0x44b   :  { %3744 = vrot.lane.b32.xlu0 %v7103_v0, %s5681_s0  ;;  %3638 = vst.msk [vmem:[#allocation3 + $0x58] sm:$0x1] %vm3627_vm2, %v7161_v2  ;;  %v3581_v22 = vpop.permute.xlu1 %3580 }
 0x44c   :  { %v3593_v28 = vpop.permute.xlu0 %3592  ;;  %v7175_v29 = vmax.f32 %v3555_v4, %v3581_v22 }
 0x44d   :  { %v7177_v19 = vmax.f32 %v3561_v21, %v3593_v28 }
 0x44e   :  { %3740 = vrot.lane.b32.xlu1 %v7115_v7, %s5681_s0  ;;  %3636 = vst.msk [vmem:[#allocation3 + $0x48] sm:$0x1] %vm3627_vm2, %v7175_v29 }
 0x44f   :  { %3752 = vrot.lane.b32.xlu0 %v7117_v8, %s5681_s0  ;;  %3642 = vst.msk [vmem:[#allocation3 + $0x78] sm:$0x1] %vm3627_vm2, %v7177_v19  ;;  %v3589_v30 = vpop.permute.xlu1 %3588 }
 0x450   :  { %v7189_v32 = vmax.f32 %v3559_v18, %v3589_v30 }
 0x452   :  { %3748 = vrot.lane.b32.xlu1 %v7129_v16, %s5681_s0  ;;  %3640 = vst.msk [vmem:[#allocation3 + $0x68] sm:$0x1] %vm3627_vm2, %v7189_v32  ;;  %vm1641_vm2 = vcmask 13312  }
 0x453   :  { %3665 = vrot.lane.b32.xlu0 %v7131_v51, %s5680_s10 }
 0x456   :  { %3661 = vrot.lane.b32.xlu1 %v7143_v52, %s5680_s10 }
 0x457   :  { %1453 = vrot.lane.b32.xlu0 %v1437_v27, %s5693_s26 }
 0x45a   :  { %1455 = vrot.lane.b32.xlu1 %v1438_v33, %s5693_s26 }
 0x45b   :  { %1457 = vrot.lane.b32.xlu0 %v1439_v37, %s5693_s26 }
 0x45e   :  { %1459 = vrot.lane.b32.xlu1 %v1440_v38, %s5693_s26 }
 0x45f   :  { %1461 = vrot.lane.b32.xlu0 %v1441_v43, %s5693_s26 }
 0x462   :  { %1463 = vrot.lane.b32.xlu1 %v1442_v46, %s5693_s26 }
 0x463   :  { %1465 = vrot.lane.b32.xlu0 %v1443_v24, %s5693_s26 }
 0x466   :  { %1467 = vrot.lane.b32.xlu1 %v1444_v14, %s5693_s26 }
 0x467   :  { %3673 = vrot.lane.b32.xlu0 %v7145_v55, %s5680_s10 }
 0x46a   :  { %3669 = vrot.lane.b32.xlu1 %v7159_v20, %s5680_s10 }
 0x46b   :  { %3681 = vrot.lane.b32.xlu0 %v7161_v2, %s5680_s10 }
 0x46e   :  { %3677 = vrot.lane.b32.xlu1 %v7175_v29, %s5680_s10 }
 0x46f   :  { %3689 = vrot.lane.b32.xlu0 %v7177_v19, %s5680_s10 }
 0x472   :  { %3685 = vrot.lane.b32.xlu1 %v7189_v32, %s5680_s10 }
 0x473   :  { %3793 = vrot.lane.b32.xlu0 %v7079_v36, %s5682_s11 }
 0x476   :  { %3789 = vrot.lane.b32.xlu1 %v7087_v49, %s5682_s11 }
 0x477   :  { %3801 = vrot.lane.b32.xlu0 %v7089_v6, %s5682_s11 }
 0x47a   :  { %3797 = vrot.lane.b32.xlu1 %v7101_v61, %s5682_s11 }
 0x47b   :  { %3809 = vrot.lane.b32.xlu0 %v7103_v0, %s5682_s11 }
 0x47e   :  { %3805 = vrot.lane.b32.xlu1 %v7115_v7, %s5682_s11 }
 0x47f   :  { %3817 = vrot.lane.b32.xlu0 %v7117_v8, %s5682_s11 }
 0x482   :  { %3813 = vrot.lane.b32.xlu1 %v7129_v16, %s5682_s11 }
 0x483   :  { %3730 = vrot.lane.b32.xlu0 %v7131_v51, %s5681_s0 }
 0x486   :  { %3726 = vrot.lane.b32.xlu1 %v7143_v52, %s5681_s0 }
 0x487   :  { %3738 = vrot.lane.b32.xlu0 %v7145_v55, %s5681_s0 }
 0x48a   :  { %3734 = vrot.lane.b32.xlu1 %v7159_v20, %s5681_s0 }
 0x48b   :  { %3746 = vrot.lane.b32.xlu0 %v7161_v2, %s5681_s0 }
 0x48e   :  { %3742 = vrot.lane.b32.xlu1 %v7175_v29, %s5681_s0 }
 0x48f   :  { %3754 = vrot.lane.b32.xlu0 %v7177_v19, %s5681_s0 }
 0x492   :  { %3750 = vrot.lane.b32.xlu1 %v7189_v32, %s5681_s0 }
 0x493   :  { %3858 = vrot.lane.b32.xlu0 %v7079_v36, %s5683_s12 }
 0x496   :  { %3854 = vrot.lane.b32.xlu1 %v7087_v49, %s5683_s12 }
 0x497   :  { %3866 = vrot.lane.b32.xlu0 %v7089_v6, %s5683_s12 }
 0x49a   :  { %3862 = vrot.lane.b32.xlu1 %v7101_v61, %s5683_s12 }
 0x49b   :  { %3874 = vrot.lane.b32.xlu0 %v7103_v0, %s5683_s12 }
 0x49e   :  { %3870 = vrot.lane.b32.xlu1 %v7115_v7, %s5683_s12 }
 0x49f   :  { %3882 = vrot.lane.b32.xlu0 %v7117_v8, %s5683_s12 }
 0x4a2   :  { %3878 = vrot.lane.b32.xlu1 %v7129_v16, %s5683_s12 }
 0x4a3   :  { %3795 = vrot.lane.b32.xlu0 %v7131_v51, %s5682_s11 }
 0x4a5   :  { %v3664_v25 = vpop.permute.xlu0 %3663 }
 0x4a6   :  { %3710 = vst.msk [vmem:[#allocation3 + $0x10] sm:$0xff] %vm367_vm3, %v3664_v25  ;;  %3791 = vrot.lane.b32.xlu1 %v7143_v52, %s5682_s11 }
 0x4a7   :  { %3803 = vrot.lane.b32.xlu0 %v7145_v55, %s5682_s11 }
 0x4a8   :  { %v3660_v48 = vpop.permute.xlu1 %3659 }
 0x4a9   :  { %v3672_v10 = vpop.permute.xlu0 %3671  ;;  %3707 = vst.msk [vmem:[#allocation3] sm:$0xff] %vm367_vm3, %v3660_v48 }
 0x4aa   :  { %3714 = vst.msk [vmem:[#allocation3 + $0x30] sm:$0xff] %vm367_vm3, %v3672_v10  ;;  %3799 = vrot.lane.b32.xlu1 %v7159_v20, %s5682_s11 }
 0x4ab   :  { %3811 = vrot.lane.b32.xlu0 %v7161_v2, %s5682_s11 }
 0x4ac   :  { %v3668_v50 = vpop.permute.xlu1 %3667 }
 0x4ad   :  { %v3680_v31 = vpop.permute.xlu0 %3679  ;;  %3712 = vst.msk [vmem:[#allocation3 + $0x20] sm:$0xff] %vm367_vm3, %v3668_v50 }
 0x4ae   :  { %3718 = vst.msk [vmem:[#allocation3 + $0x50] sm:$0xff] %vm367_vm3, %v3680_v31  ;;  %3807 = vrot.lane.b32.xlu1 %v7175_v29, %s5682_s11 }
 0x4af   :  { %3819 = vrot.lane.b32.xlu0 %v7177_v19, %s5682_s11 }
 0x4b0   :  { %v3676_v41 = vpop.permute.xlu1 %3675 }
 0x4b1   :  { %v3688_v44 = vpop.permute.xlu0 %3687  ;;  %3716 = vst.msk [vmem:[#allocation3 + $0x40] sm:$0xff] %vm367_vm3, %v3676_v41 }
 0x4b2   :  { %3722 = vst.msk [vmem:[#allocation3 + $0x70] sm:$0xff] %vm367_vm3, %v3688_v44  ;;  %3815 = vrot.lane.b32.xlu1 %v7189_v32, %s5682_s11 }
 0x4b3   :  { %3923 = vrot.lane.b32.xlu0 %v7079_v36, %s5684_s14 }
 0x4b4   :  { %v3684_v47 = vpop.permute.xlu1 %3683 }
 0x4b5   :  { %v3729_v54 = vpop.permute.xlu0 %3728  ;;  %3720 = vst.msk [vmem:[#allocation3 + $0x60] sm:$0xff] %vm367_vm3, %v3684_v47  ;;  %vm1477_vm3 = vcmask 54280  }
 0x4b6   :  { %3775 = vst.msk [vmem:[#allocation3 + $0x10] sm:$0xff] %vm433_vm5, %v3729_v54  ;;  %3919 = vrot.lane.b32.xlu1 %v7087_v49, %s5684_s14 }
 0x4b7   :  { %3931 = vrot.lane.b32.xlu0 %v7089_v6, %s5684_s14 }
 0x4b8   :  { %v3725_v57 = vpop.permute.xlu1 %3724 }
 0x4b9   :  { %v3737_v23 = vpop.permute.xlu0 %3736  ;;  %3772 = vst.msk [vmem:[#allocation3] sm:$0xff] %vm433_vm5, %v3725_v57 }
 0x4ba   :  { %3779 = vst.msk [vmem:[#allocation3 + $0x30] sm:$0xff] %vm433_vm5, %v3737_v23  ;;  %3927 = vrot.lane.b32.xlu1 %v7101_v61, %s5684_s14 }
 0x4bb   :  { %3939 = vrot.lane.b32.xlu0 %v7103_v0, %s5684_s14 }
 0x4bc   :  { %v3733_v26 = vpop.permute.xlu1 %3732 }
 0x4bd   :  { %v3745_v35 = vpop.permute.xlu0 %3744  ;;  %3777 = vst.msk [vmem:[#allocation3 + $0x20] sm:$0xff] %vm433_vm5, %v3733_v26 }
 0x4be   :  { %3783 = vst.msk [vmem:[#allocation3 + $0x50] sm:$0xff] %vm433_vm5, %v3745_v35  ;;  %3935 = vrot.lane.b32.xlu1 %v7115_v7, %s5684_s14 }
 0x4bf   :  { %3947 = vrot.lane.b32.xlu0 %v7117_v8, %s5684_s14 }
 0x4c0   :  { %v3741_v39 = vpop.permute.xlu1 %3740 }
 0x4c1   :  { %v3753_v3 = vpop.permute.xlu0 %3752  ;;  %3781 = vst.msk [vmem:[#allocation3 + $0x40] sm:$0xff] %vm433_vm5, %v3741_v39 }
 0x4c2   :  { %3787 = vst.msk [vmem:[#allocation3 + $0x70] sm:$0xff] %vm433_vm5, %v3753_v3  ;;  %3943 = vrot.lane.b32.xlu1 %v7129_v16, %s5684_s14 }
 0x4c3   :  { %3860 = vrot.lane.b32.xlu0 %v7131_v51, %s5683_s12 }
 0x4c4   :  { %v3749_v62 = vpop.permute.xlu1 %3748 }
 0x4c5   :  { %v3666_v53 = vpop.permute.xlu0 %3665  ;;  %3785 = vst.msk [vmem:[#allocation3 + $0x60] sm:$0xff] %vm433_vm5, %v3749_v62  ;;  %vm3773_vm5 = vcmask 16400  }
 0x4c6   :  { %3711 = vst.msk [vmem:[#allocation3 + $0x18] sm:$0x1] %vm3708_vm1, %v3666_v53  ;;  %3856 = vrot.lane.b32.xlu1 %v7143_v52, %s5683_s12 }
 0x4c8   :  { %v3662_v17 = vpop.permute.xlu1 %3661 }
 0x4c9   :  { %v1454_v34 = vpop.permute.xlu0 %1453  ;;  %3709 = vst.msk [vmem:[#allocation3 + $0x8] sm:$0x1] %vm3708_vm1, %v3662_v17 }
 0x4ca   :  { %1478 = vst.msk [vmem:[#allocation2] sm:$0x3f] %vm1477_vm3, %v1454_v34 }
 0x4cb   :  { %1486 = vst.msk [vmem:[#allocation2] sm:$0x3f] %vm1255_vm10, %v5688_v40 }
 0x4cc   :  { %1495 = vst.msk [vmem:[#allocation2] sm:$0x3f] %vm1494_vm13, %v5688_v40  ;;  %v1456_v15 = vpop.permute.xlu1 %1455 }
 0x4cd   :  { %v1458_v59 = vpop.permute.xlu0 %1457  ;;  %1479 = vst.msk [vmem:[#allocation2 + $0x10] sm:$0x3f] %vm1477_vm3, %v1456_v15 }
 0x4ce   :  { %1480 = vst.msk [vmem:[#allocation2 + $0x20] sm:$0x3f] %vm1477_vm3, %v1458_v59 }
 0x4cf   :  { %1487 = vst.msk [vmem:[#allocation2 + $0x10] sm:$0x3f] %vm1255_vm10, %v5688_v40  ;;  %1488 = vst.msk [vmem:[#allocation2 + $0x20] sm:$0x3f] %vm1255_vm10, %v5688_v40 }
 0x4d0   :  { %1496 = vst.msk [vmem:[#allocation2 + $0x10] sm:$0x3f] %vm1494_vm13, %v5688_v40  ;;  %1497 = vst.msk [vmem:[#allocation2 + $0x20] sm:$0x3f] %vm1494_vm13, %v5688_v40  ;;  %v1460_v45 = vpop.permute.xlu1 %1459 }
 0x4d1   :  { %v1462_v60 = vpop.permute.xlu0 %1461  ;;  %1481 = vst.msk [vmem:[#allocation2 + $0x30] sm:$0x3f] %vm1477_vm3, %v1460_v45 }
 0x4d2   :  { %1482 = vst.msk [vmem:[#allocation2 + $0x40] sm:$0x3f] %vm1477_vm3, %v1462_v60 }
 0x4d3   :  { %v7338_v63 = vld [vmem:[#allocation2] sm:$0x3f]  ;;  %1489 = vst.msk [vmem:[#allocation2 + $0x30] sm:$0x3f] %vm1255_vm10, %v5688_v40  ;;  %1490 = vst.msk [vmem:[#allocation2 + $0x40] sm:$0x3f] %vm1255_vm10, %v5688_v40 }
 0x4d4   :  { %1625 = vst.msk [vmem:[#allocation2] sm:$0x1] %vm1624_vm12, %v5688_v40  ;;  %1519 = vrot.lane.b32.xlu0 %v7338_v63, %s5679_s13  ;;  %v1464_v58 = vpop.permute.xlu1 %1463 }
 0x4d5   :  { %1498 = vst.msk [vmem:[#allocation2 + $0x30] sm:$0x3f] %vm1494_vm13, %v5688_v40  ;;  %1499 = vst.msk [vmem:[#allocation2 + $0x40] sm:$0x3f] %vm1494_vm13, %v5688_v40  ;;  %v1466_v42 = vpop.permute.xlu0 %1465 }
 0x4d6   :  { %1483 = vst.msk [vmem:[#allocation2 + $0x50] sm:$0x3f] %vm1477_vm3, %v1464_v58  ;;  %1484 = vst.msk [vmem:[#allocation2 + $0x60] sm:$0x3f] %vm1477_vm3, %v1466_v42 }
 0x4d7   :  { %v7354_v5 = vld [vmem:[#allocation2 + $0x10] sm:$0x3f]  ;;  %v7356_v1 = vld [vmem:[#allocation2 + $0x20] sm:$0x3f]  ;;  %1491 = vst.msk [vmem:[#allocation2 + $0x50] sm:$0x3f] %vm1255_vm10, %v5688_v40 }
 0x4d8   :  { %1492 = vst.msk [vmem:[#allocation2 + $0x60] sm:$0x3f] %vm1255_vm10, %v5688_v40  ;;  %1521 = vrot.lane.b32.xlu1 %v7354_v5, %s5679_s13  ;;  %1523 = vrot.lane.b32.xlu0 %v7356_v1, %s5679_s13  ;;  %v1468_v4 = vpop.permute.xlu1 %1467 }
 0x4d9   :  { %1626 = vst.msk [vmem:[#allocation2 + $0x10] sm:$0x1] %vm1624_vm12, %v5688_v40  ;;  %1627 = vst.msk [vmem:[#allocation2 + $0x20] sm:$0x1] %vm1624_vm12, %v5688_v40  ;;  %v3674_v21 = vpop.permute.xlu0 %3673 }
 0x4da   :  { %1500 = vst.msk [vmem:[#allocation2 + $0x50] sm:$0x3f] %vm1494_vm13, %v5688_v40  ;;  %1501 = vst.msk [vmem:[#allocation2 + $0x60] sm:$0x3f] %vm1494_vm13, %v5688_v40 }
 0x4db   :  { %1485 = vst.msk [vmem:[#allocation2 + $0x70] sm:$0x3f] %vm1477_vm3, %v1468_v4  ;;  %vm10888_vm3 = vcmask 80968  }
 0x4dc   :  { %3715 = vst.msk [vmem:[#allocation3 + $0x38] sm:$0x1] %vm3708_vm1, %v3674_v21  ;;  %v7376_v22 = vld [vmem:[#allocation2 + $0x30] sm:$0x3f]  ;;  %v7378_v28 = vld [vmem:[#allocation2 + $0x40] sm:$0x3f]  ;;  %v3670_v18 = vpop.permute.xlu1 %3669 }
 0x4dd   :  { %1493 = vst.msk [vmem:[#allocation2 + $0x70] sm:$0x3f] %vm1255_vm10, %v5688_v40  ;;  %1525 = vrot.lane.b32.xlu1 %v7376_v22, %s5679_s13  ;;  %1527 = vrot.lane.b32.xlu0 %v7378_v28, %s5679_s13  ;;  %v3682_v30 = vpop.permute.xlu0 %3681  ;;  %vm1615_vm10 = vcmask 62480  }
 0x4de   :  { %1628 = vst.msk [vmem:[#allocation2 + $0x30] sm:$0x1] %vm1624_vm12, %v5688_v40  ;;  %1629 = vst.msk [vmem:[#allocation2 + $0x40] sm:$0x1] %vm1624_vm12, %v5688_v40 }
 0x4df   :  { %1502 = vst.msk [vmem:[#allocation2 + $0x70] sm:$0x3f] %vm1494_vm13, %v5688_v40  ;;  %vm10889_vm13 = vmmov %vm10888_vm3 }
 0x4e0   :  { %3713 = vst.msk [vmem:[#allocation3 + $0x28] sm:$0x1] %vm3708_vm1, %v3670_v18  ;;  %3719 = vst.msk [vmem:[#allocation3 + $0x58] sm:$0x1] %vm3708_vm1, %v3682_v30  ;;  %v3678_v37 = vpop.permute.xlu1 %3677 }
 0x4e1   :  { %v7394_v27 = vld [vmem:[#allocation2 + $0x50] sm:$0x3f]  ;;  %v7396_v33 = vld [vmem:[#allocation2 + $0x60] sm:$0x3f]  ;;  %v3690_v38 = vpop.permute.xlu0 %3689  ;;  %3717 = vst.msk [vmem:[#allocation3 + $0x48] sm:$0x1] %vm3708_vm1, %v3678_v37 }
 0x4e2   :  { %1630 = vst.msk [vmem:[#allocation2 + $0x50] sm:$0x1] %vm1624_vm12, %v5688_v40  ;;  %1631 = vst.msk [vmem:[#allocation2 + $0x60] sm:$0x1] %vm1624_vm12, %v5688_v40  ;;  %1529 = vrot.lane.b32.xlu1 %v7394_v27, %s5679_s13  ;;  %1531 = vrot.lane.b32.xlu0 %v7396_v33, %s5679_s13 }
 0x4e3   :  { %3723 = vst.msk [vmem:[#allocation3 + $0x78] sm:$0x1] %vm3708_vm1, %v3690_v38 }
 0x4e4   :  { %v3686_v46 = vpop.permute.xlu1 %3685 }
 0x4e5   :  { %v3794_v24 = vpop.permute.xlu0 %3793  ;;  %3721 = vst.msk [vmem:[#allocation3 + $0x68] sm:$0x1] %vm3708_vm1, %v3686_v46  ;;  %vm1650_vm1 = vcmask 87104  }
 0x4e6   :  { %v7408_v43 = vld [vmem:[#allocation2 + $0x70] sm:$0x3f]  ;;  %1551 = vrot.lane.b32.xlu0 %v7338_v63, %s5680_s10  ;;  %3840 = vst.msk [vmem:[#allocation3 + $0x10] sm:$0xff] %vm499_vm7, %v3794_v24 }
 0x4e7   :  { %1632 = vst.msk [vmem:[#allocation2 + $0x70] sm:$0x1] %vm1624_vm12, %v5688_v40  ;;  %1533 = vrot.lane.b32.xlu1 %v7408_v43, %s5679_s13 }
 0x4e8   :  { %v3790_v14 = vpop.permute.xlu1 %3789 }
 0x4e9   :  { %v3802_v25 = vpop.permute.xlu0 %3801  ;;  %3837 = vst.msk [vmem:[#allocation3] sm:$0xff] %vm499_vm7, %v3790_v14 }
 0x4ea   :  { %1555 = vrot.lane.b32.xlu0 %v7356_v1, %s5680_s10  ;;  %3844 = vst.msk [vmem:[#allocation3 + $0x30] sm:$0xff] %vm499_vm7, %v3802_v25 }
 0x4eb   :  { %1553 = vrot.lane.b32.xlu1 %v7354_v5, %s5680_s10 }
 0x4ec   :  { %v3798_v48 = vpop.permute.xlu1 %3797 }
 0x4ed   :  { %v3810_v10 = vpop.permute.xlu0 %3809  ;;  %3842 = vst.msk [vmem:[#allocation3 + $0x20] sm:$0xff] %vm499_vm7, %v3798_v48 }
 0x4ee   :  { %1559 = vrot.lane.b32.xlu0 %v7378_v28, %s5680_s10  ;;  %3848 = vst.msk [vmem:[#allocation3 + $0x50] sm:$0xff] %vm499_vm7, %v3810_v10 }
 0x4ef   :  { %1557 = vrot.lane.b32.xlu1 %v7376_v22, %s5680_s10 }
 0x4f0   :  { %v3806_v50 = vpop.permute.xlu1 %3805 }
 0x4f1   :  { %v3818_v31 = vpop.permute.xlu0 %3817  ;;  %3846 = vst.msk [vmem:[#allocation3 + $0x40] sm:$0xff] %vm499_vm7, %v3806_v50 }
 0x4f2   :  { %1563 = vrot.lane.b32.xlu0 %v7396_v33, %s5680_s10  ;;  %3852 = vst.msk [vmem:[#allocation3 + $0x70] sm:$0xff] %vm499_vm7, %v3818_v31 }
 0x4f3   :  { %1561 = vrot.lane.b32.xlu1 %v7394_v27, %s5680_s10 }
 0x4f4   :  { %v3814_v41 = vpop.permute.xlu1 %3813 }
 0x4f5   :  { %v3731_v44 = vpop.permute.xlu0 %3730  ;;  %3850 = vst.msk [vmem:[#allocation3 + $0x60] sm:$0xff] %vm499_vm7, %v3814_v41  ;;  %vm3838_vm7 = vcmask 24600  }
 0x4f6   :  { %3868 = vrot.lane.b32.xlu0 %v7145_v55, %s5683_s12  ;;  %3776 = vst.msk [vmem:[#allocation3 + $0x18] sm:$0x1] %vm3773_vm5, %v3731_v44 }
 0x4f7   :  { %1565 = vrot.lane.b32.xlu1 %v7408_v43, %s5680_s10 }
 0x4f8   :  { %v3727_v47 = vpop.permute.xlu1 %3726 }
 0x4f9   :  { %v3739_v54 = vpop.permute.xlu0 %3738  ;;  %3774 = vst.msk [vmem:[#allocation3 + $0x8] sm:$0x1] %vm3773_vm5, %v3727_v47 }
 0x4fa   :  { %3876 = vrot.lane.b32.xlu0 %v7161_v2, %s5683_s12  ;;  %3780 = vst.msk [vmem:[#allocation3 + $0x38] sm:$0x1] %vm3773_vm5, %v3739_v54 }
 0x4fb   :  { %3864 = vrot.lane.b32.xlu1 %v7159_v20, %s5683_s12 }
 0x4fc   :  { %v3735_v57 = vpop.permute.xlu1 %3734 }
 0x4fd   :  { %v3747_v23 = vpop.permute.xlu0 %3746  ;;  %3778 = vst.msk [vmem:[#allocation3 + $0x28] sm:$0x1] %vm3773_vm5, %v3735_v57 }
 0x4fe   :  { %3884 = vrot.lane.b32.xlu0 %v7177_v19, %s5683_s12  ;;  %3784 = vst.msk [vmem:[#allocation3 + $0x58] sm:$0x1] %vm3773_vm5, %v3747_v23 }
 0x4ff   :  { %3872 = vrot.lane.b32.xlu1 %v7175_v29, %s5683_s12 }
 0x500   :  { %v3743_v26 = vpop.permute.xlu1 %3742 }
 0x501   :  { %v3755_v35 = vpop.permute.xlu0 %3754  ;;  %3782 = vst.msk [vmem:[#allocation3 + $0x48] sm:$0x1] %vm3773_vm5, %v3743_v26 }
 0x502   :  { %3988 = vrot.lane.b32.xlu0 %v7079_v36, %s5685_s15  ;;  %3788 = vst.msk [vmem:[#allocation3 + $0x78] sm:$0x1] %vm3773_vm5, %v3755_v35 }
 0x503   :  { %3880 = vrot.lane.b32.xlu1 %v7189_v32, %s5683_s12 }
 0x504   :  { %v3751_v39 = vpop.permute.xlu1 %3750 }
 0x505   :  { %v3859_v3 = vpop.permute.xlu0 %3858  ;;  %3786 = vst.msk [vmem:[#allocation3 + $0x68] sm:$0x1] %vm3773_vm5, %v3751_v39  ;;  %vm10890_vm5 = vmmov %vm10888_vm3 }
 0x506   :  { %3996 = vrot.lane.b32.xlu0 %v7089_v6, %s5685_s15  ;;  %3905 = vst.msk [vmem:[#allocation3 + $0x10] sm:$0xff] %vm565_vm9, %v3859_v3 }
 0x507   :  { %3984 = vrot.lane.b32.xlu1 %v7087_v49, %s5685_s15 }
 0x508   :  { %v3855_v62 = vpop.permute.xlu1 %3854 }
 0x509   :  { %v3867_v53 = vpop.permute.xlu0 %3866  ;;  %3902 = vst.msk [vmem:[#allocation3] sm:$0xff] %vm565_vm9, %v3855_v62 }
 0x50a   :  { %4004 = vrot.lane.b32.xlu0 %v7103_v0, %s5685_s15  ;;  %3909 = vst.msk [vmem:[#allocation3 + $0x30] sm:$0xff] %vm565_vm9, %v3867_v53 }
 0x50b   :  { %3992 = vrot.lane.b32.xlu1 %v7101_v61, %s5685_s15 }
 0x50c   :  { %v3863_v17 = vpop.permute.xlu1 %3862 }
 0x50d   :  { %v3875_v34 = vpop.permute.xlu0 %3874  ;;  %3907 = vst.msk [vmem:[#allocation3 + $0x20] sm:$0xff] %vm565_vm9, %v3863_v17 }
 0x50e   :  { %4012 = vrot.lane.b32.xlu0 %v7117_v8, %s5685_s15  ;;  %3913 = vst.msk [vmem:[#allocation3 + $0x50] sm:$0xff] %vm565_vm9, %v3875_v34 }
 0x50f   :  { %4000 = vrot.lane.b32.xlu1 %v7115_v7, %s5685_s15 }
 0x510   :  { %v3871_v15 = vpop.permute.xlu1 %3870 }
 0x511   :  { %v3883_v59 = vpop.permute.xlu0 %3882  ;;  %3911 = vst.msk [vmem:[#allocation3 + $0x40] sm:$0xff] %vm565_vm9, %v3871_v15 }
 0x512   :  { %3925 = vrot.lane.b32.xlu0 %v7131_v51, %s5684_s14  ;;  %3917 = vst.msk [vmem:[#allocation3 + $0x70] sm:$0xff] %vm565_vm9, %v3883_v59 }
 0x513   :  { %4008 = vrot.lane.b32.xlu1 %v7129_v16, %s5685_s15 }
 0x514   :  { %v3879_v45 = vpop.permute.xlu1 %3878 }
 0x515   :  { %v3796_v60 = vpop.permute.xlu0 %3795  ;;  %3915 = vst.msk [vmem:[#allocation3 + $0x60] sm:$0xff] %vm565_vm9, %v3879_v45  ;;  %vm3903_vm9 = vcmask 32800  }
 0x516   :  { %3933 = vrot.lane.b32.xlu0 %v7145_v55, %s5684_s14  ;;  %3841 = vst.msk [vmem:[#allocation3 + $0x18] sm:$0x1] %vm3838_vm7, %v3796_v60 }
 0x517   :  { %3921 = vrot.lane.b32.xlu1 %v7143_v52, %s5684_s14 }
 0x518   :  { %v3792_v58 = vpop.permute.xlu1 %3791 }
 0x519   :  { %v3804_v42 = vpop.permute.xlu0 %3803  ;;  %3839 = vst.msk [vmem:[#allocation3 + $0x8] sm:$0x1] %vm3838_vm7, %v3792_v58 }
 0x51a   :  { %3941 = vrot.lane.b32.xlu0 %v7161_v2, %s5684_s14  ;;  %3845 = vst.msk [vmem:[#allocation3 + $0x38] sm:$0x1] %vm3838_vm7, %v3804_v42 }
 0x51b   :  { %3929 = vrot.lane.b32.xlu1 %v7159_v20, %s5684_s14 }
 0x51c   :  { %v3800_v4 = vpop.permute.xlu1 %3799 }
 0x51d   :  { %v3812_v21 = vpop.permute.xlu0 %3811  ;;  %3843 = vst.msk [vmem:[#allocation3 + $0x28] sm:$0x1] %vm3838_vm7, %v3800_v4 }
 0x51e   :  { %3949 = vrot.lane.b32.xlu0 %v7177_v19, %s5684_s14  ;;  %3849 = vst.msk [vmem:[#allocation3 + $0x58] sm:$0x1] %vm3838_vm7, %v3812_v21 }
 0x51f   :  { %3937 = vrot.lane.b32.xlu1 %v7175_v29, %s5684_s14 }
 0x520   :  { %v3808_v18 = vpop.permute.xlu1 %3807 }
 0x521   :  { %v3820_v30 = vpop.permute.xlu0 %3819  ;;  %3847 = vst.msk [vmem:[#allocation3 + $0x48] sm:$0x1] %vm3838_vm7, %v3808_v18 }
 0x522   :  { %4053 = vrot.lane.b32.xlu0 %v7079_v36, %s5686_s16  ;;  %3853 = vst.msk [vmem:[#allocation3 + $0x78] sm:$0x1] %vm3838_vm7, %v3820_v30 }
 0x523   :  { %3945 = vrot.lane.b32.xlu1 %v7189_v32, %s5684_s14 }
 0x524   :  { %v3816_v37 = vpop.permute.xlu1 %3815 }
 0x525   :  { %v3924_v38 = vpop.permute.xlu0 %3923  ;;  %3851 = vst.msk [vmem:[#allocation3 + $0x68] sm:$0x1] %vm3838_vm7, %v3816_v37  ;;  %vm10891_vm7 = vcmask 107520  }
 0x526   :  { %4061 = vrot.lane.b32.xlu0 %v7089_v6, %s5686_s16  ;;  %3970 = vst.msk [vmem:[#allocation3 + $0x10] sm:$0xff] %vm631_vm11, %v3924_v38 }
 0x527   :  { %4049 = vrot.lane.b32.xlu1 %v7087_v49, %s5686_s16 }
 0x528   :  { %v3920_v46 = vpop.permute.xlu1 %3919 }
 0x529   :  { %v3932_v24 = vpop.permute.xlu0 %3931  ;;  %3967 = vst.msk [vmem:[#allocation3] sm:$0xff] %vm631_vm11, %v3920_v46 }
 0x52a   :  { %4069 = vrot.lane.b32.xlu0 %v7103_v0, %s5686_s16  ;;  %3974 = vst.msk [vmem:[#allocation3 + $0x30] sm:$0xff] %vm631_vm11, %v3932_v24 }
 0x52b   :  { %4057 = vrot.lane.b32.xlu1 %v7101_v61, %s5686_s16 }
 0x52c   :  { %v3928_v14 = vpop.permute.xlu1 %3927 }
 0x52d   :  { %v3940_v25 = vpop.permute.xlu0 %3939  ;;  %3972 = vst.msk [vmem:[#allocation3 + $0x20] sm:$0xff] %vm631_vm11, %v3928_v14 }
 0x52e   :  { %4077 = vrot.lane.b32.xlu0 %v7117_v8, %s5686_s16  ;;  %3978 = vst.msk [vmem:[#allocation3 + $0x50] sm:$0xff] %vm631_vm11, %v3940_v25 }
 0x52f   :  { %4065 = vrot.lane.b32.xlu1 %v7115_v7, %s5686_s16 }
 0x530   :  { %v3936_v48 = vpop.permute.xlu1 %3935 }
 0x531   :  { %v3948_v10 = vpop.permute.xlu0 %3947  ;;  %3976 = vst.msk [vmem:[#allocation3 + $0x40] sm:$0xff] %vm631_vm11, %v3936_v48 }
 0x532   :  { %3990 = vrot.lane.b32.xlu0 %v7131_v51, %s5685_s15  ;;  %3982 = vst.msk [vmem:[#allocation3 + $0x70] sm:$0xff] %vm631_vm11, %v3948_v10 }
 0x533   :  { %4073 = vrot.lane.b32.xlu1 %v7129_v16, %s5686_s16 }
 0x534   :  { %v3944_v50 = vpop.permute.xlu1 %3943 }
 0x535   :  { %v3861_v31 = vpop.permute.xlu0 %3860  ;;  %3980 = vst.msk [vmem:[#allocation3 + $0x60] sm:$0xff] %vm631_vm11, %v3944_v50  ;;  %vm3968_vm11 = vcmask 41000  }
 0x536   :  { %3998 = vrot.lane.b32.xlu0 %v7145_v55, %s5685_s15  ;;  %3906 = vst.msk [vmem:[#allocation3 + $0x18] sm:$0x1] %vm3903_vm9, %v3861_v31 }
 0x537   :  { %3986 = vrot.lane.b32.xlu1 %v7143_v52, %s5685_s15 }
 0x538   :  { %v3857_v41 = vpop.permute.xlu1 %3856 }
 0x539   :  { %3904 = vst.msk [vmem:[#allocation3 + $0x8] sm:$0x1] %vm3903_vm9, %v3857_v41 }
 0x53a   :  { %4006 = vrot.lane.b32.xlu0 %v7161_v2, %s5685_s15 }
 0x53b   :  { %3994 = vrot.lane.b32.xlu1 %v7159_v20, %s5685_s15 }
 0x53e   :  { %4014 = vrot.lane.b32.xlu0 %v7177_v19, %s5685_s15 }
 0x53f   :  { %4002 = vrot.lane.b32.xlu1 %v7175_v29, %s5685_s15 }
 0x542   :  { %4118 = vrot.lane.b32.xlu0 %v7079_v36, %s5687_s17 }
 0x543   :  { %4010 = vrot.lane.b32.xlu1 %v7189_v32, %s5685_s15 }
 0x546   :  { %4126 = vrot.lane.b32.xlu0 %v7089_v6, %s5687_s17  ;;  %v1520_v44 = vpop.permute.xlu0 %1519 }
 0x547   :  { %4114 = vrot.lane.b32.xlu1 %v7087_v49, %s5687_s17  ;;  %v1543_v39 = vmax.f32 %v7338_v63, %v1520_v44 }
 0x54a   :  { %4134 = vrot.lane.b32.xlu0 %v7103_v0, %s5687_s17  ;;  %v1522_v47 = vpop.permute.xlu1 %1521  ;;  %v1524_v54 = vpop.permute.xlu0 %1523 }
 0x54b   :  { %4122 = vrot.lane.b32.xlu1 %v7101_v61, %s5687_s17  ;;  %v1544_v17 = vmax.f32 %v7354_v5, %v1522_v47  ;;  %v1545_v34 = vmax.f32 %v7356_v1, %v1524_v54 }
 0x54e   :  { %4142 = vrot.lane.b32.xlu0 %v7117_v8, %s5687_s17 }
 0x54f   :  { %4130 = vrot.lane.b32.xlu1 %v7115_v7, %s5687_s17  ;;  %v1526_v57 = vpop.permute.xlu1 %1525  ;;  %v1528_v23 = vpop.permute.xlu0 %1527 }
 0x550   :  { %v1546_v58 = vmax.f32 %v7376_v22, %v1526_v57  ;;  %v1547_v63 = vmax.f32 %v7378_v28, %v1528_v23 }
 0x552   :  { %4055 = vrot.lane.b32.xlu0 %v7131_v51, %s5686_s16 }
 0x553   :  { %4138 = vrot.lane.b32.xlu1 %v7129_v16, %s5687_s17 }
 0x554   :  { %v1530_v26 = vpop.permute.xlu1 %1529  ;;  %v1532_v35 = vpop.permute.xlu0 %1531 }
 0x555   :  { %v1548_v1 = vmax.f32 %v7394_v27, %v1530_v26  ;;  %v1549_v18 = vmax.f32 %v7396_v33, %v1532_v35 }
 0x556   :  { %4063 = vrot.lane.b32.xlu0 %v7145_v55, %s5686_s16 }
 0x557   :  { %4051 = vrot.lane.b32.xlu1 %v7143_v52, %s5686_s16 }
 0x558   :  { %v1552_v62 = vpop.permute.xlu0 %1551 }
 0x559   :  { %v1534_v3 = vpop.permute.xlu1 %1533  ;;  %v1575_v53 = vmax.f32 %v1543_v39, %v1552_v62 }
 0x55a   :  { %v1550_v38 = vmax.f32 %v7408_v43, %v1534_v3 }
 0x55b   :  { %4059 = vrot.lane.b32.xlu1 %v7159_v20, %s5686_s16  ;;  %1591 = vrot.lane.b32.xlu0 %v1575_v53, %s5690_s19 }
 0x55c   :  { %v1556_v59 = vpop.permute.xlu0 %1555 }
 0x55d   :  { %v1554_v15 = vpop.permute.xlu1 %1553  ;;  %v1577_v60 = vmax.f32 %v1545_v34, %v1556_v59 }
 0x55e   :  { %v1576_v45 = vmax.f32 %v1544_v17, %v1554_v15 }
 0x55f   :  { %1595 = vrot.lane.b32.xlu0 %v1577_v60, %s5690_s19 }
 0x560   :  { %1593 = vrot.lane.b32.xlu1 %v1576_v45, %s5690_s19  ;;  %v1560_v4 = vpop.permute.xlu0 %1559 }
 0x561   :  { %v1558_v42 = vpop.permute.xlu1 %1557  ;;  %v1579_v5 = vmax.f32 %v1547_v63, %v1560_v4 }
 0x562   :  { %v1578_v21 = vmax.f32 %v1546_v58, %v1558_v42 }
 0x563   :  { %1599 = vrot.lane.b32.xlu0 %v1579_v5, %s5690_s19 }
 0x564   :  { %1597 = vrot.lane.b32.xlu1 %v1578_v21, %s5690_s19  ;;  %v1564_v22 = vpop.permute.xlu0 %1563 }
 0x565   :  { %v1562_v30 = vpop.permute.xlu1 %1561  ;;  %v1581_v28 = vmax.f32 %v1549_v18, %v1564_v22 }
 0x566   :  { %v1580_v37 = vmax.f32 %v1548_v1, %v1562_v30 }
 0x567   :  { %1603 = vrot.lane.b32.xlu0 %v1581_v28, %s5690_s19 }
 0x568   :  { %1601 = vrot.lane.b32.xlu1 %v1580_v37, %s5690_s19  ;;  %v3869_v24 = vpop.permute.xlu0 %3868 }
 0x569   :  { %v1566_v46 = vpop.permute.xlu1 %1565  ;;  %3910 = vst.msk [vmem:[#allocation3 + $0x38] sm:$0x1] %vm3903_vm9, %v3869_v24 }
 0x56a   :  { %v1582_v14 = vmax.f32 %v1550_v38, %v1566_v46 }
 0x56b   :  { %4071 = vrot.lane.b32.xlu0 %v7161_v2, %s5686_s16 }
 0x56c   :  { %1605 = vrot.lane.b32.xlu1 %v1582_v14, %s5690_s19  ;;  %v3877_v33 = vpop.permute.xlu0 %3876 }
 0x56d   :  { %v3865_v27 = vpop.permute.xlu1 %3864  ;;  %3914 = vst.msk [vmem:[#allocation3 + $0x58] sm:$0x1] %vm3903_vm9, %v3877_v33 }
 0x56e   :  { %3908 = vst.msk [vmem:[#allocation3 + $0x28] sm:$0x1] %vm3903_vm9, %v3865_v27 }
 0x56f   :  { %4079 = vrot.lane.b32.xlu0 %v7177_v19, %s5686_s16 }
 0x570   :  { %4067 = vrot.lane.b32.xlu1 %v7175_v29, %s5686_s16  ;;  %v3885_v25 = vpop.permute.xlu0 %3884 }
 0x571   :  { %v3873_v43 = vpop.permute.xlu1 %3872  ;;  %3918 = vst.msk [vmem:[#allocation3 + $0x78] sm:$0x1] %vm3903_vm9, %v3885_v25 }
 0x572   :  { %3912 = vst.msk [vmem:[#allocation3 + $0x48] sm:$0x1] %vm3903_vm9, %v3873_v43 }
 0x573   :  { %4183 = vrot.lane.b32.xlu0 %v7079_v36, %s5689_s18 }
 0x574   :  { %4075 = vrot.lane.b32.xlu1 %v7189_v32, %s5686_s16  ;;  %v3989_v10 = vpop.permute.xlu0 %3988 }
 0x575   :  { %v3881_v48 = vpop.permute.xlu1 %3880  ;;  %4035 = vst.msk [vmem:[#allocation3 + $0x10] sm:$0xff] %vm697_vm14, %v3989_v10 }
 0x576   :  { %3916 = vst.msk [vmem:[#allocation3 + $0x68] sm:$0x1] %vm3903_vm9, %v3881_v48  ;;  %vm10892_vm9 = vmmov %vm10888_vm3 }
 0x577   :  { %4191 = vrot.lane.b32.xlu0 %v7089_v6, %s5689_s18 }
 0x578   :  { %4179 = vrot.lane.b32.xlu1 %v7087_v49, %s5689_s18  ;;  %v3997_v31 = vpop.permute.xlu0 %3996 }
 0x579   :  { %v3985_v50 = vpop.permute.xlu1 %3984  ;;  %4039 = vst.msk [vmem:[#allocation3 + $0x30] sm:$0xff] %vm697_vm14, %v3997_v31 }
 0x57a   :  { %4032 = vst.msk [vmem:[#allocation3] sm:$0xff] %vm697_vm14, %v3985_v50 }
 0x57b   :  { %4199 = vrot.lane.b32.xlu0 %v7103_v0, %s5689_s18 }
 0x57c   :  { %4187 = vrot.lane.b32.xlu1 %v7101_v61, %s5689_s18  ;;  %v4005_v41 = vpop.permute.xlu0 %4004 }
 0x57d   :  { %v3993_v36 = vpop.permute.xlu1 %3992  ;;  %4043 = vst.msk [vmem:[#allocation3 + $0x50] sm:$0xff] %vm697_vm14, %v4005_v41 }
 0x57e   :  { %4037 = vst.msk [vmem:[#allocation3 + $0x20] sm:$0xff] %vm697_vm14, %v3993_v36 }
 0x57f   :  { %4207 = vrot.lane.b32.xlu0 %v7117_v8, %s5689_s18 }
 0x580   :  { %4195 = vrot.lane.b32.xlu1 %v7115_v7, %s5689_s18  ;;  %v4013_v6 = vpop.permute.xlu0 %4012 }
 0x581   :  { %v4001_v49 = vpop.permute.xlu1 %4000  ;;  %4047 = vst.msk [vmem:[#allocation3 + $0x70] sm:$0xff] %vm697_vm14, %v4013_v6 }
 0x582   :  { %4041 = vst.msk [vmem:[#allocation3 + $0x40] sm:$0xff] %vm697_vm14, %v4001_v49 }
 0x583   :  { %4120 = vrot.lane.b32.xlu0 %v7131_v51, %s5687_s17 }
 0x584   :  { %4203 = vrot.lane.b32.xlu1 %v7129_v16, %s5689_s18  ;;  %v3926_v0 = vpop.permute.xlu0 %3925 }
 0x585   :  { %v4009_v61 = vpop.permute.xlu1 %4008  ;;  %3971 = vst.msk [vmem:[#allocation3 + $0x18] sm:$0x1] %vm3968_vm11, %v3926_v0 }
 0x586   :  { %4045 = vst.msk [vmem:[#allocation3 + $0x60] sm:$0xff] %vm697_vm14, %v4009_v61  ;;  %vm4033_vm14 = vcmask 49200  }
 0x587   :  { %4128 = vrot.lane.b32.xlu0 %v7145_v55, %s5687_s17 }
 0x588   :  { %4116 = vrot.lane.b32.xlu1 %v7143_v52, %s5687_s17  ;;  %v3934_v8 = vpop.permute.xlu0 %3933 }
 0x589   :  { %v3922_v7 = vpop.permute.xlu1 %3921  ;;  %3975 = vst.msk [vmem:[#allocation3 + $0x38] sm:$0x1] %vm3968_vm11, %v3934_v8 }
 0x58a   :  { %3969 = vst.msk [vmem:[#allocation3 + $0x8] sm:$0x1] %vm3968_vm11, %v3922_v7 }
 0x58b   :  { %4136 = vrot.lane.b32.xlu0 %v7161_v2, %s5687_s17 }
 0x58c   :  { %4124 = vrot.lane.b32.xlu1 %v7159_v20, %s5687_s17  ;;  %v3942_v44 = vpop.permute.xlu0 %3941 }
 0x58d   :  { %v3930_v16 = vpop.permute.xlu1 %3929  ;;  %3979 = vst.msk [vmem:[#allocation3 + $0x58] sm:$0x1] %vm3968_vm11, %v3942_v44 }
 0x58e   :  { %3973 = vst.msk [vmem:[#allocation3 + $0x28] sm:$0x1] %vm3968_vm11, %v3930_v16 }
 0x58f   :  { %4144 = vrot.lane.b32.xlu0 %v7177_v19, %s5687_s17 }
 0x590   :  { %4132 = vrot.lane.b32.xlu1 %v7175_v29, %s5687_s17  ;;  %v3950_v54 = vpop.permute.xlu0 %3949 }
 0x591   :  { %v3938_v47 = vpop.permute.xlu1 %3937  ;;  %3983 = vst.msk [vmem:[#allocation3 + $0x78] sm:$0x1] %vm3968_vm11, %v3950_v54 }
 0x592   :  { %3977 = vst.msk [vmem:[#allocation3 + $0x48] sm:$0x1] %vm3968_vm11, %v3938_v47 }
 0x594   :  { %4140 = vrot.lane.b32.xlu1 %v7189_v32, %s5687_s17  ;;  %v4054_v23 = vpop.permute.xlu0 %4053 }
 0x595   :  { %v3946_v57 = vpop.permute.xlu1 %3945  ;;  %4100 = vst.msk [vmem:[#allocation3 + $0x10] sm:$0xff] %vm763_vm0, %v4054_v23 }
 0x596   :  { %3981 = vst.msk [vmem:[#allocation3 + $0x68] sm:$0x1] %vm3968_vm11, %v3946_v57  ;;  %vm10893_vm11 = vmmov %vm10888_vm3 }
 0x598   :  { %v4062_v35 = vpop.permute.xlu0 %4061 }
 0x599   :  { %v4050_v26 = vpop.permute.xlu1 %4049  ;;  %4104 = vst.msk [vmem:[#allocation3 + $0x30] sm:$0xff] %vm763_vm0, %v4062_v35 }
 0x59a   :  { %4097 = vst.msk [vmem:[#allocation3] sm:$0xff] %vm763_vm0, %v4050_v26 }
 0x59c   :  { %v4070_v3 = vpop.permute.xlu0 %4069 }
 0x59d   :  { %v4058_v39 = vpop.permute.xlu1 %4057  ;;  %4108 = vst.msk [vmem:[#allocation3 + $0x50] sm:$0xff] %vm763_vm0, %v4070_v3 }
 0x59e   :  { %4102 = vst.msk [vmem:[#allocation3 + $0x20] sm:$0xff] %vm763_vm0, %v4058_v39 }
 0x5a0   :  { %v4078_v53 = vpop.permute.xlu0 %4077 }
 0x5a1   :  { %v4066_v62 = vpop.permute.xlu1 %4065  ;;  %4112 = vst.msk [vmem:[#allocation3 + $0x70] sm:$0xff] %vm763_vm0, %v4078_v53 }
 0x5a2   :  { %4106 = vst.msk [vmem:[#allocation3 + $0x40] sm:$0xff] %vm763_vm0, %v4066_v62 }
 0x5a4   :  { %v3991_v34 = vpop.permute.xlu0 %3990 }
 0x5a5   :  { %v4074_v17 = vpop.permute.xlu1 %4073  ;;  %4036 = vst.msk [vmem:[#allocation3 + $0x18] sm:$0x1] %vm4033_vm14, %v3991_v34 }
 0x5a6   :  { %4110 = vst.msk [vmem:[#allocation3 + $0x60] sm:$0xff] %vm763_vm0, %v4074_v17  ;;  %vm4098_vm0 = vcmask 57400  }
 0x5a8   :  { %v3999_v59 = vpop.permute.xlu0 %3998 }
 0x5a9   :  { %v3987_v15 = vpop.permute.xlu1 %3986  ;;  %4040 = vst.msk [vmem:[#allocation3 + $0x38] sm:$0x1] %vm4033_vm14, %v3999_v59 }
 0x5aa   :  { %4034 = vst.msk [vmem:[#allocation3 + $0x8] sm:$0x1] %vm4033_vm14, %v3987_v15 }
 0x5ac   :  { %v4007_v60 = vpop.permute.xlu0 %4006 }
 0x5ad   :  { %v3995_v45 = vpop.permute.xlu1 %3994  ;;  %4044 = vst.msk [vmem:[#allocation3 + $0x58] sm:$0x1] %vm4033_vm14, %v4007_v60 }
 0x5ae   :  { %4038 = vst.msk [vmem:[#allocation3 + $0x28] sm:$0x1] %vm4033_vm14, %v3995_v45 }
 0x5b0   :  { %v4015_v63 = vpop.permute.xlu0 %4014 }
 0x5b1   :  { %v4003_v58 = vpop.permute.xlu1 %4002  ;;  %4048 = vst.msk [vmem:[#allocation3 + $0x78] sm:$0x1] %vm4033_vm14, %v4015_v63 }
 0x5b2   :  { %4042 = vst.msk [vmem:[#allocation3 + $0x48] sm:$0x1] %vm4033_vm14, %v4003_v58 }
 0x5b4   :  { %v4119_v4 = vpop.permute.xlu0 %4118 }
 0x5b5   :  { %v4011_v42 = vpop.permute.xlu1 %4010  ;;  %4165 = vst.msk [vmem:[#allocation3 + $0x10] sm:$0xff] %vm829_vm4, %v4119_v4 }
 0x5b6   :  { %4046 = vst.msk [vmem:[#allocation3 + $0x68] sm:$0x1] %vm4033_vm14, %v4011_v42  ;;  %vm10894_vm14 = vmmov %vm10891_vm7 }
 0x5b8   :  { %v4127_v5 = vpop.permute.xlu0 %4126 }
 0x5b9   :  { %v4115_v21 = vpop.permute.xlu1 %4114  ;;  %4169 = vst.msk [vmem:[#allocation3 + $0x30] sm:$0xff] %vm829_vm4, %v4127_v5 }
 0x5ba   :  { %4162 = vst.msk [vmem:[#allocation3] sm:$0xff] %vm829_vm4, %v4115_v21 }
 0x5bc   :  { %v4135_v18 = vpop.permute.xlu0 %4134 }
 0x5bd   :  { %v4123_v1 = vpop.permute.xlu1 %4122  ;;  %4173 = vst.msk [vmem:[#allocation3 + $0x50] sm:$0xff] %vm829_vm4, %v4135_v18 }
 0x5be   :  { %4167 = vst.msk [vmem:[#allocation3 + $0x20] sm:$0xff] %vm829_vm4, %v4123_v1 }
 0x5c0   :  { %v4143_v22 = vpop.permute.xlu0 %4142 }
 0x5c1   :  { %v4131_v30 = vpop.permute.xlu1 %4130  ;;  %4177 = vst.msk [vmem:[#allocation3 + $0x70] sm:$0xff] %vm829_vm4, %v4143_v22 }
 0x5c2   :  { %4171 = vst.msk [vmem:[#allocation3 + $0x40] sm:$0xff] %vm829_vm4, %v4131_v30 }
 0x5c4   :  { %v4056_v28 = vpop.permute.xlu0 %4055 }
 0x5c5   :  { %v4139_v37 = vpop.permute.xlu1 %4138  ;;  %4101 = vst.msk [vmem:[#allocation3 + $0x18] sm:$0x1] %vm4098_vm0, %v4056_v28 }
 0x5c6   :  { %4175 = vst.msk [vmem:[#allocation3 + $0x60] sm:$0xff] %vm829_vm4, %v4139_v37  ;;  %vm2258_vm4 = vcmask 33792  }
 0x5c8   :  { %v4064_v46 = vpop.permute.xlu0 %4063 }
 0x5c9   :  { %v4052_v38 = vpop.permute.xlu1 %4051  ;;  %4105 = vst.msk [vmem:[#allocation3 + $0x38] sm:$0x1] %vm4098_vm0, %v4064_v46 }
 0x5ca   :  { %4099 = vst.msk [vmem:[#allocation3 + $0x8] sm:$0x1] %vm4098_vm0, %v4052_v38 }
 0x5cd   :  { %v4060_v24 = vpop.permute.xlu1 %4059  ;;  %v1592_v14 = vpop.permute.xlu0 %1591 }
 0x5ce   :  { %4103 = vst.msk [vmem:[#allocation3 + $0x28] sm:$0x1] %vm4098_vm0, %v4060_v24 }
 0x5cf   :  { %1616 = vst.msk [vmem:[#allocation2 + $0x1] sm:$0x3f] %vm1615_vm10, %v1592_v14 }
 0x5d0   :  { %1642 = vst.msk [vmem:[#allocation2 + $0x1] sm:$0x3f] %vm1641_vm2, %v5688_v40 }
 0x5d1   :  { %1651 = vst.msk [vmem:[#allocation2 + $0x1] sm:$0x3f] %vm1650_vm1, %v5688_v40  ;;  %v1596_v33 = vpop.permute.xlu0 %1595 }
 0x5d2   :  { %v1594_v27 = vpop.permute.xlu1 %1593  ;;  %1618 = vst.msk [vmem:[#allocation2 + $0x21] sm:$0x3f] %vm1615_vm10, %v1596_v33 }
 0x5d3   :  { %1617 = vst.msk [vmem:[#allocation2 + $0x11] sm:$0x3f] %vm1615_vm10, %v1594_v27 }
 0x5d4   :  { %1643 = vst.msk [vmem:[#allocation2 + $0x11] sm:$0x3f] %vm1641_vm2, %v5688_v40  ;;  %1644 = vst.msk [vmem:[#allocation2 + $0x21] sm:$0x3f] %vm1641_vm2, %v5688_v40 }
 0x5d5   :  { %1652 = vst.msk [vmem:[#allocation2 + $0x11] sm:$0x3f] %vm1650_vm1, %v5688_v40  ;;  %1653 = vst.msk [vmem:[#allocation2 + $0x21] sm:$0x3f] %vm1650_vm1, %v5688_v40  ;;  %v1600_v25 = vpop.permute.xlu0 %1599 }
 0x5d6   :  { %v1598_v43 = vpop.permute.xlu1 %1597  ;;  %1620 = vst.msk [vmem:[#allocation2 + $0x41] sm:$0x3f] %vm1615_vm10, %v1600_v25 }
 0x5d7   :  { %1619 = vst.msk [vmem:[#allocation2 + $0x31] sm:$0x3f] %vm1615_vm10, %v1598_v43 }
 0x5d8   :  { %1645 = vst.msk [vmem:[#allocation2 + $0x31] sm:$0x3f] %vm1641_vm2, %v5688_v40  ;;  %1646 = vst.msk [vmem:[#allocation2 + $0x41] sm:$0x3f] %vm1641_vm2, %v5688_v40  ;;  %v1659_v48 = vld [vmem:[#allocation2] sm:$0x1f] }
 0x5d9   :  { %v1667_v10 = vld [vmem:[#allocation2 + $0x1] sm:$0x1f]  ;;  %1654 = vst.msk [vmem:[#allocation2 + $0x31] sm:$0x3f] %vm1650_vm1, %v5688_v40  ;;  %1655 = vst.msk [vmem:[#allocation2 + $0x41] sm:$0x3f] %vm1650_vm1, %v5688_v40  ;;  %v1604_v49 = vpop.permute.xlu0 %1603 }
 0x5da   :  { %v1683_v50 = vld [vmem:[#allocation2 + $0x2] sm:$0x1f]  ;;  %v1675_v31 = vmax.f32 %v1659_v48, %v1667_v10  ;;  %v1602_v41 = vpop.permute.xlu1 %1601  ;;  %1622 = vst.msk [vmem:[#allocation2 + $0x61] sm:$0x3f] %vm1615_vm10, %v1604_v49 }
 0x5db   :  { %v1699_v36 = vld [vmem:[#allocation2 + $0x3] sm:$0x1f]  ;;  %1621 = vst.msk [vmem:[#allocation2 + $0x51] sm:$0x3f] %vm1615_vm10, %v1602_v41 }
 0x5dc   :  { %2267 = vst.msk [vmem:[#allocation2 + $0x7] sm:$0x3] %vm2258_vm4, %v5688_v40  ;;  %v1691_v6 = vmax.f32 %v1675_v31, %v1683_v50  ;;  %v1660_v61 = vld [vmem:[#allocation2 + $0x10] sm:$0x1f]  ;;  %v1661_v47 = vld [vmem:[#allocation2 + $0x20] sm:$0x1f] }
 0x5dd   :  { %1647 = vst.msk [vmem:[#allocation2 + $0x51] sm:$0x3f] %vm1641_vm2, %v5688_v40  ;;  %1648 = vst.msk [vmem:[#allocation2 + $0x61] sm:$0x3f] %vm1641_vm2, %v5688_v40  ;;  %v1668_v0 = vld [vmem:[#allocation2 + $0x11] sm:$0x1f]  ;;  %v4072_v23 = vpop.permute.xlu0 %4071 }
 0x5de   :  { %v1684_v7 = vld [vmem:[#allocation2 + $0x12] sm:$0x1f]  ;;  %1656 = vst.msk [vmem:[#allocation2 + $0x51] sm:$0x3f] %vm1650_vm1, %v5688_v40  ;;  %1657 = vst.msk [vmem:[#allocation2 + $0x61] sm:$0x3f] %vm1650_vm1, %v5688_v40  ;;  %v7716_v8 = vmax.f32 %v1691_v6, %v1699_v36  ;;  %v1676_v16 = vmax.f32 %v1660_v61, %v1668_v0  ;;  %v1606_v57 = vpop.permute.xlu1 %1605 }
 0x5df   :  { %v1700_v44 = vld [vmem:[#allocation2 + $0x13] sm:$0x1f]  ;;  %v1669_v54 = vld [vmem:[#allocation2 + $0x21] sm:$0x1f]  ;;  %1623 = vst.msk [vmem:[#allocation2 + $0x71] sm:$0x3f] %vm1615_vm10, %v1606_v57  ;;  %vm10896_vm10 = vmmov %vm10888_vm3 }
 0x5e0   :  { %v1677_v26 = vmax.f32 %v1661_v47, %v1669_v54  ;;  %v1685_v35 = vld [vmem:[#allocation2 + $0x22] sm:$0x1f]  ;;  %2268 = vst.msk [vmem:[#allocation2 + $0x17] sm:$0x3] %vm2258_vm4, %v5688_v40  ;;  %1723 = vrot.lane.b32.xlu0 %v7716_v8, %s5679_s13  ;;  %v1692_v3 = vmax.f32 %v1676_v16, %v1684_v7  ;;  %v1662_v53 = vld [vmem:[#allocation2 + $0x30] sm:$0x1f] }
 0x5e1   :  { %v1701_v39 = vld [vmem:[#allocation2 + $0x23] sm:$0x1f]  ;;  %4109 = vst.msk [vmem:[#allocation3 + $0x58] sm:$0x1] %vm4098_vm0, %v4072_v23  ;;  %v1670_v17 = vld [vmem:[#allocation2 + $0x31] sm:$0x1f]  ;;  %v4080_v42 = vpop.permute.xlu0 %4079 }
 0x5e2   :  { %2269 = vst.msk [vmem:[#allocation2 + $0x27] sm:$0x3] %vm2258_vm4, %v5688_v40  ;;  %v1693_v62 = vmax.f32 %v1677_v26, %v1685_v35  ;;  %v1686_v34 = vld [vmem:[#allocation2 + $0x32] sm:$0x1f]  ;;  %v7730_v15 = vmax.f32 %v1692_v3, %v1700_v44  ;;  %v1678_v59 = vmax.f32 %v1662_v53, %v1670_v17  ;;  %v1663_v60 = vld [vmem:[#allocation2 + $0x40] sm:$0x1f]  ;;  %v4068_v63 = vpop.permute.xlu1 %4067 }
 0x5e3   :  { %1649 = vst.msk [vmem:[#allocation2 + $0x71] sm:$0x3f] %vm1641_vm2, %v5688_v40  ;;  %v1702_v45 = vld [vmem:[#allocation2 + $0x33] sm:$0x1f]  ;;  %v1671_v58 = vld [vmem:[#allocation2 + $0x41] sm:$0x1f]  ;;  %vm10897_vm2 = vmmov %vm10888_vm3 }
 0x5e4   :  { %1658 = vst.msk [vmem:[#allocation2 + $0x71] sm:$0x3f] %vm1650_vm1, %v5688_v40  ;;  %v7732_v4 = vmax.f32 %v1693_v62, %v1701_v39  ;;  %v1679_v21 = vmax.f32 %v1663_v60, %v1671_v58  ;;  %v1687_v5 = vld [vmem:[#allocation2 + $0x42] sm:$0x1f]  ;;  %1725 = vrot.lane.b32.xlu1 %v7730_v15, %s5679_s13  ;;  %v1694_v18 = vmax.f32 %v1678_v59, %v1686_v34  ;;  %vm4163_vm1 = vcmask 65600  }
 0x5e5   :  { %v1703_v1 = vld [vmem:[#allocation2 + $0x43] sm:$0x1f]  ;;  %2270 = vst.msk [vmem:[#allocation2 + $0x37] sm:$0x3] %vm2258_vm4, %v5688_v40  ;;  %v1664_v22 = vld [vmem:[#allocation2 + $0x50] sm:$0x1f]  ;;  %v4184_v43 = vpop.permute.xlu0 %4183 }
 0x5e6   :  { %4107 = vst.msk [vmem:[#allocation3 + $0x48] sm:$0x1] %vm4098_vm0, %v4068_v63  ;;  %4113 = vst.msk [vmem:[#allocation3 + $0x78] sm:$0x1] %vm4098_vm0, %v4080_v42  ;;  %1727 = vrot.lane.b32.xlu0 %v7732_v4, %s5679_s13  ;;  %v1695_v30 = vmax.f32 %v1679_v21, %v1687_v5  ;;  %v1672_v37 = vld [vmem:[#allocation2 + $0x51] sm:$0x1f]  ;;  %v7744_v38 = vmax.f32 %v1694_v18, %v1702_v45  ;;  %v4076_v33 = vpop.permute.xlu1 %4075 }
 0x5e7   :  { %2271 = vst.msk [vmem:[#allocation2 + $0x47] sm:$0x3] %vm2258_vm4, %v5688_v40  ;;  %v1688_v28 = vld [vmem:[#allocation2 + $0x52] sm:$0x1f]  ;;  %v1680_v46 = vmax.f32 %v1664_v22, %v1672_v37  ;;  %v1665_v14 = vld [vmem:[#allocation2 + $0x60] sm:$0x1f] }
 0x5e8   :  { %v1704_v24 = vld [vmem:[#allocation2 + $0x53] sm:$0x1f]  ;;  %v1673_v27 = vld [vmem:[#allocation2 + $0x61] sm:$0x1f]  ;;  %v7746_v25 = vmax.f32 %v1695_v30, %v1703_v1  ;;  %4111 = vst.msk [vmem:[#allocation3 + $0x68] sm:$0x1] %vm4098_vm0, %v4076_v33  ;;  %1729 = vrot.lane.b32.xlu1 %v7744_v38, %s5679_s13  ;;  %vm10895_vm0 = vmmov %vm10891_vm7 }
 0x5e9   :  { %v1681_v48 = vmax.f32 %v1665_v14, %v1673_v27  ;;  %v1689_v10 = vld [vmem:[#allocation2 + $0x62] sm:$0x1f]  ;;  %2272 = vst.msk [vmem:[#allocation2 + $0x57] sm:$0x3] %vm2258_vm4, %v5688_v40  ;;  %v1696_v31 = vmax.f32 %v1680_v46, %v1688_v28  ;;  %v4192_v44 = vpop.permute.xlu0 %4191  ;;  %v7867_v37 = vld [vmem:[#allocation2 + $0x8] sm:$0x1] }
 0x5ea   :  { %v1705_v50 = vld [vmem:[#allocation2 + $0x63] sm:$0x1f]  ;;  %4230 = vst.msk [vmem:[#allocation3 + $0x10] sm:$0xff] %vm10888_vm3, %v4184_v43  ;;  %1731 = vrot.lane.b32.xlu0 %v7746_v25, %s5679_s13  ;;  %v4180_v16 = vpop.permute.xlu1 %4179  ;;  %vm10898_vm3 = vmmov %vm10895_vm0  ;;  %v7873_v28 = vld [vmem:[#allocation2 + $0x18] sm:$0x1] }
 0x5eb   :  { %2273 = vst.msk [vmem:[#allocation2 + $0x67] sm:$0x3] %vm2258_vm4, %v5688_v40  ;;  %v1697_v36 = vmax.f32 %v1681_v48, %v1689_v10  ;;  %v1666_v41 = vld [vmem:[#allocation2 + $0x70] sm:$0x1f]  ;;  %v7758_v61 = vmax.f32 %v1696_v31, %v1704_v24  ;;  %v7879_v46 = vld [vmem:[#allocation2 + $0x28] sm:$0x1] }
 0x5ec   :  { %v1674_v49 = vld [vmem:[#allocation2 + $0x71] sm:$0x1f]  ;;  %4227 = vst.msk [vmem:[#allocation3] sm:$0xff] %vm10889_vm13, %v4180_v16  ;;  %vm10899_vm13 = vmmov %vm10895_vm0 }
 0x5ed   :  { %v1690_v6 = vld [vmem:[#allocation2 + $0x72] sm:$0x1f]  ;;  %v1682_v0 = vmax.f32 %v1666_v41, %v1674_v49  ;;  %v7760_v47 = vmax.f32 %v1697_v36, %v1705_v50  ;;  %4234 = vst.msk [vmem:[#allocation3 + $0x30] sm:$0xff] %vm10890_vm5, %v4192_v44  ;;  %1733 = vrot.lane.b32.xlu1 %v7758_v61, %s5679_s13  ;;  %v4200_v35 = vpop.permute.xlu0 %4199  ;;  %vm10900_vm5 = vmmov %vm10897_vm2 }
 0x5ee   :  { %v1706_v7 = vld [vmem:[#allocation2 + $0x73] sm:$0x1f]  ;;  %v4188_v26 = vpop.permute.xlu1 %4187  ;;  %4238 = vst.msk [vmem:[#allocation3 + $0x50] sm:$0xff] %vm10893_vm11, %v4200_v35  ;;  %vm10903_vm11 = vmmov %vm10895_vm0 }
 0x5ef   :  { %2274 = vst.msk [vmem:[#allocation2 + $0x77] sm:$0x3] %vm2258_vm4, %v5688_v40  ;;  %v1698_v54 = vmax.f32 %v1682_v0, %v1690_v6  ;;  %1735 = vrot.lane.b32.xlu0 %v7760_v47, %s5679_s13 }
 0x5f0   :  { %4232 = vst.msk [vmem:[#allocation3 + $0x20] sm:$0xff] %vm10892_vm9, %v4188_v26  ;;  %vm10902_vm9 = vmmov %vm10895_vm0 }
 0x5f1   :  { %v7770_v57 = vmax.f32 %v1698_v54, %v1706_v7  ;;  %v7772_v23 = vld [vmem:[#allocation3 + $0x10] sm:$0xff]  ;;  %v4208_v53 = vpop.permute.xlu0 %4207 }
 0x5f2   :  { %4342 = vst.msk [vmem:[#allocation3 + $0x10] sm:$0x3] %vm10891_vm7, %v5688_v40  ;;  %v4196_v62 = vpop.permute.xlu1 %4195  ;;  %vm10901_vm7 = vmmov %vm10895_vm0 }
 0x5f3   :  { %1737 = vrot.lane.b32.xlu1 %v7770_v57, %s5679_s13  ;;  %1755 = vrot.lane.b32.xlu0 %v7716_v8, %s5680_s10  ;;  %v7782_v39 = vld [vmem:[#allocation3] sm:$0xff]  ;;  %4236 = vst.msk [vmem:[#allocation3 + $0x40] sm:$0xff] %vm10896_vm10, %v4196_v62 }
 0x5f4   :  { %v7784_v3 = vld [vmem:[#allocation3 + $0x30] sm:$0xff]  ;;  %4341 = vst.msk [vmem:[#allocation3] sm:$0x3] %vm10894_vm14, %v5688_v40  ;;  %vm1851_vm14 = vcmask 4096  }
 0x5f5   :  { %4344 = vst.msk [vmem:[#allocation3 + $0x30] sm:$0x3] %vm10895_vm0, %v5688_v40  ;;  %v7798_v34 = vld [vmem:[#allocation3 + $0x50] sm:$0xff]  ;;  %v4121_v45 = vpop.permute.xlu0 %4120  ;;  %vm4228_vm0 = vcmask 73800  }
 0x5f6   :  { %4242 = vst.msk [vmem:[#allocation3 + $0x70] sm:$0xff] %vm10897_vm2, %v4208_v53  ;;  %v4204_v59 = vpop.permute.xlu1 %4203  ;;  %v7908_v24 = vld [vmem:[#allocation2 + $0x78] sm:$0x1] }
 0x5f7   :  { %1757 = vrot.lane.b32.xlu1 %v7730_v15, %s5680_s10  ;;  %1759 = vrot.lane.b32.xlu0 %v7732_v4, %s5680_s10  ;;  %v7796_v17 = vld [vmem:[#allocation3 + $0x20] sm:$0xff]  ;;  %4346 = vst.msk [vmem:[#allocation3 + $0x50] sm:$0x3] %vm10899_vm13, %v5688_v40 }
 0x5f8   :  { %4343 = vst.msk [vmem:[#allocation3 + $0x20] sm:$0x3] %vm10898_vm3, %v5688_v40 }
 0x5f9   :  { %4240 = vst.msk [vmem:[#allocation3 + $0x60] sm:$0xff] %vm10900_vm5, %v4204_v59  ;;  %v4129_v42 = vpop.permute.xlu0 %4128 }
 0x5fa   :  { %4166 = vst.msk [vmem:[#allocation3 + $0x18] sm:$0x1] %vm4163_vm1, %v4121_v45  ;;  %v7810_v60 = vld [vmem:[#allocation3 + $0x40] sm:$0xff]  ;;  %v4117_v63 = vpop.permute.xlu1 %4116  ;;  %4170 = vst.msk [vmem:[#allocation3 + $0x38] sm:$0x1] %vm4163_vm1, %v4129_v42 }
 0x5fb   :  { %1761 = vrot.lane.b32.xlu1 %v7744_v38, %s5680_s10  ;;  %1763 = vrot.lane.b32.xlu0 %v7746_v25, %s5680_s10  ;;  %4345 = vst.msk [vmem:[#allocation3 + $0x40] sm:$0x3] %vm10901_vm7, %v5688_v40 }
 0x5fc   :  { %4164 = vst.msk [vmem:[#allocation3 + $0x8] sm:$0x1] %vm4163_vm1, %v4117_v63 }
 0x5fd   :  { %v4258_v58 = vld [vmem:[#allocation3 + $0x70] sm:$0xff]  ;;  %v4137_v1 = vpop.permute.xlu0 %4136 }
 0x5fe   :  { %4348 = vst.msk [vmem:[#allocation3 + $0x70] sm:$0x3] %vm10902_vm9, %v5688_v40  ;;  %v4125_v5 = vpop.permute.xlu1 %4124 }
 0x5ff   :  { %1765 = vrot.lane.b32.xlu1 %v7758_v61, %s5680_s10  ;;  %1767 = vrot.lane.b32.xlu0 %v7760_v47, %s5680_s10  ;;  %4168 = vst.msk [vmem:[#allocation3 + $0x28] sm:$0x1] %vm4163_vm1, %v4125_v5  ;;  %4174 = vst.msk [vmem:[#allocation3 + $0x58] sm:$0x1] %vm4163_vm1, %v4137_v1 }
 0x600   :  { %v7822_v21 = vld [vmem:[#allocation3 + $0x60] sm:$0xff] }
 0x601   :  { %4347 = vst.msk [vmem:[#allocation3 + $0x60] sm:$0x3] %vm10903_vm11, %v5688_v40  ;;  %v4145_v30 = vpop.permute.xlu0 %4144  ;;  %vm1892_vm11 = vcmask 12296  }
 0x602   :  { %v4133_v18 = vpop.permute.xlu1 %4132  ;;  %4178 = vst.msk [vmem:[#allocation3 + $0x78] sm:$0x1] %vm4163_vm1, %v4145_v30 }
 0x603   :  { %1769 = vrot.lane.b32.xlu1 %v7770_v57, %s5680_s10  ;;  %1787 = vrot.lane.b32.xlu0 %v7716_v8, %s5691_s20  ;;  %4172 = vst.msk [vmem:[#allocation3 + $0x48] sm:$0x1] %vm4163_vm1, %v4133_v18 }
 0x606   :  { %v4141_v22 = vpop.permute.xlu1 %4140 }
 0x607   :  { %1789 = vrot.lane.b32.xlu1 %v7730_v15, %s5691_s20  ;;  %1791 = vrot.lane.b32.xlu0 %v7732_v4, %s5691_s20  ;;  %4176 = vst.msk [vmem:[#allocation3 + $0x68] sm:$0x1] %vm4163_vm1, %v4141_v22 }
 0x60b   :  { %1793 = vrot.lane.b32.xlu1 %v7744_v38, %s5691_s20  ;;  %1795 = vrot.lane.b32.xlu0 %v7746_v25, %s5691_s20 }
 0x60f   :  { %1797 = vrot.lane.b32.xlu1 %v7758_v61, %s5691_s20  ;;  %1799 = vrot.lane.b32.xlu0 %v7760_v47, %s5691_s20 }
 0x613   :  { %1801 = vrot.lane.b32.xlu1 %v7770_v57, %s5691_s20  ;;  %1819 = vrot.lane.b32.xlu0 %v7716_v8, %s5681_s0 }
 0x617   :  { %1821 = vrot.lane.b32.xlu1 %v7730_v15, %s5681_s0  ;;  %1823 = vrot.lane.b32.xlu0 %v7732_v4, %s5681_s0 }
 0x61b   :  { %1825 = vrot.lane.b32.xlu1 %v7744_v38, %s5681_s0  ;;  %1827 = vrot.lane.b32.xlu0 %v7746_v25, %s5681_s0 }
 0x61f   :  { %1829 = vrot.lane.b32.xlu1 %v7758_v61, %s5681_s0  ;;  %1831 = vrot.lane.b32.xlu0 %v7760_v47, %s5681_s0 }
 0x623   :  { %1833 = vrot.lane.b32.xlu1 %v7770_v57, %s5681_s0  ;;  %4185 = vrot.lane.b32.xlu0 %v7131_v51, %s5689_s18  ;;  %v7885_v51 = vld [vmem:[#allocation2 + $0x38] sm:$0x1] }
 0x627   :  { %2331 = vrot.lane.b32.xlu1 %v7867_v37, %s5693_s26  ;;  %4193 = vrot.lane.b32.xlu0 %v7145_v55, %s5689_s18  ;;  %v7891_v55 = vld [vmem:[#allocation2 + $0x48] sm:$0x1] }
 0x62b   :  { %2335 = vrot.lane.b32.xlu1 %v7873_v28, %s5693_s26  ;;  %4201 = vrot.lane.b32.xlu0 %v7161_v2, %s5689_s18  ;;  %v7897_v2 = vld [vmem:[#allocation2 + $0x58] sm:$0x1] }
 0x62f   :  { %2339 = vrot.lane.b32.xlu1 %v7879_v46, %s5693_s26  ;;  %4209 = vrot.lane.b32.xlu0 %v7177_v19, %s5689_s18  ;;  %v7903_v19 = vld [vmem:[#allocation2 + $0x68] sm:$0x1] }
 0x633   :  { %2343 = vrot.lane.b32.xlu1 %v7885_v51, %s5693_s26  ;;  %4280 = vrot.lane.b32.xlu0 %v7772_v23, %s5690_s19 }
 0x637   :  { %2347 = vrot.lane.b32.xlu1 %v7891_v55, %s5693_s26  ;;  %4288 = vrot.lane.b32.xlu0 %v7784_v3, %s5690_s19 }
 0x63b   :  { %2351 = vrot.lane.b32.xlu1 %v7897_v2, %s5693_s26  ;;  %4296 = vrot.lane.b32.xlu0 %v7798_v34, %s5690_s19 }
 0x63f   :  { %2355 = vrot.lane.b32.xlu1 %v7903_v19, %s5693_s26  ;;  %4304 = vrot.lane.b32.xlu0 %v4258_v58, %s5690_s19 }
 0x643   :  { %2359 = vrot.lane.b32.xlu1 %v7908_v24, %s5693_s26 }
 0x647   :  { %4181 = vrot.lane.b32.xlu1 %v7143_v52, %s5689_s18 }
 0x64b   :  { %4189 = vrot.lane.b32.xlu1 %v7159_v20, %s5689_s18 }
 0x64f   :  { %4197 = vrot.lane.b32.xlu1 %v7175_v29, %s5689_s18 }
 0x652   :  { %v1724_v14 = vpop.permute.xlu0 %1723 }
 0x653   :  { %4205 = vrot.lane.b32.xlu1 %v7189_v32, %s5689_s18  ;;  %v1747_v23 = vmax.f32 %v7716_v8, %v1724_v14 }
 0x656   :  { %v1726_v27 = vpop.permute.xlu1 %1725 }
 0x657   :  { %4276 = vrot.lane.b32.xlu1 %v7782_v39, %s5690_s19  ;;  %v1748_v3 = vmax.f32 %v7730_v15, %v1726_v27 }
 0x658   :  { %v1728_v33 = vpop.permute.xlu0 %1727 }
 0x659   :  { %v1749_v62 = vmax.f32 %v7732_v4, %v1728_v33 }
 0x65a   :  { %v1730_v43 = vpop.permute.xlu1 %1729 }
 0x65b   :  { %4284 = vrot.lane.b32.xlu1 %v7796_v17, %s5690_s19  ;;  %v1750_v58 = vmax.f32 %v7744_v38, %v1730_v43 }
 0x65c   :  { %v1732_v52 = vpop.permute.xlu0 %1731 }
 0x65d   :  { %v1751_v8 = vmax.f32 %v7746_v25, %v1732_v52 }
 0x65f   :  { %4292 = vrot.lane.b32.xlu1 %v7810_v60, %s5690_s19  ;;  %v1734_v20 = vpop.permute.xlu1 %1733 }
 0x660   :  { %v1752_v30 = vmax.f32 %v7758_v61, %v1734_v20 }
 0x661   :  { %v1736_v48 = vpop.permute.xlu0 %1735 }
 0x662   :  { %v1753_v38 = vmax.f32 %v7760_v47, %v1736_v48 }
 0x663   :  { %4300 = vrot.lane.b32.xlu1 %v7822_v21, %s5690_s19 }
 0x665   :  { %v1738_v29 = vpop.permute.xlu1 %1737  ;;  %v1756_v32 = vpop.permute.xlu0 %1755 }
 0x666   :  { %v1779_v39 = vmax.f32 %v1747_v23, %v1756_v32  ;;  %v1754_v61 = vmax.f32 %v7770_v57, %v1738_v29 }
 0x669   :  { %v1758_v10 = vpop.permute.xlu1 %1757  ;;  %v1760_v50 = vpop.permute.xlu0 %1759 }
 0x66a   :  { %v1780_v34 = vmax.f32 %v1748_v3, %v1758_v10  ;;  %v1781_v45 = vmax.f32 %v1749_v62, %v1760_v50 }
 0x66d   :  { %v1762_v31 = vpop.permute.xlu1 %1761  ;;  %v1764_v36 = vpop.permute.xlu0 %1763 }
 0x66e   :  { %v1782_v15 = vmax.f32 %v1750_v58, %v1762_v31  ;;  %v1783_v1 = vmax.f32 %v1751_v8, %v1764_v36 }
 0x671   :  { %v1766_v41 = vpop.permute.xlu1 %1765  ;;  %v1768_v49 = vpop.permute.xlu0 %1767 }
 0x672   :  { %v1784_v27 = vmax.f32 %v1752_v30, %v1766_v41  ;;  %v1785_v52 = vmax.f32 %v1753_v38, %v1768_v49 }
 0x675   :  { %v1770_v6 = vpop.permute.xlu1 %1769  ;;  %v1788_v0 = vpop.permute.xlu0 %1787 }
 0x676   :  { %v1811_v53 = vmax.f32 %v1779_v39, %v1788_v0  ;;  %v1786_v48 = vmax.f32 %v1754_v61, %v1770_v6 }
 0x679   :  { %v1790_v7 = vpop.permute.xlu1 %1789  ;;  %v1792_v16 = vpop.permute.xlu0 %1791 }
 0x67a   :  { %v1812_v63 = vmax.f32 %v1780_v34, %v1790_v7  ;;  %v1813_v42 = vmax.f32 %v1781_v45, %v1792_v16 }
 0x67d   :  { %v1794_v44 = vpop.permute.xlu1 %1793  ;;  %v1796_v54 = vpop.permute.xlu0 %1795 }
 0x67e   :  { %v1814_v22 = vmax.f32 %v1782_v15, %v1794_v44  ;;  %v1815_v25 = vmax.f32 %v1783_v1, %v1796_v54 }
 0x681   :  { %v1798_v26 = vpop.permute.xlu1 %1797  ;;  %v1800_v35 = vpop.permute.xlu0 %1799 }
 0x682   :  { %v1816_v20 = vmax.f32 %v1784_v27, %v1798_v26  ;;  %v1817_v10 = vmax.f32 %v1785_v52, %v1800_v35 }
 0x685   :  { %v1802_v17 = vpop.permute.xlu1 %1801  ;;  %v1820_v59 = vpop.permute.xlu0 %1819 }
 0x686   :  { %v7931_v60 = vmax.f32 %v1811_v53, %v1820_v59  ;;  %v1818_v41 = vmax.f32 %v1786_v48, %v1802_v17 }
 0x688   :  { %1852 = vst.msk [vmem:[#allocation2] sm:$0x1f] %vm1851_vm14, %v7931_v60 }
 0x689   :  { %v1822_v21 = vpop.permute.xlu1 %1821  ;;  %v1824_v5 = vpop.permute.xlu0 %1823 }
 0x68a   :  { %v7937_v4 = vmax.f32 %v1812_v63, %v1822_v21  ;;  %v7939_v18 = vmax.f32 %v1813_v42, %v1824_v5 }
 0x68c   :  { %1853 = vst.msk [vmem:[#allocation2 + $0x10] sm:$0x1f] %vm1851_vm14, %v7937_v4  ;;  %1854 = vst.msk [vmem:[#allocation2 + $0x20] sm:$0x1f] %vm1851_vm14, %v7939_v18 }
 0x68d   :  { %v1826_v14 = vpop.permute.xlu1 %1825  ;;  %v1828_v43 = vpop.permute.xlu0 %1827 }
 0x68e   :  { %v7947_v33 = vmax.f32 %v1814_v22, %v1826_v14  ;;  %v7949_v32 = vmax.f32 %v1815_v25, %v1828_v43 }
 0x690   :  { %1855 = vst.msk [vmem:[#allocation2 + $0x30] sm:$0x1f] %vm1851_vm14, %v7947_v33  ;;  %1856 = vst.msk [vmem:[#allocation2 + $0x40] sm:$0x1f] %vm1851_vm14, %v7949_v32 }
 0x691   :  { %v1830_v47 = vpop.permute.xlu1 %1829  ;;  %v1832_v31 = vpop.permute.xlu0 %1831 }
 0x692   :  { %v7956_v50 = vmax.f32 %v1816_v20, %v1830_v47  ;;  %v7958_v36 = vmax.f32 %v1817_v10, %v1832_v31 }
 0x694   :  { %1857 = vst.msk [vmem:[#allocation2 + $0x50] sm:$0x1f] %vm1851_vm14, %v7956_v50  ;;  %1858 = vst.msk [vmem:[#allocation2 + $0x60] sm:$0x1f] %vm1851_vm14, %v7958_v36 }
 0x695   :  { %v1834_v57 = vpop.permute.xlu1 %1833  ;;  %v4186_v49 = vpop.permute.xlu0 %4185 }
 0x696   :  { %v7964_v29 = vmax.f32 %v1818_v41, %v1834_v57  ;;  %4231 = vst.msk [vmem:[#allocation3 + $0x18] sm:$0x1] %vm4228_vm0, %v4186_v49 }
 0x698   :  { %1859 = vst.msk [vmem:[#allocation2 + $0x70] sm:$0x1f] %vm1851_vm14, %v7964_v29 }
 0x699   :  { %v7969_v6 = vpop.permute.xlu1 %2331  ;;  %v4194_v0 = vpop.permute.xlu0 %4193 }
 0x69a   :  { %4235 = vst.msk [vmem:[#allocation3 + $0x38] sm:$0x1] %vm4228_vm0, %v4194_v0  ;;  %vm2378_vm10 = vcmp.gt.f32.partialorder %v7867_v37, %v7969_v6 }
 0x69b   :  { %v2398_v3 = vsel %vm2378_vm10, %v7059_v9, %v7062_v12  ;;  %v2414_v20 = vsel %vm2378_vm10, %v7867_v37, %v7969_v6  ;;  %vm1958_vm10 = vcmask 28696  }
 0x69d   :  { %v7972_v7 = vpop.permute.xlu1 %2335  ;;  %v4202_v16 = vpop.permute.xlu0 %4201  ;;  %v4247_v44 = vld [vmem:[#allocation3 + $0x18] sm:$0x1] }
 0x69e   :  { %4239 = vst.msk [vmem:[#allocation3 + $0x58] sm:$0x1] %vm4228_vm0, %v4202_v16  ;;  %4282 = vrot.lane.b32.xlu0 %v4247_v44, %s5690_s19  ;;  %vm2380_vm2 = vcmp.gt.f32.partialorder %v7873_v28, %v7972_v7 }
 0x69f   :  { %v2400_v17 = vsel %vm2380_vm2, %v7059_v9, %v7062_v12  ;;  %v2416_v47 = vsel %vm2380_vm2, %v7873_v28, %v7972_v7  ;;  %vm2016_vm2 = vcmask 40960  }
 0x6a0   :  { %2025 = vst.msk [vmem:[#allocation2 + $0x6] sm:$0x1] %vm2016_vm2, %v5688_v40  ;;  %2026 = vst.msk [vmem:[#allocation2 + $0x16] sm:$0x1] %vm2016_vm2, %v5688_v40 }
 0x6a1   :  { %v7976_v54 = vpop.permute.xlu1 %2339  ;;  %v4210_v23 = vpop.permute.xlu0 %4209  ;;  %v4251_v26 = vld [vmem:[#allocation3 + $0x38] sm:$0x1]  ;;  %2027 = vst.msk [vmem:[#allocation2 + $0x26] sm:$0x1] %vm2016_vm2, %v5688_v40  ;;  %2028 = vst.msk [vmem:[#allocation2 + $0x36] sm:$0x1] %vm2016_vm2, %v5688_v40 }
 0x6a2   :  { %4243 = vst.msk [vmem:[#allocation3 + $0x78] sm:$0x1] %vm4228_vm0, %v4210_v23  ;;  %4290 = vrot.lane.b32.xlu0 %v4251_v26, %s5690_s19  ;;  %vm2382_vm1 = vcmp.gt.f32.partialorder %v7879_v46, %v7976_v54 }
 0x6a3   :  { %v2402_v45 = vsel %vm2382_vm1, %v7059_v9, %v7062_v12  ;;  %v2418_v31 = vsel %vm2382_vm1, %v7879_v46, %v7976_v54  ;;  %2029 = vst.msk [vmem:[#allocation2 + $0x46] sm:$0x1] %vm2016_vm2, %v5688_v40  ;;  %2030 = vst.msk [vmem:[#allocation2 + $0x56] sm:$0x1] %vm2016_vm2, %v5688_v40 }
 0x6a4   :  { %2031 = vst.msk [vmem:[#allocation2 + $0x66] sm:$0x1] %vm2016_vm2, %v5688_v40  ;;  %2032 = vst.msk [vmem:[#allocation2 + $0x76] sm:$0x1] %vm2016_vm2, %v5688_v40 }
 0x6a5   :  { %v7982_v35 = vpop.permute.xlu1 %2343  ;;  %v4281_v39 = vpop.permute.xlu0 %4280  ;;  %v8019_v58 = vld [vmem:[#allocation3 + $0x58] sm:$0x1] }
 0x6a6   :  { %4327 = vst.msk [vmem:[#allocation3 + $0x12] sm:$0xff] %vm993_vm15, %v4281_v39  ;;  %2513 = vrot.lane.b32.xlu0 %v2398_v3, %s5693_s26  ;;  %vm2384_vm3 = vcmp.gt.f32.partialorder %v7885_v51, %v7982_v35 }
 0x6a7   :  { %4359 = vst.msk [vmem:[#allocation3 + $0x12] sm:$0xff] %vm1028_vm6, %v5688_v40  ;;  %v2404_v42 = vsel %vm2384_vm3, %v7059_v9, %v7062_v12  ;;  %v2420_v49 = vsel %vm2384_vm3, %v7885_v51, %v7982_v35 }
 0x6a8   :  { %4376 = vst.msk [vmem:[#allocation3 + $0x12] sm:$0xff] %vm1046_vm8, %v5688_v40 }
 0x6a9   :  { %v7997_v62 = vpop.permute.xlu1 %2347  ;;  %v4289_v53 = vpop.permute.xlu0 %4288  ;;  %v8036_v21 = vld [vmem:[#allocation3 + $0x78] sm:$0x1] }
 0x6aa   :  { %4331 = vst.msk [vmem:[#allocation3 + $0x32] sm:$0xff] %vm993_vm15, %v4289_v53  ;;  %2517 = vrot.lane.b32.xlu0 %v2400_v17, %s5693_s26  ;;  %vm2386_vm13 = vcmp.gt.f32.partialorder %v7891_v55, %v7997_v62 }
 0x6ab   :  { %4363 = vst.msk [vmem:[#allocation3 + $0x32] sm:$0xff] %vm1028_vm6, %v5688_v40  ;;  %v2406_v5 = vsel %vm2386_vm13, %v7059_v9, %v7062_v12  ;;  %v2422_v0 = vsel %vm2386_vm13, %v7891_v55, %v7997_v62 }
 0x6ac   :  { %4380 = vst.msk [vmem:[#allocation3 + $0x32] sm:$0xff] %vm1046_vm8, %v5688_v40 }
 0x6ad   :  { %v8012_v34 = vpop.permute.xlu1 %2351  ;;  %v4297_v59 = vpop.permute.xlu0 %4296 }
 0x6ae   :  { %2521 = vrot.lane.b32.xlu0 %v2402_v45, %s5693_s26  ;;  %4335 = vst.msk [vmem:[#allocation3 + $0x52] sm:$0xff] %vm993_vm15, %v4297_v59  ;;  %vm2388_vm5 = vcmp.gt.f32.partialorder %v7897_v2, %v8012_v34 }
 0x6af   :  { %4367 = vst.msk [vmem:[#allocation3 + $0x52] sm:$0xff] %vm1028_vm6, %v5688_v40  ;;  %v2408_v30 = vsel %vm2388_vm5, %v7059_v9, %v7062_v12  ;;  %v2424_v7 = vsel %vm2388_vm5, %v7897_v2, %v8012_v34  ;;  %v4456_v54 = vld [vmem:[#allocation3 + $0x13] ss:$2 sm:$0x1f] }
 0x6b0   :  { %4384 = vst.msk [vmem:[#allocation3 + $0x52] sm:$0xff] %vm1046_vm8, %v5688_v40 }
 0x6b1   :  { %v8027_v63 = vpop.permute.xlu1 %2355  ;;  %v4305_v8 = vpop.permute.xlu0 %4304 }
 0x6b2   :  { %2525 = vrot.lane.b32.xlu0 %v2404_v42, %s5693_s26  ;;  %4339 = vst.msk [vmem:[#allocation3 + $0x72] sm:$0xff] %vm993_vm15, %v4305_v8  ;;  %vm2390_vm7 = vcmp.gt.f32.partialorder %v7903_v19, %v8027_v63 }
 0x6b3   :  { %4371 = vst.msk [vmem:[#allocation3 + $0x72] sm:$0xff] %vm1028_vm6, %v5688_v40  ;;  %v2410_v38 = vsel %vm2390_vm7, %v7059_v9, %v7062_v12  ;;  %v2426_v16 = vsel %vm2390_vm7, %v7903_v19, %v8027_v63  ;;  %v4460_v3 = vld [vmem:[#allocation3 + $0x33] ss:$2 sm:$0x1f] }
 0x6b4   :  { %4388 = vst.msk [vmem:[#allocation3 + $0x72] sm:$0xff] %vm1046_vm8, %v5688_v40 }
 0x6b5   :  { %v8044_v15 = vpop.permute.xlu1 %2359 }
 0x6b6   :  { %2529 = vrot.lane.b32.xlu0 %v2406_v5, %s5693_s26  ;;  %vm2392_vm9 = vcmp.gt.f32.partialorder %v7908_v24, %v8044_v15 }
 0x6b7   :  { %v2412_v27 = vsel %vm2392_vm9, %v7059_v9, %v7062_v12  ;;  %v2428_v44 = vsel %vm2392_vm9, %v7908_v24, %v8044_v15 }
 0x6b9   :  { %v4182_v1 = vpop.permute.xlu1 %4181 }
 0x6ba   :  { %4229 = vst.msk [vmem:[#allocation3 + $0x8] sm:$0x1] %vm4228_vm0, %v4182_v1  ;;  %2533 = vrot.lane.b32.xlu0 %v2408_v30, %s5693_s26 }
 0x6bd   :  { %v4190_v22 = vpop.permute.xlu1 %4189 }
 0x6be   :  { %4233 = vst.msk [vmem:[#allocation3 + $0x28] sm:$0x1] %vm4228_vm0, %v4190_v22  ;;  %2537 = vrot.lane.b32.xlu0 %v2410_v38, %s5693_s26 }
 0x6c1   :  { %v4198_v25 = vpop.permute.xlu1 %4197  ;;  %v4245_v14 = vld [vmem:[#allocation3 + $0x8] sm:$0x1] }
 0x6c2   :  { %4237 = vst.msk [vmem:[#allocation3 + $0x48] sm:$0x1] %vm4228_vm0, %v4198_v25  ;;  %4278 = vrot.lane.b32.xlu1 %v4245_v14, %s5690_s19  ;;  %2541 = vrot.lane.b32.xlu0 %v2412_v27, %s5693_s26 }
 0x6c5   :  { %v4206_v43 = vpop.permute.xlu1 %4205  ;;  %v4249_v52 = vld [vmem:[#allocation3 + $0x28] sm:$0x1] }
 0x6c6   :  { %4241 = vst.msk [vmem:[#allocation3 + $0x68] sm:$0x1] %vm4228_vm0, %v4206_v43  ;;  %4286 = vrot.lane.b32.xlu1 %v4249_v52, %s5690_s19  ;;  %1868 = vrot.lane.b32.xlu0 %v7931_v60, %s5679_s13  ;;  %vm1925_vm0 = vcmask 20496  }
 0x6c9   :  { %v4277_v61 = vpop.permute.xlu1 %4276  ;;  %v4253_v41 = vld [vmem:[#allocation3 + $0x48] sm:$0x1] }
 0x6ca   :  { %4324 = vst.msk [vmem:[#allocation3 + $0x2] sm:$0xff] %vm993_vm15, %v4277_v61  ;;  %2447 = vrot.lane.b32.xlu1 %v2414_v20, %s5693_s26  ;;  %1872 = vrot.lane.b32.xlu0 %v7939_v18, %s5679_s13 }
 0x6cb   :  { %4357 = vst.msk [vmem:[#allocation3 + $0x2] sm:$0xff] %vm1028_vm6, %v5688_v40 }
 0x6cc   :  { %4373 = vst.msk [vmem:[#allocation3 + $0x2] sm:$0xff] %vm1046_vm8, %v5688_v40 }
 0x6cd   :  { %v4285_v10 = vpop.permute.xlu1 %4284  ;;  %v4257_v6 = vld [vmem:[#allocation3 + $0x68] sm:$0x1] }
 0x6ce   :  { %4329 = vst.msk [vmem:[#allocation3 + $0x22] sm:$0xff] %vm993_vm15, %v4285_v10  ;;  %2451 = vrot.lane.b32.xlu1 %v2416_v47, %s5693_s26  ;;  %1876 = vrot.lane.b32.xlu0 %v7949_v32, %s5679_s13 }
 0x6cf   :  { %4361 = vst.msk [vmem:[#allocation3 + $0x22] sm:$0xff] %vm1028_vm6, %v5688_v40 }
 0x6d0   :  { %4378 = vst.msk [vmem:[#allocation3 + $0x22] sm:$0xff] %vm1046_vm8, %v5688_v40 }
 0x6d1   :  { %v4293_v48 = vpop.permute.xlu1 %4292 }
 0x6d2   :  { %2455 = vrot.lane.b32.xlu1 %v2418_v31, %s5693_s26  ;;  %4333 = vst.msk [vmem:[#allocation3 + $0x42] sm:$0xff] %vm993_vm15, %v4293_v48  ;;  %1880 = vrot.lane.b32.xlu0 %v7958_v36, %s5679_s13 }
 0x6d3   :  { %4365 = vst.msk [vmem:[#allocation3 + $0x42] sm:$0xff] %vm1028_vm6, %v5688_v40  ;;  %v4406_v15 = vld [vmem:[#allocation3 + $0x1] ss:$2 sm:$0x1f] }
 0x6d4   :  { %4382 = vst.msk [vmem:[#allocation3 + $0x42] sm:$0xff] %vm1046_vm8, %v5688_v40  ;;  %v4454_v27 = vld [vmem:[#allocation3 + $0x3] ss:$2 sm:$0x1f] }
 0x6d5   :  { %v4301_v57 = vpop.permute.xlu1 %4300 }
 0x6d6   :  { %2459 = vrot.lane.b32.xlu1 %v2420_v49, %s5693_s26  ;;  %4337 = vst.msk [vmem:[#allocation3 + $0x62] sm:$0xff] %vm993_vm15, %v4301_v57  ;;  %1901 = vrot.lane.b32.xlu0 %v7931_v60, %s5680_s10  ;;  %vm10814_vm15 = vcmask 8192  }
 0x6d7   :  { %4369 = vst.msk [vmem:[#allocation3 + $0x62] sm:$0xff] %vm1028_vm6, %v5688_v40  ;;  %vm4374_vm6 = vcmask 106592   ;;  %v4394_v22 = vld [vmem:[#allocation3 + $0x20] ss:$2 sm:$0x1f] }
 0x6d8   :  { %4386 = vst.msk [vmem:[#allocation3 + $0x62] sm:$0xff] %vm1046_vm8, %v5688_v40  ;;  %vm4325_vm8 = vcmask 90128   ;;  %v4410_v38 = vld [vmem:[#allocation3 + $0x21] ss:$2 sm:$0x1f] }
 0x6d9   :  { %v4423_v61 = vmax.f32 %v4394_v22, %v4410_v38  ;;  %v4458_v48 = vld [vmem:[#allocation3 + $0x23] ss:$2 sm:$0x1f]  ;;  %v4404_v22 = vld [vmem:[#allocation3 + $0x70] ss:$2 sm:$0x1f] }
 0x6da   :  { %2463 = vrot.lane.b32.xlu1 %v2422_v0, %s5693_s26  ;;  %1905 = vrot.lane.b32.xlu0 %v7939_v18, %s5680_s10  ;;  %v4420_v38 = vld [vmem:[#allocation3 + $0x71] ss:$2 sm:$0x1f] }
 0x6de   :  { %2467 = vrot.lane.b32.xlu1 %v2424_v7, %s5693_s26  ;;  %1909 = vrot.lane.b32.xlu0 %v7949_v32, %s5680_s10 }
 0x6e2   :  { %2471 = vrot.lane.b32.xlu1 %v2426_v16, %s5693_s26  ;;  %1913 = vrot.lane.b32.xlu0 %v7958_v36, %s5680_s10 }
 0x6e6   :  { %2475 = vrot.lane.b32.xlu1 %v2428_v44, %s5693_s26  ;;  %1934 = vrot.lane.b32.xlu0 %v7931_v60, %s5691_s20  ;;  %v4392_v60 = vld [vmem:[#allocation3 + $0x10] ss:$2 sm:$0x1f] }
 0x6ea   :  { %1870 = vrot.lane.b32.xlu1 %v7937_v4, %s5679_s13  ;;  %1938 = vrot.lane.b32.xlu0 %v7939_v18, %s5691_s20 }
 0x6ee   :  { %1874 = vrot.lane.b32.xlu1 %v7947_v33, %s5679_s13  ;;  %1942 = vrot.lane.b32.xlu0 %v7949_v32, %s5691_s20  ;;  %v4396_v32 = vld [vmem:[#allocation3 + $0x30] ss:$2 sm:$0x1f] }
 0x6f2   :  { %1878 = vrot.lane.b32.xlu1 %v7956_v50, %s5679_s13  ;;  %1946 = vrot.lane.b32.xlu0 %v7958_v36, %s5691_s20 }
 0x6f6   :  { %1882 = vrot.lane.b32.xlu1 %v7964_v29, %s5679_s13  ;;  %4298 = vrot.lane.b32.xlu0 %v8019_v58, %s5690_s19 }
 0x6fa   :  { %1903 = vrot.lane.b32.xlu1 %v7937_v4, %s5680_s10  ;;  %4306 = vrot.lane.b32.xlu0 %v8036_v21, %s5690_s19  ;;  %v4390_v21 = vld [vmem:[#allocation3] ss:$2 sm:$0x1f] }
 0x6fb   :  { %v4421_v30 = vmax.f32 %v4390_v21, %v4406_v15  ;;  %v4400_v21 = vld [vmem:[#allocation3 + $0x50] ss:$2 sm:$0x1f]  ;;  %v4416_v15 = vld [vmem:[#allocation3 + $0x51] ss:$2 sm:$0x1f] }
 0x6fe   :  { %1907 = vrot.lane.b32.xlu1 %v7947_v33, %s5680_s10 }
 0x702   :  { %1911 = vrot.lane.b32.xlu1 %v7956_v50, %s5680_s10 }
 0x706   :  { %1915 = vrot.lane.b32.xlu1 %v7964_v29, %s5680_s10 }
 0x70a   :  { %1936 = vrot.lane.b32.xlu1 %v7937_v4, %s5691_s20  ;;  %v4408_v4 = vld [vmem:[#allocation3 + $0x11] ss:$2 sm:$0x1f] }
 0x70e   :  { %1940 = vrot.lane.b32.xlu1 %v7947_v33, %s5691_s20  ;;  %v4422_v33 = vmax.f32 %v4392_v60, %v4408_v4 }
 0x710   :  { %v4283_v24 = vpop.permute.xlu0 %4282 }
 0x711   :  { %4328 = vst.msk [vmem:[#allocation3 + $0x1a] sm:$0x1] %vm4325_vm8, %v4283_v24 }
 0x712   :  { %1944 = vrot.lane.b32.xlu1 %v7956_v50, %s5691_s20  ;;  %4360 = vst.msk [vmem:[#allocation3 + $0x1a] sm:$0x1] %vm10814_vm15, %v5688_v40  ;;  %v4412_v50 = vld [vmem:[#allocation3 + $0x31] ss:$2 sm:$0x1f] }
 0x713   :  { %4377 = vst.msk [vmem:[#allocation3 + $0x1a] sm:$0x1] %vm4374_vm6, %v5688_v40 }
 0x714   :  { %v4291_v18 = vpop.permute.xlu0 %4290 }
 0x715   :  { %4332 = vst.msk [vmem:[#allocation3 + $0x3a] sm:$0x1] %vm4325_vm8, %v4291_v18 }
 0x716   :  { %1948 = vrot.lane.b32.xlu1 %v7964_v29, %s5691_s20  ;;  %4364 = vst.msk [vmem:[#allocation3 + $0x3a] sm:$0x1] %vm10814_vm15, %v5688_v40  ;;  %v4424_v29 = vmax.f32 %v4396_v32, %v4412_v50 }
 0x717   :  { %4381 = vst.msk [vmem:[#allocation3 + $0x3a] sm:$0x1] %vm4374_vm6, %v5688_v40 }
 0x718   :  { %v8214_v36 = vpop.permute.xlu0 %2513 }
 0x71a   :  { %4294 = vrot.lane.b32.xlu1 %v4253_v41, %s5690_s19  ;;  %v4432_v23 = vld [vmem:[#allocation3 + $0x12] ss:$2 sm:$0x1f] }
 0x71b   :  { %4954 = vst.msk [vmem:[#allocation3 + $0x16] sm:$0x1] %vm1624_vm12, %v5688_v40  ;;  %v4446_v26 = vmax.f32 %v4422_v33, %v4432_v23 }
 0x71c   :  { %v8219_v35 = vpop.permute.xlu0 %2517 }
 0x71d   :  { %v8222_v39 = vmax.f32 %v4446_v26, %v4456_v54 }
 0x71e   :  { %4302 = vrot.lane.b32.xlu1 %v4257_v6, %s5690_s19  ;;  %v4436_v62 = vld [vmem:[#allocation3 + $0x32] ss:$2 sm:$0x1f] }
 0x71f   :  { %4956 = vst.msk [vmem:[#allocation3 + $0x36] sm:$0x1] %vm1624_vm12, %v5688_v40  ;;  %4487 = vrot.lane.b32.xlu0 %v8222_v39, %s5679_s13  ;;  %v4448_v53 = vmax.f32 %v4424_v29, %v4436_v62 }
 0x720   :  { %v8228_v17 = vpop.permute.xlu0 %2521 }
 0x721   :  { %v8230_v34 = vmax.f32 %v4448_v53, %v4460_v3 }
 0x723   :  { %4491 = vrot.lane.b32.xlu0 %v8230_v34, %s5679_s13 }
 0x724   :  { %v8234_v59 = vpop.permute.xlu0 %2525 }
 0x728   :  { %v8236_v45 = vpop.permute.xlu0 %2529 }
 0x72c   :  { %v8238_v58 = vpop.permute.xlu0 %2533 }
 0x730   :  { %v8240_v63 = vpop.permute.xlu0 %2537 }
 0x734   :  { %v4279_v8 = vpop.permute.xlu1 %4278  ;;  %v8243_v42 = vpop.permute.xlu0 %2541 }
 0x735   :  { %4326 = vst.msk [vmem:[#allocation3 + $0xa] sm:$0x1] %vm4325_vm8, %v4279_v8 }
 0x736   :  { %4358 = vst.msk [vmem:[#allocation3 + $0xa] sm:$0x1] %vm10814_vm15, %v5688_v40 }
 0x737   :  { %4375 = vst.msk [vmem:[#allocation3 + $0xa] sm:$0x1] %vm4374_vm6, %v5688_v40 }
 0x738   :  { %v4287_v5 = vpop.permute.xlu1 %4286  ;;  %v1869_v1 = vpop.permute.xlu0 %1868 }
 0x739   :  { %4330 = vst.msk [vmem:[#allocation3 + $0x2a] sm:$0x1] %vm4325_vm8, %v4287_v5 }
 0x73a   :  { %4362 = vst.msk [vmem:[#allocation3 + $0x2a] sm:$0x1] %vm10814_vm15, %v5688_v40 }
 0x73b   :  { %1893 = vst.msk [vmem:[#allocation2] sm:$0x1f] %vm1892_vm11, %v1869_v1 }
 0x73c   :  { %4379 = vst.msk [vmem:[#allocation3 + $0x2a] sm:$0x1] %vm4374_vm6, %v5688_v40  ;;  %v8255_v25 = vpop.permute.xlu1 %2447  ;;  %v1873_v14 = vpop.permute.xlu0 %1872 }
 0x73d   :  { %1895 = vst.msk [vmem:[#allocation2 + $0x20] sm:$0x1f] %vm1892_vm11, %v1873_v14  ;;  %v4464_v14 = vld [vmem:[#allocation3 + $0x53] ss:$2 sm:$0x1f]  ;;  %vm2494_vm1 = vcmp.gt.f32.partialorder %v7867_v37, %v8255_v25 }
 0x73e   :  { %v4430_v43 = vld [vmem:[#allocation3 + $0x2] ss:$2 sm:$0x1f] }
 0x73f   :  { %4953 = vst.msk [vmem:[#allocation3 + $0x6] sm:$0x1] %vm1624_vm12, %v5688_v40  ;;  %v4445_v52 = vmax.f32 %v4421_v30, %v4430_v43  ;;  %v4426_v30 = vmax.f32 %v4400_v21, %v4416_v15 }
 0x740   :  { %v8260_v20 = vpop.permute.xlu1 %2451  ;;  %v1877_v10 = vpop.permute.xlu0 %1876 }
 0x741   :  { %v8262_v47 = vmax.f32 %v4445_v52, %v4454_v27  ;;  %1897 = vst.msk [vmem:[#allocation2 + $0x40] sm:$0x1f] %vm1892_vm11, %v1877_v10  ;;  %vm2496_vm3 = vcmp.gt.f32.partialorder %v7873_v28, %v8260_v20 }
 0x743   :  { %v4434_v31 = vld [vmem:[#allocation3 + $0x22] ss:$2 sm:$0x1f]  ;;  %4485 = vrot.lane.b32.xlu1 %v8262_v47, %s5679_s13 }
 0x744   :  { %4955 = vst.msk [vmem:[#allocation3 + $0x26] sm:$0x1] %vm1624_vm12, %v5688_v40  ;;  %v4447_v41 = vmax.f32 %v4423_v61, %v4434_v31  ;;  %v8269_v57 = vpop.permute.xlu1 %2455  ;;  %v1881_v49 = vpop.permute.xlu0 %1880  ;;  %v4428_v61 = vmax.f32 %v4404_v22, %v4420_v38 }
 0x745   :  { %1899 = vst.msk [vmem:[#allocation2 + $0x60] sm:$0x1f] %vm1892_vm11, %v1881_v49  ;;  %vm2498_vm13 = vcmp.gt.f32.partialorder %v7879_v46, %v8269_v57 }
 0x746   :  { %v8271_v6 = vmax.f32 %v4447_v41, %v4458_v48  ;;  %v4468_v48 = vld [vmem:[#allocation3 + $0x73] ss:$2 sm:$0x1f] }
 0x748   :  { %4489 = vrot.lane.b32.xlu1 %v8271_v6, %s5679_s13  ;;  %v8276_v0 = vpop.permute.xlu1 %2459  ;;  %v1902_v7 = vpop.permute.xlu0 %1901 }
 0x749   :  { %1926 = vst.msk [vmem:[#allocation2] sm:$0x1f] %vm1925_vm0, %v1902_v7  ;;  %vm2500_vm5 = vcmp.gt.f32.partialorder %v7885_v51, %v8276_v0 }
 0x74c   :  { %v8279_v16 = vpop.permute.xlu1 %2463  ;;  %v1906_v44 = vpop.permute.xlu0 %1905 }
 0x74d   :  { %1928 = vst.msk [vmem:[#allocation2 + $0x20] sm:$0x1f] %vm1925_vm0, %v1906_v44  ;;  %vm2502_vm7 = vcmp.gt.f32.partialorder %v7891_v55, %v8279_v16 }
 0x750   :  { %v8282_v24 = vpop.permute.xlu1 %2467  ;;  %v1910_v60 = vpop.permute.xlu0 %1909 }
 0x751   :  { %1930 = vst.msk [vmem:[#allocation2 + $0x40] sm:$0x1f] %vm1925_vm0, %v1910_v60  ;;  %vm2504_vm9 = vcmp.gt.f32.partialorder %v7897_v2, %v8282_v24 }
 0x754   :  { %v8285_v4 = vpop.permute.xlu1 %2471  ;;  %v1914_v18 = vpop.permute.xlu0 %1913 }
 0x755   :  { %1932 = vst.msk [vmem:[#allocation2 + $0x60] sm:$0x1f] %vm1925_vm0, %v1914_v18 }
 0x758   :  { %v8288_v33 = vpop.permute.xlu1 %2475  ;;  %v1935_v32 = vpop.permute.xlu0 %1934 }
 0x759   :  { %1959 = vst.msk [vmem:[#allocation2] sm:$0x1f] %vm1958_vm10, %v1935_v32 }
 0x75c   :  { %v1871_v50 = vpop.permute.xlu1 %1870  ;;  %v1939_v54 = vpop.permute.xlu0 %1938 }
 0x75d   :  { %1894 = vst.msk [vmem:[#allocation2 + $0x10] sm:$0x1f] %vm1892_vm11, %v1871_v50 }
 0x75e   :  { %1961 = vst.msk [vmem:[#allocation2 + $0x20] sm:$0x1f] %vm1958_vm10, %v1939_v54  ;;  %v4398_v54 = vld [vmem:[#allocation3 + $0x40] ss:$2 sm:$0x1f] }
 0x760   :  { %v1875_v23 = vpop.permute.xlu1 %1874  ;;  %v1943_v26 = vpop.permute.xlu0 %1942 }
 0x761   :  { %1896 = vst.msk [vmem:[#allocation2 + $0x30] sm:$0x1f] %vm1892_vm11, %v1875_v23  ;;  %v4414_v23 = vld [vmem:[#allocation3 + $0x41] ss:$2 sm:$0x1f] }
 0x762   :  { %1963 = vst.msk [vmem:[#allocation2 + $0x40] sm:$0x1f] %vm1958_vm10, %v1943_v26 }
 0x764   :  { %v1879_v29 = vpop.permute.xlu1 %1878  ;;  %v1947_v3 = vpop.permute.xlu0 %1946 }
 0x765   :  { %1898 = vst.msk [vmem:[#allocation2 + $0x50] sm:$0x1f] %vm1892_vm11, %v1879_v29  ;;  %v4425_v29 = vmax.f32 %v4398_v54, %v4414_v23 }
 0x766   :  { %1965 = vst.msk [vmem:[#allocation2 + $0x60] sm:$0x1f] %vm1958_vm10, %v1947_v3  ;;  %v4402_v3 = vld [vmem:[#allocation3 + $0x60] ss:$2 sm:$0x1f] }
 0x768   :  { %v1883_v62 = vpop.permute.xlu1 %1882  ;;  %v4299_v53 = vpop.permute.xlu0 %4298 }
 0x769   :  { %1900 = vst.msk [vmem:[#allocation2 + $0x70] sm:$0x1f] %vm1892_vm11, %v1883_v62  ;;  %v4418_v62 = vld [vmem:[#allocation3 + $0x61] ss:$2 sm:$0x1f] }
 0x76a   :  { %4336 = vst.msk [vmem:[#allocation3 + $0x5a] sm:$0x1] %vm4325_vm8, %v4299_v53  ;;  %v4462_v53 = vld [vmem:[#allocation3 + $0x43] ss:$2 sm:$0x1f]  ;;  %v4427_v15 = vmax.f32 %v4402_v3, %v4418_v62 }
 0x76b   :  { %4368 = vst.msk [vmem:[#allocation3 + $0x5a] sm:$0x1] %vm10814_vm15, %v5688_v40 }
 0x76c   :  { %4385 = vst.msk [vmem:[#allocation3 + $0x5a] sm:$0x1] %vm4374_vm6, %v5688_v40  ;;  %v1904_v8 = vpop.permute.xlu1 %1903  ;;  %v4307_v5 = vpop.permute.xlu0 %4306 }
 0x76d   :  { %1927 = vst.msk [vmem:[#allocation2 + $0x10] sm:$0x1f] %vm1925_vm0, %v1904_v8 }
 0x76e   :  { %4340 = vst.msk [vmem:[#allocation3 + $0x7a] sm:$0x1] %vm4325_vm8, %v4307_v5 }
 0x76f   :  { %4372 = vst.msk [vmem:[#allocation3 + $0x7a] sm:$0x1] %vm10814_vm15, %v5688_v40 }
 0x770   :  { %4389 = vst.msk [vmem:[#allocation3 + $0x7a] sm:$0x1] %vm4374_vm6, %v5688_v40  ;;  %v1908_v1 = vpop.permute.xlu1 %1907 }
 0x771   :  { %1929 = vst.msk [vmem:[#allocation2 + $0x30] sm:$0x1f] %vm1925_vm0, %v1908_v1  ;;  %v4466_v1 = vld [vmem:[#allocation3 + $0x63] ss:$2 sm:$0x1f] }
 0x773   :  { %v4440_v27 = vld [vmem:[#allocation3 + $0x52] ss:$2 sm:$0x1f] }
 0x774   :  { %4958 = vst.msk [vmem:[#allocation3 + $0x56] sm:$0x1] %vm1624_vm12, %v5688_v40  ;;  %v1912_v43 = vpop.permute.xlu1 %1911  ;;  %v4450_v52 = vmax.f32 %v4426_v30, %v4440_v27  ;;  %v8378_v27 = vld [vmem:[#allocation2 + $0x20] sm:$0x1f] }
 0x775   :  { %1931 = vst.msk [vmem:[#allocation2 + $0x50] sm:$0x1f] %vm1925_vm0, %v1912_v43  ;;  %v8380_v43 = vld [vmem:[#allocation2 + $0x40] sm:$0x1f] }
 0x776   :  { %v8313_v10 = vmax.f32 %v4450_v52, %v4464_v14  ;;  %v8376_v14 = vld [vmem:[#allocation2] sm:$0x1f]  ;;  %2019 = vst.msk [vmem:[#allocation2 + $0x20] sm:$0x1] %vm2016_vm2, %v5688_v40  ;;  %2021 = vst.msk [vmem:[#allocation2 + $0x40] sm:$0x1] %vm2016_vm2, %v5688_v40 }
 0x777   :  { %v4444_v31 = vld [vmem:[#allocation3 + $0x72] ss:$2 sm:$0x1f]  ;;  %v8384_v52 = vld [vmem:[#allocation2 + $0x60] sm:$0x1f] }
 0x778   :  { %4960 = vst.msk [vmem:[#allocation3 + $0x76] sm:$0x1] %vm1624_vm12, %v5688_v40  ;;  %4495 = vrot.lane.b32.xlu0 %v8313_v10, %s5679_s13  ;;  %v1916_v41 = vpop.permute.xlu1 %1915  ;;  %v4452_v49 = vmax.f32 %v4428_v61, %v4444_v31 }
 0x779   :  { %1933 = vst.msk [vmem:[#allocation2 + $0x70] sm:$0x1f] %vm1925_vm0, %v1916_v41 }
 0x77a   :  { %v8320_v7 = vmax.f32 %v4452_v49, %v4468_v48  ;;  %2017 = vst.msk [vmem:[#allocation2] sm:$0x1] %vm2016_vm2, %v5688_v40  ;;  %2023 = vst.msk [vmem:[#allocation2 + $0x60] sm:$0x1] %vm2016_vm2, %v5688_v40 }
 0x77c   :  { %4499 = vrot.lane.b32.xlu0 %v8320_v7, %s5679_s13  ;;  %v1937_v44 = vpop.permute.xlu1 %1936 }
 0x77d   :  { %1960 = vst.msk [vmem:[#allocation2 + $0x10] sm:$0x1f] %vm1958_vm10, %v1937_v44 }
 0x780   :  { %4519 = vrot.lane.b32.xlu0 %v8222_v39, %s5680_s10  ;;  %v1941_v60 = vpop.permute.xlu1 %1940 }
 0x781   :  { %1962 = vst.msk [vmem:[#allocation2 + $0x30] sm:$0x1f] %vm1958_vm10, %v1941_v60 }
 0x784   :  { %4523 = vrot.lane.b32.xlu0 %v8230_v34, %s5680_s10  ;;  %v1945_v18 = vpop.permute.xlu1 %1944  ;;  %v8386_v61 = vld [vmem:[#allocation2 + $0x10] sm:$0x1f] }
 0x785   :  { %1964 = vst.msk [vmem:[#allocation2 + $0x50] sm:$0x1f] %vm1958_vm10, %v1945_v18 }
 0x786   :  { %2018 = vst.msk [vmem:[#allocation2 + $0x10] sm:$0x1] %vm2016_vm2, %v5688_v40 }
 0x788   :  { %4527 = vrot.lane.b32.xlu0 %v8313_v10, %s5680_s10  ;;  %v1949_v32 = vpop.permute.xlu1 %1948  ;;  %v8388_v48 = vld [vmem:[#allocation2 + $0x30] sm:$0x1f] }
 0x789   :  { %1966 = vst.msk [vmem:[#allocation2 + $0x70] sm:$0x1f] %vm1958_vm10, %v1949_v32 }
 0x78a   :  { %2020 = vst.msk [vmem:[#allocation2 + $0x30] sm:$0x1] %vm2016_vm2, %v5688_v40 }
 0x78c   :  { %4531 = vrot.lane.b32.xlu0 %v8320_v7, %s5680_s10  ;;  %v4295_v50 = vpop.permute.xlu1 %4294  ;;  %v8390_v31 = vld [vmem:[#allocation2 + $0x50] sm:$0x1f] }
 0x78d   :  { %4334 = vst.msk [vmem:[#allocation3 + $0x4a] sm:$0x1] %vm4325_vm8, %v4295_v50 }
 0x78e   :  { %4366 = vst.msk [vmem:[#allocation3 + $0x4a] sm:$0x1] %vm10814_vm15, %v5688_v40 }
 0x78f   :  { %4383 = vst.msk [vmem:[#allocation3 + $0x4a] sm:$0x1] %vm4374_vm6, %v5688_v40 }
 0x790   :  { %4551 = vrot.lane.b32.xlu0 %v8222_v39, %s5691_s20  ;;  %v4303_v26 = vpop.permute.xlu1 %4302  ;;  %v8392_v41 = vld [vmem:[#allocation2 + $0x70] sm:$0x1f]  ;;  %2022 = vst.msk [vmem:[#allocation2 + $0x50] sm:$0x1] %vm2016_vm2, %v5688_v40 }
 0x791   :  { %4338 = vst.msk [vmem:[#allocation3 + $0x6a] sm:$0x1] %vm4325_vm8, %v4303_v26  ;;  %v4488_v49 = vpop.permute.xlu0 %4487  ;;  %vm2506_vm8 = vcmp.gt.f32.partialorder %v7903_v19, %v8285_v4 }
 0x792   :  { %4370 = vst.msk [vmem:[#allocation3 + $0x6a] sm:$0x1] %vm10814_vm15, %v5688_v40  ;;  %v4510_v26 = vmax.f32 %v8222_v39, %v4488_v49 }
 0x793   :  { %4387 = vst.msk [vmem:[#allocation3 + $0x6a] sm:$0x1] %vm4374_vm6, %v5688_v40 }
 0x794   :  { %4555 = vrot.lane.b32.xlu0 %v8230_v34, %s5691_s20  ;;  %2024 = vst.msk [vmem:[#allocation2 + $0x70] sm:$0x1] %vm2016_vm2, %v5688_v40 }
 0x795   :  { %v4492_v44 = vpop.permute.xlu0 %4491 }
 0x796   :  { %v4438_v8 = vld [vmem:[#allocation3 + $0x42] ss:$2 sm:$0x1f] }
 0x797   :  { %4957 = vst.msk [vmem:[#allocation3 + $0x46] sm:$0x1] %vm1624_vm12, %v5688_v40  ;;  %v4449_v21 = vmax.f32 %v4425_v29, %v4438_v8 }
 0x798   :  { %4559 = vrot.lane.b32.xlu0 %v8313_v10, %s5691_s20 }
 0x799   :  { %v8354_v5 = vmax.f32 %v4449_v21, %v4462_v53  ;;  %v4512_v53 = vmax.f32 %v8230_v34, %v4492_v44 }
 0x79a   :  { %v4442_v30 = vld [vmem:[#allocation3 + $0x62] ss:$2 sm:$0x1f] }
 0x79b   :  { %4959 = vst.msk [vmem:[#allocation3 + $0x66] sm:$0x1] %vm1624_vm12, %v5688_v40  ;;  %4493 = vrot.lane.b32.xlu1 %v8354_v5, %s5679_s13  ;;  %v4451_v22 = vmax.f32 %v4427_v15, %v4442_v30 }
 0x79c   :  { %4563 = vrot.lane.b32.xlu0 %v8320_v7, %s5691_s20 }
 0x79d   :  { %v8362_v38 = vmax.f32 %v4451_v22, %v4466_v1 }
 0x79f   :  { %4497 = vrot.lane.b32.xlu1 %v8362_v38, %s5679_s13 }
 0x7a3   :  { %4517 = vrot.lane.b32.xlu1 %v8262_v47, %s5680_s10 }
 0x7a7   :  { %4521 = vrot.lane.b32.xlu1 %v8271_v6, %s5680_s10 }
 0x7ab   :  { %4525 = vrot.lane.b32.xlu1 %v8354_v5, %s5680_s10 }
 0x7af   :  { %4529 = vrot.lane.b32.xlu1 %v8362_v38, %s5680_s10 }
 0x7b3   :  { %4549 = vrot.lane.b32.xlu1 %v8262_v47, %s5691_s20 }
 0x7b5   :  { %v4486_v3 = vpop.permute.xlu1 %4485 }
 0x7b7   :  { %4553 = vrot.lane.b32.xlu1 %v8271_v6, %s5691_s20 }
 0x7ba   :  { %v4490_v39 = vpop.permute.xlu1 %4489 }
 0x7bb   :  { %4557 = vrot.lane.b32.xlu1 %v8354_v5, %s5691_s20 }
 0x7bf   :  { %4561 = vrot.lane.b32.xlu1 %v8362_v38, %s5691_s20 }
 0x7ea   :  { %v4496_v60 = vpop.permute.xlu0 %4495 }
 0x7eb   :  { %v4514_v1 = vmax.f32 %v8313_v10, %v4496_v60 }
 0x7ee   :  { %v4500_v18 = vpop.permute.xlu0 %4499 }
 0x7ef   :  { %v4516_v49 = vmax.f32 %v8320_v7, %v4500_v18 }
 0x7f2   :  { %v4520_v32 = vpop.permute.xlu0 %4519 }
 0x7f3   :  { %v4542_v29 = vmax.f32 %v4510_v26, %v4520_v32  ;;  %v2562_v26 = vsel %vm2496_vm3, %v7873_v28, %v8260_v20  ;;  %v2550_v28 = vsel %vm2500_vm5, %v7064_v11, %v8234_v59 }
 0x7f6   :  { %v4524_v50 = vpop.permute.xlu0 %4523 }
 0x7f7   :  { %v4544_v21 = vmax.f32 %v4512_v53, %v4524_v50 }
 0x7fa   :  { %v4528_v54 = vpop.permute.xlu0 %4527 }
 0x7fb   :  { %v4546_v22 = vmax.f32 %v4514_v1, %v4528_v54  ;;  %v2560_v54 = vsel %vm2494_vm1, %v7867_v37, %v8255_v25  ;;  %v2566_v1 = vsel %vm2500_vm5, %v7885_v51, %v8276_v0  ;;  %v2548_v37 = vsel %vm2498_vm13, %v7064_v11, %v8228_v17 }
 0x7fc   :  { %v2554_v51 = vsel %vm2504_vm9, %v7064_v11, %v8238_v58  ;;  %vm10813_vm5 = vcmask 3072  }
 0x7fe   :  { %v4532_v23 = vpop.permute.xlu0 %4531 }
 0x7ff   :  { %v4548_v32 = vmax.f32 %v4516_v49, %v4532_v23 }
 0x802   :  { %v4552_v62 = vpop.permute.xlu0 %4551 }
 0x803   :  { %v8432_v8 = vmax.f32 %v4542_v29, %v4552_v62  ;;  %v2564_v62 = vsel %vm2498_vm13, %v7879_v46, %v8269_v57  ;;  %v2552_v46 = vsel %vm2502_vm7, %v7064_v11, %v8236_v45  ;;  %vm4815_vm13 = vcmask 61496  }
 0x805   :  { %4582 = vst.msk [vmem:[#allocation3 + $0x10] sm:$0x1f] %vm1851_vm14, %v8432_v8  ;;  %4599 = vrot.lane.b32.xlu0 %v8432_v8, %s5679_s13 }
 0x806   :  { %v4556_v15 = vpop.permute.xlu0 %4555 }
 0x807   :  { %v8439_v30 = vmax.f32 %v4544_v21, %v4556_v15  ;;  %v4509_v21 = vmax.f32 %v8262_v47, %v4486_v3  ;;  %v2568_v47 = vsel %vm2502_vm7, %v7891_v55, %v8279_v16  ;;  %v2556_v55 = vsel %vm2506_vm8, %v7064_v11, %v8240_v63 }
 0x808   :  { %vm2284_vm7 = vcmask 36888  }
 0x809   :  { %4584 = vst.msk [vmem:[#allocation3 + $0x30] sm:$0x1f] %vm1851_vm14, %v8439_v30  ;;  %4603 = vrot.lane.b32.xlu0 %v8439_v30, %s5679_s13 }
 0x80a   :  { %v4560_v34 = vpop.permute.xlu0 %4559 }
 0x80b   :  { %v8446_v44 = vmax.f32 %v4546_v22, %v4560_v34  ;;  %v4511_v34 = vmax.f32 %v8271_v6, %v4490_v39 }
 0x80d   :  { %4586 = vst.msk [vmem:[#allocation3 + $0x50] sm:$0x1f] %vm1851_vm14, %v8446_v44  ;;  %4607 = vrot.lane.b32.xlu0 %v8446_v44, %s5679_s13  ;;  %v4494_v10 = vpop.permute.xlu1 %4493 }
 0x80e   :  { %v4564_v60 = vpop.permute.xlu0 %4563  ;;  %v4513_v3 = vmax.f32 %v8354_v5, %v4494_v10 }
 0x80f   :  { %v8452_v50 = vmax.f32 %v4548_v32, %v4564_v60 }
 0x811   :  { %4588 = vst.msk [vmem:[#allocation3 + $0x70] sm:$0x1f] %vm1851_vm14, %v8452_v50  ;;  %4611 = vrot.lane.b32.xlu0 %v8452_v50, %s5679_s13  ;;  %v4498_v7 = vpop.permute.xlu1 %4497 }
 0x812   :  { %v4515_v10 = vmax.f32 %v8362_v38, %v4498_v7 }
 0x815   :  { %4631 = vrot.lane.b32.xlu0 %v8432_v8, %s5680_s10  ;;  %v4518_v18 = vpop.permute.xlu1 %4517 }
 0x816   :  { %v4541_v15 = vmax.f32 %v4509_v21, %v4518_v18  ;;  %v5668_v18 = vld [vmem:[#allocation2 + $0x58] sm:$0x1] }
 0x817   :  { %v5670_v21 = vld [vmem:[#allocation2 + $0x78] sm:$0x1] }
 0x818   :  { %vm2508_vm6 = vcmp.gt.f32.partialorder %v5670_v21, %v8288_v33 }
 0x819   :  { %2594 = vrot.lane.b32.xlu0 %v2560_v54, %s5693_s26  ;;  %v4522_v23 = vpop.permute.xlu1 %4521  ;;  %v2570_v54 = vsel %vm2504_vm9, %v5668_v18, %v8282_v24  ;;  %v2558_v2 = vsel %vm2508_vm6, %v7064_v11, %v8243_v42  ;;  %vm5244_vm9 = vcmask 19472  }
 0x81a   :  { %v4543_v32 = vmax.f32 %v4511_v34, %v4522_v23 }
 0x81d   :  { %2598 = vrot.lane.b32.xlu0 %v2562_v26, %s5693_s26  ;;  %v4526_v29 = vpop.permute.xlu1 %4525 }
 0x81e   :  { %v4545_v60 = vmax.f32 %v4513_v3, %v4526_v29  ;;  %v5669_v29 = vld [vmem:[#allocation2 + $0x68] sm:$0x1] }
 0x821   :  { %2602 = vrot.lane.b32.xlu0 %v2564_v62, %s5693_s26  ;;  %v4530_v53 = vpop.permute.xlu1 %4529  ;;  %v2572_v62 = vsel %vm2506_vm8, %v5669_v29, %v8285_v4  ;;  %vm5277_vm8 = vcmask 27672  }
 0x822   :  { %v4547_v26 = vmax.f32 %v4515_v10, %v4530_v53  ;;  %v2574_v53 = vsel %vm2508_vm6, %v5670_v21, %v8288_v33  ;;  %vm5326_vm6 = vcmask 35848  }
 0x825   :  { %2606 = vrot.lane.b32.xlu0 %v2566_v1, %s5693_s26  ;;  %v4550_v22 = vpop.permute.xlu1 %4549  ;;  %v2546_v1 = vsel %vm2496_vm3, %v7064_v11, %v8219_v35  ;;  %vm2041_vm3 = vcmask 45096  }
 0x826   :  { %v8496_v49 = vmax.f32 %v4541_v15, %v4550_v22  ;;  %v2544_v15 = vsel %vm2494_vm1, %v7064_v11, %v8214_v36  ;;  %vm2007_vm1 = vcmask 36872  }
 0x828   :  { %4581 = vst.msk [vmem:[#allocation3] sm:$0x1f] %vm1851_vm14, %v8496_v49  ;;  %4597 = vrot.lane.b32.xlu1 %v8496_v49, %s5679_s13 }
 0x829   :  { %2610 = vrot.lane.b32.xlu0 %v2568_v47, %s5693_s26  ;;  %v4554_v6 = vpop.permute.xlu1 %4553 }
 0x82a   :  { %v8511_v39 = vmax.f32 %v4543_v32, %v4554_v6 }
 0x82c   :  { %4583 = vst.msk [vmem:[#allocation3 + $0x20] sm:$0x1f] %vm1851_vm14, %v8511_v39  ;;  %4601 = vrot.lane.b32.xlu1 %v8511_v39, %s5679_s13 }
 0x82d   :  { %2614 = vrot.lane.b32.xlu0 %v2570_v54, %s5693_s26  ;;  %v4558_v5 = vpop.permute.xlu1 %4557 }
 0x82e   :  { %v8525_v23 = vmax.f32 %v4545_v60, %v4558_v5 }
 0x830   :  { %4585 = vst.msk [vmem:[#allocation3 + $0x40] sm:$0x1f] %vm1851_vm14, %v8525_v23  ;;  %4605 = vrot.lane.b32.xlu1 %v8525_v23, %s5679_s13 }
 0x831   :  { %2618 = vrot.lane.b32.xlu0 %v2572_v62, %s5693_s26  ;;  %v4562_v38 = vpop.permute.xlu1 %4561 }
 0x832   :  { %v8537_v7 = vmax.f32 %v4547_v26, %v4562_v38 }
 0x834   :  { %4587 = vst.msk [vmem:[#allocation3 + $0x60] sm:$0x1f] %vm1851_vm14, %v8537_v7  ;;  %4609 = vrot.lane.b32.xlu1 %v8537_v7, %s5679_s13 }
 0x835   :  { %2622 = vrot.lane.b32.xlu0 %v2574_v53, %s5693_s26 }
 0x838   :  { %4629 = vrot.lane.b32.xlu1 %v8496_v49, %s5680_s10 }
 0x839   :  { %1983 = vrot.lane.b32.xlu0 %v8376_v14, %s5693_s26 }
 0x83c   :  { %2660 = vrot.lane.b32.xlu1 %v2544_v15, %s5693_s26 }
 0x83d   :  { %1987 = vrot.lane.b32.xlu0 %v8378_v27, %s5693_s26 }
 0x840   :  { %2664 = vrot.lane.b32.xlu1 %v2546_v1, %s5693_s26 }
 0x841   :  { %1991 = vrot.lane.b32.xlu0 %v8380_v43, %s5693_s26 }
 0x844   :  { %2668 = vrot.lane.b32.xlu1 %v2548_v37, %s5693_s26 }
 0x845   :  { %1995 = vrot.lane.b32.xlu0 %v8384_v52, %s5693_s26 }
 0x848   :  { %2672 = vrot.lane.b32.xlu1 %v2550_v28, %s5693_s26 }
 0x849   :  { %4635 = vrot.lane.b32.xlu0 %v8439_v30, %s5680_s10 }
 0x84c   :  { %2676 = vrot.lane.b32.xlu1 %v2552_v46, %s5693_s26 }
 0x84d   :  { %4639 = vrot.lane.b32.xlu0 %v8446_v44, %s5680_s10 }
 0x850   :  { %2680 = vrot.lane.b32.xlu1 %v2554_v51, %s5693_s26 }
 0x851   :  { %4643 = vrot.lane.b32.xlu0 %v8452_v50, %s5680_s10 }
 0x854   :  { %2684 = vrot.lane.b32.xlu1 %v2556_v55, %s5693_s26 }
 0x855   :  { %4663 = vrot.lane.b32.xlu0 %v8432_v8, %s5691_s20 }
 0x858   :  { %2688 = vrot.lane.b32.xlu1 %v2558_v2, %s5693_s26 }
 0x859   :  { %4667 = vrot.lane.b32.xlu0 %v8439_v30, %s5691_s20 }
 0x85c   :  { %1985 = vrot.lane.b32.xlu1 %v8386_v61, %s5693_s26 }
 0x85d   :  { %4671 = vrot.lane.b32.xlu0 %v8446_v44, %s5691_s20 }
 0x860   :  { %1989 = vrot.lane.b32.xlu1 %v8388_v48, %s5693_s26 }
 0x861   :  { %4675 = vrot.lane.b32.xlu0 %v8452_v50, %s5691_s20 }
 0x864   :  { %1993 = vrot.lane.b32.xlu1 %v8390_v31, %s5693_s26 }
 0x865   :  { %4695 = vrot.lane.b32.xlu0 %v8432_v8, %s5681_s0 }
 0x868   :  { %1997 = vrot.lane.b32.xlu1 %v8392_v41, %s5693_s26 }
 0x869   :  { %4699 = vrot.lane.b32.xlu0 %v8439_v30, %s5681_s0 }
 0x86c   :  { %4633 = vrot.lane.b32.xlu1 %v8511_v39, %s5680_s10 }
 0x86d   :  { %4703 = vrot.lane.b32.xlu0 %v8446_v44, %s5681_s0 }
 0x870   :  { %4637 = vrot.lane.b32.xlu1 %v8525_v23, %s5680_s10 }
 0x871   :  { %4707 = vrot.lane.b32.xlu0 %v8452_v50, %s5681_s0 }
 0x874   :  { %4641 = vrot.lane.b32.xlu1 %v8537_v7, %s5680_s10 }
 0x875   :  { %4728 = vrot.lane.b32.xlu0 %v8432_v8, %s5692_s21 }
 0x877   :  { %v4600_v19 = vpop.permute.xlu0 %4599 }
 0x878   :  { %4622 = vst.msk [vmem:[#allocation3 + $0x10] sm:$0x1f] %vm1892_vm11, %v4600_v19  ;;  %4661 = vrot.lane.b32.xlu1 %v8496_v49, %s5691_s20 }
 0x879   :  { %4732 = vrot.lane.b32.xlu0 %v8439_v30, %s5692_s21 }
 0x87b   :  { %v4604_v36 = vpop.permute.xlu0 %4603 }
 0x87c   :  { %4624 = vst.msk [vmem:[#allocation3 + $0x30] sm:$0x1f] %vm1892_vm11, %v4604_v36  ;;  %4665 = vrot.lane.b32.xlu1 %v8511_v39, %s5691_s20 }
 0x87d   :  { %4736 = vrot.lane.b32.xlu0 %v8446_v44, %s5692_s21 }
 0x87f   :  { %v4608_v35 = vpop.permute.xlu0 %4607 }
 0x880   :  { %4626 = vst.msk [vmem:[#allocation3 + $0x50] sm:$0x1f] %vm1892_vm11, %v4608_v35  ;;  %4669 = vrot.lane.b32.xlu1 %v8525_v23, %s5691_s20 }
 0x881   :  { %4740 = vrot.lane.b32.xlu0 %v8452_v50, %s5692_s21 }
 0x883   :  { %v4612_v17 = vpop.permute.xlu0 %4611 }
 0x884   :  { %4628 = vst.msk [vmem:[#allocation3 + $0x70] sm:$0x1f] %vm1892_vm11, %v4612_v17  ;;  %4673 = vrot.lane.b32.xlu1 %v8537_v7, %s5691_s20 }
 0x887   :  { %v4632_v59 = vpop.permute.xlu0 %4631 }
 0x888   :  { %4654 = vst.msk [vmem:[#allocation3 + $0x10] sm:$0x1f] %vm1925_vm0, %v4632_v59  ;;  %4693 = vrot.lane.b32.xlu1 %v8496_v49, %s5681_s0 }
 0x88b   :  { %v8663_v45 = vpop.permute.xlu0 %2594 }
 0x88c   :  { %4697 = vrot.lane.b32.xlu1 %v8511_v39, %s5681_s0 }
 0x88f   :  { %v8667_v58 = vpop.permute.xlu0 %2598 }
 0x890   :  { %4701 = vrot.lane.b32.xlu1 %v8525_v23, %s5681_s0 }
 0x893   :  { %v8671_v63 = vpop.permute.xlu0 %2602 }
 0x894   :  { %4705 = vrot.lane.b32.xlu1 %v8537_v7, %s5681_s0 }
 0x897   :  { %v8675_v42 = vpop.permute.xlu0 %2606 }
 0x898   :  { %4726 = vrot.lane.b32.xlu1 %v8496_v49, %s5692_s21 }
 0x89a   :  { %v4598_v25 = vpop.permute.xlu1 %4597 }
 0x89b   :  { %4621 = vst.msk [vmem:[#allocation3] sm:$0x1f] %vm1892_vm11, %v4598_v25  ;;  %v8680_v20 = vpop.permute.xlu0 %2610 }
 0x89c   :  { %4730 = vrot.lane.b32.xlu1 %v8511_v39, %s5692_s21 }
 0x89e   :  { %v4602_v57 = vpop.permute.xlu1 %4601 }
 0x89f   :  { %4623 = vst.msk [vmem:[#allocation3 + $0x20] sm:$0x1f] %vm1892_vm11, %v4602_v57  ;;  %v8685_v0 = vpop.permute.xlu0 %2614 }
 0x8a0   :  { %4734 = vrot.lane.b32.xlu1 %v8525_v23, %s5692_s21 }
 0x8a2   :  { %v4606_v16 = vpop.permute.xlu1 %4605 }
 0x8a3   :  { %4625 = vst.msk [vmem:[#allocation3 + $0x40] sm:$0x1f] %vm1892_vm11, %v4606_v16  ;;  %v8690_v24 = vpop.permute.xlu0 %2618 }
 0x8a4   :  { %4738 = vrot.lane.b32.xlu1 %v8537_v7, %s5692_s21 }
 0x8a6   :  { %v4610_v4 = vpop.permute.xlu1 %4609 }
 0x8a7   :  { %4627 = vst.msk [vmem:[#allocation3 + $0x60] sm:$0x1f] %vm1892_vm11, %v4610_v4  ;;  %v8695_v33 = vpop.permute.xlu0 %2622  ;;  %vm4717_vm11 = vcmask 36896  }
 0x8aa   :  { %v4630_v14 = vpop.permute.xlu1 %4629 }
 0x8ab   :  { %4653 = vst.msk [vmem:[#allocation3] sm:$0x1f] %vm1925_vm0, %v4630_v14  ;;  %v1984_v27 = vpop.permute.xlu0 %1983 }
 0x8ac   :  { %2008 = vst.msk [vmem:[#allocation2 + $0x1] sm:$0x1f] %vm2007_vm1, %v1984_v27 }
 0x8ad   :  { %2033 = vst.msk [vmem:[#allocation2 + $0x1] sm:$0x1f] %vm1851_vm14, %v5688_v40 }
 0x8ae   :  { %v8701_v43 = vpop.permute.xlu1 %2660  ;;  %2042 = vst.msk [vmem:[#allocation2 + $0x1] sm:$0x1f] %vm2041_vm3, %v5688_v40 }
 0x8af   :  { %v1988_v52 = vpop.permute.xlu0 %1987 }
 0x8b0   :  { %2010 = vst.msk [vmem:[#allocation2 + $0x21] sm:$0x1f] %vm2007_vm1, %v1988_v52 }
 0x8b1   :  { %2035 = vst.msk [vmem:[#allocation2 + $0x21] sm:$0x1f] %vm1851_vm14, %v5688_v40 }
 0x8b2   :  { %v8708_v61 = vpop.permute.xlu1 %2664  ;;  %2044 = vst.msk [vmem:[#allocation2 + $0x21] sm:$0x1f] %vm2041_vm3, %v5688_v40 }
 0x8b3   :  { %v1992_v48 = vpop.permute.xlu0 %1991 }
 0x8b4   :  { %2012 = vst.msk [vmem:[#allocation2 + $0x41] sm:$0x1f] %vm2007_vm1, %v1992_v48 }
 0x8b5   :  { %2037 = vst.msk [vmem:[#allocation2 + $0x41] sm:$0x1f] %vm1851_vm14, %v5688_v40  ;;  %v8774_v46 = vld [vmem:[#allocation2] sm:$0x3f] }
 0x8b6   :  { %v8715_v31 = vpop.permute.xlu1 %2668  ;;  %2046 = vst.msk [vmem:[#allocation2 + $0x41] sm:$0x1f] %vm2041_vm3, %v5688_v40  ;;  %v8776_v51 = vld [vmem:[#allocation2 + $0x1] sm:$0x3f] }
 0x8b7   :  { %v1996_v41 = vpop.permute.xlu0 %1995  ;;  %2259 = vst.msk [vmem:[#allocation2] sm:$0x3] %vm2258_vm4, %v5688_v40 }
 0x8b8   :  { %2014 = vst.msk [vmem:[#allocation2 + $0x61] sm:$0x1f] %vm2007_vm1, %v1996_v41 }
 0x8b9   :  { %2039 = vst.msk [vmem:[#allocation2 + $0x61] sm:$0x1f] %vm1851_vm14, %v5688_v40  ;;  %v8783_v36 = vld [vmem:[#allocation2 + $0x20] sm:$0x3f] }
 0x8ba   :  { %v8722_v8 = vpop.permute.xlu1 %2672  ;;  %2048 = vst.msk [vmem:[#allocation2 + $0x61] sm:$0x1f] %vm2041_vm3, %v5688_v40  ;;  %v8785_v35 = vld [vmem:[#allocation2 + $0x21] sm:$0x3f] }
 0x8bb   :  { %v4636_v30 = vpop.permute.xlu0 %4635  ;;  %2261 = vst.msk [vmem:[#allocation2 + $0x20] sm:$0x3] %vm2258_vm4, %v5688_v40 }
 0x8bc   :  { %4656 = vst.msk [vmem:[#allocation3 + $0x30] sm:$0x1f] %vm1925_vm0, %v4636_v30 }
 0x8bd   :  { %v8791_v25 = vld [vmem:[#allocation2 + $0x40] sm:$0x3f] }
 0x8be   :  { %v8727_v44 = vpop.permute.xlu1 %2676  ;;  %v8793_v57 = vld [vmem:[#allocation2 + $0x41] sm:$0x3f] }
 0x8bf   :  { %v4640_v50 = vpop.permute.xlu0 %4639  ;;  %2263 = vst.msk [vmem:[#allocation2 + $0x40] sm:$0x3] %vm2258_vm4, %v5688_v40 }
 0x8c0   :  { %4658 = vst.msk [vmem:[#allocation3 + $0x50] sm:$0x1f] %vm1925_vm0, %v4640_v50 }
 0x8c1   :  { %v8799_v14 = vld [vmem:[#allocation2 + $0x60] sm:$0x3f] }
 0x8c2   :  { %v8730_v22 = vpop.permute.xlu1 %2680  ;;  %v8801_v27 = vld [vmem:[#allocation2 + $0x61] sm:$0x3f] }
 0x8c3   :  { %v4644_v34 = vpop.permute.xlu0 %4643  ;;  %2265 = vst.msk [vmem:[#allocation2 + $0x60] sm:$0x3] %vm2258_vm4, %v5688_v40 }
 0x8c4   :  { %4660 = vst.msk [vmem:[#allocation3 + $0x70] sm:$0x1f] %vm1925_vm0, %v4644_v34 }
 0x8c6   :  { %v8733_v49 = vpop.permute.xlu1 %2684 }
 0x8c7   :  { %v4664_v32 = vpop.permute.xlu0 %4663 }
 0x8c8   :  { %4686 = vst.msk [vmem:[#allocation3 + $0x10] sm:$0x1f] %vm1958_vm10, %v4664_v32 }
 0x8ca   :  { %v8736_v47 = vpop.permute.xlu1 %2688 }
 0x8cb   :  { %v4668_v6 = vpop.permute.xlu0 %4667 }
 0x8cc   :  { %4688 = vst.msk [vmem:[#allocation3 + $0x30] sm:$0x1f] %vm1958_vm10, %v4668_v6 }
 0x8ce   :  { %v1986_v3 = vpop.permute.xlu1 %1985 }
 0x8cf   :  { %2009 = vst.msk [vmem:[#allocation2 + $0x11] sm:$0x1f] %vm2007_vm1, %v1986_v3  ;;  %v4672_v39 = vpop.permute.xlu0 %4671 }
 0x8d0   :  { %2034 = vst.msk [vmem:[#allocation2 + $0x11] sm:$0x1f] %vm1851_vm14, %v5688_v40 }
 0x8d1   :  { %4690 = vst.msk [vmem:[#allocation3 + $0x50] sm:$0x1f] %vm1958_vm10, %v4672_v39 }
 0x8d2   :  { %2043 = vst.msk [vmem:[#allocation2 + $0x11] sm:$0x1f] %vm2041_vm3, %v5688_v40  ;;  %v1990_v60 = vpop.permute.xlu1 %1989 }
 0x8d3   :  { %2011 = vst.msk [vmem:[#allocation2 + $0x31] sm:$0x1f] %vm2007_vm1, %v1990_v60  ;;  %v4676_v18 = vpop.permute.xlu0 %4675 }
 0x8d4   :  { %2036 = vst.msk [vmem:[#allocation2 + $0x31] sm:$0x1f] %vm1851_vm14, %v5688_v40 }
 0x8d5   :  { %4692 = vst.msk [vmem:[#allocation3 + $0x70] sm:$0x1f] %vm1958_vm10, %v4676_v18 }
 0x8d6   :  { %2045 = vst.msk [vmem:[#allocation2 + $0x31] sm:$0x1f] %vm2041_vm3, %v5688_v40  ;;  %v1994_v54 = vpop.permute.xlu1 %1993 }
 0x8d7   :  { %2013 = vst.msk [vmem:[#allocation2 + $0x51] sm:$0x1f] %vm2007_vm1, %v1994_v54  ;;  %v4696_v5 = vpop.permute.xlu0 %4695 }
 0x8d8   :  { %2038 = vst.msk [vmem:[#allocation2 + $0x51] sm:$0x1f] %vm1851_vm14, %v5688_v40 }
 0x8d9   :  { %4719 = vst.msk [vmem:[#allocation3 + $0x10] sm:$0x1f] %vm4717_vm11, %v4696_v5  ;;  %v8812_v6 = vld [vmem:[#allocation2 + $0x10] sm:$0x3f] }
 0x8da   :  { %2047 = vst.msk [vmem:[#allocation2 + $0x51] sm:$0x1f] %vm2041_vm3, %v5688_v40  ;;  %v1998_v10 = vpop.permute.xlu1 %1997  ;;  %v8814_v3 = vld [vmem:[#allocation2 + $0x11] sm:$0x3f] }
 0x8db   :  { %2015 = vst.msk [vmem:[#allocation2 + $0x71] sm:$0x1f] %vm2007_vm1, %v1998_v10  ;;  %v4700_v23 = vpop.permute.xlu0 %4699  ;;  %vm5359_vm1 = vcmask 44072  }
 0x8dc   :  { %2040 = vst.msk [vmem:[#allocation2 + $0x71] sm:$0x1f] %vm1851_vm14, %v5688_v40 }
 0x8dd   :  { %4721 = vst.msk [vmem:[#allocation3 + $0x30] sm:$0x1f] %vm4717_vm11, %v4700_v23  ;;  %v8820_v18 = vld [vmem:[#allocation2 + $0x30] sm:$0x3f] }
 0x8de   :  { %2049 = vst.msk [vmem:[#allocation2 + $0x71] sm:$0x1f] %vm2041_vm3, %v5688_v40  ;;  %v4634_v26 = vpop.permute.xlu1 %4633  ;;  %v8822_v54 = vld [vmem:[#allocation2 + $0x31] sm:$0x3f] }
 0x8df   :  { %4655 = vst.msk [vmem:[#allocation3 + $0x20] sm:$0x1f] %vm1925_vm0, %v4634_v26  ;;  %v4704_v29 = vpop.permute.xlu0 %4703 }
 0x8e0   :  { %4723 = vst.msk [vmem:[#allocation3 + $0x50] sm:$0x1f] %vm4717_vm11, %v4704_v29 }
 0x8e1   :  { %2260 = vst.msk [vmem:[#allocation2 + $0x10] sm:$0x3] %vm2258_vm4, %v5688_v40  ;;  %2262 = vst.msk [vmem:[#allocation2 + $0x30] sm:$0x3] %vm2258_vm4, %v5688_v40  ;;  %v8827_v10 = vld [vmem:[#allocation2 + $0x50] sm:$0x3f] }
 0x8e2   :  { %v4638_v62 = vpop.permute.xlu1 %4637  ;;  %v8829_v23 = vld [vmem:[#allocation2 + $0x51] sm:$0x3f] }
 0x8e3   :  { %4657 = vst.msk [vmem:[#allocation3 + $0x40] sm:$0x1f] %vm1925_vm0, %v4638_v62  ;;  %v4708_v21 = vpop.permute.xlu0 %4707 }
 0x8e4   :  { %4725 = vst.msk [vmem:[#allocation3 + $0x70] sm:$0x1f] %vm4717_vm11, %v4708_v21 }
 0x8e5   :  { %2264 = vst.msk [vmem:[#allocation2 + $0x50] sm:$0x3] %vm2258_vm4, %v5688_v40  ;;  %v8834_v29 = vld [vmem:[#allocation2 + $0x70] sm:$0x3f] }
 0x8e6   :  { %v4642_v38 = vpop.permute.xlu1 %4641  ;;  %v8836_v62 = vld [vmem:[#allocation2 + $0x71] sm:$0x3f] }
 0x8e7   :  { %4659 = vst.msk [vmem:[#allocation3 + $0x60] sm:$0x1f] %vm1925_vm0, %v4642_v38  ;;  %v4729_v7 = vpop.permute.xlu0 %4728 }
 0x8e8   :  { %4751 = vst.msk [vmem:[#allocation3 + $0x10] sm:$0x1f] %vm2041_vm3, %v4729_v7 }
 0x8e9   :  { %2266 = vst.msk [vmem:[#allocation2 + $0x70] sm:$0x3] %vm2258_vm4, %v5688_v40  ;;  %vm2275_vm4 = vcmask 12288  }
 0x8ea   :  { %v4662_v53 = vpop.permute.xlu1 %4661 }
 0x8eb   :  { %4685 = vst.msk [vmem:[#allocation3] sm:$0x1f] %vm1958_vm10, %v4662_v53  ;;  %v4733_v15 = vpop.permute.xlu0 %4732 }
 0x8ec   :  { %4753 = vst.msk [vmem:[#allocation3 + $0x30] sm:$0x1f] %vm2041_vm3, %v4733_v15 }
 0x8ee   :  { %v4666_v1 = vpop.permute.xlu1 %4665 }
 0x8ef   :  { %v4759_v37 = vld [vmem:[#allocation3 + $0x10] sm:$0x1f]  ;;  %4687 = vst.msk [vmem:[#allocation3 + $0x20] sm:$0x1f] %vm1958_vm10, %v4666_v1  ;;  %v4737_v28 = vpop.permute.xlu0 %4736 }
 0x8f0   :  { %4755 = vst.msk [vmem:[#allocation3 + $0x50] sm:$0x1f] %vm2041_vm3, %v4737_v28  ;;  %4776 = vrot.lane.b32.xlu0 %v4759_v37, %s5693_s26  ;;  %v8874_v37 = vmax.f32 %v8774_v46, %v8776_v51  ;;  %v8892_v46 = vmax.f32 %v8791_v25, %v8793_v57  ;;  %v8900_v51 = vmax.f32 %v8799_v14, %v8801_v27 }
 0x8f1   :  { %v8946_v57 = vmax.f32 %v8812_v6, %v8814_v3  ;;  %v8968_v27 = vmax.f32 %v8827_v10, %v8829_v23 }
 0x8f2   :  { %v4670_v55 = vpop.permute.xlu1 %4669 }
 0x8f3   :  { %v4761_v2 = vld [vmem:[#allocation3 + $0x30] sm:$0x1f]  ;;  %4689 = vst.msk [vmem:[#allocation3 + $0x40] sm:$0x1f] %vm1958_vm10, %v4670_v55  ;;  %v4741_v19 = vpop.permute.xlu0 %4740  ;;  %v8882_v55 = vmax.f32 %v8783_v36, %v8785_v35 }
 0x8f4   :  { %4757 = vst.msk [vmem:[#allocation3 + $0x70] sm:$0x1f] %vm2041_vm3, %v4741_v19  ;;  %4780 = vrot.lane.b32.xlu0 %v4761_v2, %s5693_s26 }
 0x8f6   :  { %v4674_v17 = vpop.permute.xlu1 %4673 }
 0x8f7   :  { %v4763_v59 = vld [vmem:[#allocation3 + $0x50] sm:$0x1f]  ;;  %4691 = vst.msk [vmem:[#allocation3 + $0x60] sm:$0x1f] %vm1958_vm10, %v4674_v17  ;;  %vm4798_vm10 = vcmask 53256  }
 0x8f8   :  { %4784 = vrot.lane.b32.xlu0 %v4763_v59, %s5693_s26 }
 0x8fa   :  { %v4694_v16 = vpop.permute.xlu1 %4693 }
 0x8fb   :  { %v4765_v4 = vld [vmem:[#allocation3 + $0x70] sm:$0x1f]  ;;  %4718 = vst.msk [vmem:[#allocation3] sm:$0x1f] %vm4717_vm11, %v4694_v16 }
 0x8fc   :  { %4788 = vrot.lane.b32.xlu0 %v4765_v4, %s5693_s26  ;;  %v8956_v4 = vmax.f32 %v8820_v18, %v8822_v54 }
 0x8fe   :  { %v4698_v52 = vpop.permute.xlu1 %4697 }
 0x8ff   :  { %4720 = vst.msk [vmem:[#allocation3 + $0x20] sm:$0x1f] %vm4717_vm11, %v4698_v52  ;;  %v8978_v52 = vmax.f32 %v8834_v29, %v8836_v62 }
 0x902   :  { %v4702_v48 = vpop.permute.xlu1 %4701 }
 0x903   :  { %4722 = vst.msk [vmem:[#allocation3 + $0x40] sm:$0x1f] %vm4717_vm11, %v4702_v48 }
 0x906   :  { %v4706_v41 = vpop.permute.xlu1 %4705 }
 0x907   :  { %4724 = vst.msk [vmem:[#allocation3 + $0x60] sm:$0x1f] %vm4717_vm11, %v4706_v41 }
 0x90a   :  { %v4727_v30 = vpop.permute.xlu1 %4726 }
 0x90b   :  { %4750 = vst.msk [vmem:[#allocation3] sm:$0x1f] %vm2041_vm3, %v4727_v30 }
 0x90e   :  { %v4731_v50 = vpop.permute.xlu1 %4730 }
 0x90f   :  { %4752 = vst.msk [vmem:[#allocation3 + $0x20] sm:$0x1f] %vm2041_vm3, %v4731_v50 }
 0x912   :  { %v4758_v34 = vld [vmem:[#allocation3] sm:$0x1f]  ;;  %v4735_v32 = vpop.permute.xlu1 %4734 }
 0x913   :  { %4754 = vst.msk [vmem:[#allocation3 + $0x40] sm:$0x1f] %vm2041_vm3, %v4735_v32  ;;  %4774 = vrot.lane.b32.xlu1 %v4758_v34, %s5693_s26 }
 0x916   :  { %v4760_v39 = vld [vmem:[#allocation3 + $0x20] sm:$0x1f]  ;;  %v4739_v60 = vpop.permute.xlu1 %4738 }
 0x917   :  { %4756 = vst.msk [vmem:[#allocation3 + $0x60] sm:$0x1f] %vm2041_vm3, %v4739_v60  ;;  %4778 = vrot.lane.b32.xlu1 %v4760_v39, %s5693_s26 }
 0x91a   :  { %v4762_v5 = vld [vmem:[#allocation3 + $0x40] sm:$0x1f] }
 0x91b   :  { %4782 = vrot.lane.b32.xlu1 %v4762_v5, %s5693_s26 }
 0x91e   :  { %v4764_v26 = vld [vmem:[#allocation3 + $0x60] sm:$0x1f] }
 0x91f   :  { %4786 = vrot.lane.b32.xlu1 %v4764_v26, %s5693_s26 }
 0x962   :  { %v4777_v21 = vpop.permute.xlu0 %4776 }
 0x963   :  { %4800 = vst.msk [vmem:[#allocation3 + $0x10] sm:$0x1f] %vm4798_vm10, %v4777_v21 }
 0x964   :  { %4808 = vst.msk [vmem:[#allocation3 + $0x10] sm:$0x1f] %vm1851_vm14, %v5688_v40 }
 0x965   :  { %4817 = vst.msk [vmem:[#allocation3 + $0x10] sm:$0x1f] %vm4815_vm13, %v5688_v40 }
 0x966   :  { %v4781_v38 = vpop.permute.xlu0 %4780 }
 0x967   :  { %4802 = vst.msk [vmem:[#allocation3 + $0x30] sm:$0x1f] %vm4798_vm10, %v4781_v38 }
 0x968   :  { %4810 = vst.msk [vmem:[#allocation3 + $0x30] sm:$0x1f] %vm1851_vm14, %v5688_v40 }
 0x969   :  { %4819 = vst.msk [vmem:[#allocation3 + $0x30] sm:$0x1f] %vm4815_vm13, %v5688_v40 }
 0x96a   :  { %v4785_v7 = vpop.permute.xlu0 %4784 }
 0x96b   :  { %4804 = vst.msk [vmem:[#allocation3 + $0x50] sm:$0x1f] %vm4798_vm10, %v4785_v7 }
 0x96c   :  { %4812 = vst.msk [vmem:[#allocation3 + $0x50] sm:$0x1f] %vm1851_vm14, %v5688_v40  ;;  %v8853_v53 = vld [vmem:[#allocation3 + $0x10] sm:$0x1f] }
 0x96d   :  { %4821 = vst.msk [vmem:[#allocation3 + $0x50] sm:$0x1f] %vm4815_vm13, %v5688_v40  ;;  %4842 = vrot.lane.b32.xlu0 %v8853_v53, %s5679_s13 }
 0x96e   :  { %4946 = vst.msk [vmem:[#allocation3 + $0x10] sm:$0x1] %vm1624_vm12, %v5688_v40  ;;  %v4789_v15 = vpop.permute.xlu0 %4788 }
 0x96f   :  { %4806 = vst.msk [vmem:[#allocation3 + $0x70] sm:$0x1f] %vm4798_vm10, %v4789_v15 }
 0x970   :  { %4814 = vst.msk [vmem:[#allocation3 + $0x70] sm:$0x1f] %vm1851_vm14, %v5688_v40  ;;  %v8864_v1 = vld [vmem:[#allocation3 + $0x30] sm:$0x1f] }
 0x971   :  { %4823 = vst.msk [vmem:[#allocation3 + $0x70] sm:$0x1f] %vm4815_vm13, %v5688_v40  ;;  %4846 = vrot.lane.b32.xlu0 %v8864_v1, %s5679_s13 }
 0x972   :  { %4948 = vst.msk [vmem:[#allocation3 + $0x30] sm:$0x1] %vm1624_vm12, %v5688_v40 }
 0x974   :  { %v8876_v28 = vld [vmem:[#allocation3 + $0x50] sm:$0x1f] }
 0x975   :  { %2082 = vrot.lane.b32.xlu0 %v8874_v37, %s5680_s10  ;;  %4950 = vst.msk [vmem:[#allocation3 + $0x50] sm:$0x1] %vm1624_vm12, %v5688_v40 }
 0x978   :  { %v8886_v2 = vld [vmem:[#allocation3 + $0x70] sm:$0x1f] }
 0x979   :  { %2086 = vrot.lane.b32.xlu0 %v8882_v55, %s5680_s10  ;;  %4952 = vst.msk [vmem:[#allocation3 + $0x70] sm:$0x1] %vm1624_vm12, %v5688_v40 }
 0x97d   :  { %2090 = vrot.lane.b32.xlu0 %v8892_v46, %s5680_s10 }
 0x981   :  { %2094 = vrot.lane.b32.xlu0 %v8900_v51, %s5680_s10 }
 0x985   :  { %2114 = vrot.lane.b32.xlu0 %v8874_v37, %s5681_s0  ;;  %v4775_v19 = vpop.permute.xlu1 %4774 }
 0x986   :  { %4799 = vst.msk [vmem:[#allocation3] sm:$0x1f] %vm4798_vm10, %v4775_v19 }
 0x987   :  { %4807 = vst.msk [vmem:[#allocation3] sm:$0x1f] %vm1851_vm14, %v5688_v40 }
 0x988   :  { %4816 = vst.msk [vmem:[#allocation3] sm:$0x1f] %vm4815_vm13, %v5688_v40 }
 0x989   :  { %2118 = vrot.lane.b32.xlu0 %v8882_v55, %s5681_s0  ;;  %v4779_v36 = vpop.permute.xlu1 %4778 }
 0x98a   :  { %4801 = vst.msk [vmem:[#allocation3 + $0x20] sm:$0x1f] %vm4798_vm10, %v4779_v36 }
 0x98b   :  { %4809 = vst.msk [vmem:[#allocation3 + $0x20] sm:$0x1f] %vm1851_vm14, %v5688_v40 }
 0x98c   :  { %4818 = vst.msk [vmem:[#allocation3 + $0x20] sm:$0x1f] %vm4815_vm13, %v5688_v40 }
 0x98d   :  { %2122 = vrot.lane.b32.xlu0 %v8892_v46, %s5681_s0  ;;  %v4783_v35 = vpop.permute.xlu1 %4782 }
 0x98e   :  { %4803 = vst.msk [vmem:[#allocation3 + $0x40] sm:$0x1f] %vm4798_vm10, %v4783_v35 }
 0x98f   :  { %4811 = vst.msk [vmem:[#allocation3 + $0x40] sm:$0x1f] %vm1851_vm14, %v5688_v40  ;;  %v8923_v17 = vld [vmem:[#allocation3] sm:$0x1f] }
 0x990   :  { %4820 = vst.msk [vmem:[#allocation3 + $0x40] sm:$0x1f] %vm4815_vm13, %v5688_v40  ;;  %4840 = vrot.lane.b32.xlu1 %v8923_v17, %s5679_s13 }
 0x991   :  { %4945 = vst.msk [vmem:[#allocation3] sm:$0x1] %vm1624_vm12, %v5688_v40  ;;  %2126 = vrot.lane.b32.xlu0 %v8900_v51, %s5681_s0  ;;  %v4787_v59 = vpop.permute.xlu1 %4786 }
 0x992   :  { %4805 = vst.msk [vmem:[#allocation3 + $0x60] sm:$0x1f] %vm4798_vm10, %v4787_v59 }
 0x993   :  { %4813 = vst.msk [vmem:[#allocation3 + $0x60] sm:$0x1f] %vm1851_vm14, %v5688_v40  ;;  %v8936_v25 = vld [vmem:[#allocation3 + $0x20] sm:$0x1f]  ;;  %vm4969_vm14 = vcmask 86080  }
 0x994   :  { %4822 = vst.msk [vmem:[#allocation3 + $0x60] sm:$0x1f] %vm4815_vm13, %v5688_v40  ;;  %4844 = vrot.lane.b32.xlu1 %v8936_v25, %s5679_s13 }
 0x995   :  { %4947 = vst.msk [vmem:[#allocation3 + $0x20] sm:$0x1] %vm1624_vm12, %v5688_v40  ;;  %4850 = vrot.lane.b32.xlu0 %v8876_v28, %s5679_s13 }
 0x997   :  { %v8950_v16 = vld [vmem:[#allocation3 + $0x40] sm:$0x1f] }
 0x998   :  { %2084 = vrot.lane.b32.xlu1 %v8946_v57, %s5680_s10  ;;  %4949 = vst.msk [vmem:[#allocation3 + $0x40] sm:$0x1] %vm1624_vm12, %v5688_v40 }
 0x999   :  { %4854 = vrot.lane.b32.xlu0 %v8886_v2, %s5679_s13 }
 0x99b   :  { %v8962_v14 = vld [vmem:[#allocation3 + $0x60] sm:$0x1f] }
 0x99c   :  { %2088 = vrot.lane.b32.xlu1 %v8956_v4, %s5680_s10  ;;  %4951 = vst.msk [vmem:[#allocation3 + $0x60] sm:$0x1] %vm1624_vm12, %v5688_v40  ;;  %vm4936_vm12 = vcmask 61456  }
 0x99d   :  { %4874 = vrot.lane.b32.xlu0 %v8853_v53, %s5680_s10 }
 0x9a0   :  { %2092 = vrot.lane.b32.xlu1 %v8968_v27, %s5680_s10 }
 0x9a1   :  { %4878 = vrot.lane.b32.xlu0 %v8864_v1, %s5680_s10 }
 0x9a4   :  { %2096 = vrot.lane.b32.xlu1 %v8978_v52, %s5680_s10 }
 0x9a5   :  { %4882 = vrot.lane.b32.xlu0 %v8876_v28, %s5680_s10 }
 0x9a8   :  { %2116 = vrot.lane.b32.xlu1 %v8946_v57, %s5681_s0 }
 0x9a9   :  { %4886 = vrot.lane.b32.xlu0 %v8886_v2, %s5680_s10 }
 0x9ac   :  { %2120 = vrot.lane.b32.xlu1 %v8956_v4, %s5681_s0 }
 0x9b0   :  { %2124 = vrot.lane.b32.xlu1 %v8968_v27, %s5681_s0 }
 0x9b4   :  { %2128 = vrot.lane.b32.xlu1 %v8978_v52, %s5681_s0 }
 0x9b8   :  { %4848 = vrot.lane.b32.xlu1 %v8950_v16, %s5679_s13 }
 0x9bc   :  { %4852 = vrot.lane.b32.xlu1 %v8962_v14, %s5679_s13 }
 0x9c0   :  { %4872 = vrot.lane.b32.xlu1 %v8923_v17, %s5680_s10 }
 0x9c4   :  { %4876 = vrot.lane.b32.xlu1 %v8936_v25, %s5680_s10 }
 0x9c8   :  { %4880 = vrot.lane.b32.xlu1 %v8950_v16, %s5680_s10 }
 0x9cc   :  { %4884 = vrot.lane.b32.xlu1 %v8962_v14, %s5680_s10 }
 0x9df   :  { %v4843_v48 = vpop.permute.xlu0 %4842 }
 0x9e0   :  { %v4865_v26 = vmax.f32 %v8853_v53, %v4843_v48 }
 0x9e3   :  { %v4847_v41 = vpop.permute.xlu0 %4846 }
 0x9e4   :  { %v4867_v38 = vmax.f32 %v8864_v1, %v4847_v41 }
 0x9e7   :  { %v9008_v30 = vpop.permute.xlu0 %2082 }
 0x9eb   :  { %v9010_v50 = vpop.permute.xlu0 %2086 }
 0x9ef   :  { %v9012_v34 = vpop.permute.xlu0 %2090 }
 0x9f3   :  { %v9014_v32 = vpop.permute.xlu0 %2094 }
 0x9f7   :  { %v9016_v6 = vpop.permute.xlu0 %2114 }
 0x9fb   :  { %v9018_v3 = vpop.permute.xlu0 %2118 }
 0x9ff   :  { %v9020_v39 = vpop.permute.xlu0 %2122 }
 0xa02   :  { %v4841_v60 = vpop.permute.xlu1 %4840 }
 0xa03   :  { %v9022_v18 = vpop.permute.xlu0 %2126 }
 0xa06   :  { %v4845_v54 = vpop.permute.xlu1 %4844 }
 0xa07   :  { %v4851_v5 = vpop.permute.xlu0 %4850 }
 0xa08   :  { %v4869_v36 = vmax.f32 %v8876_v28, %v4851_v5 }
 0xa0a   :  { %v9024_v10 = vpop.permute.xlu1 %2084 }
 0xa0b   :  { %v4855_v23 = vpop.permute.xlu0 %4854 }
 0xa0c   :  { %v4871_v48 = vmax.f32 %v8886_v2, %v4855_v23  ;;  %v4866_v23 = vmax.f32 %v8936_v25, %v4845_v54 }
 0xa0e   :  { %v9027_v29 = vpop.permute.xlu1 %2088 }
 0xa0f   :  { %v4875_v62 = vpop.permute.xlu0 %4874 }
 0xa10   :  { %v4897_v21 = vmax.f32 %v4865_v26, %v4875_v62 }
 0xa12   :  { %4914 = vrot.lane.b32.xlu0 %v4897_v21, %s5690_s19  ;;  %v9031_v7 = vpop.permute.xlu1 %2092 }
 0xa13   :  { %v4879_v15 = vpop.permute.xlu0 %4878 }
 0xa14   :  { %v4899_v19 = vmax.f32 %v4867_v38, %v4879_v15  ;;  %v4864_v15 = vmax.f32 %v8923_v17, %v4841_v60 }
 0xa16   :  { %4918 = vrot.lane.b32.xlu0 %v4899_v19, %s5690_s19  ;;  %v9035_v35 = vpop.permute.xlu1 %2096 }
 0xa17   :  { %v4883_v59 = vpop.permute.xlu0 %4882 }
 0xa18   :  { %v4901_v53 = vmax.f32 %v4869_v36, %v4883_v59 }
 0xa1a   :  { %4922 = vrot.lane.b32.xlu0 %v4901_v53, %s5690_s19  ;;  %v9039_v26 = vpop.permute.xlu1 %2116 }
 0xa1b   :  { %v4887_v1 = vpop.permute.xlu0 %4886 }
 0xa1c   :  { %v4903_v41 = vmax.f32 %v4871_v48, %v4887_v1 }
 0xa1e   :  { %4926 = vrot.lane.b32.xlu0 %v4903_v41, %s5690_s19  ;;  %v9042_v62 = vpop.permute.xlu1 %2120 }
 0xa22   :  { %v9044_v21 = vpop.permute.xlu1 %2124 }
 0xa26   :  { %v9046_v28 = vpop.permute.xlu1 %2128 }
 0xa2a   :  { %v4849_v5 = vpop.permute.xlu1 %4848 }
 0xa2b   :  { %v4868_v53 = vmax.f32 %v8950_v16, %v4849_v5 }
 0xa2e   :  { %v4853_v38 = vpop.permute.xlu1 %4852 }
 0xa2f   :  { %v4870_v41 = vmax.f32 %v8962_v14, %v4853_v38 }
 0xa32   :  { %v4873_v19 = vpop.permute.xlu1 %4872 }
 0xa33   :  { %v4896_v2 = vmax.f32 %v4864_v15, %v4873_v19  ;;  %v2106_v19 = vmax.f32 %v8874_v37, %v9008_v30  ;;  %v2108_v37 = vmax.f32 %v8882_v55, %v9010_v50 }
 0xa35   :  { %4912 = vrot.lane.b32.xlu1 %v4896_v2, %s5690_s19 }
 0xa36   :  { %v4877_v36 = vpop.permute.xlu1 %4876 }
 0xa37   :  { %v4898_v59 = vmax.f32 %v4866_v23, %v4877_v36 }
 0xa39   :  { %4916 = vrot.lane.b32.xlu1 %v4898_v59, %s5690_s19 }
 0xa3a   :  { %v4881_v48 = vpop.permute.xlu1 %4880 }
 0xa3b   :  { %v4900_v1 = vmax.f32 %v4868_v53, %v4881_v48  ;;  %v2138_v53 = vmax.f32 %v2106_v19, %v9016_v6  ;;  %v2140_v6 = vmax.f32 %v2108_v37, %v9018_v3 }
 0xa3d   :  { %4920 = vrot.lane.b32.xlu1 %v4900_v1, %s5690_s19  ;;  %v2156_v50 = vrot.slane %v2140_v6, 1 }
 0xa3e   :  { %v4885_v56 = vpop.permute.xlu1 %4884 }
 0xa3f   :  { %v4902_v17 = vmax.f32 %v4870_v41, %v4885_v56 }
 0xa41   :  { %4924 = vrot.lane.b32.xlu1 %v4902_v17, %s5690_s19  ;;  %v2154_v17 = vrot.slane %v2138_v53, 1 }
 0xa43   :  { %v9098_v55 = vmax.f32 %v2138_v53, %v2154_v17 }
 0xa84   :  { %v4915_v25 = vpop.permute.xlu0 %4914 }
 0xa85   :  { %4938 = vst.msk [vmem:[#allocation3 + $0x11] sm:$0x1f] %vm4936_vm12, %v4915_v25 }
 0xa86   :  { %4962 = vst.msk [vmem:[#allocation3 + $0x11] sm:$0x1f] %vm2275_vm4, %v5688_v40 }
 0xa87   :  { %4971 = vst.msk [vmem:[#allocation3 + $0x11] sm:$0x1f] %vm4969_vm14, %v5688_v40 }
 0xa88   :  { %v4919_v16 = vpop.permute.xlu0 %4918 }
 0xa89   :  { %4940 = vst.msk [vmem:[#allocation3 + $0x31] sm:$0x1f] %vm4936_vm12, %v4919_v16 }
 0xa8a   :  { %4964 = vst.msk [vmem:[#allocation3 + $0x31] sm:$0x1f] %vm2275_vm4, %v5688_v40 }
 0xa8b   :  { %4973 = vst.msk [vmem:[#allocation3 + $0x31] sm:$0x1f] %vm4969_vm14, %v5688_v40 }
 0xa8c   :  { %v4923_v56 = vpop.permute.xlu0 %4922 }
 0xa8d   :  { %4942 = vst.msk [vmem:[#allocation3 + $0x51] sm:$0x1f] %vm4936_vm12, %v4923_v56 }
 0xa8e   :  { %4966 = vst.msk [vmem:[#allocation3 + $0x51] sm:$0x1f] %vm2275_vm4, %v5688_v40  ;;  %v4979_v14 = vld [vmem:[#allocation3 + $0x10] sm:$0xf] }
 0xa8f   :  { %v4987_v60 = vld [vmem:[#allocation3 + $0x11] sm:$0xf]  ;;  %4975 = vst.msk [vmem:[#allocation3 + $0x51] sm:$0x1f] %vm4969_vm14, %v5688_v40 }
 0xa90   :  { %v5003_v54 = vld [vmem:[#allocation3 + $0x12] sm:$0xf]  ;;  %v4995_v5 = vmax.f32 %v4979_v14, %v4987_v60  ;;  %v4927_v15 = vpop.permute.xlu0 %4926  ;;  %v2110_v14 = vmax.f32 %v8892_v46, %v9012_v34 }
 0xa91   :  { %v5019_v38 = vld [vmem:[#allocation3 + $0x13] sm:$0xf]  ;;  %4944 = vst.msk [vmem:[#allocation3 + $0x71] sm:$0x1f] %vm4936_vm12, %v4927_v15 }
 0xa92   :  { %5344 = vst.msk [vmem:[#allocation3 + $0x15] sm:$0x1] %vm2016_vm2, %v5688_v40  ;;  %v5011_v2 = vmax.f32 %v4995_v5, %v5003_v54  ;;  %v4981_v23 = vld [vmem:[#allocation3 + $0x30] sm:$0xf]  ;;  %v2142_v60 = vmax.f32 %v2110_v14, %v9020_v39  ;;  %v2112_v5 = vmax.f32 %v8900_v51, %v9014_v32 }
 0xa93   :  { %4968 = vst.msk [vmem:[#allocation3 + $0x71] sm:$0x1f] %vm2275_vm4, %v5688_v40  ;;  %v4989_v36 = vld [vmem:[#allocation3 + $0x31] sm:$0xf] }
 0xa94   :  { %v5005_v59 = vld [vmem:[#allocation3 + $0x32] sm:$0xf]  ;;  %v9079_v48 = vmax.f32 %v5011_v2, %v5019_v38  ;;  %4977 = vst.msk [vmem:[#allocation3 + $0x71] sm:$0x1f] %vm4969_vm14, %v5688_v40  ;;  %v4997_v1 = vmax.f32 %v4981_v23, %v4989_v36  ;;  %v9107_v38 = vmax.f32 %v2140_v6, %v2156_v50  ;;  %v2158_v15 = vrot.slane %v2142_v60, 1 }
 0xa95   :  { %v5021_v41 = vld [vmem:[#allocation3 + $0x33] sm:$0xf]  ;;  %v2144_v19 = vmax.f32 %v2112_v5, %v9022_v18 }
 0xa96   :  { %5346 = vst.msk [vmem:[#allocation3 + $0x35] sm:$0x1] %vm2016_vm2, %v5688_v40  ;;  %5044 = vrot.lane.b32.xlu0 %v9079_v48, %s5679_s13  ;;  %v5013_v30 = vmax.f32 %v4997_v1, %v5005_v59  ;;  %v5007_v16 = vld [vmem:[#allocation3 + $0x52] sm:$0xf]  ;;  %v9112_v36 = vmax.f32 %v2142_v60, %v2158_v15 }
 0xa97   :  { %v5023_v56 = vld [vmem:[#allocation3 + $0x53] sm:$0xf]  ;;  %v2160_v59 = vrot.slane %v2144_v19, 1 }
 0xa98   :  { %v9090_v25 = vmax.f32 %v5013_v30, %v5021_v41  ;;  %5348 = vst.msk [vmem:[#allocation3 + $0x55] sm:$0x1] %vm2016_vm2, %v5688_v40  ;;  %v4983_v46 = vld [vmem:[#allocation3 + $0x50] sm:$0xf] }
 0xa99   :  { %v4991_v34 = vld [vmem:[#allocation3 + $0x51] sm:$0xf]  ;;  %v9116_v53 = vmax.f32 %v2144_v19, %v2160_v59 }
 0xa9a   :  { %5048 = vrot.lane.b32.xlu0 %v9090_v25, %s5679_s13  ;;  %v4999_v39 = vmax.f32 %v4983_v46, %v4991_v34 }
 0xa9b   :  { %v5009_v54 = vld [vmem:[#allocation3 + $0x72] sm:$0xf] }
 0xa9c   :  { %v5025_v3 = vld [vmem:[#allocation3 + $0x73] sm:$0xf]  ;;  %v5015_v51 = vmax.f32 %v4999_v39, %v5007_v16  ;;  %v2109_v39 = vmax.f32 %v8956_v4, %v9027_v29  ;;  %v2111_v4 = vmax.f32 %v8968_v27, %v9031_v7 }
 0xa9d   :  { %5350 = vst.msk [vmem:[#allocation3 + $0x75] sm:$0x1] %vm2016_vm2, %v5688_v40  ;;  %v4985_v2 = vld [vmem:[#allocation3 + $0x70] sm:$0xf] }
 0xa9e   :  { %2186 = vrot.lane.b32.xlu0 %v9098_v55, %s5679_s13  ;;  %v4993_v23 = vld [vmem:[#allocation3 + $0x71] sm:$0xf]  ;;  %v9123_v18 = vmax.f32 %v5015_v51, %v5023_v56 }
 0xa9f   :  { %v5001_v32 = vmax.f32 %v4985_v2, %v4993_v23  ;;  %v2141_v23 = vmax.f32 %v2109_v39, %v9042_v62  ;;  %v2143_v62 = vmax.f32 %v2111_v4, %v9044_v21 }
 0xaa1   :  { %v5017_v41 = vmax.f32 %v5001_v32, %v5009_v54  ;;  %v2107_v54 = vmax.f32 %v8946_v57, %v9024_v10 }
 0xaa2   :  { %2190 = vrot.lane.b32.xlu0 %v9107_v38, %s5679_s13 }
 0xaa3   :  { %v9132_v30 = vmax.f32 %v5017_v41, %v5025_v3  ;;  %v2139_v15 = vmax.f32 %v2107_v54, %v9039_v26 }
 0xaa5   :  { %v2155_v26 = vrot.slane %v2139_v15, 1 }
 0xaa6   :  { %2194 = vrot.lane.b32.xlu0 %v9112_v36, %s5679_s13 }
 0xaa7   :  { %v4913_v1 = vpop.permute.xlu1 %4912  ;;  %v9176_v29 = vmax.f32 %v2139_v15, %v2155_v26 }
 0xaa8   :  { %4937 = vst.msk [vmem:[#allocation3 + $0x1] sm:$0x1f] %vm4936_vm12, %v4913_v1  ;;  %v2157_v1 = vrot.slane %v2141_v23, 1 }
 0xaa9   :  { %4961 = vst.msk [vmem:[#allocation3 + $0x1] sm:$0x1f] %vm2275_vm4, %v5688_v40 }
 0xaaa   :  { %2198 = vrot.lane.b32.xlu0 %v9116_v53, %s5679_s13  ;;  %4970 = vst.msk [vmem:[#allocation3 + $0x1] sm:$0x1f] %vm4969_vm14, %v5688_v40 }
 0xaab   :  { %v4917_v37 = vpop.permute.xlu1 %4916 }
 0xaac   :  { %4939 = vst.msk [vmem:[#allocation3 + $0x21] sm:$0x1f] %vm4936_vm12, %v4917_v37 }
 0xaad   :  { %4963 = vst.msk [vmem:[#allocation3 + $0x21] sm:$0x1f] %vm2275_vm4, %v5688_v40 }
 0xaae   :  { %5052 = vrot.lane.b32.xlu0 %v9123_v18, %s5679_s13  ;;  %4972 = vst.msk [vmem:[#allocation3 + $0x21] sm:$0x1f] %vm4969_vm14, %v5688_v40 }
 0xaaf   :  { %v4921_v17 = vpop.permute.xlu1 %4920 }
 0xab0   :  { %4941 = vst.msk [vmem:[#allocation3 + $0x41] sm:$0x1f] %vm4936_vm12, %v4921_v17  ;;  %v2113_v17 = vmax.f32 %v8978_v52, %v9035_v35 }
 0xab1   :  { %4965 = vst.msk [vmem:[#allocation3 + $0x41] sm:$0x1f] %vm2275_vm4, %v5688_v40  ;;  %v4978_v6 = vld [vmem:[#allocation3] sm:$0xf] }
 0xab2   :  { %5056 = vrot.lane.b32.xlu0 %v9132_v30, %s5679_s13  ;;  %v4986_v16 = vld [vmem:[#allocation3 + $0x1] sm:$0xf]  ;;  %4974 = vst.msk [vmem:[#allocation3 + $0x41] sm:$0x1f] %vm4969_vm14, %v5688_v40  ;;  %v2145_v21 = vmax.f32 %v2113_v17, %v9046_v28 }
 0xab3   :  { %v5002_v56 = vld [vmem:[#allocation3 + $0x2] sm:$0xf]  ;;  %v4994_v14 = vmax.f32 %v4978_v6, %v4986_v16  ;;  %v4925_v60 = vpop.permute.xlu1 %4924  ;;  %v9187_v6 = vmax.f32 %v2141_v23, %v2157_v1  ;;  %v2159_v16 = vrot.slane %v2143_v62, 1 }
 0xab4   :  { %v5018_v50 = vld [vmem:[#allocation3 + $0x3] sm:$0xf]  ;;  %4943 = vst.msk [vmem:[#allocation3 + $0x61] sm:$0x1f] %vm4936_vm12, %v4925_v60 }
 0xab5   :  { %5343 = vst.msk [vmem:[#allocation3 + $0x5] sm:$0x1] %vm2016_vm2, %v5688_v40  ;;  %v5010_v3 = vmax.f32 %v4994_v14, %v5002_v56  ;;  %v4980_v5 = vld [vmem:[#allocation3 + $0x20] sm:$0xf]  ;;  %v2175_v14 = vmax.f32 %v2143_v62, %v2159_v16 }
 0xab6   :  { %4967 = vst.msk [vmem:[#allocation3 + $0x61] sm:$0x1f] %vm2275_vm4, %v5688_v40  ;;  %5076 = vrot.lane.b32.xlu0 %v9079_v48, %s5680_s10  ;;  %v4988_v46 = vld [vmem:[#allocation3 + $0x21] sm:$0xf] }
 0xab7   :  { %v5004_v34 = vld [vmem:[#allocation3 + $0x22] sm:$0xf]  ;;  %4976 = vst.msk [vmem:[#allocation3 + $0x61] sm:$0x1f] %vm4969_vm14, %v5688_v40  ;;  %v9155_v19 = vmax.f32 %v5010_v3, %v5018_v50  ;;  %v4996_v57 = vmax.f32 %v4980_v5, %v4988_v46  ;;  %v2161_v50 = vrot.slane %v2145_v21, 1 }
 0xab8   :  { %v5020_v10 = vld [vmem:[#allocation3 + $0x23] sm:$0xf] }
 0xab9   :  { %5345 = vst.msk [vmem:[#allocation3 + $0x25] sm:$0x1] %vm2016_vm2, %v5688_v40  ;;  %5042 = vrot.lane.b32.xlu1 %v9155_v19, %s5679_s13  ;;  %v5012_v2 = vmax.f32 %v4996_v57, %v5004_v34  ;;  %v5006_v51 = vld [vmem:[#allocation3 + $0x42] sm:$0xf]  ;;  %v2177_v3 = vmax.f32 %v2145_v21, %v2161_v50 }
 0xaba   :  { %5080 = vrot.lane.b32.xlu0 %v9090_v25, %s5680_s10  ;;  %v5022_v32 = vld [vmem:[#allocation3 + $0x43] sm:$0xf] }
 0xabb   :  { %v9166_v59 = vmax.f32 %v5012_v2, %v5020_v10  ;;  %5347 = vst.msk [vmem:[#allocation3 + $0x45] sm:$0x1] %vm2016_vm2, %v5688_v40  ;;  %v4982_v27 = vld [vmem:[#allocation3 + $0x40] sm:$0xf] }
 0xabc   :  { %v4990_v7 = vld [vmem:[#allocation3 + $0x41] sm:$0xf] }
 0xabd   :  { %5046 = vrot.lane.b32.xlu1 %v9166_v59, %s5679_s13  ;;  %v4998_v56 = vmax.f32 %v4982_v27, %v4990_v7 }
 0xabe   :  { %5084 = vrot.lane.b32.xlu0 %v9123_v18, %s5680_s10  ;;  %v5008_v41 = vld [vmem:[#allocation3 + $0x62] sm:$0xf] }
 0xabf   :  { %v5024_v37 = vld [vmem:[#allocation3 + $0x63] sm:$0xf]  ;;  %v5014_v60 = vmax.f32 %v4998_v56, %v5006_v51 }
 0xac0   :  { %5349 = vst.msk [vmem:[#allocation3 + $0x65] sm:$0x1] %vm2016_vm2, %v5688_v40  ;;  %v4984_v52 = vld [vmem:[#allocation3 + $0x60] sm:$0xf] }
 0xac1   :  { %2188 = vrot.lane.b32.xlu1 %v9176_v29, %s5679_s13  ;;  %v4992_v35 = vld [vmem:[#allocation3 + $0x61] sm:$0xf]  ;;  %v9198_v28 = vmax.f32 %v5014_v60, %v5022_v32 }
 0xac2   :  { %5088 = vrot.lane.b32.xlu0 %v9132_v30, %s5680_s10  ;;  %v5000_v54 = vmax.f32 %v4984_v52, %v4992_v35 }
 0xac4   :  { %v5016_v5 = vmax.f32 %v5000_v54, %v5008_v41 }
 0xac5   :  { %2192 = vrot.lane.b32.xlu1 %v9187_v6, %s5679_s13 }
 0xac6   :  { %5108 = vrot.lane.b32.xlu0 %v9079_v48, %s5691_s20  ;;  %v9204_v46 = vmax.f32 %v5016_v5, %v5024_v37 }
 0xac9   :  { %2196 = vrot.lane.b32.xlu1 %v2175_v14, %s5679_s13 }
 0xaca   :  { %5112 = vrot.lane.b32.xlu0 %v9090_v25, %s5691_s20 }
 0xacd   :  { %2200 = vrot.lane.b32.xlu1 %v2177_v3, %s5679_s13 }
 0xace   :  { %5116 = vrot.lane.b32.xlu0 %v9123_v18, %s5691_s20 }
 0xad1   :  { %5050 = vrot.lane.b32.xlu1 %v9198_v28, %s5679_s13 }
 0xad2   :  { %5120 = vrot.lane.b32.xlu0 %v9132_v30, %s5691_s20 }
 0xad5   :  { %5054 = vrot.lane.b32.xlu1 %v9204_v46, %s5679_s13 }
 0xad6   :  { %5140 = vrot.lane.b32.xlu0 %v9079_v48, %s5681_s0 }
 0xad9   :  { %5074 = vrot.lane.b32.xlu1 %v9155_v19, %s5680_s10 }
 0xadd   :  { %5078 = vrot.lane.b32.xlu1 %v9166_v59, %s5680_s10 }
 0xae1   :  { %5082 = vrot.lane.b32.xlu1 %v9198_v28, %s5680_s10 }
 0xae5   :  { %5086 = vrot.lane.b32.xlu1 %v9204_v46, %s5680_s10 }
 0xae9   :  { %5106 = vrot.lane.b32.xlu1 %v9155_v19, %s5691_s20 }
 0xaed   :  { %5110 = vrot.lane.b32.xlu1 %v9166_v59, %s5691_s20 }
 0xaf1   :  { %5114 = vrot.lane.b32.xlu1 %v9198_v28, %s5691_s20 }
 0xaf5   :  { %5118 = vrot.lane.b32.xlu1 %v9204_v46, %s5691_s20 }
 0xaf9   :  { %5138 = vrot.lane.b32.xlu1 %v9155_v19, %s5681_s0 }
 0xb08   :  { %v5045_v34 = vpop.permute.xlu0 %5044 }
 0xb0c   :  { %v9230_v15 = vpop.permute.xlu0 %5048 }
 0xb10   :  { %v2187_v57 = vpop.permute.xlu0 %2186 }
 0xb11   :  { %v2210_v10 = vmax.f32 %v9098_v55, %v2187_v57 }
 0xb13   :  { %2226 = vrot.lane.b32.xlu0 %v2210_v10, %s5690_s19 }
 0xb14   :  { %v2191_v39 = vpop.permute.xlu0 %2190 }
 0xb15   :  { %v2212_v2 = vmax.f32 %v9107_v38, %v2191_v39 }
 0xb17   :  { %2230 = vrot.lane.b32.xlu0 %v2212_v2, %s5690_s19 }
 0xb18   :  { %v2195_v26 = vpop.permute.xlu0 %2194 }
 0xb19   :  { %v2214_v23 = vmax.f32 %v9112_v36, %v2195_v26 }
 0xb1b   :  { %2234 = vrot.lane.b32.xlu0 %v2214_v23, %s5690_s19 }
 0xb1c   :  { %v2199_v51 = vpop.permute.xlu0 %2198 }
 0xb1d   :  { %v2216_v32 = vmax.f32 %v9116_v53, %v2199_v51 }
 0xb1f   :  { %2238 = vrot.lane.b32.xlu0 %v2216_v32, %s5690_s19 }
 0xb20   :  { %v9240_v4 = vpop.permute.xlu0 %5052 }
 0xb23   :  { %5144 = vrot.lane.b32.xlu0 %v9090_v25, %s5681_s0 }
 0xb24   :  { %v9244_v55 = vpop.permute.xlu0 %5056 }
 0xb27   :  { %5148 = vrot.lane.b32.xlu0 %v9123_v18, %s5681_s0 }
 0xb28   :  { %v5077_v38 = vpop.permute.xlu0 %5076 }
 0xb2b   :  { %5152 = vrot.lane.b32.xlu0 %v9132_v30, %s5681_s0  ;;  %v5043_v36 = vpop.permute.xlu1 %5042 }
 0xb2c   :  { %v5081_v1 = vpop.permute.xlu0 %5080  ;;  %v5066_v32 = vmax.f32 %v9155_v19, %v5043_v36 }
 0xb2f   :  { %v9250_v62 = vpop.permute.xlu1 %5046 }
 0xb30   :  { %v5085_v53 = vpop.permute.xlu0 %5084 }
 0xb33   :  { %v2189_v41 = vpop.permute.xlu1 %2188 }
 0xb34   :  { %v2211_v37 = vmax.f32 %v9176_v29, %v2189_v41  ;;  %v9253_v17 = vpop.permute.xlu0 %5088  ;;  %v5067_v29 = vmax.f32 %v9079_v48, %v5045_v34 }
 0xb36   :  { %2228 = vrot.lane.b32.xlu1 %v2211_v37, %s5690_s19  ;;  %v5099_v57 = vmax.f32 %v5067_v29, %v5077_v38  ;;  %v5073_v29 = vmax.f32 %v9132_v30, %v9244_v55 }
 0xb37   :  { %v2193_v27 = vpop.permute.xlu1 %2192 }
 0xb38   :  { %v2213_v7 = vmax.f32 %v9187_v6, %v2193_v27  ;;  %v5109_v16 = vpop.permute.xlu0 %5108 }
 0xb39   :  { %v5131_v6 = vmax.f32 %v5099_v57, %v5109_v16 }
 0xb3a   :  { %2232 = vrot.lane.b32.xlu1 %v2213_v7, %s5690_s19 }
 0xb3b   :  { %v2197_v21 = vpop.permute.xlu1 %2196 }
 0xb3c   :  { %v2215_v56 = vmax.f32 %v2175_v14, %v2197_v21  ;;  %v5113_v52 = vpop.permute.xlu0 %5112  ;;  %v5069_v21 = vmax.f32 %v9090_v25, %v9230_v15 }
 0xb3e   :  { %2236 = vrot.lane.b32.xlu1 %v2215_v56, %s5690_s19  ;;  %v5071_v56 = vmax.f32 %v9123_v18, %v9240_v4 }
 0xb3f   :  { %v2201_v35 = vpop.permute.xlu1 %2200 }
 0xb40   :  { %v2217_v50 = vmax.f32 %v2177_v3, %v2201_v35  ;;  %v5117_v60 = vpop.permute.xlu0 %5116  ;;  %v5103_v57 = vmax.f32 %v5071_v56, %v5085_v53 }
 0xb42   :  { %2240 = vrot.lane.b32.xlu1 %v2217_v50, %s5690_s19  ;;  %v5101_v50 = vmax.f32 %v5069_v21, %v5081_v1  ;;  %v5135_v25 = vmax.f32 %v5103_v57, %v5117_v60 }
 0xb43   :  { %v9261_v54 = vpop.permute.xlu1 %5050 }
 0xb44   :  { %v5121_v5 = vpop.permute.xlu0 %5120  ;;  %v5070_v60 = vmax.f32 %v9198_v28, %v9261_v54 }
 0xb46   :  { %5142 = vrot.lane.b32.xlu1 %v9166_v59, %s5681_s0 }
 0xb47   :  { %v9265_v10 = vpop.permute.xlu1 %5054 }
 0xb48   :  { %v5141_v14 = vpop.permute.xlu0 %5140 }
 0xb49   :  { %v9267_v39 = vmax.f32 %v5131_v6, %v5141_v14  ;;  %v5133_v6 = vmax.f32 %v5101_v50, %v5113_v52  ;;  %v5068_v52 = vmax.f32 %v9166_v59, %v9250_v62  ;;  %v5072_v59 = vmax.f32 %v9204_v46, %v9265_v10 }
 0xb4a   :  { %5146 = vrot.lane.b32.xlu1 %v9198_v28, %s5681_s0 }
 0xb4b   :  { %5189 = vrot.lane.b32.xlu0 %v9267_v39, %s5679_s13  ;;  %v5075_v48 = vpop.permute.xlu1 %5074  ;;  %5172 = vst.msk [vmem:[#allocation3 + $0x10] sm:$0xf] %vm10813_vm5, %v9267_v39 }
 0xb4c   :  { %v5098_v41 = vmax.f32 %v5066_v32, %v5075_v48 }
 0xb4e   :  { %5150 = vrot.lane.b32.xlu1 %v9204_v46, %s5681_s0 }
 0xb4f   :  { %v9277_v3 = vpop.permute.xlu1 %5078 }
 0xb50   :  { %v5100_v32 = vmax.f32 %v5068_v52, %v9277_v3 }
 0xb53   :  { %v9279_v34 = vpop.permute.xlu1 %5082 }
 0xb54   :  { %v5102_v62 = vmax.f32 %v5070_v60, %v9279_v34 }
 0xb57   :  { %v9281_v2 = vpop.permute.xlu1 %5086 }
 0xb58   :  { %v5104_v3 = vmax.f32 %v5072_v59, %v9281_v2 }
 0xb5b   :  { %v5107_v26 = vpop.permute.xlu1 %5106 }
 0xb5c   :  { %v5130_v37 = vmax.f32 %v5098_v41, %v5107_v26  ;;  %v5105_v26 = vmax.f32 %v5073_v29, %v9253_v17 }
 0xb5e   :  { %v5137_v4 = vmax.f32 %v5105_v26, %v5121_v5 }
 0xb5f   :  { %v9283_v23 = vpop.permute.xlu1 %5110 }
 0xb60   :  { %v5132_v28 = vmax.f32 %v5100_v32, %v9283_v23 }
 0xb63   :  { %v9285_v51 = vpop.permute.xlu1 %5114 }
 0xb64   :  { %v5134_v41 = vmax.f32 %v5102_v62, %v9285_v51 }
 0xb67   :  { %v9288_v38 = vpop.permute.xlu1 %5118 }
 0xb68   :  { %v5136_v23 = vmax.f32 %v5104_v3, %v9288_v38 }
 0xb6b   :  { %v5139_v27 = vpop.permute.xlu1 %5138 }
 0xb6c   :  { %v9290_v7 = vmax.f32 %v5130_v37, %v5139_v27 }
 0xb6e   :  { %5187 = vrot.lane.b32.xlu1 %v9290_v7, %s5679_s13  ;;  %5171 = vst.msk [vmem:[#allocation3] sm:$0xf] %vm10813_vm5, %v9290_v7 }
 0xb85   :  { %v2227_v16 = vpop.permute.xlu0 %2226 }
 0xb86   :  { %2250 = vst.msk [vmem:[#allocation2 + $0x2] sm:$0x1f] %vm1925_vm0, %v2227_v16 }
 0xb87   :  { %2276 = vst.msk [vmem:[#allocation2 + $0x2] sm:$0x1f] %vm2275_vm4, %v5688_v40 }
 0xb88   :  { %2285 = vst.msk [vmem:[#allocation2 + $0x2] sm:$0x1f] %vm2284_vm7, %v5688_v40 }
 0xb89   :  { %v2231_v19 = vpop.permute.xlu0 %2230 }
 0xb8a   :  { %2252 = vst.msk [vmem:[#allocation2 + $0x22] sm:$0x1f] %vm1925_vm0, %v2231_v19 }
 0xb8b   :  { %2278 = vst.msk [vmem:[#allocation2 + $0x22] sm:$0x1f] %vm2275_vm4, %v5688_v40 }
 0xb8c   :  { %2287 = vst.msk [vmem:[#allocation2 + $0x22] sm:$0x1f] %vm2284_vm7, %v5688_v40 }
 0xb8d   :  { %v2235_v36 = vpop.permute.xlu0 %2234 }
 0xb8e   :  { %2254 = vst.msk [vmem:[#allocation2 + $0x42] sm:$0x1f] %vm1925_vm0, %v2235_v36 }
 0xb8f   :  { %2280 = vst.msk [vmem:[#allocation2 + $0x42] sm:$0x1f] %vm2275_vm4, %v5688_v40  ;;  %v9408_v26 = vld [vmem:[#allocation2] sm:$0xff] }
 0xb90   :  { %2289 = vst.msk [vmem:[#allocation2 + $0x42] sm:$0x1f] %vm2284_vm7, %v5688_v40 }
 0xb91   :  { %v2239_v35 = vpop.permute.xlu0 %2238 }
 0xb92   :  { %2256 = vst.msk [vmem:[#allocation2 + $0x62] sm:$0x1f] %vm1925_vm0, %v2239_v35 }
 0xb93   :  { %2282 = vst.msk [vmem:[#allocation2 + $0x62] sm:$0x1f] %vm2275_vm4, %v5688_v40 }
 0xb94   :  { %2291 = vst.msk [vmem:[#allocation2 + $0x62] sm:$0x1f] %vm2284_vm7, %v5688_v40 }
 0xb95   :  { %v5145_v14 = vpop.permute.xlu0 %5144 }
 0xb96   :  { %v5165_v48 = vmax.f32 %v5133_v6, %v5145_v14 }
 0xb97   :  { %v9432_v52 = vld [vmem:[#allocation2 + $0x40] sm:$0xff] }
 0xb98   :  { %5193 = vrot.lane.b32.xlu0 %v5165_v48, %s5679_s13  ;;  %5174 = vst.msk [vmem:[#allocation3 + $0x30] sm:$0xf] %vm10813_vm5, %v5165_v48 }
 0xb99   :  { %v5149_v18 = vpop.permute.xlu0 %5148 }
 0xb9a   :  { %v5167_v15 = vmax.f32 %v5135_v25, %v5149_v18 }
 0xb9b   :  { %v9442_v59 = vld [vmem:[#allocation2 + $0x60] sm:$0xff] }
 0xb9c   :  { %5197 = vrot.lane.b32.xlu0 %v5167_v15, %s5679_s13  ;;  %5176 = vst.msk [vmem:[#allocation3 + $0x50] sm:$0xf] %vm10813_vm5, %v5167_v15 }
 0xb9d   :  { %v5153_v1 = vpop.permute.xlu0 %5152 }
 0xb9e   :  { %v5169_v30 = vmax.f32 %v5137_v4, %v5153_v1 }
 0xba0   :  { %5201 = vrot.lane.b32.xlu0 %v5169_v30, %s5679_s13  ;;  %5178 = vst.msk [vmem:[#allocation3 + $0x70] sm:$0xf] %vm10813_vm5, %v5169_v30 }
 0xba4   :  { %5222 = vrot.lane.b32.xlu0 %v9267_v39, %s5680_s10 }
 0xba8   :  { %5226 = vrot.lane.b32.xlu0 %v5165_v48, %s5680_s10  ;;  %v2229_v55 = vpop.permute.xlu1 %2228 }
 0xba9   :  { %2251 = vst.msk [vmem:[#allocation2 + $0x12] sm:$0x1f] %vm1925_vm0, %v2229_v55 }
 0xbaa   :  { %2277 = vst.msk [vmem:[#allocation2 + $0x12] sm:$0x1f] %vm2275_vm4, %v5688_v40 }
 0xbab   :  { %2286 = vst.msk [vmem:[#allocation2 + $0x12] sm:$0x1f] %vm2284_vm7, %v5688_v40 }
 0xbac   :  { %5230 = vrot.lane.b32.xlu0 %v5167_v15, %s5680_s10  ;;  %v2233_v53 = vpop.permute.xlu1 %2232 }
 0xbad   :  { %2253 = vst.msk [vmem:[#allocation2 + $0x32] sm:$0x1f] %vm1925_vm0, %v2233_v53 }
 0xbae   :  { %2279 = vst.msk [vmem:[#allocation2 + $0x32] sm:$0x1f] %vm2275_vm4, %v5688_v40 }
 0xbaf   :  { %2288 = vst.msk [vmem:[#allocation2 + $0x32] sm:$0x1f] %vm2284_vm7, %v5688_v40 }
 0xbb0   :  { %5234 = vrot.lane.b32.xlu0 %v5169_v30, %s5680_s10  ;;  %v2237_v17 = vpop.permute.xlu1 %2236 }
 0xbb1   :  { %2255 = vst.msk [vmem:[#allocation2 + $0x52] sm:$0x1f] %vm1925_vm0, %v2237_v17 }
 0xbb2   :  { %2281 = vst.msk [vmem:[#allocation2 + $0x52] sm:$0x1f] %vm2275_vm4, %v5688_v40 }
 0xbb3   :  { %2290 = vst.msk [vmem:[#allocation2 + $0x52] sm:$0x1f] %vm2284_vm7, %v5688_v40 }
 0xbb4   :  { %5255 = vrot.lane.b32.xlu0 %v9267_v39, %s5691_s20  ;;  %v2241_v5 = vpop.permute.xlu1 %2240 }
 0xbb5   :  { %2257 = vst.msk [vmem:[#allocation2 + $0x72] sm:$0x1f] %vm1925_vm0, %v2241_v5  ;;  %vm5211_vm0 = vcmask 11272  }
 0xbb6   :  { %2283 = vst.msk [vmem:[#allocation2 + $0x72] sm:$0x1f] %vm2275_vm4, %v5688_v40  ;;  %v9427_v53 = vld [vmem:[#allocation2 + $0x30] sm:$0xff] }
 0xbb7   :  { %2292 = vst.msk [vmem:[#allocation2 + $0x72] sm:$0x1f] %vm2284_vm7, %v5688_v40 }
 0xbb8   :  { %5259 = vrot.lane.b32.xlu0 %v5165_v48, %s5691_s20  ;;  %v5143_v54 = vpop.permute.xlu1 %5142 }
 0xbb9   :  { %v5164_v39 = vmax.f32 %v5132_v28, %v5143_v54 }
 0xbba   :  { %v9437_v5 = vld [vmem:[#allocation2 + $0x50] sm:$0xff] }
 0xbbb   :  { %5191 = vrot.lane.b32.xlu1 %v5164_v39, %s5679_s13  ;;  %5173 = vst.msk [vmem:[#allocation3 + $0x20] sm:$0xf] %vm10813_vm5, %v5164_v39 }
 0xbbc   :  { %5263 = vrot.lane.b32.xlu0 %v5167_v15, %s5691_s20  ;;  %v5147_v46 = vpop.permute.xlu1 %5146  ;;  %v9415_v15 = vld [vmem:[#allocation2 + $0x10] sm:$0xff] }
 0xbbd   :  { %v5166_v10 = vmax.f32 %v5134_v41, %v5147_v46  ;;  %v5190_v34 = vpop.permute.xlu0 %5189 }
 0xbbe   :  { %5213 = vst.msk [vmem:[#allocation3 + $0x10] sm:$0xf] %vm5211_vm0, %v5190_v34  ;;  %v9447_v28 = vld [vmem:[#allocation2 + $0x70] sm:$0xff] }
 0xbbf   :  { %5175 = vst.msk [vmem:[#allocation3 + $0x40] sm:$0xf] %vm10813_vm5, %v5166_v10  ;;  %5195 = vrot.lane.b32.xlu1 %v5166_v10, %s5679_s13 }
 0xbc0   :  { %5267 = vrot.lane.b32.xlu0 %v5169_v30, %s5691_s20  ;;  %v5151_v2 = vpop.permute.xlu1 %5150  ;;  %v9422_v30 = vld [vmem:[#allocation2 + $0x20] sm:$0xff] }
 0xbc1   :  { %v5168_v51 = vmax.f32 %v5136_v23, %v5151_v2 }
 0xbc3   :  { %5177 = vst.msk [vmem:[#allocation3 + $0x60] sm:$0xf] %vm10813_vm5, %v5168_v51  ;;  %5199 = vrot.lane.b32.xlu1 %v5168_v51, %s5679_s13 }
 0xbc7   :  { %5220 = vrot.lane.b32.xlu1 %v9290_v7, %s5680_s10 }
 0xbcb   :  { %5224 = vrot.lane.b32.xlu1 %v5164_v39, %s5680_s10 }
 0xbcf   :  { %5228 = vrot.lane.b32.xlu1 %v5166_v10, %s5680_s10 }
 0xbd3   :  { %5232 = vrot.lane.b32.xlu1 %v5168_v51, %s5680_s10 }
 0xbd7   :  { %5253 = vrot.lane.b32.xlu1 %v9290_v7, %s5691_s20 }
 0xbdb   :  { %5257 = vrot.lane.b32.xlu1 %v5164_v39, %s5691_s20 }
 0xbdf   :  { %5261 = vrot.lane.b32.xlu1 %v5166_v10, %s5691_s20 }
 0xbe0   :  { %v5188_v38 = vpop.permute.xlu1 %5187 }
 0xbe1   :  { %5212 = vst.msk [vmem:[#allocation3] sm:$0xf] %vm5211_vm0, %v5188_v38 }
 0xbe3   :  { %5265 = vrot.lane.b32.xlu1 %v5168_v51, %s5691_s20 }
 0xc0a   :  { %v5194_v37 = vpop.permute.xlu0 %5193 }
 0xc0b   :  { %5215 = vst.msk [vmem:[#allocation3 + $0x30] sm:$0xf] %vm5211_vm0, %v5194_v37 }
 0xc0e   :  { %v5198_v27 = vpop.permute.xlu0 %5197 }
 0xc0f   :  { %5217 = vst.msk [vmem:[#allocation3 + $0x50] sm:$0xf] %vm5211_vm0, %v5198_v27 }
 0xc12   :  { %v5202_v16 = vpop.permute.xlu0 %5201 }
 0xc13   :  { %5219 = vst.msk [vmem:[#allocation3 + $0x70] sm:$0xf] %vm5211_vm0, %v5202_v16 }
 0xc16   :  { %v5223_v7 = vpop.permute.xlu0 %5222 }
 0xc17   :  { %5246 = vst.msk [vmem:[#allocation3 + $0x10] sm:$0xf] %vm5244_vm9, %v5223_v7 }
 0xc1a   :  { %v5227_v19 = vpop.permute.xlu0 %5226 }
 0xc1b   :  { %5248 = vst.msk [vmem:[#allocation3 + $0x30] sm:$0xf] %vm5244_vm9, %v5227_v19 }
 0xc1e   :  { %v5231_v36 = vpop.permute.xlu0 %5230 }
 0xc1f   :  { %5250 = vst.msk [vmem:[#allocation3 + $0x50] sm:$0xf] %vm5244_vm9, %v5231_v36 }
 0xc22   :  { %v5235_v21 = vpop.permute.xlu0 %5234 }
 0xc23   :  { %5252 = vst.msk [vmem:[#allocation3 + $0x70] sm:$0xf] %vm5244_vm9, %v5235_v21 }
 0xc26   :  { %v5256_v56 = vpop.permute.xlu0 %5255 }
 0xc27   :  { %5279 = vst.msk [vmem:[#allocation3 + $0x10] sm:$0xf] %vm5277_vm8, %v5256_v56 }
 0xc2a   :  { %v5260_v35 = vpop.permute.xlu0 %5259 }
 0xc2b   :  { %5281 = vst.msk [vmem:[#allocation3 + $0x30] sm:$0xf] %vm5277_vm8, %v5260_v35 }
 0xc2d   :  { %v5192_v50 = vpop.permute.xlu1 %5191 }
 0xc2e   :  { %5214 = vst.msk [vmem:[#allocation3 + $0x20] sm:$0xf] %vm5211_vm0, %v5192_v50  ;;  %v5264_v29 = vpop.permute.xlu0 %5263  ;;  %v5287_v57 = vld [vmem:[#allocation3 + $0x10] sm:$0xf] }
 0xc2f   :  { %5304 = vrot.lane.b32.xlu0 %v5287_v57, %s5693_s26  ;;  %5336 = vst.msk [vmem:[#allocation3 + $0x10] sm:$0x1] %vm2016_vm2, %v5688_v40 }
 0xc30   :  { %5283 = vst.msk [vmem:[#allocation3 + $0x50] sm:$0xf] %vm5277_vm8, %v5264_v29 }
 0xc31   :  { %v5196_v6 = vpop.permute.xlu1 %5195 }
 0xc32   :  { %5216 = vst.msk [vmem:[#allocation3 + $0x40] sm:$0xf] %vm5211_vm0, %v5196_v6  ;;  %v5268_v14 = vpop.permute.xlu0 %5267  ;;  %v5289_v48 = vld [vmem:[#allocation3 + $0x30] sm:$0xf] }
 0xc33   :  { %5285 = vst.msk [vmem:[#allocation3 + $0x70] sm:$0xf] %vm5277_vm8, %v5268_v14  ;;  %5308 = vrot.lane.b32.xlu0 %v5289_v48, %s5693_s26 }
 0xc34   :  { %5338 = vst.msk [vmem:[#allocation3 + $0x30] sm:$0x1] %vm2016_vm2, %v5688_v40 }
 0xc35   :  { %v5200_v25 = vpop.permute.xlu1 %5199 }
 0xc36   :  { %5218 = vst.msk [vmem:[#allocation3 + $0x60] sm:$0xf] %vm5211_vm0, %v5200_v25 }
 0xc37   :  { %v5291_v18 = vld [vmem:[#allocation3 + $0x50] sm:$0xf]  ;;  %2329 = vrot.lane.b32.xlu0 %v9408_v26, %s5693_s26 }
 0xc38   :  { %5340 = vst.msk [vmem:[#allocation3 + $0x50] sm:$0x1] %vm2016_vm2, %v5688_v40 }
 0xc39   :  { %v5221_v4 = vpop.permute.xlu1 %5220 }
 0xc3a   :  { %5245 = vst.msk [vmem:[#allocation3] sm:$0xf] %vm5244_vm9, %v5221_v4  ;;  %v5293_v1 = vld [vmem:[#allocation3 + $0x70] sm:$0xf] }
 0xc3b   :  { %2333 = vrot.lane.b32.xlu0 %v9415_v15, %s5693_s26  ;;  %5342 = vst.msk [vmem:[#allocation3 + $0x70] sm:$0x1] %vm2016_vm2, %v5688_v40 }
 0xc3d   :  { %v5225_v55 = vpop.permute.xlu1 %5224 }
 0xc3e   :  { %5247 = vst.msk [vmem:[#allocation3 + $0x20] sm:$0xf] %vm5244_vm9, %v5225_v55 }
 0xc3f   :  { %2337 = vrot.lane.b32.xlu0 %v9422_v30, %s5693_s26 }
 0xc41   :  { %v5229_v17 = vpop.permute.xlu1 %5228 }
 0xc42   :  { %5249 = vst.msk [vmem:[#allocation3 + $0x40] sm:$0xf] %vm5244_vm9, %v5229_v17 }
 0xc43   :  { %2341 = vrot.lane.b32.xlu0 %v9427_v53, %s5693_s26 }
 0xc45   :  { %v5233_v60 = vpop.permute.xlu1 %5232 }
 0xc46   :  { %5251 = vst.msk [vmem:[#allocation3 + $0x60] sm:$0xf] %vm5244_vm9, %v5233_v60 }
 0xc47   :  { %2345 = vrot.lane.b32.xlu0 %v9432_v52, %s5693_s26 }
 0xc49   :  { %v5254_v32 = vpop.permute.xlu1 %5253 }
 0xc4a   :  { %5278 = vst.msk [vmem:[#allocation3] sm:$0xf] %vm5277_vm8, %v5254_v32 }
 0xc4b   :  { %2349 = vrot.lane.b32.xlu0 %v9437_v5, %s5693_s26 }
 0xc4d   :  { %v5258_v62 = vpop.permute.xlu1 %5257 }
 0xc4e   :  { %5280 = vst.msk [vmem:[#allocation3 + $0x20] sm:$0xf] %vm5277_vm8, %v5258_v62 }
 0xc4f   :  { %2353 = vrot.lane.b32.xlu0 %v9442_v59, %s5693_s26 }
 0xc51   :  { %v5262_v54 = vpop.permute.xlu1 %5261  ;;  %v5286_v39 = vld [vmem:[#allocation3] sm:$0xf] }
 0xc52   :  { %5282 = vst.msk [vmem:[#allocation3 + $0x40] sm:$0xf] %vm5277_vm8, %v5262_v54  ;;  %5302 = vrot.lane.b32.xlu1 %v5286_v39, %s5693_s26 }
 0xc53   :  { %5335 = vst.msk [vmem:[#allocation3] sm:$0x1] %vm2016_vm2, %v5688_v40  ;;  %2357 = vrot.lane.b32.xlu0 %v9447_v28, %s5693_s26 }
 0xc55   :  { %v5266_v3 = vpop.permute.xlu1 %5265  ;;  %v5288_v41 = vld [vmem:[#allocation3 + $0x20] sm:$0xf] }
 0xc56   :  { %5284 = vst.msk [vmem:[#allocation3 + $0x60] sm:$0xf] %vm5277_vm8, %v5266_v3  ;;  %5306 = vrot.lane.b32.xlu1 %v5288_v41, %s5693_s26 }
 0xc57   :  { %5337 = vst.msk [vmem:[#allocation3 + $0x20] sm:$0x1] %vm2016_vm2, %v5688_v40  ;;  %5312 = vrot.lane.b32.xlu0 %v5291_v18, %s5693_s26 }
 0xc59   :  { %v5290_v46 = vld [vmem:[#allocation3 + $0x40] sm:$0xf] }
 0xc5a   :  { %5310 = vrot.lane.b32.xlu1 %v5290_v46, %s5693_s26  ;;  %5339 = vst.msk [vmem:[#allocation3 + $0x40] sm:$0x1] %vm2016_vm2, %v5688_v40 }
 0xc5b   :  { %5316 = vrot.lane.b32.xlu0 %v5293_v1, %s5693_s26 }
 0xc5d   :  { %v5292_v10 = vld [vmem:[#allocation3 + $0x60] sm:$0xf] }
 0xc5e   :  { %5314 = vrot.lane.b32.xlu1 %v5292_v10, %s5693_s26  ;;  %5341 = vst.msk [vmem:[#allocation3 + $0x60] sm:$0x1] %vm2016_vm2, %v5688_v40 }
 0xca1   :  { %v5305_v34 = vpop.permute.xlu0 %5304 }
 0xca2   :  { %5328 = vst.msk [vmem:[#allocation3 + $0x11] sm:$0xf] %vm5326_vm6, %v5305_v34 }
 0xca3   :  { %5352 = vst.msk [vmem:[#allocation3 + $0x11] sm:$0xf] %vm10813_vm5, %v5688_v40 }
 0xca4   :  { %5361 = vst.msk [vmem:[#allocation3 + $0x11] sm:$0xf] %vm5359_vm1, %v5688_v40 }
 0xca5   :  { %v5309_v23 = vpop.permute.xlu0 %5308 }
 0xca6   :  { %5330 = vst.msk [vmem:[#allocation3 + $0x31] sm:$0xf] %vm5326_vm6, %v5309_v23 }
 0xca7   :  { %5354 = vst.msk [vmem:[#allocation3 + $0x31] sm:$0xf] %vm10813_vm5, %v5688_v40 }
 0xca8   :  { %5363 = vst.msk [vmem:[#allocation3 + $0x31] sm:$0xf] %vm5359_vm1, %v5688_v40 }
 0xca9   :  { %v9477_v2 = vpop.permute.xlu0 %2329 }
 0xcaa   :  { %vm2377_vm2 = vcmp.gt.f32.partialorder %v9408_v26, %v9477_v2 }
 0xcab   :  { %v5369_v51 = vld [vmem:[#allocation3 + $0x10] sm:$0x1f] }
 0xcac   :  { %v5377_v38 = vld [vmem:[#allocation3 + $0x11] sm:$0x1f] }
 0xcad   :  { %v9479_v37 = vmax.f32 %v5369_v51, %v5377_v38  ;;  %v9481_v27 = vpop.permute.xlu0 %2333 }
 0xcae   :  { %vm2379_vm3 = vcmp.gt.f32.partialorder %v9415_v15, %v9481_v27 }
 0xcaf   :  { %5402 = vrot.lane.b32.xlu0 %v9479_v37, %s5680_s10  ;;  %v5371_v16 = vld [vmem:[#allocation3 + $0x30] sm:$0x1f] }
 0xcb0   :  { %v5379_v7 = vld [vmem:[#allocation3 + $0x31] sm:$0x1f] }
 0xcb1   :  { %v9485_v19 = vmax.f32 %v5371_v16, %v5379_v7  ;;  %v9487_v36 = vpop.permute.xlu0 %2337  ;;  %v2413_v16 = vsel %vm2377_vm2, %v9408_v26, %v9477_v2  ;;  %v2397_v7 = vsel %vm2377_vm2, %v7059_v9, %v7062_v12  ;;  %v2399_v2 = vsel %vm2379_vm3, %v7059_v9, %v7062_v12 }
 0xcb2   :  { %vm2381_vm11 = vcmp.gt.f32.partialorder %v9422_v30, %v9487_v36 }
 0xcb3   :  { %5406 = vrot.lane.b32.xlu0 %v9485_v19, %s5680_s10 }
 0xcb5   :  { %v9491_v21 = vpop.permute.xlu0 %2341 }
 0xcb6   :  { %vm2383_vm10 = vcmp.gt.f32.partialorder %v9427_v53, %v9491_v21 }
 0xcb9   :  { %v9493_v56 = vpop.permute.xlu0 %2345 }
 0xcba   :  { %vm2385_vm13 = vcmp.gt.f32.partialorder %v9432_v52, %v9493_v56 }
 0xcbd   :  { %v9495_v35 = vpop.permute.xlu0 %2349 }
 0xcbe   :  { %vm2387_vm12 = vcmp.gt.f32.partialorder %v9437_v5, %v9495_v35 }
 0xcc1   :  { %v9497_v50 = vpop.permute.xlu0 %2353 }
 0xcc2   :  { %vm2389_vm4 = vcmp.gt.f32.partialorder %v9442_v59, %v9497_v50 }
 0xcc4   :  { %v5303_v29 = vpop.permute.xlu1 %5302 }
 0xcc5   :  { %5327 = vst.msk [vmem:[#allocation3 + $0x1] sm:$0xf] %vm5326_vm6, %v5303_v29  ;;  %v9500_v57 = vpop.permute.xlu0 %2357  ;;  %v2415_v29 = vsel %vm2379_vm3, %v9415_v15, %v9481_v27  ;;  %v2401_v27 = vsel %vm2381_vm11, %v7059_v9, %v7062_v12 }
 0xcc6   :  { %5351 = vst.msk [vmem:[#allocation3 + $0x1] sm:$0xf] %vm10813_vm5, %v5688_v40  ;;  %vm2391_vm14 = vcmp.gt.f32.partialorder %v9447_v28, %v9500_v57 }
 0xcc7   :  { %5360 = vst.msk [vmem:[#allocation3 + $0x1] sm:$0xf] %vm5359_vm1, %v5688_v40 }
 0xcc8   :  { %v5307_v6 = vpop.permute.xlu1 %5306 }
 0xcc9   :  { %5329 = vst.msk [vmem:[#allocation3 + $0x21] sm:$0xf] %vm5326_vm6, %v5307_v6  ;;  %v5313_v14 = vpop.permute.xlu0 %5312  ;;  %v2417_v6 = vsel %vm2381_vm11, %v9422_v30, %v9487_v36  ;;  %v2403_v36 = vsel %vm2383_vm10, %v7059_v9, %v7062_v12 }
 0xcca   :  { %5353 = vst.msk [vmem:[#allocation3 + $0x21] sm:$0xf] %vm10813_vm5, %v5688_v40 }
 0xccb   :  { %5332 = vst.msk [vmem:[#allocation3 + $0x51] sm:$0xf] %vm5326_vm6, %v5313_v14  ;;  %v2419_v14 = vsel %vm2383_vm10, %v9427_v53, %v9491_v21  ;;  %v2405_v21 = vsel %vm2385_vm13, %v7059_v9, %v7062_v12 }
 0xccc   :  { %5356 = vst.msk [vmem:[#allocation3 + $0x51] sm:$0xf] %vm10813_vm5, %v5688_v40  ;;  %v5311_v48 = vpop.permute.xlu1 %5310 }
 0xccd   :  { %5362 = vst.msk [vmem:[#allocation3 + $0x21] sm:$0xf] %vm5359_vm1, %v5688_v40  ;;  %5365 = vst.msk [vmem:[#allocation3 + $0x51] sm:$0xf] %vm5359_vm1, %v5688_v40  ;;  %v5317_v25 = vpop.permute.xlu0 %5316 }
 0xcce   :  { %5331 = vst.msk [vmem:[#allocation3 + $0x41] sm:$0xf] %vm5326_vm6, %v5311_v48  ;;  %5334 = vst.msk [vmem:[#allocation3 + $0x71] sm:$0xf] %vm5326_vm6, %v5317_v25  ;;  %v5368_v18 = vld [vmem:[#allocation3] sm:$0x1f]  ;;  %v2421_v48 = vsel %vm2385_vm13, %v9432_v52, %v9493_v56  ;;  %v2423_v25 = vsel %vm2387_vm12, %v9437_v5, %v9495_v35  ;;  %v2407_v56 = vsel %vm2387_vm12, %v7059_v9, %v7062_v12 }
 0xccf   :  { %5355 = vst.msk [vmem:[#allocation3 + $0x41] sm:$0xf] %vm10813_vm5, %v5688_v40  ;;  %v5376_v4 = vld [vmem:[#allocation3 + $0x1] sm:$0x1f]  ;;  %5358 = vst.msk [vmem:[#allocation3 + $0x71] sm:$0xf] %vm10813_vm5, %v5688_v40  ;;  %v2409_v35 = vsel %vm2389_vm4, %v7059_v9, %v7062_v12 }
 0xcd0   :  { %5364 = vst.msk [vmem:[#allocation3 + $0x41] sm:$0xf] %vm5359_vm1, %v5688_v40  ;;  %v9524_v1 = vmax.f32 %v5368_v18, %v5376_v4  ;;  %5367 = vst.msk [vmem:[#allocation3 + $0x71] sm:$0xf] %vm5359_vm1, %v5688_v40  ;;  %v5315_v55 = vpop.permute.xlu1 %5314  ;;  %v2425_v18 = vsel %vm2389_vm4, %v9442_v59, %v9497_v50  ;;  %v2427_v4 = vsel %vm2391_vm14, %v9447_v28, %v9500_v57 }
 0xcd1   :  { %5333 = vst.msk [vmem:[#allocation3 + $0x61] sm:$0xf] %vm5326_vm6, %v5315_v55  ;;  %v2411_v55 = vsel %vm2391_vm14, %v7059_v9, %v7062_v12 }
 0xcd2   :  { %5400 = vrot.lane.b32.xlu1 %v9524_v1, %s5680_s10  ;;  %5357 = vst.msk [vmem:[#allocation3 + $0x61] sm:$0xf] %vm10813_vm5, %v5688_v40 }
 0xcd3   :  { %5366 = vst.msk [vmem:[#allocation3 + $0x61] sm:$0xf] %vm5359_vm1, %v5688_v40 }
 0xcd4   :  { %v5370_v17 = vld [vmem:[#allocation3 + $0x20] sm:$0x1f]  ;;  %v5373_v62 = vld [vmem:[#allocation3 + $0x50] sm:$0x1f] }
 0xcd5   :  { %v5378_v60 = vld [vmem:[#allocation3 + $0x21] sm:$0x1f]  ;;  %v5381_v54 = vld [vmem:[#allocation3 + $0x51] sm:$0x1f] }
 0xcd6   :  { %v9535_v32 = vmax.f32 %v5370_v17, %v5378_v60  ;;  %v9537_v39 = vmax.f32 %v5373_v62, %v5381_v54 }
 0xcd7   :  { %v5372_v3 = vld [vmem:[#allocation3 + $0x40] sm:$0x1f]  ;;  %v5375_v10 = vld [vmem:[#allocation3 + $0x70] sm:$0x1f] }
 0xcd8   :  { %10904 = vst [vmem:[#allocation4_spill] sm:$0xff] %v9537_v39  ;;  %5404 = vrot.lane.b32.xlu1 %v9535_v32, %s5680_s10  ;;  %5410 = vrot.lane.b32.xlu0 %v9537_v39, %s5680_s10  ;;  %v5380_v41 = vld [vmem:[#allocation3 + $0x41] sm:$0x1f]  ;;  %v5383_v34 = vld [vmem:[#allocation3 + $0x71] sm:$0x1f] }
 0xcd9   :  { %v9543_v46 = vmax.f32 %v5372_v3, %v5380_v41  ;;  %v9545_v23 = vmax.f32 %v5375_v10, %v5383_v34 }
 0xcda   :  { %v5374_v40 = vld [vmem:[#allocation3 + $0x60] sm:$0x1f] }
 0xcdb   :  { %10905 = vst [vmem:[#allocation5_spill] sm:$0xff] %v9543_v46  ;;  %10906 = vst [vmem:[#allocation6_spill] sm:$0xff] %v9545_v23  ;;  %v5382_v51 = vld [vmem:[#allocation3 + $0x61] sm:$0x1f] }
 0xcdc   :  { %5408 = vrot.lane.b32.xlu1 %v9543_v46, %s5680_s10  ;;  %5414 = vrot.lane.b32.xlu0 %v9545_v23, %s5680_s10  ;;  %v9551_v38 = vmax.f32 %v5374_v40, %v5382_v51 }
 0xcde   :  { %10907 = vst [vmem:[#allocation7_spill] sm:$0xff] %v9551_v38 }
 0xce0   :  { %5412 = vrot.lane.b32.xlu1 %v9551_v38, %s5680_s10  ;;  %5434 = vrot.lane.b32.xlu0 %v9479_v37, %s5681_s0 }
 0xce4   :  { %5432 = vrot.lane.b32.xlu1 %v9524_v1, %s5681_s0  ;;  %2445 = vrot.lane.b32.xlu0 %v2413_v16, %s5693_s26 }
 0xce8   :  { %2511 = vrot.lane.b32.xlu1 %v2397_v7, %s5693_s26  ;;  %2449 = vrot.lane.b32.xlu0 %v2415_v29, %s5693_s26 }
 0xcec   :  { %2515 = vrot.lane.b32.xlu1 %v2399_v2, %s5693_s26  ;;  %2453 = vrot.lane.b32.xlu0 %v2417_v6, %s5693_s26 }
 0xcf0   :  { %2519 = vrot.lane.b32.xlu1 %v2401_v27, %s5693_s26  ;;  %2457 = vrot.lane.b32.xlu0 %v2419_v14, %s5693_s26 }
 0xcf4   :  { %2523 = vrot.lane.b32.xlu1 %v2403_v36, %s5693_s26  ;;  %2461 = vrot.lane.b32.xlu0 %v2421_v48, %s5693_s26 }
 0xcf8   :  { %2527 = vrot.lane.b32.xlu1 %v2405_v21, %s5693_s26  ;;  %2465 = vrot.lane.b32.xlu0 %v2423_v25, %s5693_s26 }
 0xcfc   :  { %2531 = vrot.lane.b32.xlu1 %v2407_v56, %s5693_s26  ;;  %2469 = vrot.lane.b32.xlu0 %v2425_v18, %s5693_s26 }
 0xd00   :  { %2535 = vrot.lane.b32.xlu1 %v2409_v35, %s5693_s26  ;;  %2473 = vrot.lane.b32.xlu0 %v2427_v4, %s5693_s26 }
 0xd04   :  { %2539 = vrot.lane.b32.xlu1 %v2411_v55, %s5693_s26  ;;  %5438 = vrot.lane.b32.xlu0 %v9485_v19, %s5681_s0 }
 0xd08   :  { %5436 = vrot.lane.b32.xlu1 %v9535_v32, %s5681_s0  ;;  %5442 = vrot.lane.b32.xlu0 %v9537_v39, %s5681_s0  ;;  %v10925_v39 = vmov 0 }
 0xd0c   :  { %5440 = vrot.lane.b32.xlu1 %v9543_v46, %s5681_s0  ;;  %5446 = vrot.lane.b32.xlu0 %v9545_v23, %s5681_s0 }
 0xd10   :  { %5444 = vrot.lane.b32.xlu1 %v9551_v38, %s5681_s0 }
 0xd21   :  { %v9635_v9 = vpop.permute.xlu0 %5402 }
 0xd25   :  { %v9637_v12 = vpop.permute.xlu0 %5406 }
 0xd44   :  { %v9639_v50 = vpop.permute.xlu1 %5400 }
 0xd4a   :  { %v9641_v57 = vpop.permute.xlu1 %5404  ;;  %v9643_v17 = vpop.permute.xlu0 %5410 }
 0xd4b   :  { %10908 = vst [vmem:[#allocation8_spill] sm:$0xff] %v9643_v17 }
 0xd4e   :  { %v9645_v60 = vpop.permute.xlu1 %5408  ;;  %v9647_v62 = vpop.permute.xlu0 %5414 }
 0xd4f   :  { %10909 = vst [vmem:[#allocation9_spill] sm:$0xff] %v9647_v62 }
 0xd52   :  { %v9649_v54 = vpop.permute.xlu1 %5412  ;;  %v9651_v3 = vpop.permute.xlu0 %5434 }
 0xd53   :  { %10910 = vst [vmem:[#allocation10_spill] sm:$0xff] %v9649_v54 }
 0xd56   :  { %v9653_v41 = vpop.permute.xlu1 %5432  ;;  %v2446_v10 = vpop.permute.xlu0 %2445 }
 0xd57   :  { %vm2493_vm7 = vcmp.gt.f32.partialorder %v9408_v26, %v2446_v10 }
 0xd58   :  { %v2559_v34 = vsel %vm2493_vm7, %v9408_v26, %v2446_v10 }
 0xd59   :  { %2592 = vrot.lane.b32.xlu1 %v2559_v34, %s5693_s26 }
 0xd5a   :  { %v2512_v40 = vpop.permute.xlu1 %2511  ;;  %v2450_v16 = vpop.permute.xlu0 %2449 }
 0xd5b   :  { %v2543_v51 = vsel %vm2493_vm7, %v7064_v11, %v2512_v40  ;;  %vm2495_vm0 = vcmp.gt.f32.partialorder %v9415_v15, %v2450_v16 }
 0xd5c   :  { %2658 = vrot.lane.b32.xlu0 %v2543_v51, %s5693_s26  ;;  %v2561_v7 = vsel %vm2495_vm0, %v9415_v15, %v2450_v16 }
 0xd5d   :  { %2596 = vrot.lane.b32.xlu1 %v2561_v7, %s5693_s26 }
 0xd5e   :  { %v2516_v29 = vpop.permute.xlu1 %2515  ;;  %v2454_v6 = vpop.permute.xlu0 %2453 }
 0xd5f   :  { %v2545_v2 = vsel %vm2495_vm0, %v7064_v11, %v2516_v29  ;;  %vm2497_vm9 = vcmp.gt.f32.partialorder %v9422_v30, %v2454_v6 }
 0xd60   :  { %2662 = vrot.lane.b32.xlu0 %v2545_v2, %s5693_s26  ;;  %v2563_v27 = vsel %vm2497_vm9, %v9422_v30, %v2454_v6 }
 0xd61   :  { %2600 = vrot.lane.b32.xlu1 %v2563_v27, %s5693_s26 }
 0xd62   :  { %v2520_v14 = vpop.permute.xlu1 %2519  ;;  %v2458_v48 = vpop.permute.xlu0 %2457 }
 0xd63   :  { %v2547_v36 = vsel %vm2497_vm9, %v7064_v11, %v2520_v14  ;;  %vm2499_vm8 = vcmp.gt.f32.partialorder %v9427_v53, %v2458_v48 }
 0xd64   :  { %2666 = vrot.lane.b32.xlu0 %v2547_v36, %s5693_s26  ;;  %v2565_v21 = vsel %vm2499_vm8, %v9427_v53, %v2458_v48 }
 0xd65   :  { %2604 = vrot.lane.b32.xlu1 %v2565_v21, %s5693_s26 }
 0xd66   :  { %v2524_v25 = vpop.permute.xlu1 %2523  ;;  %v2462_v18 = vpop.permute.xlu0 %2461 }
 0xd67   :  { %v2549_v56 = vsel %vm2499_vm8, %v7064_v11, %v2524_v25  ;;  %vm2501_vm6 = vcmp.gt.f32.partialorder %v9432_v52, %v2462_v18 }
 0xd68   :  { %2670 = vrot.lane.b32.xlu0 %v2549_v56, %s5693_s26  ;;  %v2567_v35 = vsel %vm2501_vm6, %v9432_v52, %v2462_v18 }
 0xd69   :  { %2608 = vrot.lane.b32.xlu1 %v2567_v35, %s5693_s26 }
 0xd6a   :  { %v2528_v4 = vpop.permute.xlu1 %2527  ;;  %v2466_v10 = vpop.permute.xlu0 %2465 }
 0xd6b   :  { %v2551_v55 = vsel %vm2501_vm6, %v7064_v11, %v2528_v4  ;;  %vm2503_vm1 = vcmp.gt.f32.partialorder %v9437_v5, %v2466_v10 }
 0xd6c   :  { %2674 = vrot.lane.b32.xlu0 %v2551_v55, %s5693_s26  ;;  %v2569_v34 = vsel %vm2503_vm1, %v9437_v5, %v2466_v10 }
 0xd6d   :  { %2612 = vrot.lane.b32.xlu1 %v2569_v34, %s5693_s26 }
 0xd6e   :  { %v2532_v40 = vpop.permute.xlu1 %2531  ;;  %v2470_v16 = vpop.permute.xlu0 %2469 }
 0xd6f   :  { %v2553_v51 = vsel %vm2503_vm1, %v7064_v11, %v2532_v40  ;;  %vm2505_vm2 = vcmp.gt.f32.partialorder %v9442_v59, %v2470_v16 }
 0xd70   :  { %2678 = vrot.lane.b32.xlu0 %v2553_v51, %s5693_s26  ;;  %v2571_v7 = vsel %vm2505_vm2, %v9442_v59, %v2470_v16 }
 0xd71   :  { %2616 = vrot.lane.b32.xlu1 %v2571_v7, %s5693_s26 }
 0xd72   :  { %v2536_v29 = vpop.permute.xlu1 %2535  ;;  %v2474_v6 = vpop.permute.xlu0 %2473 }
 0xd73   :  { %v2555_v2 = vsel %vm2505_vm2, %v7064_v11, %v2536_v29  ;;  %vm2507_vm3 = vcmp.gt.f32.partialorder %v9447_v28, %v2474_v6 }
 0xd74   :  { %2682 = vrot.lane.b32.xlu0 %v2555_v2, %s5693_s26  ;;  %v2573_v27 = vsel %vm2507_vm3, %v9447_v28, %v2474_v6 }
 0xd75   :  { %2620 = vrot.lane.b32.xlu1 %v2573_v27, %s5693_s26 }
 0xd76   :  { %v2540_v14 = vpop.permute.xlu1 %2539  ;;  %v9697_v21 = vpop.permute.xlu0 %5438 }
 0xd77   :  { %v2557_v36 = vsel %vm2507_vm3, %v7064_v11, %v2540_v14  ;;  %10911 = vst [vmem:[#allocation11_spill] sm:$0xff] %v9697_v21  ;;  %v9852_v21 = vld [vmem:[#allocation2 + $0x58] sm:$0x1] }
 0xd78   :  { %2686 = vrot.lane.b32.xlu0 %v2557_v36, %s5693_s26  ;;  %vm10817_vm3 = vcmp.gt.f32.partialorder %v9852_v21, %v8685_v0 }
 0xd79   :  { %v9891_v46 = vsel %vm10817_vm3, %v9852_v21, %v8685_v0 }
 0xd7a   :  { %v9695_v48 = vpop.permute.xlu1 %5436  ;;  %v9701_v56 = vpop.permute.xlu0 %5442  ;;  %10946 = vst [vmem:[#allocation30_spill] sm:$0xff] %v9891_v46 }
 0xd7b   :  { %10913 = vst [vmem:[#allocation13_spill] sm:$0xff] %v9701_v56 }
 0xd7e   :  { %v9699_v25 = vpop.permute.xlu1 %5440  ;;  %v9705_v35 = vpop.permute.xlu0 %5446 }
 0xd7f   :  { %10912 = vst [vmem:[#allocation12_spill] sm:$0xff] %v9699_v25  ;;  %10915 = vst [vmem:[#allocation15_spill] sm:$0xff] %v9705_v35 }
 0xd82   :  { %v9703_v18 = vpop.permute.xlu1 %5444 }
 0xd83   :  { %10914 = vst [vmem:[#allocation14_spill] sm:$0xff] %v9703_v18 }
 0xdcb   :  { %v9707_v4 = vpop.permute.xlu1 %2592 }
 0xdcc   :  { %vm2640_vm11 = vcmp.gt.f32.partialorder %v9408_v26, %v9707_v4 }
 0xdce   :  { %v2659_v11 = vpop.permute.xlu0 %2658 }
 0xdcf   :  { %v9715_v55 = vsel %vm2640_vm11, %v7066_v13, %v2659_v11  ;;  %v9717_v10 = vpop.permute.xlu1 %2596 }
 0xdd0   :  { %10916 = vst [vmem:[#allocation16_spill] sm:$0xff] %v9715_v55  ;;  %v2734_v34 = vrot.slane %v9715_v55, 1  ;;  %vm2642_vm10 = vcmp.gt.f32.partialorder %v9415_v15, %v9717_v10 }
 0xdd2   :  { %2742 = vrot.lane.b32.xlu0 %v2734_v34, %s5691_s20  ;;  %v2663_v40 = vpop.permute.xlu0 %2662 }
 0xdd3   :  { %v9727_v51 = vsel %vm2642_vm10, %v7066_v13, %v2663_v40  ;;  %v9729_v16 = vpop.permute.xlu1 %2600 }
 0xdd4   :  { %10917 = vst [vmem:[#allocation17_spill] sm:$0xff] %v9727_v51  ;;  %v2735_v7 = vrot.slane %v9727_v51, 1  ;;  %vm2644_vm13 = vcmp.gt.f32.partialorder %v9422_v30, %v9729_v16 }
 0xdd6   :  { %2744 = vrot.lane.b32.xlu1 %v2735_v7, %s5691_s20  ;;  %v2667_v29 = vpop.permute.xlu0 %2666 }
 0xdd7   :  { %v9739_v2 = vsel %vm2644_vm13, %v7066_v13, %v2667_v29  ;;  %v9741_v6 = vpop.permute.xlu1 %2604 }
 0xdd8   :  { %10918 = vst [vmem:[#allocation18_spill] sm:$0xff] %v9739_v2  ;;  %v2736_v27 = vrot.slane %v9739_v2, 1  ;;  %vm2646_vm12 = vcmp.gt.f32.partialorder %v9427_v53, %v9741_v6 }
 0xdda   :  { %2746 = vrot.lane.b32.xlu0 %v2736_v27, %s5691_s20  ;;  %v2671_v14 = vpop.permute.xlu0 %2670 }
 0xddb   :  { %v9751_v36 = vsel %vm2646_vm12, %v7066_v13, %v2671_v14  ;;  %v9753_v11 = vpop.permute.xlu1 %2608 }
 0xddc   :  { %v2737_v34 = vrot.slane %v9751_v36, 1  ;;  %vm2648_vm4 = vcmp.gt.f32.partialorder %v9432_v52, %v9753_v11  ;;  %v2849_v25 = vrot.slane %v9751_v36, 2 }
 0xdde   :  { %2748 = vrot.lane.b32.xlu1 %v2737_v34, %s5691_s20  ;;  %v2675_v40 = vpop.permute.xlu0 %2674 }
 0xddf   :  { %v9763_v7 = vsel %vm2648_vm4, %v7066_v13, %v2675_v40  ;;  %v2613_v29 = vpop.permute.xlu1 %2612 }
 0xde0   :  { %v2738_v27 = vrot.slane %v9763_v7, 1  ;;  %vm2650_vm14 = vcmp.gt.f32.partialorder %v9437_v5, %v2613_v29 }
 0xde1   :  { %v9778_v18 = vsel %vm2650_vm14, %v9437_v5, %v2613_v29 }
 0xde2   :  { %2750 = vrot.lane.b32.xlu0 %v2738_v27, %s5691_s20  ;;  %v2679_v14 = vpop.permute.xlu0 %2678  ;;  %10919 = vst [vmem:[#allocation19_spill] sm:$0xff] %v9778_v18 }
 0xde3   :  { %v9769_v35 = vsel %vm2650_vm14, %v7066_v13, %v2679_v14  ;;  %v2617_v23 = vpop.permute.xlu1 %2616 }
 0xde4   :  { %v2739_v34 = vrot.slane %v9769_v35, 1  ;;  %vm2652_vm7 = vcmp.gt.f32.partialorder %v9442_v59, %v2617_v23 }
 0xde5   :  { %v9782_v14 = vsel %vm2652_vm7, %v9442_v59, %v2617_v23  ;;  %v2846_v59 = vrot.slane %v9715_v55, 2 }
 0xde6   :  { %2752 = vrot.lane.b32.xlu1 %v2739_v34, %s5691_s20  ;;  %v2683_v40 = vpop.permute.xlu0 %2682  ;;  %10920 = vst [vmem:[#allocation20_spill] sm:$0xff] %v9782_v14  ;;  %v2780_v5 = vrot.slane %v9782_v14, 7 }
 0xde7   :  { %v9775_v62 = vsel %vm2652_vm7, %v7066_v13, %v2683_v40  ;;  %v2621_v56 = vpop.permute.xlu1 %2620  ;;  %v2779_v40 = vrot.slane %v9778_v18, 7 }
 0xde8   :  { %v2740_v27 = vrot.slane %v9775_v62, 1  ;;  %vm2654_vm0 = vcmp.gt.f32.partialorder %v9447_v28, %v2621_v56  ;;  %vm9810_vm8 = vcmp.gt.f32.partialorder %v9782_v14, %v2780_v5 }
 0xde9   :  { %v9786_v38 = vsel %vm2654_vm0, %v9447_v28, %v2621_v56  ;;  %v2847_v28 = vrot.slane %v9727_v51, 2  ;;  %vm9801_vm9 = vcmp.gt.f32.partialorder %v9778_v18, %v2779_v40  ;;  %v10922_v56 = vmov 0 }
 0xdea   :  { %10921 = vst [vmem:[#allocation21_spill] sm:$0xff] %v9786_v38  ;;  %2754 = vrot.lane.b32.xlu0 %v2740_v27, %s5691_s20  ;;  %v2687_v34 = vpop.permute.xlu0 %2686  ;;  %v2781_v29 = vrot.slane %v9786_v38, 7  ;;  %v10923_v56 = vsel %vm9801_vm9, 4294967295, %v10922_v56  ;;  %v2848_v27 = vrot.slane %v9739_v2, 2  ;;  %v10926_v39 = vsel %vm9810_vm8, 4294967295, %v10925_v39 }
 0xdeb   :  { %v9791_v54 = vsel %vm2654_vm0, %v7066_v13, %v2687_v34  ;;  %10924 = vst [vmem:[#allocation22_spill] sm:$0xff] %v10923_v56  ;;  %v2843_v34 = vsel %vm9801_vm9, %v9778_v18, %v2779_v40  ;;  %10927 = vst [vmem:[#allocation23_spill] sm:$0xff] %v10926_v39  ;;  %v2844_v17 = vsel %vm9810_vm8, %v9782_v14, %v2780_v5 }
 0xdec   :  { %v2741_v23 = vrot.slane %v9791_v54, 1  ;;  %vm9815_vm6 = vcmp.gt.f32.partialorder %v9786_v38, %v2781_v29  ;;  %v2892_v40 = vrot.slane %v2844_v17, 7  ;;  %v9829_v56 = vsel %vm2640_vm11, %v9408_v26, %v9707_v4 }
 0xded   :  { %v2845_v5 = vsel %vm9815_vm6, %v9786_v38, %v2781_v29  ;;  %v2850_v17 = vrot.slane %v9763_v7, 2  ;;  %v10934_v26 = vmov 0  ;;  %v9856_v29 = vld [vmem:[#allocation2 + $0x68] sm:$0x1] }
 0xdee   :  { %2854 = vrot.lane.b32.xlu0 %v2846_v59, %s5691_s20  ;;  %2756 = vrot.lane.b32.xlu1 %v2741_v23, %s5691_s20  ;;  %v10928_v59 = vmov 0  ;;  %v2891_v23 = vrot.slane %v2843_v34, 7  ;;  %v10931_v34 = vmov 0  ;;  %vm9845_vm2 = vcmp.gt.f32.partialorder %v9782_v14, %v2892_v40 }
 0xdef   :  { %v10929_v59 = vsel %vm9815_vm6, 4294967295, %v10928_v59  ;;  %v10935_v26 = vsel %vm9845_vm2, 4294967295, %v10934_v26  ;;  %v2893_v4 = vrot.slane %v2845_v5, 7  ;;  %v2956_v39 = vsel %vm9845_vm2, %v9782_v14, %v2892_v40 }
 0xdf0   :  { %10930 = vst [vmem:[#allocation24_spill] sm:$0xff] %v10929_v59  ;;  %vm9833_vm1 = vcmp.gt.f32.partialorder %v9778_v18, %v2891_v23  ;;  %10936 = vst [vmem:[#allocation26_spill] sm:$0xff] %v10935_v26  ;;  %vm10815_vm11 = vcmp.gt.f32.partialorder %v9856_v29, %v8690_v24  ;;  %v10937_v5 = vmov 0  ;;  %v2774_v40 = vrot.slane %v9829_v56, 7 }
 0xdf1   :  { %v10932_v34 = vsel %vm9833_vm1, 4294967295, %v10931_v34  ;;  %vm9863_vm14 = vcmp.gt.f32.partialorder %v9786_v38, %v2893_v4  ;;  %v10940_v26 = vmov 0  ;;  %v10943_v59 = vmov 0 }
 0xdf2   :  { %2858 = vrot.lane.b32.xlu0 %v2848_v27, %s5691_s20  ;;  %2856 = vrot.lane.b32.xlu1 %v2847_v28, %s5691_s20  ;;  %10933 = vst [vmem:[#allocation25_spill] sm:$0xff] %v10932_v34  ;;  %v2955_v28 = vsel %vm9833_vm1, %v9778_v18, %v2891_v23  ;;  %v3005_v23 = vrot.slane %v2956_v39, 7  ;;  %v10938_v5 = vsel %vm9863_vm14, 4294967295, %v10937_v5  ;;  %v2852_v39 = vrot.slane %v9775_v62, 2 }
 0xdf3   :  { %v3004_v27 = vrot.slane %v2955_v28, 7  ;;  %10939 = vst [vmem:[#allocation27_spill] sm:$0xff] %v10938_v5  ;;  %v2851_v28 = vrot.slane %v9769_v35, 2  ;;  %v9910_v5 = vsel %vm10815_vm11, %v9856_v29, %v8690_v24  ;;  %vm9927_vm15 = vcmp.gt.f32.partialorder %v9829_v56, %v2774_v40 }
 0xdf4   :  { %vm9882_vm0 = vcmp.gt.f32.partialorder %v9782_v14, %v3005_v23  ;;  %10948 = vst [vmem:[#allocation32_spill] sm:$0xff] %v9910_v5  ;;  %vm10984_vm2 = vcmask 1043456   ;;  %vm10990_vm6 = vcmask 1043456  }
 0xdf5   :  { %vm9870_vm7 = vcmp.gt.f32.partialorder %v9778_v18, %v3004_v27  ;;  %v10944_v59 = vsel %vm9882_vm0, 4294967295, %v10943_v59  ;;  %vm10993_vm8 = vmmov %vm10990_vm6 }
 0xdf6   :  { %2862 = vrot.lane.b32.xlu0 %v2850_v17, %s5691_s20  ;;  %2860 = vrot.lane.b32.xlu1 %v2849_v25, %s5691_s20  ;;  %v10941_v26 = vsel %vm9870_vm7, 4294967295, %v10940_v26  ;;  %v2957_v17 = vsel %vm9863_vm14, %v9786_v38, %v2893_v4  ;;  %v3068_v25 = vsel %vm9870_vm7, %v9778_v18, %v3004_v27  ;;  %10945 = vst [vmem:[#allocation29_spill] sm:$0xff] %v10944_v59  ;;  %vm10979_vm14 = vcmask 1043456   ;;  %v10090_v18 = vld [vmem:[#allocation2 + $0x38] sm:$0x1] }
 0xdf7   :  { %10942 = vst [vmem:[#allocation28_spill] sm:$0xff] %v10941_v26  ;;  %v3006_v34 = vrot.slane %v2957_v17, 7  ;;  %v9898_v4 = vsel %vm2642_vm10, %v9415_v15, %v9717_v10  ;;  %v9900_v27 = vrot.slane %v3068_v25, 7  ;;  %v3069_v17 = vsel %vm9882_vm0, %v9782_v14, %v3005_v23  ;;  %v9912_v26 = vld [vmem:[#allocation2 + $0x78] sm:$0x1] }
 0xdf8   :  { %vm10832_vm5 = vcmp.gt.f32.partialorder %v9912_v26, %v8695_v33  ;;  %v9918_v15 = vrot.slane %v3069_v17, 7  ;;  %v10950_v10 = vmov 0  ;;  %v2959_v23 = vrot.slane %v9715_v55, 3 }
 0xdf9   :  { %10947 = vst [vmem:[#allocation31_spill] sm:$0xff] %v9900_v27  ;;  %vm9921_vm10 = vcmp.gt.f32.partialorder %v9786_v38, %v3006_v34  ;;  %v10953_v25 = vmov 0  ;;  %vm10829_vm11 = vcmp.gt.f32.partialorder %v9891_v46, %v9900_v27  ;;  %v2853_v17 = vrot.slane %v9791_v54, 2 }
 0xdfa   :  { %2866 = vrot.lane.b32.xlu0 %v2852_v39, %s5691_s20  ;;  %2864 = vrot.lane.b32.xlu1 %v2851_v28, %s5691_s20  ;;  %10949 = vst [vmem:[#allocation33_spill] sm:$0xff] %v9918_v15  ;;  %v10951_v10 = vsel %vm9921_vm10, 4294967295, %v10950_v10  ;;  %v10954_v25 = vsel %vm9927_vm15, 4294967295, %v10953_v25  ;;  %v3070_v28 = vsel %vm9921_vm10, %v9786_v38, %v3006_v34  ;;  %v2775_v39 = vrot.slane %v9898_v4, 7 }
 0xdfb   :  { %10952 = vst [vmem:[#allocation34_spill] sm:$0xff] %v10951_v10  ;;  %10955 = vst [vmem:[#allocation35_spill] sm:$0xff] %v10954_v25  ;;  %v9943_v59 = vsel %vm10829_vm11, %v9891_v46, %v9900_v27  ;;  %vm10823_vm3 = vcmp.gt.f32.partialorder %v9910_v5, %v9918_v15  ;;  %v9952_v34 = vsel %vm2644_vm13, %v9422_v30, %v9729_v16  ;;  %v9961_v38 = vrot.slane %v3070_v28, 7 }
 0xdfc   :  { %10956 = vst [vmem:[#allocation36_spill] sm:$0xff] %v9943_v59  ;;  %v9959_v10 = vsel %vm10823_vm3, %v9910_v5, %v9918_v15  ;;  %v9968_v46 = vsel %vm10832_vm5, %v9912_v26, %v8695_v33  ;;  %v2960_v30 = vrot.slane %v9727_v51, 3  ;;  %v2838_v16 = vsel %vm9927_vm15, %v9829_v56, %v2774_v40 }
 0xdfd   :  { %10957 = vst [vmem:[#allocation37_spill] sm:$0xff] %v9959_v10  ;;  %10958 = vst [vmem:[#allocation38_spill] sm:$0xff] %v9961_v38  ;;  %vm10826_vm13 = vcmp.gt.f32.partialorder %v9968_v46, %v9961_v38  ;;  %v2776_v28 = vrot.slane %v9952_v34, 7  ;;  %v2961_v5 = vrot.slane %v9739_v2, 3  ;;  %vm9981_vm3 = vcmp.gt.f32.partialorder %v9898_v4, %v2775_v39 }
 0xdfe   :  { %10959 = vst [vmem:[#allocation39_spill] sm:$0xff] %v9968_v46  ;;  %2967 = vrot.lane.b32.xlu0 %v2959_v23, %s5691_s20  ;;  %2868 = vrot.lane.b32.xlu1 %v2853_v17, %s5691_s20  ;;  %v10960_v10 = vmov 0  ;;  %v9990_v23 = vsel %vm10826_vm13, %v9968_v46, %v9961_v38  ;;  %v9997_v40 = vsel %vm2646_vm12, %v9427_v53, %v9741_v6  ;;  %v2886_v17 = vrot.slane %v2838_v16, 7  ;;  %v10019_v6 = vld [vmem:[#allocation2 + $0x8] sm:$0x1] }
 0xdff   :  { %v10961_v10 = vsel %vm9981_vm3, 4294967295, %v10960_v10  ;;  %10963 = vst [vmem:[#allocation41_spill] sm:$0xff] %v9990_v23  ;;  %v2839_v25 = vsel %vm9981_vm3, %v9898_v4, %v2775_v39  ;;  %v2777_v59 = vrot.slane %v9997_v40, 7  ;;  %v2963_v46 = vrot.slane %v9763_v7, 3 }
 0xe00   :  { %10962 = vst [vmem:[#allocation40_spill] sm:$0xff] %v10961_v10  ;;  %v2962_v23 = vrot.slane %v9751_v36, 3  ;;  %vm10008_vm13 = vcmp.gt.f32.partialorder %v9952_v34, %v2776_v28  ;;  %v10964_v38 = vmov 0  ;;  %v10017_v53 = vsel %vm2648_vm4, %v9432_v52, %v9753_v11  ;;  %v10050_v10 = vld [vmem:[#allocation2 + $0x18] sm:$0x1] }
 0xe01   :  { %v10965_v38 = vsel %vm10008_vm13, 4294967295, %v10964_v38  ;;  %vm10831_vm12 = vcmp.gt.f32.partialorder %v10019_v6, %v8663_v45  ;;  %vm10026_vm11 = vcmp.gt.f32.partialorder %v9829_v56, %v2886_v17  ;;  %v2887_v39 = vrot.slane %v2839_v25, 7 }
 0xe02   :  { %2971 = vrot.lane.b32.xlu0 %v2961_v5, %s5691_s20  ;;  %2969 = vrot.lane.b32.xlu1 %v2960_v30, %s5691_s20  ;;  %10966 = vst [vmem:[#allocation42_spill] sm:$0xff] %v10965_v38  ;;  %v10967_v5 = vmov 0  ;;  %v2691_v52 = vsel %vm10831_vm12, %v7066_v13, %v8701_v43  ;;  %v2840_v11 = vsel %vm10008_vm13, %v9952_v34, %v2776_v28  ;;  %v2965_v30 = vrot.slane %v9775_v62, 3 }
 0xe03   :  { %v10968_v5 = vsel %vm10026_vm11, 4294967295, %v10967_v5  ;;  %v2964_v16 = vrot.slane %v9769_v35, 3  ;;  %vm10042_vm4 = vcmp.gt.f32.partialorder %v9997_v40, %v2777_v59  ;;  %v3073_v25 = vrot.slane %v9715_v55, 4  ;;  %v10061_v55 = vld [vmem:[#allocation2 + $0x28] sm:$0x1] }
 0xe04   :  { %10969 = vst [vmem:[#allocation43_spill] sm:$0xff] %v10968_v5  ;;  %v2950_v43 = vsel %vm10026_vm11, %v9829_v56, %v2886_v17  ;;  %vm10847_vm12 = vcmp.gt.f32.partialorder %v10050_v10, %v8667_v58  ;;  %vm10057_vm10 = vcmp.gt.f32.partialorder %v9898_v4, %v2887_v39  ;;  %v10973_v28 = vmov 0 }
 0xe05   :  { %v10974_v28 = vsel %vm10057_vm10, 4294967295, %v10973_v28  ;;  %v2888_v38 = vrot.slane %v2840_v11, 7  ;;  %vm10846_vm0 = vcmp.gt.f32.partialorder %v10061_v55, %v8671_v63  ;;  %v3074_v17 = vrot.slane %v2691_v52, 4 }
 0xe06   :  { %2975 = vrot.lane.b32.xlu0 %v2963_v46, %s5691_s20  ;;  %2973 = vrot.lane.b32.xlu1 %v2962_v23, %s5691_s20  ;;  %v2778_v46 = vrot.slane %v10017_v53, 7  ;;  %v10970_v23 = vmov 0  ;;  %10975 = vst [vmem:[#allocation45_spill] sm:$0xff] %v10974_v28  ;;  %v2695_v11 = vsel %vm10846_vm0, %v7066_v13, %v8715_v31  ;;  %v2966_v5 = vrot.slane %v9791_v54, 3  ;;  %v10094_v31 = vld [vmem:[#allocation2 + $0x48] sm:$0x1] }
 0xe07   :  { %v10971_v23 = vsel %vm10042_vm4, 4294967295, %v10970_v23  ;;  %v2999_v14 = vrot.slane %v2950_v43, 7  ;;  %v10976_v52 = vmov 0  ;;  %v3079_v15 = vrot.slane %v9739_v2, 4 }
 0xe08   :  { %10972 = vst [vmem:[#allocation44_spill] sm:$0xff] %v10971_v23  ;;  %vm10080_vm5 = vcmp.gt.f32.partialorder %v10017_v53, %v2778_v46  ;;  %v2951_v23 = vsel %vm10057_vm10, %v9898_v4, %v2887_v39  ;;  %vm10851_vm0 = vcmp.gt.f32.partialorder %v10090_v18, %v8675_v42 }
 0xe09   :  { %v10977_v52 = vsel %vm10080_vm5, 4294967295, %v10976_v52  ;;  %v2697_v28 = vsel %vm10851_vm0, %v7066_v13, %v8722_v8  ;;  %vm10120_vm7 = vcmp.gt.f32.partialorder %v9829_v56, %v2999_v14  ;;  %vm10985_vm0 = vmmov %vm10984_vm2 }
 0xe0a   :  { %2979 = vrot.lane.b32.xlu0 %v2965_v30, %s5691_s20  ;;  %2977 = vrot.lane.b32.xlu1 %v2964_v16, %s5691_s20  ;;  %v2693_v30 = vsel %vm10847_vm12, %v7066_v13, %v8708_v61  ;;  %v2841_v16 = vsel %vm10042_vm4, %v9997_v40, %v2777_v59  ;;  %10978 = vst [vmem:[#allocation46_spill] sm:$0xff] %v10977_v52  ;;  %v3076_v59 = vrot.slane %v9727_v51, 4  ;;  %v3083_v51 = vrot.slane %v2697_v28, 4 }
 0xe0b   :  { %v3075_v61 = vsel %vm10979_vm14, %v3073_v25, %v3074_v17  ;;  %vm10855_vm12 = vcmp.gt.f32.partialorder %v10094_v31, %v8680_v20  ;;  %vm10101_vm14 = vcmp.gt.f32.partialorder %v9952_v34, %v2888_v38  ;;  %v2889_v39 = vrot.slane %v2841_v16, 7 }
 0xe0c   :  { %v3077_v43 = vrot.slane %v2693_v30, 4  ;;  %v3080_v17 = vrot.slane %v2695_v11, 4  ;;  %v3082_v16 = vrot.slane %v9751_v36, 4  ;;  %v3000_v11 = vrot.slane %v2951_v23, 7 }
 0xe0d   :  { %v2952_v52 = vsel %vm10101_vm14, %v9952_v34, %v2888_v38  ;;  %v3063_v38 = vsel %vm10120_vm7, %v9829_v56, %v2999_v14 }
 0xe0e   :  { %3097 = vrot.lane.b32.xlu0 %v3075_v61, %s5691_s20  ;;  %2981 = vrot.lane.b32.xlu1 %v2966_v5, %s5691_s20  ;;  %v2842_v61 = vsel %vm10080_vm5, %v10017_v53, %v2778_v46  ;;  %v2699_v5 = vsel %vm10855_vm12, %v7066_v13, %v8727_v44  ;;  %v3081_v8 = vsel %vm10984_vm2, %v3079_v15, %v3080_v17  ;;  %v3085_v46 = vrot.slane %v9763_v7, 4 }
 0xe0f   :  { %v3078_v2 = vsel %vm10985_vm0, %v3076_v59, %v3077_v43  ;;  %vm10133_vm12 = vcmp.gt.f32.partialorder %v9997_v40, %v2889_v39  ;;  %v10986_v44 = vmov 0  ;;  %v2890_v23 = vrot.slane %v2842_v61, 7 }
 0xe10   :  { %v10987_v44 = vsel %vm10133_vm12, 4294967295, %v10986_v44  ;;  %v3086_v15 = vrot.slane %v2699_v5, 4  ;;  %vm10988_vm2 = vcmp.gt.f32.partialorder %v9852_v21, %v8685_v0  ;;  %vm10989_vm0 = vcmp.gt.f32.partialorder %v9856_v29, %v8690_v24 }
 0xe11   :  { %v2701_v59 = vsel %vm10988_vm2, %v7066_v13, %v8730_v22  ;;  %v3084_v28 = vsel %vm10990_vm6, %v3082_v16, %v3083_v51  ;;  %vm10152_vm1 = vcmp.gt.f32.partialorder %v9898_v4, %v3000_v11  ;;  %v3001_v17 = vrot.slane %v2952_v52, 7 }
 0xe12   :  { %3101 = vrot.lane.b32.xlu0 %v3081_v8, %s5691_s20  ;;  %3099 = vrot.lane.b32.xlu1 %v3078_v2, %s5691_s20  ;;  %v2703_v2 = vsel %vm10989_vm0, %v7066_v13, %v8733_v49  ;;  %v3087_v0 = vsel %vm10993_vm8, %v3085_v46, %v3086_v15  ;;  %v3091_v22 = vrot.slane %v9775_v62, 4  ;;  %v3088_v21 = vrot.slane %v9769_v35, 4 }
 0xe13   :  { %v2953_v14 = vsel %vm10133_vm12, %v9997_v40, %v2889_v39  ;;  %v10164_v24 = vrot.slane %v3063_v38, 7  ;;  %vm10167_vm6 = vcmp.gt.f32.partialorder %v10017_v53, %v2890_v23  ;;  %v10994_v49 = vmov 0 }
 0xe14   :  { %v10995_v49 = vsel %vm10167_vm6, 4294967295, %v10994_v49  ;;  %v3089_v51 = vrot.slane %v2701_v59, 4  ;;  %v3092_v29 = vrot.slane %v2703_v2, 4  ;;  %v3064_v52 = vsel %vm10152_vm1, %v9898_v4, %v3000_v11  ;;  %v11071_v2 = vld [vmem:[#allocation26_spill] sm:$0xff] }
 0xe15   :  { %vm10996_vm8 = vcmp.gt.f32.partialorder %v9912_v26, %v8695_v33  ;;  %vm10180_vm2 = vcmp.gt.f32.partialorder %v9952_v34, %v3001_v17  ;;  %v10997_v61 = vmov 0  ;;  %v3002_v5 = vrot.slane %v2953_v14, 7 }
 0xe16   :  { %3105 = vrot.lane.b32.xlu0 %v3087_v0, %s5691_s20  ;;  %3103 = vrot.lane.b32.xlu1 %v3084_v28, %s5691_s20  ;;  %v2705_v39 = vsel %vm10996_vm8, %v7066_v13, %v8736_v47  ;;  %v10998_v61 = vsel %vm10180_vm2, 4294967295, %v10997_v61  ;;  %vm10999_vm0 = vcmask 1043456   ;;  %v3094_v46 = vrot.slane %v9791_v54, 4 }
 0xe17   :  { %v3093_v16 = vsel %vm10999_vm0, %v3091_v22, %v3092_v29  ;;  %vm11000_vm9 = vmmov %vm10999_vm0  ;;  %v2954_v11 = vsel %vm10167_vm6, %v10017_v53, %v2890_v23  ;;  %vm10863_vm8 = vcmp.gt.f32.partialorder %v9829_v56, %v10164_v24  ;;  %v10194_v13 = vrot.slane %v3064_v52, 7 }
 0xe18   :  { %v3090_v8 = vsel %vm11000_vm9, %v3088_v21, %v3089_v51  ;;  %v3095_v33 = vrot.slane %v2705_v39, 4  ;;  %v3065_v47 = vsel %vm10180_vm2, %v9952_v34, %v3001_v17  ;;  %vm10200_vm9 = vcmp.gt.f32.partialorder %v9997_v40, %v3002_v5 }
 0xe19   :  { %v3003_v23 = vrot.slane %v2954_v11, 7  ;;  %vm11003_vm0 = vcmp.gt.f32.partialorder %v10019_v6, %v8663_v45  ;;  %v3209_v59 = vsel %vm10863_vm8, %v9829_v56, %v10164_v24  ;;  %vm11004_vm6 = vcmask 1043456  }
 0xe1a   :  { %3109 = vrot.lane.b32.xlu0 %v3093_v16, %s5691_s20  ;;  %3107 = vrot.lane.b32.xlu1 %v3090_v8, %s5691_s20  ;;  %v10209_v15 = vsel %vm11003_vm0, %v10019_v6, %v8663_v45  ;;  %v3096_v38 = vsel %vm11004_vm6, %v3094_v46, %v3095_v33  ;;  %vm10864_vm2 = vcmp.gt.f32.partialorder %v9898_v4, %v10194_v13  ;;  %v10223_v45 = vrot.slane %v3065_v47, 7 }
 0xe1b   :  { %vm10865_vm12 = vcmp.gt.f32.partialorder %v10209_v15, %v10164_v24  ;;  %v3066_v6 = vsel %vm10200_vm9, %v9997_v40, %v3002_v5  ;;  %vm10229_vm0 = vcmp.gt.f32.partialorder %v10017_v53, %v3003_v23  ;;  %vm11007_vm6 = vcmp.gt.f32.partialorder %v10050_v10, %v8667_v58 }
 0xe1c   :  { %v10238_v28 = vsel %vm11007_vm6, %v10050_v10, %v8667_v58  ;;  %v3211_v17 = vsel %vm10864_vm2, %v9898_v4, %v10194_v13  ;;  %v3210_v0 = vsel %vm10865_vm12, %v10209_v15, %v10164_v24  ;;  %vm10866_vm6 = vcmp.gt.f32.partialorder %v9952_v34, %v10223_v45 }
 0xe1d   :  { %vm10867_vm8 = vcmp.gt.f32.partialorder %v10238_v28, %v10194_v13  ;;  %v10256_v58 = vrot.slane %v3066_v6, 7  ;;  %v3067_v10 = vsel %vm10229_vm0, %v10017_v53, %v3003_v23  ;;  %vm11008_vm2 = vcmp.gt.f32.partialorder %v10061_v55, %v8671_v63 }
 0xe1e   :  { %3241 = vrot.lane.b32.xlu0 %v3209_v59, %s5691_s20  ;;  %3111 = vrot.lane.b32.xlu1 %v3096_v38, %s5691_s20  ;;  %v10266_v22 = vsel %vm11008_vm2, %v10061_v55, %v8671_v63  ;;  %v3213_v21 = vsel %vm10866_vm6, %v9952_v34, %v10223_v45  ;;  %v3212_v14 = vsel %vm10867_vm8, %v10238_v28, %v10194_v13  ;;  %v10284_v63 = vrot.slane %v3067_v10, 7 }
 0xe1f   :  { %vm10868_vm2 = vcmp.gt.f32.partialorder %v9997_v40, %v10256_v58  ;;  %vm3150_vm12 = vcmp.gt.f32.partialorder %v10266_v22, %v10223_v45  ;;  %vm11009_vm6 = vcmp.gt.f32.partialorder %v10090_v18, %v8675_v42 }
 0xe20   :  { %v10291_v55 = vsel %vm11009_vm6, %v10090_v18, %v8675_v42  ;;  %v3215_v51 = vsel %vm10868_vm2, %v9997_v40, %v10256_v58  ;;  %v3214_v29 = vsel %vm3150_vm12, %v10266_v22, %v10223_v45  ;;  %vm10870_vm6 = vcmp.gt.f32.partialorder %v10017_v53, %v10284_v63 }
 0xe21   :  { %vm10871_vm8 = vcmp.gt.f32.partialorder %v10291_v55, %v10256_v58  ;;  %vm11010_vm2 = vcmp.gt.f32.partialorder %v10094_v31, %v8680_v20  ;;  %v3217_v18 = vsel %vm10870_vm6, %v10017_v53, %v10284_v63  ;;  %vm11020_vm6 = vcmask 8192  }
 0xe22   :  { %3245 = vrot.lane.b32.xlu0 %v3211_v17, %s5691_s20  ;;  %3243 = vrot.lane.b32.xlu1 %v3210_v0, %s5691_s20  ;;  %v10314_v42 = vsel %vm11010_vm2, %v10094_v31, %v8680_v20  ;;  %v3216_v52 = vsel %vm10871_vm8, %v10291_v55, %v10256_v58  ;;  %v11011_v31 = vlaneseq  ;;  %vm11032_vm8 = vmmov %vm11020_vm6 }
 0xe23   :  { %vm10869_vm2 = vcmp.gt.f32.partialorder %v10314_v42, %v10284_v63 }
 0xe24   :  { %v3218_v20 = vsel %vm10869_vm2, %v10314_v42, %v10284_v63  ;;  %v10337_v39 = vshrl.u32 %v11011_v31, 7  ;;  %vm10872_vm2 = vcmask 15364  }
 0xe26   :  { %3249 = vrot.lane.b32.xlu0 %v3213_v21, %s5691_s20  ;;  %3247 = vrot.lane.b32.xlu1 %v3212_v14, %s5691_s20  ;;  %v10340_v5 = vadd.s32 4294967294, %v10337_v39 }
 0xe28   :  { %v2733_v16 = vadd.s32 1, %v10340_v5 }
 0xe2a   :  { %3253 = vrot.lane.b32.xlu0 %v3215_v51, %s5691_s20  ;;  %3251 = vrot.lane.b32.xlu1 %v3214_v29, %s5691_s20 }
 0xe2e   :  { %3257 = vrot.lane.b32.xlu0 %v3217_v18, %s5691_s20  ;;  %3255 = vrot.lane.b32.xlu1 %v3216_v52, %s5691_s20 }
 0xe32   :  { %3259 = vrot.lane.b32.xlu1 %v3218_v20, %s5691_s20 }
 0xe44   :  { %v2743_v8 = vpop.permute.xlu0 %2742 }
 0xe45   :  { %v2758_v46 = vadd.s32 %v2743_v8, %v2733_v16 }
 0xe47   :  { %v2798_v11 = vrot.slane %v2758_v46, 7 }
 0xe48   :  { %v2745_v33 = vpop.permute.xlu1 %2744 }
 0xe49   :  { %v2759_v47 = vadd.s32 %v2745_v33, %v2733_v16  ;;  %2806 = vrot.lane.b32.xlu0 %v2798_v11, %s5694_s24 }
 0xe4b   :  { %v2799_v23 = vrot.slane %v2759_v47, 7 }
 0xe4c   :  { %v2747_v59 = vpop.permute.xlu0 %2746 }
 0xe4d   :  { %v2760_v38 = vadd.s32 %v2747_v59, %v2733_v16  ;;  %2808 = vrot.lane.b32.xlu1 %v2799_v23, %s5694_s24 }
 0xe4f   :  { %v2800_v6 = vrot.slane %v2760_v38, 7 }
 0xe50   :  { %v2749_v17 = vpop.permute.xlu1 %2748 }
 0xe51   :  { %v2761_v0 = vadd.s32 %v2749_v17, %v2733_v16  ;;  %2810 = vrot.lane.b32.xlu0 %v2800_v6, %s5694_s24 }
 0xe53   :  { %v2801_v10 = vrot.slane %v2761_v0, 7 }
 0xe54   :  { %v2751_v21 = vpop.permute.xlu0 %2750 }
 0xe55   :  { %v2762_v14 = vadd.s32 %v2751_v21, %v2733_v16  ;;  %2812 = vrot.lane.b32.xlu1 %v2801_v10, %s5694_s24 }
 0xe57   :  { %v2802_v51 = vrot.slane %v2762_v14, 7 }
 0xe58   :  { %v2753_v29 = vpop.permute.xlu1 %2752 }
 0xe59   :  { %v2763_v18 = vadd.s32 %v2753_v29, %v2733_v16  ;;  %2814 = vrot.lane.b32.xlu0 %v2802_v51, %s5694_s24 }
 0xe5b   :  { %v2803_v52 = vrot.slane %v2763_v18, 7 }
 0xe5c   :  { %v2755_v20 = vpop.permute.xlu0 %2754 }
 0xe5d   :  { %v2764_v31 = vadd.s32 %v2755_v20, %v2733_v16  ;;  %2816 = vrot.lane.b32.xlu1 %v2803_v52, %s5694_s24 }
 0xe5f   :  { %v2804_v8 = vrot.slane %v2764_v31, 7 }
 0xe60   :  { %v2757_v46 = vpop.permute.xlu1 %2756  ;;  %v2855_v11 = vpop.permute.xlu0 %2854 }
 0xe61   :  { %v2765_v33 = vadd.s32 %v2757_v46, %v2733_v16  ;;  %v2870_v47 = vadd.s32 %v2855_v11, %v10337_v39  ;;  %2818 = vrot.lane.b32.xlu0 %v2804_v8, %s5694_s24  ;;  %v2958_v11 = vadd.s32 3, %v10340_v5 }
 0xe63   :  { %v2805_v23 = vrot.slane %v2765_v33, 7  ;;  %v2910_v59 = vrot.slane %v2870_v47, 6 }
 0xe64   :  { %v2857_v38 = vpop.permute.xlu1 %2856  ;;  %v2859_v6 = vpop.permute.xlu0 %2858 }
 0xe65   :  { %v2871_v17 = vadd.s32 %v2857_v38, %v10337_v39  ;;  %v2872_v0 = vadd.s32 %v2859_v6, %v10337_v39  ;;  %2820 = vrot.lane.b32.xlu1 %v2805_v23, %s5694_s24  ;;  %2918 = vrot.lane.b32.xlu0 %v2910_v59, %s5694_s24 }
 0xe67   :  { %v2911_v10 = vrot.slane %v2871_v17, 6  ;;  %v2912_v21 = vrot.slane %v2872_v0, 6 }
 0xe68   :  { %v2861_v14 = vpop.permute.xlu1 %2860  ;;  %v2863_v16 = vpop.permute.xlu0 %2862 }
 0xe69   :  { %v2873_v51 = vadd.s32 %v2861_v14, %v10337_v39  ;;  %v2874_v29 = vadd.s32 %v2863_v16, %v10337_v39  ;;  %2920 = vrot.lane.b32.xlu1 %v2911_v10, %s5694_s24  ;;  %2922 = vrot.lane.b32.xlu0 %v2912_v21, %s5694_s24 }
 0xe6b   :  { %v2913_v18 = vrot.slane %v2873_v51, 6  ;;  %v2914_v52 = vrot.slane %v2874_v29, 6 }
 0xe6c   :  { %v2865_v20 = vpop.permute.xlu1 %2864  ;;  %v2867_v31 = vpop.permute.xlu0 %2866 }
 0xe6d   :  { %v2875_v8 = vadd.s32 %v2865_v20, %v10337_v39  ;;  %v2876_v46 = vadd.s32 %v2867_v31, %v10337_v39  ;;  %2924 = vrot.lane.b32.xlu1 %v2913_v18, %s5694_s24  ;;  %2926 = vrot.lane.b32.xlu0 %v2914_v52, %s5694_s24 }
 0xe6f   :  { %v2915_v33 = vrot.slane %v2875_v8, 6  ;;  %v2916_v47 = vrot.slane %v2876_v46, 6 }
 0xe70   :  { %v2869_v23 = vpop.permute.xlu1 %2868  ;;  %v2968_v59 = vpop.permute.xlu0 %2967 }
 0xe71   :  { %v2877_v38 = vadd.s32 %v2869_v23, %v10337_v39  ;;  %v2983_v6 = vadd.s32 %v2968_v59, %v2958_v11  ;;  %2928 = vrot.lane.b32.xlu1 %v2915_v33, %s5694_s24  ;;  %2930 = vrot.lane.b32.xlu0 %v2916_v47, %s5694_s24  ;;  %v3071_v59 = vadd.s32 4, %v10340_v5 }
 0xe73   :  { %v2917_v17 = vrot.slane %v2877_v38, 6  ;;  %v3023_v0 = vrot.slane %v2983_v6, 5 }
 0xe74   :  { %v2970_v10 = vpop.permute.xlu1 %2969  ;;  %v2972_v21 = vpop.permute.xlu0 %2971 }
 0xe75   :  { %v2984_v14 = vadd.s32 %v2970_v10, %v2958_v11  ;;  %v2985_v16 = vadd.s32 %v2972_v21, %v2958_v11  ;;  %2932 = vrot.lane.b32.xlu1 %v2917_v17, %s5694_s24  ;;  %3031 = vrot.lane.b32.xlu0 %v3023_v0, %s5694_s24 }
 0xe77   :  { %v3024_v51 = vrot.slane %v2984_v14, 5  ;;  %v3025_v29 = vrot.slane %v2985_v16, 5 }
 0xe78   :  { %v2974_v18 = vpop.permute.xlu1 %2973  ;;  %v2976_v52 = vpop.permute.xlu0 %2975 }
 0xe79   :  { %v2986_v39 = vadd.s32 %v2974_v18, %v2958_v11  ;;  %v2987_v20 = vadd.s32 %v2976_v52, %v2958_v11  ;;  %3033 = vrot.lane.b32.xlu1 %v3024_v51, %s5694_s24  ;;  %3035 = vrot.lane.b32.xlu0 %v3025_v29, %s5694_s24 }
 0xe7b   :  { %v3026_v31 = vrot.slane %v2986_v39, 5  ;;  %v3027_v8 = vrot.slane %v2987_v20, 5 }
 0xe7c   :  { %v2978_v46 = vpop.permute.xlu1 %2977  ;;  %v2980_v33 = vpop.permute.xlu0 %2979 }
 0xe7d   :  { %v2988_v47 = vadd.s32 %v2978_v46, %v2958_v11  ;;  %v2989_v23 = vadd.s32 %v2980_v33, %v2958_v11  ;;  %3037 = vrot.lane.b32.xlu1 %v3026_v31, %s5694_s24  ;;  %3039 = vrot.lane.b32.xlu0 %v3027_v8, %s5694_s24 }
 0xe7f   :  { %v3028_v38 = vrot.slane %v2988_v47, 5  ;;  %v3029_v6 = vrot.slane %v2989_v23, 5 }
 0xe80   :  { %v2982_v17 = vpop.permute.xlu1 %2981  ;;  %v3098_v0 = vpop.permute.xlu0 %3097 }
 0xe81   :  { %v2990_v10 = vadd.s32 %v2982_v17, %v2958_v11  ;;  %v3113_v21 = vadd.s32 %v3098_v0, %v3071_v59  ;;  %3041 = vrot.lane.b32.xlu1 %v3028_v38, %s5694_s24  ;;  %3043 = vrot.lane.b32.xlu0 %v3029_v6, %s5694_s24  ;;  %v5424_v11 = vmax.f32 %v9524_v1, %v9639_v50 }
 0xe82   :  { %v5425_v6 = vmax.f32 %v9479_v37, %v9635_v9  ;;  %v5427_v37 = vmax.f32 %v9485_v19, %v9637_v12  ;;  %v11015_v12 = vld [vmem:[#allocation12_spill] sm:$0xff] }
 0xe83   :  { %v3030_v14 = vrot.slane %v2990_v10, 5  ;;  %v3161_v16 = vrot.slane %v3113_v21, 4  ;;  %v5456_v47 = vmax.f32 %v5424_v11, %v9653_v41  ;;  %v5426_v10 = vmax.f32 %v9535_v32, %v9641_v57  ;;  %v11012_v32 = vld [vmem:[#allocation5_spill] sm:$0xff]  ;;  %v11017_v11 = vld [vmem:[#allocation4_spill] sm:$0xff] }
 0xe84   :  { %v3100_v51 = vpop.permute.xlu1 %3099  ;;  %v3102_v29 = vpop.permute.xlu0 %3101  ;;  %v5457_v50 = vmax.f32 %v5425_v6, %v9651_v3  ;;  %v5428_v57 = vmax.f32 %v11012_v32, %v9645_v60 }
 0xe85   :  { %v3114_v18 = vadd.s32 %v3100_v51, %v3071_v59  ;;  %v3115_v52 = vadd.s32 %v3102_v29, %v3071_v59  ;;  %3045 = vrot.lane.b32.xlu1 %v3030_v14, %s5694_s24  ;;  %3169 = vrot.lane.b32.xlu0 %v3161_v16, %s5694_s24  ;;  %v5472_v41 = vrot.slane %v5456_v47, 1  ;;  %v5458_v14 = vmax.f32 %v5426_v10, %v9695_v48  ;;  %v11013_v48 = vld [vmem:[#allocation11_spill] sm:$0xff] }
 0xe86   :  { %v5473_v3 = vrot.slane %v5457_v50, 1 }
 0xe87   :  { %v3162_v39 = vrot.slane %v3114_v18, 4  ;;  %v3163_v20 = vrot.slane %v3115_v52, 4  ;;  %v5459_v52 = vmax.f32 %v5427_v37, %v11013_v48  ;;  %v5474_v19 = vrot.slane %v5458_v14, 1  ;;  %v11025_v37 = vld [vmem:[#allocation9_spill] sm:$0xff] }
 0xe88   :  { %v3104_v31 = vpop.permute.xlu1 %3103  ;;  %v3106_v8 = vpop.permute.xlu0 %3105 }
 0xe89   :  { %v3116_v46 = vadd.s32 %v3104_v31, %v3071_v59  ;;  %v3117_v33 = vadd.s32 %v3106_v8, %v3071_v59  ;;  %3171 = vrot.lane.b32.xlu1 %v3162_v39, %s5694_s24  ;;  %3173 = vrot.lane.b32.xlu0 %v3163_v20, %s5694_s24  ;;  %v10402_v39 = vmax.f32 %v5456_v47, %v5472_v41  ;;  %v11016_v8 = vld [vmem:[#allocation8_spill] sm:$0xff]  ;;  %v5475_v6 = vrot.slane %v5459_v52, 1 }
 0xe8a   :  { %v5460_v20 = vmax.f32 %v5428_v57, %v11015_v12  ;;  %v10420_v47 = vmax.f32 %v5457_v50, %v5473_v3  ;;  %v11029_v57 = vld [vmem:[#allocation15_spill] sm:$0xff] }
 0xe8b   :  { %v3164_v23 = vrot.slane %v3116_v46, 4  ;;  %v3165_v38 = vrot.slane %v3117_v33, 4  ;;  %11014 = vst [vmem:[#allocation5_spill] sm:$0xff] %v10402_v39  ;;  %v5429_v46 = vmax.f32 %v11017_v11, %v11016_v8  ;;  %v11018_v33 = vld [vmem:[#allocation10_spill] sm:$0xff]  ;;  %v10440_v50 = vmax.f32 %v5459_v52, %v5475_v6  ;;  %v11037_v6 = vld [vmem:[#allocation36_spill] sm:$0xff] }
 0xe8c   :  { %v3108_v17 = vpop.permute.xlu1 %3107  ;;  %v3110_v0 = vpop.permute.xlu0 %3109  ;;  %11021 = vst [vmem:[#allocation11_spill] sm:$0xff] %v10420_v47 }
 0xe8d   :  { %v3118_v21 = vadd.s32 %v3108_v17, %v3071_v59  ;;  %v3119_v1 = vadd.s32 %v3110_v0, %v3071_v59  ;;  %3175 = vrot.lane.b32.xlu1 %v3164_v23, %s5694_s24  ;;  %3177 = vrot.lane.b32.xlu0 %v3165_v38, %s5694_s24  ;;  %v11019_v23 = vld [vmem:[#allocation7_spill] sm:$0xff]  ;;  %v10422_v17 = vmax.f32 %v5458_v14, %v5474_v19  ;;  %v11023_v0 = vld [vmem:[#allocation13_spill] sm:$0xff] }
 0xe8e   :  { %v5430_v38 = vmax.f32 %v11019_v23, %v11018_v33  ;;  %v5461_v10 = vmax.f32 %v5429_v46, %v11023_v0  ;;  %11027 = vst [vmem:[#allocation8_spill] sm:$0xff] %v10440_v50  ;;  %v11035_v33 = vld [vmem:[#allocation33_spill] sm:$0xff]  ;;  %v11036_v23 = vld [vmem:[#allocation20_spill] sm:$0xff]  ;;  %v11038_v0 = vld [vmem:[#allocation38_spill] sm:$0xff] }
 0xe8f   :  { %v3166_v16 = vrot.slane %v3118_v21, 4  ;;  %v3167_v51 = vrot.slane %v3119_v1, 4  ;;  %11022 = vst [vmem:[#allocation12_spill] sm:$0xff] %v10422_v17  ;;  %v5476_v21 = vrot.slane %v5460_v20, 1  ;;  %v11024_v1 = vld [vmem:[#allocation14_spill] sm:$0xff] }
 0xe90   :  { %v3112_v9 = vpop.permute.xlu1 %3111  ;;  %v3242_v29 = vpop.permute.xlu0 %3241  ;;  %v5462_v41 = vmax.f32 %v5430_v38, %v11024_v1  ;;  %v5477_v14 = vrot.slane %v5461_v10, 1  ;;  %v11040_v1 = vld [vmem:[#allocation37_spill] sm:$0xff] }
 0xe91   :  { %v3120_v18 = vadd.s32 %v3112_v9, %v3071_v59  ;;  %3290 = vst.msk [vmem:[%s10796_s2 - $0x4] sm:$0xf0] %vm10872_vm2, %v3242_v29  ;;  %3179 = vrot.lane.b32.xlu1 %v3166_v16, %s5694_s24  ;;  %3181 = vrot.lane.b32.xlu0 %v3167_v51, %s5694_s24  ;;  %v11026_v9 = vld [vmem:[#allocation6_spill] sm:$0xff]  ;;  %v10442_v32 = vmax.f32 %v5460_v20, %v5476_v21 }
 0xe92   :  { %v5431_v29 = vmax.f32 %v11026_v9, %v11025_v37  ;;  %v5478_v3 = vrot.slane %v5462_v41, 1  ;;  %v10457_v52 = vmax.f32 %v5461_v10, %v5477_v14  ;;  %v11039_v10 = vld [vmem:[#allocation21_spill] sm:$0xff] }
 0xe93   :  { %v3168_v31 = vrot.slane %v3120_v18, 4  ;;  %11028 = vst [vmem:[#allocation4_spill] sm:$0xff] %v10442_v32 }
 0xe94   :  { %v3244_v60 = vpop.permute.xlu1 %3243  ;;  %v3246_v59 = vpop.permute.xlu0 %3245  ;;  %v5463_v18 = vmax.f32 %v5431_v29, %v11029_v57  ;;  %11030 = vst [vmem:[#allocation10_spill] sm:$0xff] %v10457_v52  ;;  %v10459_v20 = vmax.f32 %v5462_v41, %v5478_v3  ;;  %v11041_v41 = vld [vmem:[#allocation41_spill] sm:$0xff] }
 0xe95   :  { %3292 = vst.msk [vmem:[%s10796_s2 + $0x4] sm:$0x1] %vm11020_vm6, %v3244_v60  ;;  %3183 = vrot.lane.b32.xlu1 %v3168_v31, %s5694_s24  ;;  %5504 = vrot.lane.b32.xlu0 %v10402_v39, %s5679_s13 }
 0xe96   :  { %3293 = vst.msk [vmem:[%s10796_s2 + $0x4] sm:$0xf0] %vm10872_vm2, %v3246_v59  ;;  %v5479_v12 = vrot.slane %v5463_v18, 1  ;;  %11031 = vst [vmem:[#allocation7_spill] sm:$0xff] %v10459_v20  ;;  %v11033_v59 = vld [vmem:[#allocation19_spill] sm:$0xff] }
 0xe98   :  { %v3248_v16 = vpop.permute.xlu1 %3247  ;;  %v3250_v51 = vpop.permute.xlu0 %3249  ;;  %v10475_v8 = vmax.f32 %v5463_v18, %v5479_v12 }
 0xe99   :  { %3294 = vst.msk [vmem:[%s10796_s2 + $0xc] sm:$0x1] %vm11020_vm6, %v3248_v16  ;;  %5506 = vrot.lane.b32.xlu1 %v10420_v47, %s5679_s13  ;;  %5508 = vrot.lane.b32.xlu0 %v10422_v17, %s5679_s13 }
 0xe9a   :  { %3295 = vst.msk [vmem:[%s10796_s2 + $0xc] sm:$0xf0] %vm10872_vm2, %v3250_v51  ;;  %11034 = vst [vmem:[#allocation13_spill] sm:$0xff] %v10475_v8 }
 0xe9c   :  { %v3252_v48 = vpop.permute.xlu1 %3251  ;;  %v3254_v19 = vpop.permute.xlu0 %3253 }
 0xe9d   :  { %3296 = vst.msk [vmem:[%s10796_s2 + $0x14] sm:$0x1] %vm11020_vm6, %v3252_v48  ;;  %5510 = vrot.lane.b32.xlu1 %v10440_v50, %s5679_s13  ;;  %5512 = vrot.lane.b32.xlu0 %v10442_v32, %s5679_s13  ;;  %vm3155_vm6 = vcmp.gt.f32.partialorder %v11033_v59, %v9900_v27 }
 0xe9e   :  { %3297 = vst.msk [vmem:[%s10796_s2 + $0x14] sm:$0xf0] %vm10872_vm2, %v3254_v19  ;;  %v3219_v46 = vsel %vm3155_vm6, %v11033_v59, %v9900_v27  ;;  %v2728_v27 = vadd.s32 %v10340_v5, %v9751_v36 }
 0xea0   :  { %v3256_v31 = vpop.permute.xlu1 %3255  ;;  %v3258_v60 = vpop.permute.xlu0 %3257  ;;  %v2825_v39 = vrot.slane %v2728_v27, 7 }
 0xea1   :  { %3298 = vst.msk [vmem:[%s10796_s2 + $0x1c] sm:$0x1] %vm11032_vm8, %v3256_v31  ;;  %5514 = vrot.lane.b32.xlu1 %v10457_v52, %s5679_s13  ;;  %5516 = vrot.lane.b32.xlu0 %v10459_v20, %s5679_s13 }
 0xea2   :  { %3299 = vst.msk [vmem:[%s10796_s2 + $0x1c] sm:$0xf0] %vm10872_vm2, %v3258_v60  ;;  %vm3157_vm2 = vcmp.gt.f32.partialorder %v11036_v23, %v11035_v33  ;;  %v11042_v60 = vld [vmem:[#allocation16_spill] sm:$0xff] }
 0xea3   :  { %v3221_v38 = vsel %vm3157_vm2, %v11036_v23, %v11035_v33  ;;  %v2729_v23 = vadd.s32 %v10340_v5, %v9763_v7  ;;  %v2730_v7 = vadd.s32 %v10340_v5, %v9769_v35 }
 0xea4   :  { %v3260_v11 = vpop.permute.xlu1 %3259 }
 0xea5   :  { %3300 = vst.msk [vmem:[%s10796_s2 + $0x24] sm:$0x1] %vm11032_vm8, %v3260_v11  ;;  %5518 = vrot.lane.b32.xlu1 %v10475_v8, %s5679_s13  ;;  %3261 = vrot.lane.b32.xlu0 %v3219_v46, %s5691_s20  ;;  %vm3159_vm8 = vcmp.gt.f32.partialorder %v11039_v10, %v11038_v0  ;;  %v2725_v11 = vadd.s32 %v10340_v5, %v11042_v60  ;;  %v2826_v27 = vrot.slane %v2729_v23, 7 }
 0xea6   :  { %v3223_v21 = vsel %vm3159_vm8, %v11039_v10, %v11038_v0  ;;  %v11046_v10 = vld [vmem:[#allocation18_spill] sm:$0xff] }
 0xea7   :  { %v2727_v32 = vadd.s32 %v10340_v5, %v11046_v10 }
 0xea9   :  { %3263 = vrot.lane.b32.xlu1 %v11037_v6, %s5691_s20  ;;  %3265 = vrot.lane.b32.xlu0 %v3221_v38, %s5691_s20  ;;  %v2822_v6 = vrot.slane %v2725_v11, 7 }
 0xead   :  { %3267 = vrot.lane.b32.xlu1 %v11040_v1, %s5691_s20  ;;  %3269 = vrot.lane.b32.xlu0 %v3223_v21, %s5691_s20  ;;  %v11043_v21 = vld [vmem:[#allocation17_spill] sm:$0xff] }
 0xeae   :  { %v2726_v1 = vadd.s32 %v10340_v5, %v11043_v21  ;;  %v2824_v21 = vrot.slane %v2727_v32, 7 }
 0xeb0   :  { %v2823_v0 = vrot.slane %v2726_v1, 7 }
 0xeb1   :  { %3271 = vrot.lane.b32.xlu1 %v11041_v41, %s5691_s20 }
 0xebb   :  { %v2807_v16 = vpop.permute.xlu0 %2806 }
 0xebc   :  { %v2830_v52 = vsel %vm9927_vm15, %v2807_v16, %v2822_v6  ;;  %vm11052_vm15 = vcmp.gt.f32.partialorder %v9829_v56, %v10164_v24  ;;  %v2731_v56 = vadd.s32 %v10340_v5, %v9775_v62 }
 0xebd   :  { %v2934_v33 = vrot.slane %v2830_v52, 7 }
 0xebf   :  { %v2809_v51 = vpop.permute.xlu1 %2808 }
 0xec0   :  { %v2831_v17 = vsel %vm9981_vm3, %v2809_v51, %v2823_v0  ;;  %vm11053_vm3 = vcmp.gt.f32.partialorder %v10209_v15, %v10164_v24 }
 0xec1   :  { %v2935_v16 = vrot.slane %v2831_v17, 7 }
 0xec3   :  { %v2811_v37 = vpop.permute.xlu0 %2810 }
 0xec4   :  { %v2832_v1 = vsel %vm10008_vm13, %v2811_v37, %v2824_v21  ;;  %vm11061_vm13 = vnez %v10995_v49 }
 0xec5   :  { %v2936_v0 = vrot.slane %v2832_v1, 7 }
 0xec7   :  { %v2813_v9 = vpop.permute.xlu1 %2812 }
 0xec8   :  { %v2833_v51 = vsel %vm10042_vm4, %v2813_v9, %v2825_v39  ;;  %vm11062_vm4 = vcmp.gt.f32.partialorder %v9952_v34, %v10223_v45 }
 0xecb   :  { %v2815_v29 = vpop.permute.xlu0 %2814 }
 0xecf   :  { %v10511_v14 = vpop.permute.xlu1 %2816 }
 0xed3   :  { %v10513_v57 = vpop.permute.xlu0 %2818 }
 0xed7   :  { %v10515_v18 = vpop.permute.xlu1 %2820  ;;  %v2919_v3 = vpop.permute.xlu0 %2918 }
 0xed8   :  { %v2942_v47 = vsel %vm10026_vm11, %v2919_v3, %v2934_v33  ;;  %vm11056_vm11 = vnez %v10998_v61 }
 0xed9   :  { %v3047_v10 = vrot.slane %v2942_v47, 7 }
 0xedb   :  { %v2921_v48 = vpop.permute.xlu1 %2920  ;;  %v2923_v19 = vpop.permute.xlu0 %2922 }
 0xedc   :  { %v2943_v52 = vsel %vm10057_vm10, %v2921_v48, %v2935_v16  ;;  %v2944_v47 = vsel %vm10101_vm14, %v2923_v19, %v2936_v0  ;;  %v2834_v19 = vsel %vm10080_vm5, %v2815_v29, %v2826_v27  ;;  %vm11057_vm5 = vcmp.gt.f32.partialorder %v9898_v4, %v10194_v13 }
 0xedd   :  { %v3048_v37 = vrot.slane %v2943_v52, 7  ;;  %v3049_v11 = vrot.slane %v2944_v47, 7  ;;  %v2938_v16 = vrot.slane %v2834_v19, 7  ;;  %v2732_v4 = vadd.s32 %v10340_v5, %v9791_v54  ;;  %v11065_v54 = vld [vmem:[#allocation25_spill] sm:$0xff] }
 0xedf   :  { %v2925_v12 = vpop.permute.xlu1 %2924  ;;  %v2927_v31 = vpop.permute.xlu0 %2926  ;;  %v2829_v34 = vrot.slane %v2732_v4, 7 }
 0xee0   :  { %v2946_v62 = vsel %vm11061_vm13, %v2927_v31, %v2938_v16  ;;  %v11063_v31 = vld [vmem:[#allocation23_spill] sm:$0xff] }
 0xee1   :  { %vm11064_vm14 = vnez %v11063_v31 }
 0xee3   :  { %v10519_v46 = vpop.permute.xlu1 %2928  ;;  %v10521_v38 = vpop.permute.xlu0 %2930 }
 0xee7   :  { %v10525_v41 = vpop.permute.xlu1 %2932  ;;  %v3032_v8 = vpop.permute.xlu0 %3031 }
 0xee8   :  { %11044 = vst [vmem:[#allocation14_spill] sm:$0xff] %v10525_v41  ;;  %v3055_v32 = vsel %vm10120_vm7, %v3032_v8, %v3047_v10  ;;  %v2937_v41 = vrot.slane %v2833_v51, 7  ;;  %vm11058_vm7 = vcmp.gt.f32.partialorder %v10238_v28, %v10194_v13  ;;  %v11069_v51 = vld [vmem:[#allocation24_spill] sm:$0xff] }
 0xee9   :  { %v3185_v3 = vrot.slane %v3055_v32, 7  ;;  %v3051_v32 = vrot.slane %v2946_v62, 7  ;;  %v11095_v62 = vld [vmem:[#allocation33_spill] sm:$0xff] }
 0xeeb   :  { %v3034_v50 = vpop.permute.xlu1 %3033  ;;  %v3036_v60 = vpop.permute.xlu0 %3035 }
 0xeec   :  { %v3056_v30 = vsel %vm10152_vm1, %v3034_v50, %v3048_v37  ;;  %vm11055_vm1 = vnez %v10987_v44  ;;  %v2827_v50 = vrot.slane %v2730_v7, 7  ;;  %v3057_v24 = vsel %vm11056_vm11, %v3036_v60, %v3049_v11  ;;  %v11085_v11 = vld [vmem:[#allocation31_spill] sm:$0xff] }
 0xeed   :  { %v2945_v35 = vsel %vm11055_vm1, %v2925_v12, %v2937_v41  ;;  %v3186_v43 = vrot.slane %v3056_v30, 7  ;;  %v11059_v12 = vld [vmem:[#allocation22_spill] sm:$0xff]  ;;  %v3187_v61 = vrot.slane %v3057_v24, 7  ;;  %v2828_v60 = vrot.slane %v2731_v56, 7  ;;  %v11077_v30 = vld [vmem:[#allocation5_spill] sm:$0xff]  ;;  %v11088_v56 = vld [vmem:[#allocation11_spill] sm:$0xff] }
 0xeee   :  { %vm11060_vm10 = vnez %v11059_v12  ;;  %v3050_v1 = vrot.slane %v2945_v35, 7  ;;  %vm11075_vm11 = vcmp.gt.f32.partialorder %v10017_v53, %v10284_v63  ;;  %v11082_v53 = vld [vmem:[#allocation29_spill] sm:$0xff] }
 0xeef   :  { %v3038_v59 = vpop.permute.xlu1 %3037  ;;  %v3040_v20 = vpop.permute.xlu0 %3039  ;;  %v2835_v6 = vsel %vm11060_vm10, %v10511_v14, %v2827_v50  ;;  %v2836_v23 = vsel %vm11064_vm14, %v10513_v57, %v2828_v60  ;;  %vm11081_vm10 = vcmask 3072   ;;  %vm11083_vm13 = vnez %v11082_v53  ;;  %v11096_v60 = vld [vmem:[#allocation32_spill] sm:$0xff] }
 0xef0   :  { %v3058_v13 = vsel %vm10200_vm9, %v3038_v59, %v3050_v1  ;;  %v2939_v52 = vrot.slane %v2835_v6, 7  ;;  %vm11066_vm9 = vnez %v11065_v54  ;;  %v3059_v59 = vsel %vm10229_vm0, %v3040_v20, %v3051_v32  ;;  %vm11090_vm14 = vmmov %vm11081_vm10  ;;  %v11104_v54 = vld [vmem:[#allocation39_spill] sm:$0xff] }
 0xef1   :  { %v3188_v5 = vrot.slane %v3058_v13, 7  ;;  %v2940_v0 = vrot.slane %v2836_v23, 7  ;;  %vm11072_vm0 = vnez %v11071_v2  ;;  %v3189_v47 = vrot.slane %v3059_v59, 7  ;;  %v11098_v13 = vld [vmem:[#allocation8_spill] sm:$0xff]  ;;  %v11103_v23 = vld [vmem:[#allocation38_spill] sm:$0xff]  ;;  %v11107_v59 = vld [vmem:[#allocation7_spill] sm:$0xff] }
 0xef2   :  { %v2947_v26 = vsel %vm11066_vm9, %v10519_v46, %v2939_v52 }
 0xef3   :  { %v10545_v33 = vpop.permute.xlu1 %3041  ;;  %v10547_v36 = vpop.permute.xlu0 %3043  ;;  %v3052_v37 = vrot.slane %v2947_v26, 7  ;;  %v2948_v20 = vsel %vm11072_vm0, %v10521_v38, %v2940_v0  ;;  %v11078_v38 = vld [vmem:[#allocation14_spill] sm:$0xff] }
 0xef4   :  { %v3053_v41 = vrot.slane %v2948_v20, 7 }
 0xef7   :  { %v10557_v8 = vpop.permute.xlu1 %3045  ;;  %v3170_v48 = vpop.permute.xlu0 %3169 }
 0xef8   :  { %v3193_v39 = vsel %vm11052_vm15, %v3170_v48, %v3185_v3  ;;  %v3194_v25 = vsel %vm11053_vm3, %v3170_v48, %v3185_v3  ;;  %vm11068_vm15 = vcmp.gt.f32.partialorder %v10291_v55, %v10256_v58  ;;  %vm11070_vm3 = vnez %v11069_v51 }
 0xef9   :  { %3309 = vrot.lane.b32.xlu1 %v3194_v25, %s5691_s20  ;;  %3307 = vrot.lane.b32.xlu0 %v3193_v39, %s5691_s20  ;;  %v2837_v46 = vsel %vm11070_vm3, %v10515_v18, %v2829_v34 }
 0xefa   :  { %v2941_v27 = vrot.slane %v2837_v46, 7 }
 0xefb   :  { %v3172_v15 = vpop.permute.xlu1 %3171  ;;  %v3174_v21 = vpop.permute.xlu0 %3173 }
 0xefc   :  { %v3195_v29 = vsel %vm11057_vm5, %v3172_v15, %v3186_v43  ;;  %v3196_v44 = vsel %vm11058_vm7, %v3172_v15, %v3186_v43  ;;  %v3197_v14 = vsel %vm11062_vm4, %v3174_v21, %v3187_v61  ;;  %v3198_v49 = vsel %vm3150_vm12, %v3174_v21, %v3187_v61  ;;  %v11086_v43 = vld [vmem:[#allocation30_spill] sm:$0xff]  ;;  %v11089_v15 = vld [vmem:[#allocation12_spill] sm:$0xff] }
 0xefd   :  { %3313 = vrot.lane.b32.xlu1 %v3196_v44, %s5691_s20  ;;  %3311 = vrot.lane.b32.xlu0 %v3195_v29, %s5691_s20  ;;  %vm11067_vm12 = vcmp.gt.f32.partialorder %v9997_v40, %v10256_v58  ;;  %v11073_v40 = vld [vmem:[#allocation28_spill] sm:$0xff]  ;;  %vm11076_vm5 = vcmp.gt.f32.partialorder %v10314_v42, %v10284_v63  ;;  %v3061_v63 = vsel %vm11083_vm13, %v10547_v36, %v3053_v41  ;;  %v11092_v29 = vld [vmem:[#allocation34_spill] sm:$0xff] }
 0xefe   :  { %vm11074_vm1 = vnez %v11073_v40  ;;  %vm11087_vm4 = vcmp.gt.f32.partialorder %v11086_v43, %v11085_v11  ;;  %v3191_v36 = vrot.slane %v3061_v63, 7  ;;  %vm11093_vm9 = vnez %v11092_v29 }
 0xeff   :  { %v3176_v28 = vpop.permute.xlu1 %3175  ;;  %v3178_v10 = vpop.permute.xlu0 %3177  ;;  %v3060_v3 = vsel %vm11074_vm1, %v10545_v33, %v3052_v37  ;;  %v11079_v33 = vld [vmem:[#allocation27_spill] sm:$0xff] }
 0xf00   :  { %v3199_v57 = vsel %vm11067_vm12, %v3176_v28, %v3188_v5  ;;  %v3200_v17 = vsel %vm11068_vm15, %v3176_v28, %v3188_v5  ;;  %v3201_v18 = vsel %vm11075_vm11, %v3178_v10, %v3189_v47  ;;  %v3202_v7 = vsel %vm11076_vm5, %v3178_v10, %v3189_v47  ;;  %v11099_v10 = vld [vmem:[#allocation4_spill] sm:$0xff]  ;;  %v11106_v5 = vld [vmem:[#allocation10_spill] sm:$0xff] }
 0xf01   :  { %3317 = vrot.lane.b32.xlu1 %v3198_v49, %s5691_s20  ;;  %3315 = vrot.lane.b32.xlu0 %v3197_v14, %s5691_s20  ;;  %vm11080_vm7 = vnez %v11079_v33  ;;  %v3190_v25 = vrot.slane %v3060_v3, 7  ;;  %vm11097_vm12 = vcmp.gt.f32.partialorder %v11096_v60, %v11095_v62  ;;  %vm11113_vm5 = vcmask 8192  }
 0xf02   :  { %v2949_v39 = vsel %vm11080_vm7, %v11078_v38, %v2941_v27 }
 0xf03   :  { %v3180_v45 = vpop.permute.xlu1 %3179  ;;  %v3182_v22 = vpop.permute.xlu0 %3181  ;;  %v3054_v16 = vrot.slane %v2949_v39, 7 }
 0xf04   :  { %v3203_v35 = vsel %vm3155_vm6, %v3180_v45, %v3190_v25  ;;  %v3204_v50 = vsel %vm11087_vm4, %v3180_v45, %v3190_v25  ;;  %vm11091_vm6 = vmmov %vm11081_vm10  ;;  %v3205_v61 = vsel %vm3157_vm2, %v3182_v22, %v3191_v36  ;;  %v3206_v4 = vsel %vm11097_vm12, %v3182_v22, %v3191_v36 }
 0xf05   :  { %3321 = vrot.lane.b32.xlu1 %v3200_v17, %s5691_s20  ;;  %3319 = vrot.lane.b32.xlu0 %v3199_v57, %s5691_s20  ;;  %v3062_v44 = vsel %vm11093_vm9, %v10557_v8, %v3054_v16  ;;  %vm11100_vm15 = vmmov %vm11091_vm6  ;;  %vm11105_vm2 = vcmp.gt.f32.partialorder %v11104_v54, %v11103_v23  ;;  %v11110_v57 = vld [vmem:[#allocation13_spill] sm:$0xff] }
 0xf06   :  { %v3192_v14 = vrot.slane %v3062_v44, 7  ;;  %vm11101_vm3 = vmmov %vm11091_vm6 }
 0xf07   :  { %v3184_v58 = vpop.permute.xlu1 %3183  ;;  %v5505_v55 = vpop.permute.xlu0 %5504  ;;  %vm11108_vm0 = vmmov %vm11101_vm3 }
 0xf08   :  { %v5528_v48 = vmax.f32 %v11077_v30, %v5505_v55  ;;  %v3207_v32 = vsel %vm3159_vm8, %v3184_v58, %v3192_v14  ;;  %v3208_v26 = vsel %vm11105_vm2, %v3184_v58, %v3192_v14  ;;  %vm11109_vm1 = vmmov %vm11108_vm0  ;;  %vm11111_vm8 = vcmask 15364  }
 0xf09   :  { %3325 = vrot.lane.b32.xlu1 %v3202_v7, %s5691_s20  ;;  %3323 = vrot.lane.b32.xlu0 %v3201_v18, %s5691_s20  ;;  %vm11112_vm11 = vmmov %vm11108_vm0 }
 0xf0a   :  { %5536 = vst.msk [vmem:[%s10797_s4] sm:$0xf] %vm11081_vm10, %v5528_v48  ;;  %vm11114_vm7 = vmmov %vm11111_vm8 }
 0xf0b   :  { %v5507_v42 = vpop.permute.xlu1 %5506  ;;  %v5509_v9 = vpop.permute.xlu0 %5508  ;;  %vm11115_vm10 = vmmov %vm11113_vm5 }
 0xf0c   :  { %v5529_v24 = vmax.f32 %v11088_v56, %v5507_v42  ;;  %v5530_v21 = vmax.f32 %v11089_v15, %v5509_v9  ;;  %vm11116_vm13 = vmmov %vm11114_vm7 }
 0xf0d   :  { %3329 = vrot.lane.b32.xlu1 %v3204_v50, %s5691_s20  ;;  %3327 = vrot.lane.b32.xlu0 %v3203_v35, %s5691_s20  ;;  %vm11117_vm4 = vmmov %vm11113_vm5 }
 0xf0e   :  { %5537 = vst.msk [vmem:[%s10797_s4 + $0x4] sm:$0xf] %vm11090_vm14, %v5529_v24  ;;  %vm11118_vm14 = vmmov %vm11117_vm4 }
 0xf0f   :  { %5538 = vst.msk [vmem:[%s10797_s4 + $0x8] sm:$0xf] %vm11091_vm6, %v5530_v21  ;;  %v5511_v12 = vpop.permute.xlu1 %5510  ;;  %v5513_v6 = vpop.permute.xlu0 %5512  ;;  %vm11119_vm6 = vmmov %vm11114_vm7 }
 0xf10   :  { %v5531_v28 = vmax.f32 %v11098_v13, %v5511_v12  ;;  %v5532_v52 = vmax.f32 %v11099_v10, %v5513_v6  ;;  %vm11120_vm9 = vmmov %vm11117_vm4 }
 0xf11   :  { %3333 = vrot.lane.b32.xlu1 %v3206_v4, %s5691_s20  ;;  %3331 = vrot.lane.b32.xlu0 %v3205_v61, %s5691_s20  ;;  %vm11121_vm12 = vmmov %vm11119_vm6 }
 0xf12   :  { %5539 = vst.msk [vmem:[%s10797_s4 + $0xc] sm:$0xf] %vm11100_vm15, %v5531_v28  ;;  %vm11122_vm15 = vmmov %vm11117_vm4 }
 0xf13   :  { %5540 = vst.msk [vmem:[%s10797_s4 + $0x10] sm:$0xf] %vm11101_vm3, %v5532_v52  ;;  %v5515_v8 = vpop.permute.xlu1 %5514  ;;  %v5517_v49 = vpop.permute.xlu0 %5516  ;;  %vm11123_vm3 = vmmov %vm11119_vm6 }
 0xf14   :  { %v5533_v34 = vmax.f32 %v11106_v5, %v5515_v8  ;;  %v5534_v45 = vmax.f32 %v11107_v59, %v5517_v49  ;;  %vm11124_vm2 = vmmov %vm11117_vm4 }
 0xf15   :  { %3337 = vrot.lane.b32.xlu1 %v3208_v26, %s5691_s20  ;;  %3335 = vrot.lane.b32.xlu0 %v3207_v32, %s5691_s20 }
 0xf16   :  { %5541 = vst.msk [vmem:[%s10797_s4 + $0x14] sm:$0xf] %vm11108_vm0, %v5533_v34  ;;  %vm11125_vm0 = vmmov %vm11123_vm3 }
 0xf17   :  { %5542 = vst.msk [vmem:[%s10797_s4 + $0x18] sm:$0xf] %vm11109_vm1, %v5534_v45  ;;  %v5519_v22 = vpop.permute.xlu1 %5518  ;;  %v3262_v0 = vpop.permute.xlu0 %3261  ;;  %vm11126_vm1 = vmmov %vm11124_vm2 }
 0xf18   :  { %v5535_v17 = vmax.f32 %v11110_v57, %v5519_v22  ;;  %3301 = vst.msk [vmem:[%s10796_s2 + $0x24] sm:$0xf0] %vm11111_vm8, %v3262_v0  ;;  %vm11127_vm8 = vmmov %vm11125_vm0 }
 0xf1a   :  { %5543 = vst.msk [vmem:[%s10797_s4 + $0x1c] sm:$0xf] %vm11112_vm11, %v5535_v17  ;;  %vm11128_vm11 = vmmov %vm11126_vm1 }
 0xf1b   :  { %v3264_v51 = vpop.permute.xlu1 %3263  ;;  %v3266_v46 = vpop.permute.xlu0 %3265 }
 0xf1c   :  { %3302 = vst.msk [vmem:[%s10796_s2 + $0x2c] sm:$0x1] %vm11113_vm5, %v3264_v51  ;;  %vm11129_vm5 = vmmov %vm11125_vm0 }
 0xf1d   :  { %3303 = vst.msk [vmem:[%s10796_s2 + $0x2c] sm:$0xf0] %vm11114_vm7, %v3266_v46  ;;  %vm11130_vm7 = vmmov %vm11126_vm1 }
 0xf1f   :  { %v3268_v37 = vpop.permute.xlu1 %3267  ;;  %v3270_v2 = vpop.permute.xlu0 %3269 }
 0xf20   :  { %3304 = vst.msk [vmem:[%s10796_s2 + $0x34] sm:$0x1] %vm11115_vm10, %v3268_v37  ;;  %vm11131_vm10 = vmmov %vm11125_vm0 }
 0xf21   :  { %3305 = vst.msk [vmem:[%s10796_s2 + $0x34] sm:$0xf0] %vm11116_vm13, %v3270_v2  ;;  %vm11132_vm13 = vmmov %vm11126_vm1 }
 0xf23   :  { %v3272_v20 = vpop.permute.xlu1 %3271 }
 0xf24   :  { %3306 = vst.msk [vmem:[%s10796_s2 + $0x3c] sm:$0x1] %vm11117_vm4, %v3272_v20  ;;  %vm11133_vm4 = vmmov %vm11125_vm0 }
 0xf6b   :  { %v3310_v47 = vpop.permute.xlu1 %3309  ;;  %v3308_v40 = vpop.permute.xlu0 %3307 }
 0xf6c   :  { %3340 = vst.msk [vmem:[%s10798_s3 + $0x4] sm:$0x1] %vm11118_vm14, %v3310_v47 }
 0xf6d   :  { %3339 = vst.msk [vmem:[%s10798_s3 - $0x4] sm:$0xf0] %vm11119_vm6, %v3308_v40 }
 0xf6f   :  { %v3314_v3 = vpop.permute.xlu1 %3313  ;;  %v3312_v58 = vpop.permute.xlu0 %3311 }
 0xf70   :  { %3342 = vst.msk [vmem:[%s10798_s3 + $0xc] sm:$0x1] %vm11120_vm9, %v3314_v3 }
 0xf71   :  { %3341 = vst.msk [vmem:[%s10798_s3 + $0x4] sm:$0xf0] %vm11121_vm12, %v3312_v58 }
 0xf73   :  { %v3318_v55 = vpop.permute.xlu1 %3317  ;;  %v3316_v27 = vpop.permute.xlu0 %3315 }
 0xf74   :  { %3344 = vst.msk [vmem:[%s10798_s3 + $0x14] sm:$0x1] %vm11122_vm15, %v3318_v55 }
 0xf75   :  { %3343 = vst.msk [vmem:[%s10798_s3 + $0xc] sm:$0xf0] %vm11123_vm3, %v3316_v27 }
 0xf77   :  { %v3322_v18 = vpop.permute.xlu1 %3321  ;;  %v3320_v7 = vpop.permute.xlu0 %3319 }
 0xf78   :  { %3346 = vst.msk [vmem:[%s10798_s3 + $0x1c] sm:$0x1] %vm11124_vm2, %v3322_v18 }
 0xf79   :  { %3345 = vst.msk [vmem:[%s10798_s3 + $0x14] sm:$0xf0] %vm11125_vm0, %v3320_v7 }
 0xf7b   :  { %v3326_v30 = vpop.permute.xlu1 %3325  ;;  %v3324_v48 = vpop.permute.xlu0 %3323 }
 0xf7c   :  { %3348 = vst.msk [vmem:[%s10798_s3 + $0x24] sm:$0x1] %vm11126_vm1, %v3326_v30 }
 0xf7d   :  { %3347 = vst.msk [vmem:[%s10798_s3 + $0x1c] sm:$0xf0] %vm11127_vm8, %v3324_v48 }
 0xf7f   :  { %v3330_v41 = vpop.permute.xlu1 %3329  ;;  %v3328_v38 = vpop.permute.xlu0 %3327 }
 0xf80   :  { %3350 = vst.msk [vmem:[%s10798_s3 + $0x2c] sm:$0x1] %vm11128_vm11, %v3330_v41 }
 0xf81   :  { %3349 = vst.msk [vmem:[%s10798_s3 + $0x24] sm:$0xf0] %vm11129_vm5, %v3328_v38 }
 0xf83   :  { %v3334_v33 = vpop.permute.xlu1 %3333  ;;  %v3332_v39 = vpop.permute.xlu0 %3331 }
 0xf84   :  { %3352 = vst.msk [vmem:[%s10798_s3 + $0x34] sm:$0x1] %vm11130_vm7, %v3334_v33 }
 0xf85   :  { %3351 = vst.msk [vmem:[%s10798_s3 + $0x2c] sm:$0xf0] %vm11131_vm10, %v3332_v39 }
 0xf87   :  { %v3338_v25 = vpop.permute.xlu1 %3337  ;;  %v3336_v53 = vpop.permute.xlu0 %3335 }
 0xf88   :  { %3354 = vst.msk [vmem:[%s10798_s3 + $0x3c] sm:$0x1] %vm11132_vm13, %v3338_v25 }
 0xf89   :  { %3353 = vst.msk [vmem:[%s10798_s3 + $0x34] sm:$0xf0] %vm11133_vm4, %v3336_v53 }

</bundles_post_ra>
